<compile_context>
chip_gen: v7x
topology: tpu7x:2x2x1
jax: 0.10.0
libtpu: 0.0.40
codegen_flags: <defaults>
</compile_context>

<pallas_src>
import functools

import jax
import jax.numpy as jnp
from jax.experimental import pallas as pl
from jax.experimental.pallas import tpu as pltpu

_BN_EPS = 1e-5


# ------------------------------ BN folding --------------------------------- #

def _fold_bn(p, eps=_BN_EPS):
    scale = p["gamma"] / jnp.sqrt(p["var"] + eps)
    bias = p["beta"] - p["mean"] * scale
    return scale, bias


# ------------------------------ Pallas kernel ------------------------------ #

def _make_aspp_kernel(offsets, m_rows, cpad):
    """offsets: static tuple of flat row offsets, one per fused tap weight."""

    def kernel(x_ref, w_ref, init_ref, o_ref):
        # Per-batch init row: folded BN biases for the conv branches, the
        # pre-ReLU pooled activation for the image-pool block, zeros in the
        # lane-padding channels.
        acc = jnp.broadcast_to(init_ref[0], (m_rows, cpad))        # f32
        # In-kernel "im2col": each tap reads a shifted window of the padded,
        # flattened input; bf16 matmuls accumulate in f32.
        for t, s in enumerate(offsets):
            x_t = x_ref[0, s:s + m_rows, :]                        # (M, Cin) bf16
            acc = acc + jnp.dot(x_t, w_ref[t],
                                preferred_element_type=jnp.float32)
        o_ref[...] = jnp.maximum(acc, 0.0)                         # fused ReLU

    return kernel


# ------------------------------ ASPP forward ------------------------------- #

def aspp_forward(x_nchw, params, rates):
    x = jnp.transpose(x_nchw, (0, 2, 3, 1)).astype(jnp.float32)    # NHWC
    N, H, W, Cin = x.shape
    out_ch = params["c0"]["w"].shape[0]
    P = max(rates)
    Hp, Wp = H + 2 * P, W + 2 * P
    M = H * Wp                       # matmul rows per image (Wp-strided pixels)
    L = Hp * Wp + 2 * P              # flat rows incl. bottom halo slack
    n_conv = 1 + len(rates)
    c_total = out_ch * (n_conv + 1)  # conv branches + image pool
    cpad = ((c_total + 127) // 128) * 128      # lane-dense output channels

    def place(w_tap, off):           # (Cin, out_ch) -> column block of (Cin, cpad)
        return jnp.zeros((Cin, cpad), jnp.float32).at[:, off:off + out_ch].set(w_tap)

    # Fold BN into weights and fuse all conv branches into per-offset weights.
    tap_w = {}                       # flat offset -> fused (Cin, cpad) weight

    def add_tap(s, w_full):
        tap_w[s] = w_full if s not in tap_w else tap_w[s] + w_full

    biases = []
    # c0: 1x1 conv + BN + ReLU
    scale, bias = _fold_bn(params["c0"])
    w0 = params["c0"]["w"].reshape(out_ch, Cin).T * scale[None, :]
    add_tap(P * Wp + P, place(w0, 0))
    biases.append(bias)
    # c1..cR: 3x3 dilated conv + BN + ReLU
    for i, r in enumerate(rates):
        p = params[f"c{i + 1}"]
        scale, bias = _fold_bn(p)
        off = out_ch * (1 + i)
        for dy in range(3):
            for dx in range(3):
                s = (P - r + dy * r) * Wp + (P - r + dx * r)
                w_t = p["w"][:, :, dy, dx].T * scale[None, :]      # (Cin, out)
                add_tap(s, place(w_t, off))
        biases.append(bias)

    offsets = tuple(sorted(tap_w))
    w_all = jnp.stack([tap_w[s] for s in offsets]).astype(jnp.bfloat16)
    T = len(offsets)

    # Image-pool branch: tiny (N,Cin)x(Cin,out) matmul in plain XLA; bilinear
    # upsample of a 1x1 map (align_corners=False) is a constant broadcast, so
    # the pre-ReLU value is folded into the kernel's per-batch init row.
    pp = params["imagepool"]
    scale_p, bias_p = _fold_bn(pp)
    w_p = pp["w"].reshape(out_ch, Cin).T * scale_p[None, :]
    pooled_pre = jnp.mean(x, axis=(1, 2)) @ w_p + bias_p[None, :]  # (N, out)

    conv_bias = jnp.concatenate(biases)                            # (n_conv*out,)
    init = jnp.concatenate(
        [jnp.broadcast_to(conv_bias[None, :], (N, conv_bias.shape[0])),
         pooled_pre,
         jnp.zeros((N, cpad - c_total), jnp.float32)], axis=1)
    init = init[:, None, :]                                        # (N, 1, cpad)

    # Padded + flattened input in bf16 — no im2col materialization.
    xpad = jnp.pad(x, ((0, 0), (P, P), (P, P), (0, 0)))
    x_flat = jnp.pad(xpad.reshape(N, Hp * Wp, Cin),
                     ((0, 0), (0, 2 * P), (0, 0))).astype(jnp.bfloat16)

    kernel = _make_aspp_kernel(offsets, M, cpad)
    out = pl.pallas_call(
        kernel,
        out_shape=jax.ShapeDtypeStruct((N * M, cpad), jnp.float32),
        grid=(N,),
        in_specs=[
            pl.BlockSpec((1, L, Cin), lambda n: (n, 0, 0)),        # halo'd image
            pl.BlockSpec((T, Cin, cpad), lambda n: (0, 0, 0)),     # fused weights
            pl.BlockSpec((1, 1, cpad), lambda n: (n, 0, 0)),       # bias/pool row
        ],
        out_specs=pl.BlockSpec((M, cpad), lambda n: (n, 0)),       # lane-dense
        compiler_params=pltpu.CompilerParams(
            dimension_semantics=("parallel",),
            vmem_limit_bytes=32 * 1024 * 1024),
    )(x_flat, w_all, init)

    # Drop the Wp-stride garbage columns and lane padding; XLA fuses this with
    # the NCHW transpose the PyTorch module requires anyway.
    y = out.reshape(N, H, Wp, cpad)[:, :, :W, :c_total]
    return jnp.transpose(y, (0, 3, 1, 2))                          # NCHW


# ------------------------- pure-XLA reference (check) ----------------------- #

def aspp_reference(x_nchw, params, rates):
    x = jnp.transpose(x_nchw, (0, 2, 3, 1)).astype(jnp.float32)
    N, H, W, Cin = x.shape

    def conv_branch(p, rate, ksize):
        scale, bias = _fold_bn(p)
        w = jnp.transpose(p["w"], (2, 3, 1, 0))                    # HWIO
        pad = 0 if ksize == 1 else rate
        y = jax.lax.conv_general_dilated(
            x, w, window_strides=(1, 1), padding=[(pad, pad), (pad, pad)],
            rhs_dilation=(rate, rate),
            dimension_numbers=("NHWC", "HWIO", "NHWC"))
        return jnp.maximum(y * scale + bias, 0.0)

    outs = [conv_branch(params["c0"], 1, 1)]
    for i, r in enumerate(rates):
        outs.append(conv_branch(params[f"c{i + 1}"], r, 3))
    pp = params["imagepool"]
    scale_p, bias_p = _fold_bn(pp)
    out_ch = pp["w"].shape[0]
    pooled = jnp.mean(x, axis=(1, 2))
    py = jnp.maximum(pooled @ (pp["w"].reshape(out_ch, Cin).T * scale_p) + bias_p, 0.0)
    outs.append(jnp.broadcast_to(py[:, None, None, :], (N, H, W, out_ch)))
    return jnp.transpose(jnp.concatenate(outs, axis=-1), (0, 3, 1, 2))


# --------------------------- parameter construction ------------------------- #

def _init_conv_bn(key, in_ch, out_ch, ksize):
    kw, kg, kb, km, kv = jax.random.split(key, 5)
    w = 0.1 * jax.random.normal(kw, (out_ch, in_ch, ksize, ksize), jnp.float32)
    gamma = 1.0 + 0.05 * jax.random.normal(kg, (out_ch,), jnp.float32)
    beta = 0.05 * jax.random.normal(kb, (out_ch,), jnp.float32)
    mean = 0.05 * jax.random.normal(km, (out_ch,), jnp.float32)
    var = jnp.abs(0.5 + 0.1 * jax.random.normal(kv, (out_ch,), jnp.float32))
    return {"w": w, "gamma": gamma, "beta": beta, "mean": mean, "var": var}


def init_aspp_params(key, in_ch, out_ch, rates):
    keys = jax.random.split(key, len(rates) + 2)
    params = {"c0": _init_conv_bn(keys[0], in_ch, out_ch, 1)}
    for i, _ in enumerate(rates):
        params[f"c{i + 1}"] = _init_conv_bn(keys[i + 1], in_ch, out_ch, 3)
    params["imagepool"] = _init_conv_bn(keys[-1], in_ch, out_ch, 1)
    return params


# ----------------------------------- main ----------------------------------- #

if __name__ == "__main__":
    key = jax.random.PRNGKey(0)
    k_x, k_p = jax.random.split(key)

    in_ch, out_ch = 4, 8
    rates = (1, 2, 3)
    N, H, W = 2, 16, 16

    x = jax.random.normal(k_x, (N, in_ch, H, W), jnp.float32)      # NCHW input
    params = init_aspp_params(k_p, in_ch, out_ch, rates)

    fwd = jax.jit(functools.partial(aspp_forward, rates=rates))
    y = fwd(x, params)
    jax.block_until_ready(y)

    expected_channels = out_ch * (1 + len(rates) + 1)
    assert y.shape == (N, expected_channels, H, W), y.shape
    assert bool(jnp.all(y >= 0.0))                                 # ReLU output

    y_ref = aspp_reference(x, params, rates)
    err = float(jnp.max(jnp.abs(y - y_ref)))
    assert err < 5e-2, f"max abs err {err}"                        # bf16 MXU tol
    print("KERNEL_OK")
</pallas_src>

<mosaic_0001>
module attributes {stable_mosaic.version = 11 : i64} {
  func.func @kernel(%arg0: i32, %arg1: memref<1x490x4xbf16, #tpu.memory_space<vmem>>, %arg2: memref<25x4x128xbf16, #tpu.memory_space<vmem>>, %arg3: memref<1x1x128xf32, #tpu.memory_space<vmem>>, %arg4: memref<352x128xf32, #tpu.memory_space<vmem>>) attributes {dimension_semantics = [#tpu.dimension_semantics<parallel>], iteration_bounds = array<i64: 2>, scalar_prefetch = 0 : i64, scratch_operands = 0 : i64, tpu.core_type = #tpu.core_type<tc>, window_params = [{transform_indices = @transform_0, window_bounds = array<i64: 1, 490, 4>}, {pipeline_mode = #tpu.pipeline_mode<synchronous>, transform_indices = @transform_1, window_bounds = array<i64: 25, 4, 128>}, {transform_indices = @transform_2, window_bounds = array<i64: 1, 1, 128>}, {transform_indices = @transform_3, window_bounds = array<i64: 352, 128>}]} {
    %c0 = arith.constant 0 : index
    %c0_0 = arith.constant 0 : index
    %c0_1 = arith.constant 0 : index
    %0 = vector.load %arg3[%c0, %c0_0, %c0_1] : memref<1x1x128xf32, #tpu.memory_space<vmem>>, vector<1x1x128xf32>
    %1 = vector.shape_cast %0 : vector<1x1x128xf32> to vector<1x128xf32>
    %2 = vector.shape_cast %1 : vector<1x128xf32> to vector<1x128xf32>
    %3 = vector.broadcast %2 : vector<1x128xf32> to vector<352x128xf32>
    %c0_2 = arith.constant 0 : index
    %c0_3 = arith.constant 0 : index
    %c0_4 = arith.constant 0 : index
    %4 = vector.load %arg1[%c0_2, %c0_3, %c0_4] : memref<1x490x4xbf16, #tpu.memory_space<vmem>>, vector<1x352x4xbf16>
    %5 = vector.shape_cast %4 : vector<1x352x4xbf16> to vector<352x4xbf16>
    %c0_5 = arith.constant 0 : index
    %c0_6 = arith.constant 0 : index
    %c0_7 = arith.constant 0 : index
    %6 = vector.load %arg2[%c0_5, %c0_6, %c0_7] : memref<25x4x128xbf16, #tpu.memory_space<vmem>>, vector<1x4x128xbf16>
    %7 = vector.shape_cast %6 : vector<1x4x128xbf16> to vector<4x128xbf16>
    %cst = arith.constant dense<0.000000e+00> : vector<352x128xf32>
    %8 = tpu.matmul %5, %7, %cst {dimension_numbers = #tpu.dot_dimension_numbers<[1], [0], [0], [1], [0, 0, 1, 1], [], []>} : vector<352x4xbf16>, vector<4x128xbf16>, vector<352x128xf32> -> vector<352x128xf32>
    %9 = arith.addf %3, %8 : vector<352x128xf32>
    %c0_8 = arith.constant 0 : index
    %c3 = arith.constant 3 : index
    %c0_9 = arith.constant 0 : index
    %10 = vector.load %arg1[%c0_8, %c3, %c0_9] : memref<1x490x4xbf16, #tpu.memory_space<vmem>>, vector<1x352x4xbf16>
    %11 = vector.shape_cast %10 : vector<1x352x4xbf16> to vector<352x4xbf16>
    %c1 = arith.constant 1 : index
    %c0_10 = arith.constant 0 : index
    %c0_11 = arith.constant 0 : index
    %12 = vector.load %arg2[%c1, %c0_10, %c0_11] : memref<25x4x128xbf16, #tpu.memory_space<vmem>>, vector<1x4x128xbf16>
    %13 = vector.shape_cast %12 : vector<1x4x128xbf16> to vector<4x128xbf16>
    %cst_12 = arith.constant dense<0.000000e+00> : vector<352x128xf32>
    %14 = tpu.matmul %11, %13, %cst_12 {dimension_numbers = #tpu.dot_dimension_numbers<[1], [0], [0], [1], [0, 0, 1, 1], [], []>} : vector<352x4xbf16>, vector<4x128xbf16>, vector<352x128xf32> -> vector<352x128xf32>
    %15 = arith.addf %9, %14 : vector<352x128xf32>
    %c0_13 = arith.constant 0 : index
    %c6 = arith.constant 6 : index
    %c0_14 = arith.constant 0 : index
    %16 = vector.load %arg1[%c0_13, %c6, %c0_14] : memref<1x490x4xbf16, #tpu.memory_space<vmem>>, vector<1x352x4xbf16>
    %17 = vector.shape_cast %16 : vector<1x352x4xbf16> to vector<352x4xbf16>
    %c2 = arith.constant 2 : index
    %c0_15 = arith.constant 0 : index
    %c0_16 = arith.constant 0 : index
    %18 = vector.load %arg2[%c2, %c0_15, %c0_16] : memref<25x4x128xbf16, #tpu.memory_space<vmem>>, vector<1x4x128xbf16>
    %19 = vector.shape_cast %18 : vector<1x4x128xbf16> to vector<4x128xbf16>
    %cst_17 = arith.constant dense<0.000000e+00> : vector<352x128xf32>
    %20 = tpu.matmul %17, %19, %cst_17 {dimension_numbers = #tpu.dot_dimension_numbers<[1], [0], [0], [1], [0, 0, 1, 1], [], []>} : vector<352x4xbf16>, vector<4x128xbf16>, vector<352x128xf32> -> vector<352x128xf32>
    %21 = arith.addf %15, %20 : vector<352x128xf32>
    %c0_18 = arith.constant 0 : index
    %c23 = arith.constant 23 : index
    %c0_19 = arith.constant 0 : index
    %22 = vector.load %arg1[%c0_18, %c23, %c0_19] : memref<1x490x4xbf16, #tpu.memory_space<vmem>>, vector<1x352x4xbf16>
    %23 = vector.shape_cast %22 : vector<1x352x4xbf16> to vector<352x4xbf16>
    %c3_20 = arith.constant 3 : index
    %c0_21 = arith.constant 0 : index
    %c0_22 = arith.constant 0 : index
    %24 = vector.load %arg2[%c3_20, %c0_21, %c0_22] : memref<25x4x128xbf16, #tpu.memory_space<vmem>>, vector<1x4x128xbf16>
    %25 = vector.shape_cast %24 : vector<1x4x128xbf16> to vector<4x128xbf16>
    %cst_23 = arith.constant dense<0.000000e+00> : vector<352x128xf32>
    %26 = tpu.matmul %23, %25, %cst_23 {dimension_numbers = #tpu.dot_dimension_numbers<[1], [0], [0], [1], [0, 0, 1, 1], [], []>} : vector<352x4xbf16>, vector<4x128xbf16>, vector<352x128xf32> -> vector<352x128xf32>
    %27 = arith.addf %21, %26 : vector<352x128xf32>
    %c0_24 = arith.constant 0 : index
    %c25 = arith.constant 25 : index
    %c0_25 = arith.constant 0 : index
    %28 = vector.load %arg1[%c0_24, %c25, %c0_25] : memref<1x490x4xbf16, #tpu.memory_space<vmem>>, vector<1x352x4xbf16>
    %29 = vector.shape_cast %28 : vector<1x352x4xbf16> to vector<352x4xbf16>
    %c4 = arith.constant 4 : index
    %c0_26 = arith.constant 0 : index
    %c0_27 = arith.constant 0 : index
    %30 = vector.load %arg2[%c4, %c0_26, %c0_27] : memref<25x4x128xbf16, #tpu.memory_space<vmem>>, vector<1x4x128xbf16>
    %31 = vector.shape_cast %30 : vector<1x4x128xbf16> to vector<4x128xbf16>
    %cst_28 = arith.constant dense<0.000000e+00> : vector<352x128xf32>
    %32 = tpu.matmul %29, %31, %cst_28 {dimension_numbers = #tpu.dot_dimension_numbers<[1], [0], [0], [1], [0, 0, 1, 1], [], []>} : vector<352x4xbf16>, vector<4x128xbf16>, vector<352x128xf32> -> vector<352x128xf32>
    %33 = arith.addf %27, %32 : vector<352x128xf32>
    %c0_29 = arith.constant 0 : index
    %c27 = arith.constant 27 : index
    %c0_30 = arith.constant 0 : index
    %34 = vector.load %arg1[%c0_29, %c27, %c0_30] : memref<1x490x4xbf16, #tpu.memory_space<vmem>>, vector<1x352x4xbf16>
    %35 = vector.shape_cast %34 : vector<1x352x4xbf16> to vector<352x4xbf16>
    %c5 = arith.constant 5 : index
    %c0_31 = arith.constant 0 : index
    %c0_32 = arith.constant 0 : index
    %36 = vector.load %arg2[%c5, %c0_31, %c0_32] : memref<25x4x128xbf16, #tpu.memory_space<vmem>>, vector<1x4x128xbf16>
    %37 = vector.shape_cast %36 : vector<1x4x128xbf16> to vector<4x128xbf16>
    %cst_33 = arith.constant dense<0.000000e+00> : vector<352x128xf32>
    %38 = tpu.matmul %35, %37, %cst_33 {dimension_numbers = #tpu.dot_dimension_numbers<[1], [0], [0], [1], [0, 0, 1, 1], [], []>} : vector<352x4xbf16>, vector<4x128xbf16>, vector<352x128xf32> -> vector<352x128xf32>
    %39 = arith.addf %33, %38 : vector<352x128xf32>
    %c0_34 = arith.constant 0 : index
    %c46 = arith.constant 46 : index
    %c0_35 = arith.constant 0 : index
    %40 = vector.load %arg1[%c0_34, %c46, %c0_35] : memref<1x490x4xbf16, #tpu.memory_space<vmem>>, vector<1x352x4xbf16>
    %41 = vector.shape_cast %40 : vector<1x352x4xbf16> to vector<352x4xbf16>
    %c6_36 = arith.constant 6 : index
    %c0_37 = arith.constant 0 : index
    %c0_38 = arith.constant 0 : index
    %42 = vector.load %arg2[%c6_36, %c0_37, %c0_38] : memref<25x4x128xbf16, #tpu.memory_space<vmem>>, vector<1x4x128xbf16>
    %43 = vector.shape_cast %42 : vector<1x4x128xbf16> to vector<4x128xbf16>
    %cst_39 = arith.constant dense<0.000000e+00> : vector<352x128xf32>
    %44 = tpu.matmul %41, %43, %cst_39 {dimension_numbers = #tpu.dot_dimension_numbers<[1], [0], [0], [1], [0, 0, 1, 1], [], []>} : vector<352x4xbf16>, vector<4x128xbf16>, vector<352x128xf32> -> vector<352x128xf32>
    %45 = arith.addf %39, %44 : vector<352x128xf32>
    %c0_40 = arith.constant 0 : index
    %c47 = arith.constant 47 : index
    %c0_41 = arith.constant 0 : index
    %46 = vector.load %arg1[%c0_40, %c47, %c0_41] : memref<1x490x4xbf16, #tpu.memory_space<vmem>>, vector<1x352x4xbf16>
    %47 = vector.shape_cast %46 : vector<1x352x4xbf16> to vector<352x4xbf16>
    %c7 = arith.constant 7 : index
    %c0_42 = arith.constant 0 : index
    %c0_43 = arith.constant 0 : index
    %48 = vector.load %arg2[%c7, %c0_42, %c0_43] : memref<25x4x128xbf16, #tpu.memory_space<vmem>>, vector<1x4x128xbf16>
    %49 = vector.shape_cast %48 : vector<1x4x128xbf16> to vector<4x128xbf16>
    %cst_44 = arith.constant dense<0.000000e+00> : vector<352x128xf32>
    %50 = tpu.matmul %47, %49, %cst_44 {dimension_numbers = #tpu.dot_dimension_numbers<[1], [0], [0], [1], [0, 0, 1, 1], [], []>} : vector<352x4xbf16>, vector<4x128xbf16>, vector<352x128xf32> -> vector<352x128xf32>
    %51 = arith.addf %45, %50 : vector<352x128xf32>
    %c0_45 = arith.constant 0 : index
    %c48 = arith.constant 48 : index
    %c0_46 = arith.constant 0 : index
    %52 = vector.load %arg1[%c0_45, %c48, %c0_46] : memref<1x490x4xbf16, #tpu.memory_space<vmem>>, vector<1x352x4xbf16>
    %53 = vector.shape_cast %52 : vector<1x352x4xbf16> to vector<352x4xbf16>
    %c8 = arith.constant 8 : index
    %c0_47 = arith.constant 0 : index
    %c0_48 = arith.constant 0 : index
    %54 = vector.load %arg2[%c8, %c0_47, %c0_48] : memref<25x4x128xbf16, #tpu.memory_space<vmem>>, vector<1x4x128xbf16>
    %55 = vector.shape_cast %54 : vector<1x4x128xbf16> to vector<4x128xbf16>
    %cst_49 = arith.constant dense<0.000000e+00> : vector<352x128xf32>
    %56 = tpu.matmul %53, %55, %cst_49 {dimension_numbers = #tpu.dot_dimension_numbers<[1], [0], [0], [1], [0, 0, 1, 1], [], []>} : vector<352x4xbf16>, vector<4x128xbf16>, vector<352x128xf32> -> vector<352x128xf32>
    %57 = arith.addf %51, %56 : vector<352x128xf32>
    %c0_50 = arith.constant 0 : index
    %c66 = arith.constant 66 : index
    %c0_51 = arith.constant 0 : index
    %58 = vector.load %arg1[%c0_50, %c66, %c0_51] : memref<1x490x4xbf16, #tpu.memory_space<vmem>>, vector<1x352x4xbf16>
    %59 = vector.shape_cast %58 : vector<1x352x4xbf16> to vector<352x4xbf16>
    %c9 = arith.constant 9 : index
    %c0_52 = arith.constant 0 : index
    %c0_53 = arith.constant 0 : index
    %60 = vector.load %arg2[%c9, %c0_52, %c0_53] : memref<25x4x128xbf16, #tpu.memory_space<vmem>>, vector<1x4x128xbf16>
    %61 = vector.shape_cast %60 : vector<1x4x128xbf16> to vector<4x128xbf16>
    %cst_54 = arith.constant dense<0.000000e+00> : vector<352x128xf32>
    %62 = tpu.matmul %59, %61, %cst_54 {dimension_numbers = #tpu.dot_dimension_numbers<[1], [0], [0], [1], [0, 0, 1, 1], [], []>} : vector<352x4xbf16>, vector<4x128xbf16>, vector<352x128xf32> -> vector<352x128xf32>
    %63 = arith.addf %57, %62 : vector<352x128xf32>
    %c0_55 = arith.constant 0 : index
    %c67 = arith.constant 67 : index
    %c0_56 = arith.constant 0 : index
    %64 = vector.load %arg1[%c0_55, %c67, %c0_56] : memref<1x490x4xbf16, #tpu.memory_space<vmem>>, vector<1x352x4xbf16>
    %65 = vector.shape_cast %64 : vector<1x352x4xbf16> to vector<352x4xbf16>
    %c10 = arith.constant 10 : index
    %c0_57 = arith.constant 0 : index
    %c0_58 = arith.constant 0 : index
    %66 = vector.load %arg2[%c10, %c0_57, %c0_58] : memref<25x4x128xbf16, #tpu.memory_space<vmem>>, vector<1x4x128xbf16>
    %67 = vector.shape_cast %66 : vector<1x4x128xbf16> to vector<4x128xbf16>
    %cst_59 = arith.constant dense<0.000000e+00> : vector<352x128xf32>
    %68 = tpu.matmul %65, %67, %cst_59 {dimension_numbers = #tpu.dot_dimension_numbers<[1], [0], [0], [1], [0, 0, 1, 1], [], []>} : vector<352x4xbf16>, vector<4x128xbf16>, vector<352x128xf32> -> vector<352x128xf32>
    %69 = arith.addf %63, %68 : vector<352x128xf32>
    %c0_60 = arith.constant 0 : index
    %c68 = arith.constant 68 : index
    %c0_61 = arith.constant 0 : index
    %70 = vector.load %arg1[%c0_60, %c68, %c0_61] : memref<1x490x4xbf16, #tpu.memory_space<vmem>>, vector<1x352x4xbf16>
    %71 = vector.shape_cast %70 : vector<1x352x4xbf16> to vector<352x4xbf16>
    %c11 = arith.constant 11 : index
    %c0_62 = arith.constant 0 : index
    %c0_63 = arith.constant 0 : index
    %72 = vector.load %arg2[%c11, %c0_62, %c0_63] : memref<25x4x128xbf16, #tpu.memory_space<vmem>>, vector<1x4x128xbf16>
    %73 = vector.shape_cast %72 : vector<1x4x128xbf16> to vector<4x128xbf16>
    %cst_64 = arith.constant dense<0.000000e+00> : vector<352x128xf32>
    %74 = tpu.matmul %71, %73, %cst_64 {dimension_numbers = #tpu.dot_dimension_numbers<[1], [0], [0], [1], [0, 0, 1, 1], [], []>} : vector<352x4xbf16>, vector<4x128xbf16>, vector<352x128xf32> -> vector<352x128xf32>
    %75 = arith.addf %69, %74 : vector<352x128xf32>
    %c0_65 = arith.constant 0 : index
    %c69 = arith.constant 69 : index
    %c0_66 = arith.constant 0 : index
    %76 = vector.load %arg1[%c0_65, %c69, %c0_66] : memref<1x490x4xbf16, #tpu.memory_space<vmem>>, vector<1x352x4xbf16>
    %77 = vector.shape_cast %76 : vector<1x352x4xbf16> to vector<352x4xbf16>
    %c12 = arith.constant 12 : index
    %c0_67 = arith.constant 0 : index
    %c0_68 = arith.constant 0 : index
    %78 = vector.load %arg2[%c12, %c0_67, %c0_68] : memref<25x4x128xbf16, #tpu.memory_space<vmem>>, vector<1x4x128xbf16>
    %79 = vector.shape_cast %78 : vector<1x4x128xbf16> to vector<4x128xbf16>
    %cst_69 = arith.constant dense<0.000000e+00> : vector<352x128xf32>
    %80 = tpu.matmul %77, %79, %cst_69 {dimension_numbers = #tpu.dot_dimension_numbers<[1], [0], [0], [1], [0, 0, 1, 1], [], []>} : vector<352x4xbf16>, vector<4x128xbf16>, vector<352x128xf32> -> vector<352x128xf32>
    %81 = arith.addf %75, %80 : vector<352x128xf32>
    %c0_70 = arith.constant 0 : index
    %c70 = arith.constant 70 : index
    %c0_71 = arith.constant 0 : index
    %82 = vector.load %arg1[%c0_70, %c70, %c0_71] : memref<1x490x4xbf16, #tpu.memory_space<vmem>>, vector<1x352x4xbf16>
    %83 = vector.shape_cast %82 : vector<1x352x4xbf16> to vector<352x4xbf16>
    %c13 = arith.constant 13 : index
    %c0_72 = arith.constant 0 : index
    %c0_73 = arith.constant 0 : index
    %84 = vector.load %arg2[%c13, %c0_72, %c0_73] : memref<25x4x128xbf16, #tpu.memory_space<vmem>>, vector<1x4x128xbf16>
    %85 = vector.shape_cast %84 : vector<1x4x128xbf16> to vector<4x128xbf16>
    %cst_74 = arith.constant dense<0.000000e+00> : vector<352x128xf32>
    %86 = tpu.matmul %83, %85, %cst_74 {dimension_numbers = #tpu.dot_dimension_numbers<[1], [0], [0], [1], [0, 0, 1, 1], [], []>} : vector<352x4xbf16>, vector<4x128xbf16>, vector<352x128xf32> -> vector<352x128xf32>
    %87 = arith.addf %81, %86 : vector<352x128xf32>
    %c0_75 = arith.constant 0 : index
    %c71 = arith.constant 71 : index
    %c0_76 = arith.constant 0 : index
    %88 = vector.load %arg1[%c0_75, %c71, %c0_76] : memref<1x490x4xbf16, #tpu.memory_space<vmem>>, vector<1x352x4xbf16>
    %89 = vector.shape_cast %88 : vector<1x352x4xbf16> to vector<352x4xbf16>
    %c14 = arith.constant 14 : index
    %c0_77 = arith.constant 0 : index
    %c0_78 = arith.constant 0 : index
    %90 = vector.load %arg2[%c14, %c0_77, %c0_78] : memref<25x4x128xbf16, #tpu.memory_space<vmem>>, vector<1x4x128xbf16>
    %91 = vector.shape_cast %90 : vector<1x4x128xbf16> to vector<4x128xbf16>
    %cst_79 = arith.constant dense<0.000000e+00> : vector<352x128xf32>
    %92 = tpu.matmul %89, %91, %cst_79 {dimension_numbers = #tpu.dot_dimension_numbers<[1], [0], [0], [1], [0, 0, 1, 1], [], []>} : vector<352x4xbf16>, vector<4x128xbf16>, vector<352x128xf32> -> vector<352x128xf32>
    %93 = arith.addf %87, %92 : vector<352x128xf32>
    %c0_80 = arith.constant 0 : index
    %c72 = arith.constant 72 : index
    %c0_81 = arith.constant 0 : index
    %94 = vector.load %arg1[%c0_80, %c72, %c0_81] : memref<1x490x4xbf16, #tpu.memory_space<vmem>>, vector<1x352x4xbf16>
    %95 = vector.shape_cast %94 : vector<1x352x4xbf16> to vector<352x4xbf16>
    %c15 = arith.constant 15 : index
    %c0_82 = arith.constant 0 : index
    %c0_83 = arith.constant 0 : index
    %96 = vector.load %arg2[%c15, %c0_82, %c0_83] : memref<25x4x128xbf16, #tpu.memory_space<vmem>>, vector<1x4x128xbf16>
    %97 = vector.shape_cast %96 : vector<1x4x128xbf16> to vector<4x128xbf16>
    %cst_84 = arith.constant dense<0.000000e+00> : vector<352x128xf32>
    %98 = tpu.matmul %95, %97, %cst_84 {dimension_numbers = #tpu.dot_dimension_numbers<[1], [0], [0], [1], [0, 0, 1, 1], [], []>} : vector<352x4xbf16>, vector<4x128xbf16>, vector<352x128xf32> -> vector<352x128xf32>
    %99 = arith.addf %93, %98 : vector<352x128xf32>
    %c0_85 = arith.constant 0 : index
    %c90 = arith.constant 90 : index
    %c0_86 = arith.constant 0 : index
    %100 = vector.load %arg1[%c0_85, %c90, %c0_86] : memref<1x490x4xbf16, #tpu.memory_space<vmem>>, vector<1x352x4xbf16>
    %101 = vector.shape_cast %100 : vector<1x352x4xbf16> to vector<352x4xbf16>
    %c16 = arith.constant 16 : index
    %c0_87 = arith.constant 0 : index
    %c0_88 = arith.constant 0 : index
    %102 = vector.load %arg2[%c16, %c0_87, %c0_88] : memref<25x4x128xbf16, #tpu.memory_space<vmem>>, vector<1x4x128xbf16>
    %103 = vector.shape_cast %102 : vector<1x4x128xbf16> to vector<4x128xbf16>
    %cst_89 = arith.constant dense<0.000000e+00> : vector<352x128xf32>
    %104 = tpu.matmul %101, %103, %cst_89 {dimension_numbers = #tpu.dot_dimension_numbers<[1], [0], [0], [1], [0, 0, 1, 1], [], []>} : vector<352x4xbf16>, vector<4x128xbf16>, vector<352x128xf32> -> vector<352x128xf32>
    %105 = arith.addf %99, %104 : vector<352x128xf32>
    %c0_90 = arith.constant 0 : index
    %c91 = arith.constant 91 : index
    %c0_91 = arith.constant 0 : index
    %106 = vector.load %arg1[%c0_90, %c91, %c0_91] : memref<1x490x4xbf16, #tpu.memory_space<vmem>>, vector<1x352x4xbf16>
    %107 = vector.shape_cast %106 : vector<1x352x4xbf16> to vector<352x4xbf16>
    %c17 = arith.constant 17 : index
    %c0_92 = arith.constant 0 : index
    %c0_93 = arith.constant 0 : index
    %108 = vector.load %arg2[%c17, %c0_92, %c0_93] : memref<25x4x128xbf16, #tpu.memory_space<vmem>>, vector<1x4x128xbf16>
    %109 = vector.shape_cast %108 : vector<1x4x128xbf16> to vector<4x128xbf16>
    %cst_94 = arith.constant dense<0.000000e+00> : vector<352x128xf32>
    %110 = tpu.matmul %107, %109, %cst_94 {dimension_numbers = #tpu.dot_dimension_numbers<[1], [0], [0], [1], [0, 0, 1, 1], [], []>} : vector<352x4xbf16>, vector<4x128xbf16>, vector<352x128xf32> -> vector<352x128xf32>
    %111 = arith.addf %105, %110 : vector<352x128xf32>
    %c0_95 = arith.constant 0 : index
    %c92 = arith.constant 92 : index
    %c0_96 = arith.constant 0 : index
    %112 = vector.load %arg1[%c0_95, %c92, %c0_96] : memref<1x490x4xbf16, #tpu.memory_space<vmem>>, vector<1x352x4xbf16>
    %113 = vector.shape_cast %112 : vector<1x352x4xbf16> to vector<352x4xbf16>
    %c18 = arith.constant 18 : index
    %c0_97 = arith.constant 0 : index
    %c0_98 = arith.constant 0 : index
    %114 = vector.load %arg2[%c18, %c0_97, %c0_98] : memref<25x4x128xbf16, #tpu.memory_space<vmem>>, vector<1x4x128xbf16>
    %115 = vector.shape_cast %114 : vector<1x4x128xbf16> to vector<4x128xbf16>
    %cst_99 = arith.constant dense<0.000000e+00> : vector<352x128xf32>
    %116 = tpu.matmul %113, %115, %cst_99 {dimension_numbers = #tpu.dot_dimension_numbers<[1], [0], [0], [1], [0, 0, 1, 1], [], []>} : vector<352x4xbf16>, vector<4x128xbf16>, vector<352x128xf32> -> vector<352x128xf32>
    %117 = arith.addf %111, %116 : vector<352x128xf32>
    %c0_100 = arith.constant 0 : index
    %c111 = arith.constant 111 : index
    %c0_101 = arith.constant 0 : index
    %118 = vector.load %arg1[%c0_100, %c111, %c0_101] : memref<1x490x4xbf16, #tpu.memory_space<vmem>>, vector<1x352x4xbf16>
    %119 = vector.shape_cast %118 : vector<1x352x4xbf16> to vector<352x4xbf16>
    %c19 = arith.constant 19 : index
    %c0_102 = arith.constant 0 : index
    %c0_103 = arith.constant 0 : index
    %120 = vector.load %arg2[%c19, %c0_102, %c0_103] : memref<25x4x128xbf16, #tpu.memory_space<vmem>>, vector<1x4x128xbf16>
    %121 = vector.shape_cast %120 : vector<1x4x128xbf16> to vector<4x128xbf16>
    %cst_104 = arith.constant dense<0.000000e+00> : vector<352x128xf32>
    %122 = tpu.matmul %119, %121, %cst_104 {dimension_numbers = #tpu.dot_dimension_numbers<[1], [0], [0], [1], [0, 0, 1, 1], [], []>} : vector<352x4xbf16>, vector<4x128xbf16>, vector<352x128xf32> -> vector<352x128xf32>
    %123 = arith.addf %117, %122 : vector<352x128xf32>
    %c0_105 = arith.constant 0 : index
    %c113 = arith.constant 113 : index
    %c0_106 = arith.constant 0 : index
    %124 = vector.load %arg1[%c0_105, %c113, %c0_106] : memref<1x490x4xbf16, #tpu.memory_space<vmem>>, vector<1x352x4xbf16>
    %125 = vector.shape_cast %124 : vector<1x352x4xbf16> to vector<352x4xbf16>
    %c20 = arith.constant 20 : index
    %c0_107 = arith.constant 0 : index
    %c0_108 = arith.constant 0 : index
    %126 = vector.load %arg2[%c20, %c0_107, %c0_108] : memref<25x4x128xbf16, #tpu.memory_space<vmem>>, vector<1x4x128xbf16>
    %127 = vector.shape_cast %126 : vector<1x4x128xbf16> to vector<4x128xbf16>
    %cst_109 = arith.constant dense<0.000000e+00> : vector<352x128xf32>
    %128 = tpu.matmul %125, %127, %cst_109 {dimension_numbers = #tpu.dot_dimension_numbers<[1], [0], [0], [1], [0, 0, 1, 1], [], []>} : vector<352x4xbf16>, vector<4x128xbf16>, vector<352x128xf32> -> vector<352x128xf32>
    %129 = arith.addf %123, %128 : vector<352x128xf32>
    %c0_110 = arith.constant 0 : index
    %c115 = arith.constant 115 : index
    %c0_111 = arith.constant 0 : index
    %130 = vector.load %arg1[%c0_110, %c115, %c0_111] : memref<1x490x4xbf16, #tpu.memory_space<vmem>>, vector<1x352x4xbf16>
    %131 = vector.shape_cast %130 : vector<1x352x4xbf16> to vector<352x4xbf16>
    %c21 = arith.constant 21 : index
    %c0_112 = arith.constant 0 : index
    %c0_113 = arith.constant 0 : index
    %132 = vector.load %arg2[%c21, %c0_112, %c0_113] : memref<25x4x128xbf16, #tpu.memory_space<vmem>>, vector<1x4x128xbf16>
    %133 = vector.shape_cast %132 : vector<1x4x128xbf16> to vector<4x128xbf16>
    %cst_114 = arith.constant dense<0.000000e+00> : vector<352x128xf32>
    %134 = tpu.matmul %131, %133, %cst_114 {dimension_numbers = #tpu.dot_dimension_numbers<[1], [0], [0], [1], [0, 0, 1, 1], [], []>} : vector<352x4xbf16>, vector<4x128xbf16>, vector<352x128xf32> -> vector<352x128xf32>
    %135 = arith.addf %129, %134 : vector<352x128xf32>
    %c0_115 = arith.constant 0 : index
    %c132 = arith.constant 132 : index
    %c0_116 = arith.constant 0 : index
    %136 = vector.load %arg1[%c0_115, %c132, %c0_116] : memref<1x490x4xbf16, #tpu.memory_space<vmem>>, vector<1x352x4xbf16>
    %137 = vector.shape_cast %136 : vector<1x352x4xbf16> to vector<352x4xbf16>
    %c22 = arith.constant 22 : index
    %c0_117 = arith.constant 0 : index
    %c0_118 = arith.constant 0 : index
    %138 = vector.load %arg2[%c22, %c0_117, %c0_118] : memref<25x4x128xbf16, #tpu.memory_space<vmem>>, vector<1x4x128xbf16>
    %139 = vector.shape_cast %138 : vector<1x4x128xbf16> to vector<4x128xbf16>
    %cst_119 = arith.constant dense<0.000000e+00> : vector<352x128xf32>
    %140 = tpu.matmul %137, %139, %cst_119 {dimension_numbers = #tpu.dot_dimension_numbers<[1], [0], [0], [1], [0, 0, 1, 1], [], []>} : vector<352x4xbf16>, vector<4x128xbf16>, vector<352x128xf32> -> vector<352x128xf32>
    %141 = arith.addf %135, %140 : vector<352x128xf32>
    %c0_120 = arith.constant 0 : index
    %c135 = arith.constant 135 : index
    %c0_121 = arith.constant 0 : index
    %142 = vector.load %arg1[%c0_120, %c135, %c0_121] : memref<1x490x4xbf16, #tpu.memory_space<vmem>>, vector<1x352x4xbf16>
    %143 = vector.shape_cast %142 : vector<1x352x4xbf16> to vector<352x4xbf16>
    %c23_122 = arith.constant 23 : index
    %c0_123 = arith.constant 0 : index
    %c0_124 = arith.constant 0 : index
    %144 = vector.load %arg2[%c23_122, %c0_123, %c0_124] : memref<25x4x128xbf16, #tpu.memory_space<vmem>>, vector<1x4x128xbf16>
    %145 = vector.shape_cast %144 : vector<1x4x128xbf16> to vector<4x128xbf16>
    %cst_125 = arith.constant dense<0.000000e+00> : vector<352x128xf32>
    %146 = tpu.matmul %143, %145, %cst_125 {dimension_numbers = #tpu.dot_dimension_numbers<[1], [0], [0], [1], [0, 0, 1, 1], [], []>} : vector<352x4xbf16>, vector<4x128xbf16>, vector<352x128xf32> -> vector<352x128xf32>
    %147 = arith.addf %141, %146 : vector<352x128xf32>
    %c0_126 = arith.constant 0 : index
    %c138 = arith.constant 138 : index
    %c0_127 = arith.constant 0 : index
    %148 = vector.load %arg1[%c0_126, %c138, %c0_127] : memref<1x490x4xbf16, #tpu.memory_space<vmem>>, vector<1x352x4xbf16>
    %149 = vector.shape_cast %148 : vector<1x352x4xbf16> to vector<352x4xbf16>
    %c24 = arith.constant 24 : index
    %c0_128 = arith.constant 0 : index
    %c0_129 = arith.constant 0 : index
    %150 = vector.load %arg2[%c24, %c0_128, %c0_129] : memref<25x4x128xbf16, #tpu.memory_space<vmem>>, vector<1x4x128xbf16>
    %151 = vector.shape_cast %150 : vector<1x4x128xbf16> to vector<4x128xbf16>
    %cst_130 = arith.constant dense<0.000000e+00> : vector<352x128xf32>
    %152 = tpu.matmul %149, %151, %cst_130 {dimension_numbers = #tpu.dot_dimension_numbers<[1], [0], [0], [1], [0, 0, 1, 1], [], []>} : vector<352x4xbf16>, vector<4x128xbf16>, vector<352x128xf32> -> vector<352x128xf32>
    %153 = arith.addf %147, %152 : vector<352x128xf32>
    %cst_131 = arith.constant 0.000000e+00 : f32
    %154 = vector.broadcast %cst_131 : f32 to vector<352x128xf32>
    %155 = arith.maximumf %153, %154 : vector<352x128xf32>
    %c0_132 = arith.constant 0 : index
    %c0_133 = arith.constant 0 : index
    %156 = vector.load %arg4[%c0_132, %c0_133] : memref<352x128xf32, #tpu.memory_space<vmem>>, vector<352x128xf32>
    tpu.vector_store %arg4[%c0_132, %c0_133], %155 {strides = array<i32>} : memref<352x128xf32, #tpu.memory_space<vmem>>, vector<352x128xf32>,
    return
  }
  func.func @transform_0(%arg0: i32) -> (i32, i32, i32) {
    %c0_i32 = arith.constant 0 : i32
    %c0_i32_0 = arith.constant 0 : i32
    %c0_i32_1 = arith.constant 0 : i32
    return %arg0, %c0_i32, %c0_i32_0 : i32, i32, i32
  }
  func.func @transform_1(%arg0: i32) -> (i32, i32, i32) {
    %c0_i32 = arith.constant 0 : i32
    %c0_i32_0 = arith.constant 0 : i32
    %c0_i32_1 = arith.constant 0 : i32
    %c0_i32_2 = arith.constant 0 : i32
    return %c0_i32, %c0_i32_0, %c0_i32_1 : i32, i32, i32
  }
  func.func @transform_2(%arg0: i32) -> (i32, i32, i32) {
    %c0_i32 = arith.constant 0 : i32
    %c0_i32_0 = arith.constant 0 : i32
    %c0_i32_1 = arith.constant 0 : i32
    return %arg0, %c0_i32, %c0_i32_0 : i32, i32, i32
  }
  func.func @transform_3(%arg0: i32) -> (i32, i32) {
    %c0_i32 = arith.constant 0 : i32
    %c0_i32_0 = arith.constant 0 : i32
    return %arg0, %c0_i32 : i32, i32
  }
}

</mosaic_0001>

<bundles_post_ra>
// kernel: aspp_forward.1
= control target key start
LH: loop header
LB: loop body
LE: loop exit
PB: predicated region body
PF: predicated region fallthrough
CT: control target
= control target key end

     0   :  { %s17115_s12 = smov 0   ;;  %s20431_s0 = inlined_call_operand.vmem [shape: bf16[2,490,4], index: 0, kind: input, shape index: {}]   ;;  %s20432_s1 = inlined_call_operand.vmem [shape: bf16[25,4,128], index: 1, kind: input, shape index: {}]   ;;  %s20433_s2 = inlined_call_operand.vmem [shape: f32[2,1,128], index: 2, kind: input, shape index: {}]   ;;  %s20434_s3 = inlined_call_operand.vmem [shape: f32[704,128], index: 3, kind: output, shape index: {}]  }
   0x1 LB: > { %s17121_s13 = sadd.s32 4294967295, %s17093_s12   ;;  %p12912_p0 = scmp.ge.s32.totalorder %s17093_s12, 1  ;;  %s17093_s12 = sphi %s17115_s12, %s13_s12  }
   0x2   : > { %p145_p1 = scmp.lt.s32.totalorder %s17093_s12, 3 }
   0x4   : > { %p146_p2 = pnand %p12912_p0, %p145_p1 }
   0x6   : > { %149 = sbr.rel (%p146_p2) target bundleno = 1349 (0x545), region = 32 }
   0xd   : > { %v238_v0 = vld [vmem:[%s20432_s1] sm:$0x3]  ;;  %vm416_vm0 = vcmask 1041408   ;;  %p172_p3 = scmp.lt.s32.totalorder %s17121_s13, 1  ;;  %v13357_v2 = vld [vmem:[%s20432_s1 + $0x18] sm:$0x3] }
   0xe   : > { %16631 = vmatprep.subr.msk.bf16.mxu1 %vm416_vm0, %v238_v0  ;;  %v418_v1 = vsel %vm416_vm0, %v238_v0, 0  ;;  %16643 = vmatprep.subr.msk.bf16.mxu0 %vm416_vm0, %v13357_v2  ;;  %v17139_v3 = vsel %vm416_vm0, %v13357_v2, 0  ;;  %v13381_v4 = vld [vmem:[%s20432_s1 + $0x1a] sm:$0x3]  ;;  %v12960_v5 = vld [vmem:[%s20432_s1 + $0x2] sm:$0x3] }
   0xf   : > { %14380 = vmatpush3.bf16.msra.mxu1 %v418_v1  ;;  %s17135_s18 = scalar_select %p172_p3, %s17121_s13, 1  ;;  %20589 = vst [vmem:[#allocation2_spill] sm:$0xff] %v17139_v3  ;;  %14932 = vmatpush3.bf16.msra.mxu0 %v17139_v3  ;;  %vm349_vm1 = vcmask 31744   ;;  %v17160_v7 = vld [vmem:[%s20432_s1 + $0x4] sm:$0x3]  ;;  %v1107_v9 = vsel %vm416_vm0, %v12960_v5, 0 }
  0x10   : > { %16632 = vmatprep.subr.msk.bf16.mxu1 %vm416_vm0, %v12960_v5  ;;  %16645 = vmatprep.subr.msk.bf16.mxu0 %vm416_vm0, %v13381_v4  ;;  %vm6374_vm2 = vsmask.f32 5376  ;;  %v6916_v19 = vsel %vm416_vm0, %v13381_v4, 0  ;;  %v17226_v48 = vld [vmem:[%s20432_s1 + $0x1c] sm:$0x3]  ;;  %vm1372_vm3 = vcmask 1044480  }
  0x11   : > { %s16657_s23 = smul.u32 248, %s17135_s18  ;;  %vm833_vm4 = vsmask.f32 6400  ;;  %vm1900_vm5 = vsmask.f32 4352  ;;  %vm5092_vm6 = vcmask 1046528   ;;  %s179_s27 = scalar_lea.vmem %s20433_s2, %s17135_s18 }
  0x12   : > { %vm2589_vm7 = vsmask.f32 7424  ;;  %vm6000_vm8 = vcmask 1045504  }
  0x13   : > { %s17154_s26 = scalar_lea.vmem %s20431_s0, %s16657_s23 }
  0x14   : > { %v16666_v6 = vld [vmem:[%s17154_s26] sm:$0xff]   ;;  %v16667_v8 = vld [vmem:[%s17154_s26 + $0x8] sm:$0xff]   ;;  %v16670_v16 = vld [vmem:[%s17154_s26 + $0x10] sm:$0xff]  }
  0x15   : > { %14381 = vmatprep.mubr.msk.bf16.mxu1 %vm349_vm1, %v16666_v6  ;;  %v17166_v10 = vld [vmem:[%s17154_s26 + $0x24] sm:$0xf]  ;;  %v4934_v11 = vld [vmem:[%s17154_s26 + $0x28] sm:$0xf]  ;;  %v4935_v12 = vld [vmem:[%s17154_s26 + $0x2c] sm:$0xf] }
  0x16   : > { %14382 = vmatmul.mubr.msk.bf16.vlgmr.msra.gmra.mrb[0].mxu1 %vm349_vm1, %v16667_v8  ;;  %v17171_v13 = vcombine.low %v4934_v11, %v4935_v12  ;;  %v5994_v14 = vld [vmem:[%s17154_s26 + $0x20] sm:$0xc]  ;;  %v4936_v17 = vld [vmem:[%s17154_s26 + $0x30] sm:$0xf]  ;;  %v4937_v18 = vld [vmem:[%s17154_s26 + $0x34] sm:$0xf] }
  0x17   : > { %v17175_v15 = vcombine.low %v5994_v14, %v17166_v10  ;;  %14426 = vmatpush3.bf16.msra.mxu1 %v1107_v9  ;;  %v17187_v22 = vcombine.low %v4936_v17, %v4937_v18  ;;  %14385 = vmatprep.mubr.msk.bf16.mxu1 %vm349_vm1, %v16670_v16  ;;  %v16672_v25 = vld [vmem:[%s17154_s26 + $0x18] sm:$0xff]   ;;  %v16674_v27 = vld [vmem:[%s17154_s26 + $0x20] sm:$0xff]   ;;  %v4942_v46 = vld [vmem:[%s17154_s26 + $0x48] sm:$0xf] }
  0x18   : > { %20590 = vst [vmem:[#allocation3_spill] sm:$0xff] %v17171_v13  ;;  %v17182_v20 = vshrl.u32 %v17171_v13, 16  ;;  %v17185_v21 = vshll.u32 %v17171_v13, 16  ;;  %16633 = vmatprep.subr.msk.bf16.mxu1 %vm416_vm0, %v17160_v7  ;;  %v4938_v26 = vld [vmem:[%s17154_s26 + $0x38] sm:$0xf]  ;;  %v16676_v59 = vld [vmem:[%s17154_s26 + $0x28] sm:$0xff]  }
  0x19   : > { %20591 = vst [vmem:[#allocation4_spill] sm:$0xff] %v17175_v15  ;;  %20594 = vst [vmem:[#allocation7_spill] sm:$0xff] %v17187_v22  ;;  %v6376_v23 = vshrl.u32 %v17175_v15, 16  ;;  %v6379_v24 = vshll.u32 %v17175_v15, 16  ;;  %v17200_v30 = vshrl.u32 %v17187_v22, 16  ;;  %v17203_v31 = vshll.u32 %v17187_v22, 16 }
  0x1a   : > { %20592 = vst [vmem:[#allocation5_spill] sm:$0xff] %v17182_v20  ;;  %20593 = vst [vmem:[#allocation6_spill] sm:$0xff] %v17185_v21  ;;  %v6383_v28 = vrot.slane %v17182_v20, 2  ;;  %v6384_v29 = vrot.slane %v17185_v21, 3  ;;  %v4939_v32 = vld [vmem:[%s17154_s26 + $0x3c] sm:$0xf] }
  0x1b   : > { %20595 = vst [vmem:[#allocation8_spill] sm:$0xff] %v17200_v30  ;;  %20596 = vst [vmem:[#allocation9_spill] sm:$0xff] %v17203_v31  ;;  %v6378_v33 = vrot.slane %v6376_v23, 2  ;;  %v6381_v34 = vrot.slane %v6379_v24, 3  ;;  %v17206_v35 = vcombine.low %v4938_v26, %v4939_v32  ;;  %v6387_v37 = vrot.slane %v17200_v30, 2  ;;  %v16678_v0 = vld [vmem:[%s17154_s26 + $0x30] sm:$0xff]  }
  0x1c   : > { %v6385_v36 = vor.u32 %v6384_v29, %v6383_v28  ;;  %v6388_v38 = vrot.slane %v17203_v31, 3  ;;  %v4940_v39 = vld [vmem:[%s17154_s26 + $0x40] sm:$0xf]  ;;  %v4941_v40 = vld [vmem:[%s17154_s26 + $0x44] sm:$0xf]  ;;  %v16680_v32 = vld [vmem:[%s17154_s26 + $0x38] sm:$0xff]  }
  0x1d   : > { %20597 = vst [vmem:[#allocation10_spill] sm:$0xff] %v17206_v35  ;;  %v6382_v41 = vor.u32 %v6381_v34, %v6378_v33  ;;  %v17213_v42 = vshrl.u32 %v17206_v35, 16  ;;  %v17216_v43 = vshll.u32 %v17206_v35, 16  ;;  %v17218_v44 = vcombine.low %v4940_v39, %v4941_v40  ;;  %v4943_v47 = vld [vmem:[%s17154_s26 + $0x4c] sm:$0xf] }
  0x1e   : > { %v6389_v45 = vor.u32 %v6388_v38, %v6387_v37  ;;  %14386 = vmatmul.mubr.msk.bf16.gmra.mrb[4].mxu1 %vm349_vm1, %v16672_v25  ;;  %v17240_v55 = vcombine.low %v4942_v46, %v4943_v47  ;;  %v4944_v56 = vld [vmem:[%s17154_s26 + $0x50] sm:$0xf]  ;;  %v4945_v60 = vld [vmem:[%s17154_s26 + $0x54] sm:$0xf]  ;;  %v4946_v4 = vld [vmem:[%s17154_s26 + $0x58] sm:$0xf] }
  0x1f   : > { %20598 = vst [vmem:[#allocation11_spill] sm:$0xff] %v17213_v42  ;;  %20599 = vst [vmem:[#allocation12_spill] sm:$0xff] %v17216_v43  ;;  %v6386_v49 = vsel %vm6374_vm2, %v6382_v41, %v6385_v36  ;;  %v6391_v50 = vrot.slane %v17213_v42, 2  ;;  %v6392_v51 = vrot.slane %v17216_v43, 3  ;;  %14389 = vmatprep.mubr.msk.bf16.mxu1 %vm349_vm1, %v16674_v27  ;;  %v17233_v52 = vshrl.u32 %v17218_v44, 16  ;;  %v16682_v38 = vld [vmem:[%s17154_s26 + $0x40] sm:$0xff]  }
  0x20   : > { %20600 = vst [vmem:[#allocation13_spill] sm:$0xff] %v17218_v44  ;;  %14933 = vmatprep.mubr.msk.bf16.mxu0 %vm349_vm1, %v6386_v49  ;;  %v6390_v53 = vsel %vm6374_vm2, %v6385_v36, %v6389_v45  ;;  %v17238_v54 = vshll.u32 %v17218_v44, 16  ;;  %20603 = vst [vmem:[#allocation16_spill] sm:$0xff] %v17240_v55  ;;  %v17249_v62 = vshrl.u32 %v17240_v55, 16  ;;  %v17252_v63 = vshll.u32 %v17240_v55, 16 }
  0x21   : > { %20601 = vst [vmem:[#allocation14_spill] sm:$0xff] %v17233_v52  ;;  %14934 = vmatmul.mubr.msk.bf16.vlgmr.msra.gmra.mrb[0].mxu0 %vm349_vm1, %v6390_v53  ;;  %v6393_v57 = vor.u32 %v6392_v51, %v6391_v50  ;;  %v6395_v58 = vrot.slane %v17233_v52, 2  ;;  %v17255_v1 = vcombine.low %v4944_v56, %v4945_v60  ;;  %v4947_v5 = vld [vmem:[%s17154_s26 + $0x5c] sm:$0xf]  ;;  %v4948_v16 = vld [vmem:[%s17154_s26 + $0x60] sm:$0xf] }
  0x22   : > { %20602 = vst [vmem:[#allocation15_spill] sm:$0xff] %v17238_v54  ;;  %14978 = vmatpush3.bf16.msra.mxu0 %v6916_v19  ;;  %v6396_v61 = vrot.slane %v17238_v54, 3  ;;  %20604 = vst [vmem:[#allocation17_spill] sm:$0xff] %v17249_v62  ;;  %v6399_v8 = vrot.slane %v17249_v62, 2  ;;  %v6400_v9 = vrot.slane %v17252_v63, 3  ;;  %v17271_v14 = vcombine.low %v4946_v4, %v4947_v5  ;;  %v16684_v4 = vld [vmem:[%s17154_s26 + $0x48] sm:$0xff]  }
  0x23   : > { %20605 = vst [vmem:[#allocation18_spill] sm:$0xff] %v17252_v63  ;;  %20606 = vst [vmem:[#allocation19_spill] sm:$0xff] %v17255_v1  ;;  %v6394_v2 = vsel %vm6374_vm2, %v6389_v45, %v6393_v57  ;;  %16646 = vmatprep.subr.msk.bf16.mxu0 %vm416_vm0, %v17226_v48  ;;  %v17266_v11 = vshrl.u32 %v17255_v1, 16  ;;  %v17269_v12 = vshll.u32 %v17255_v1, 16  ;;  %v4949_v17 = vld [vmem:[%s17154_s26 + $0x64] sm:$0xf] }
  0x24   : > { %14937 = vmatprep.mubr.msk.bf16.mxu0 %vm349_vm1, %v6394_v2  ;;  %v6397_v6 = vor.u32 %v6396_v61, %v6395_v58  ;;  %20609 = vst [vmem:[#allocation22_spill] sm:$0xff] %v17271_v14  ;;  %v6401_v19 = vor.u32 %v6400_v9, %v6399_v8  ;;  %v17278_v24 = vcombine.low %v4948_v16, %v4949_v17  ;;  %v17283_v26 = vshrl.u32 %v17271_v14, 16  ;;  %v4950_v28 = vld [vmem:[%s17154_s26 + $0x68] sm:$0xf]  ;;  %v4951_v34 = vld [vmem:[%s17154_s26 + $0x6c] sm:$0xf] }
  0x25   : > { %20607 = vst [vmem:[#allocation20_spill] sm:$0xff] %v17266_v11  ;;  %20608 = vst [vmem:[#allocation21_spill] sm:$0xff] %v17269_v12  ;;  %v6403_v23 = vrot.slane %v17266_v11, 2  ;;  %v6404_v25 = vrot.slane %v17269_v12, 3  ;;  %v17286_v27 = vshll.u32 %v17271_v14, 16  ;;  %v17302_v40 = vcombine.low %v4950_v28, %v4951_v34  ;;  %v16686_v5 = vld [vmem:[%s17154_s26 + $0x50] sm:$0xff]  }
  0x26   : > { %v6398_v18 = vsel %vm6374_vm2, %v6393_v57, %v6397_v6  ;;  %14390 = vmatmul.mubr.msk.bf16.gmra.mrb[8].mxu1 %vm349_vm1, %v16676_v59  ;;  %20610 = vst [vmem:[#allocation23_spill] sm:$0xff] %v17278_v24  ;;  %20611 = vst [vmem:[#allocation24_spill] sm:$0xff] %v17283_v26  ;;  %v6402_v29 = vsel %vm6374_vm2, %v6397_v6, %v6401_v19  ;;  %v17292_v33 = vshrl.u32 %v17278_v24, 16  ;;  %v6407_v36 = vrot.slane %v17283_v26, 2  ;;  %v4952_v45 = vld [vmem:[%s17154_s26 + $0x70] sm:$0xf] }
  0x27   : > { %14393 = vmatprep.mubr.msk.bf16.mxu1 %vm349_vm1, %v16678_v0  ;;  %20612 = vst [vmem:[#allocation25_spill] sm:$0xff] %v17286_v27  ;;  %v6408_v37 = vrot.slane %v17286_v27, 3  ;;  %v17300_v39 = vshll.u32 %v17278_v24, 16  ;;  %20615 = vst [vmem:[#allocation28_spill] sm:$0xff] %v17302_v40  ;;  %v6405_v41 = vor.u32 %v6404_v25, %v6403_v23  ;;  %v4953_v46 = vld [vmem:[%s17154_s26 + $0x74] sm:$0xf] }
  0x28   : > { %20613 = vst [vmem:[#allocation26_spill] sm:$0xff] %v17292_v33  ;;  %v17308_v49 = vshrl.u32 %v17302_v40, 16  ;;  %v17311_v50 = vshll.u32 %v17302_v40, 16  ;;  %v4954_v51 = vld [vmem:[%s17154_s26 + $0x78] sm:$0xf]  ;;  %v6411_v57 = vrot.slane %v17292_v33, 2  ;;  %v17319_v59 = vcombine.low %v4952_v45, %v4953_v46 }
  0x29   : > { %14938 = vmatmul.mubr.msk.bf16.gmra.mrb[4].mxu0 %vm349_vm1, %v6398_v18  ;;  %20614 = vst [vmem:[#allocation27_spill] sm:$0xff] %v17300_v39  ;;  %v6409_v47 = vor.u32 %v6408_v37, %v6407_v36  ;;  %v4955_v53 = vld [vmem:[%s17154_s26 + $0x7c] sm:$0xf]  ;;  %v6406_v56 = vsel %vm6374_vm2, %v6401_v19, %v6405_v41  ;;  %v6412_v58 = vrot.slane %v17300_v39, 3  ;;  %v4956_v6 = vld [vmem:[%s17154_s26 + $0x80] sm:$0xf] }
  0x2a   : > { %14941 = vmatprep.mubr.msk.bf16.mxu0 %vm349_vm1, %v6402_v29  ;;  %20616 = vst [vmem:[#allocation29_spill] sm:$0xff] %v17308_v49  ;;  %20617 = vst [vmem:[#allocation30_spill] sm:$0xff] %v17311_v50  ;;  %v6415_v61 = vrot.slane %v17308_v49, 2  ;;  %v6416_v0 = vrot.slane %v17311_v50, 3  ;;  %v17325_v2 = vcombine.low %v4954_v51, %v4955_v53  ;;  %v17333_v9 = vshrl.u32 %v17319_v59, 16  ;;  %v16690_v51 = vld [vmem:[%s17154_s26 + $0x60] sm:$0xff]  }
  0x2b   : > { %20618 = vst [vmem:[#allocation31_spill] sm:$0xff] %v17319_v59  ;;  %v6410_v60 = vsel %vm6374_vm2, %v6405_v41, %v6409_v47  ;;  %v6413_v8 = vor.u32 %v6412_v58, %v6411_v57  ;;  %v17336_v16 = vshll.u32 %v17319_v59, 16  ;;  %v4957_v17 = vld [vmem:[%s17154_s26 + $0x84] sm:$0xf]  ;;  %v6798_v53 = vld [vmem:[%s17154_s26 + $0x20] sm:$0x8] }
  0x2c   : > { %20619 = vst [vmem:[#allocation32_spill] sm:$0xff] %v17325_v2  ;;  %20620 = vst [vmem:[#allocation33_spill] sm:$0xff] %v17333_v9  ;;  %v6417_v18 = vor.u32 %v6416_v0, %v6415_v61  ;;  %v17340_v19 = vshrl.u32 %v17325_v2, 16  ;;  %v17343_v23 = vshll.u32 %v17325_v2, 16  ;;  %v6419_v28 = vrot.slane %v17333_v9, 2 }
  0x2d   : > { %20621 = vst [vmem:[#allocation34_spill] sm:$0xff] %v17336_v16  ;;  %v6414_v25 = vsel %vm6374_vm2, %v6409_v47, %v6413_v8  ;;  %v6420_v29 = vrot.slane %v17336_v16, 3  ;;  %v17373_v61 = vcombine.low %v6798_v53, %v17166_v10  ;;  %v6813_v53 = vrot.slane %v17240_v55, 3  ;;  %v17461_v55 = vld [vmem:[%s17154_s26 + $0x28] sm:$0xff]  }
  0x2e   : > { %14394 = vmatmul.mubr.msk.bf16.gmra.mrb[12].mxu1 %vm349_vm1, %v16680_v32  ;;  %20622 = vst [vmem:[#allocation35_spill] sm:$0xff] %v17340_v19  ;;  %20623 = vst [vmem:[#allocation36_spill] sm:$0xff] %v17343_v23  ;;  %v17349_v32 = vcombine.low %v4956_v6, %v4957_v17  ;;  %v6418_v34 = vsel %vm6374_vm2, %v6413_v8, %v6417_v18  ;;  %v6423_v36 = vrot.slane %v17340_v19, 2  ;;  %v6424_v37 = vrot.slane %v17343_v23, 3  ;;  %v16694_v8 = vld [vmem:[%s17154_s26 + $0x70] sm:$0xff]  }
  0x2f   : > { %14397 = vmatprep.mubr.msk.bf16.mxu1 %vm349_vm1, %v16682_v38  ;;  %v16688_v38 = vld [vmem:[%s17154_s26 + $0x58] sm:$0xff]   ;;  %v6421_v41 = vor.u32 %v6420_v29, %v6419_v28  ;;  %v6805_v6 = vrot.slane %v17171_v13, 3  ;;  %v6809_v28 = vrot.slane %v17206_v35, 3  ;;  %v16696_v29 = vld [vmem:[%s17154_s26 + $0x80] sm:$0xff]   ;;  %v4966_v23 = vld [vmem:[%s17154_s26 + $0xa8] sm:$0xf] }
  0x30   : > { %20624 = vst [vmem:[#allocation37_spill] sm:$0xff] %v17349_v32  ;;  %v17359_v45 = vshrl.u32 %v17349_v32, 16  ;;  %v17362_v46 = vshll.u32 %v17349_v32, 16  ;;  %v6425_v47 = vor.u32 %v6424_v37, %v6423_v36  ;;  %v7345_v36 = vsel %vm416_vm0, %v17226_v48, 0  ;;  %v16698_v48 = vld [vmem:[%s17154_s26 + $0x90] sm:$0xff]  }
  0x31   : > { %14942 = vmatmul.mubr.msk.bf16.gmra.mrb[8].mxu0 %vm349_vm1, %v6406_v56  ;;  %v6422_v56 = vsel %vm6374_vm2, %v6417_v18, %v6421_v41  ;;  %v6807_v18 = vrot.slane %v17187_v22, 3 }
  0x32   : > { %14945 = vmatprep.mubr.msk.bf16.mxu0 %vm349_vm1, %v6410_v60  ;;  %20625 = vst [vmem:[#allocation38_spill] sm:$0xff] %v17359_v45  ;;  %20626 = vst [vmem:[#allocation39_spill] sm:$0xff] %v17362_v46  ;;  %v6427_v57 = vrot.slane %v17359_v45, 2  ;;  %v6428_v58 = vrot.slane %v17362_v46, 3  ;;  %v6426_v60 = vsel %vm6374_vm2, %v6421_v41, %v6425_v47  ;;  %v17403_v41 = vld [vmem:[%s17154_s26 + $0x4] sm:$0xf] }
  0x33   : > { %v6810_v37 = vsel %vm1372_vm3, %v6807_v18, %v6809_v28 }
  0x34   : > { %v17377_v0 = vor.u32 %v6428_v58, %v6427_v57  ;;  %v17412_v57 = vld [vmem:[%s17154_s26 + $0x8] sm:$0xff]  }
  0x36   : > { %14398 = vmatmul.mubr.msk.bf16.gmra.mrb[16].mxu1 %vm349_vm1, %v16684_v4  ;;  %20627 = vst [vmem:[#allocation40_spill] sm:$0xff] %v17377_v0  ;;  %v16692_v4 = vld [vmem:[%s17154_s26 + $0x68] sm:$0xff]   ;;  %v6430_v17 = vsel %vm6374_vm2, %v6425_v47, %v17377_v0  ;;  %v6811_v47 = vrot.slane %v17218_v44, 3  ;;  %v17446_v0 = vld [vmem:[%s17154_s26 + $0x20] sm:$0xff]   ;;  %v4963_v44 = vld [vmem:[%s17154_s26 + $0x9c] sm:$0xf] }
  0x37   : > { %14401 = vmatprep.mubr.msk.bf16.mxu1 %vm349_vm1, %v16686_v5  ;;  %v6804_v5 = vrot.slane %v17373_v61, 3 }
  0x38   : > { %v6812_v58 = vsel %vm1372_vm3, %v6809_v28, %v6811_v47  ;;  %v17433_v28 = vld [vmem:[%s17154_s26 + $0x18] sm:$0xff]  }
  0x39   : > { %14946 = vmatmul.mubr.msk.bf16.gmra.mrb[12].mxu0 %vm349_vm1, %v6414_v25  ;;  %v6806_v10 = vsel %vm1372_vm3, %v6804_v5, %v6805_v6  ;;  %v16695_v25 = vld [vmem:[%s17154_s26 + $0x78] sm:$0xff]  }
  0x3a   : > { %14949 = vmatprep.mubr.msk.bf16.mxu0 %vm349_vm1, %v6418_v34  ;;  %v6808_v34 = vsel %vm1372_vm3, %v6805_v6, %v6807_v18  ;;  %v843_v6 = vshrl.u32 %v17412_v57, 16  ;;  %v17428_v18 = vld [vmem:[%s20432_s1 + $0x1e] sm:$0x3] }
  0x3e   : > { %14402 = vmatmul.mubr.msk.bf16.gmra.mrb[20].mxu1 %vm349_vm1, %v16688_v38  ;;  %v673_v38 = vld [vmem:[%s17154_s26] sm:$0xe] }
  0x3f   : > { %14405 = vmatprep.mubr.msk.bf16.mxu1 %vm349_vm1, %v16690_v51  ;;  %v16697_v51 = vld [vmem:[%s17154_s26 + $0x88] sm:$0xff]  }
  0x41   : > { %14950 = vmatmul.mubr.msk.bf16.gmra.mrb[16].mxu0 %vm349_vm1, %v6422_v56  ;;  %v12961_v56 = vcombine.low %v673_v38, %v17403_v41  ;;  %v845_v38 = vrot.slane %v843_v6, 1  ;;  %v4958_v6 = vld [vmem:[%s17154_s26 + $0x88] sm:$0xf] }
  0x42   : > { %14953 = vmatprep.mubr.msk.bf16.mxu0 %vm349_vm1, %v6426_v60  ;;  %v6814_v60 = vsel %vm1372_vm3, %v6811_v47, %v6813_v53 }
  0x43   : > { %v838_v5 = vshll.u32 %v12961_v56, 16 }
  0x46   : > { %14406 = vmatmul.mubr.msk.bf16.gmra.mrb[24].mxu1 %vm349_vm1, %v16692_v4  ;;  %v835_v4 = vshrl.u32 %v12961_v56, 16 }
  0x47   : > { %14409 = vmatprep.mubr.msk.bf16.mxu1 %vm349_vm1, %v16694_v8  ;;  %v846_v8 = vshll.u32 %v17412_v57, 16 }
  0x49   : > { %14954 = vmatmul.mubr.msk.bf16.gmra.mrb[20].mxu0 %vm349_vm1, %v6430_v17  ;;  %v16699_v17 = vld [vmem:[%s17154_s26 + $0x98] sm:$0xff]   ;;  %v848_v47 = vrot.slane %v846_v8, 2  ;;  %v4959_v8 = vld [vmem:[%s17154_s26 + $0x8c] sm:$0xf] }
  0x4a   : > { %14979 = vmatprep.mubr.msk.bf16.mxu0 %vm349_vm1, %v6806_v10  ;;  %v17423_v10 = vld [vmem:[%s17154_s26 + $0x10] sm:$0xff]  }
  0x4b   : > { %v849_v15 = vor.u32 %v848_v47, %v845_v38  ;;  %v17470_v47 = vld [vmem:[%s17154_s26 + $0x30] sm:$0xff]  }
  0x4c   : > { %v888_v22 = vshrl.u32 %v17470_v47, 16 }
  0x4e   : > { %14410 = vmatmul.mubr.msk.bf16.gmra.mrb[28].mxu1 %vm349_vm1, %v16695_v25  ;;  %v6815_v25 = vrot.slane %v17255_v1, 3  ;;  %v890_v46 = vrot.slane %v888_v22, 1  ;;  %v1374_v22 = vrot.slane %v17412_v57, 3  ;;  %v1378_v57 = vrot.slane %v17433_v28, 3 }
  0x4f   : > { %14413 = vmatprep.mubr.msk.bf16.mxu1 %vm349_vm1, %v16696_v29  ;;  %v6817_v29 = vrot.slane %v17271_v14, 3  ;;  %v6821_v14 = vrot.slane %v17302_v40, 3 }
  0x50   : > { %v6816_v56 = vsel %vm1372_vm3, %v6813_v53, %v6815_v25  ;;  %v6819_v53 = vrot.slane %v17278_v24, 3  ;;  %v17466_v24 = vcombine.low %v4958_v6, %v4959_v8  ;;  %v879_v8 = vshrl.u32 %v17461_v55, 16 }
  0x51   : > { %14980 = vmatmul.mubr.msk.bf16.vlgmr.msra.gmra.mrb[0].mxu0 %vm349_vm1, %v6808_v34  ;;  %v16700_v34 = vld [vmem:[%s17154_s26 + $0xa0] sm:$0xff]  }
  0x52   : > { %15024 = vmatpush3.bf16.msra.mxu0 %v7345_v36  ;;  %14983 = vmatprep.mubr.msk.bf16.mxu0 %vm349_vm1, %v6810_v37  ;;  %v837_v36 = vrot.slane %v835_v4, 1  ;;  %v840_v37 = vrot.slane %v838_v5, 2  ;;  %v17450_v4 = vsel %vm416_vm0, %v17160_v7, 0  ;;  %v6818_v5 = vsel %vm1372_vm3, %v6815_v25, %v6817_v29  ;;  %20628 = vst [vmem:[#allocation41_spill] sm:$0xff] %v17466_v24 }
  0x53   : > { %16647 = vmatprep.subr.msk.bf16.mxu0 %vm416_vm0, %v17428_v18  ;;  %v870_v25 = vshrl.u32 %v17446_v0, 16 }
  0x54   : > { %v841_v3 = vor.u32 %v840_v37, %v837_v36  ;;  %v6823_v36 = vrot.slane %v17319_v59, 3  ;;  %v882_v59 = vshll.u32 %v17461_v55, 16 }
  0x56   : > { %14414 = vmatmul.mubr.msk.bf16.gmra.mrb[32].mxu1 %vm349_vm1, %v16697_v51  ;;  %v852_v51 = vshrl.u32 %v17423_v10, 16 }
  0x57   : > { %14417 = vmatprep.mubr.msk.bf16.mxu1 %vm349_vm1, %v16698_v48  ;;  %v855_v48 = vshll.u32 %v17423_v10, 16 }
  0x58   : > { %v854_v7 = vrot.slane %v852_v51, 1  ;;  %v6820_v51 = vsel %vm1372_vm3, %v6817_v29, %v6819_v53 }
  0x59   : > { %14984 = vmatmul.mubr.msk.bf16.gmra.mrb[4].mxu0 %vm349_vm1, %v6812_v58  ;;  %v861_v58 = vshrl.u32 %v17433_v28, 16  ;;  %v857_v1 = vrot.slane %v855_v48, 2  ;;  %v850_v48 = vsel %vm833_vm4, %v841_v3, %v849_v15 }
  0x5a   : > { %14987 = vmatprep.mubr.msk.bf16.mxu0 %vm349_vm1, %v6814_v60  ;;  %v864_v60 = vshll.u32 %v17433_v28, 16 }
  0x5b   : > { %v863_v37 = vrot.slane %v861_v58, 1  ;;  %v858_v40 = vor.u32 %v857_v1, %v854_v7  ;;  %v17480_v58 = vld [vmem:[%s17154_s26 + $0x38] sm:$0xff]   ;;  %v6822_v7 = vsel %vm1372_vm3, %v6819_v53, %v6821_v14 }
  0x5c   : > { %v866_v38 = vrot.slane %v864_v60, 2  ;;  %v872_v60 = vrot.slane %v870_v25, 1  ;;  %v4962_v1 = vld [vmem:[%s17154_s26 + $0x98] sm:$0xf]  ;;  %v4964_v25 = vld [vmem:[%s17154_s26 + $0xa0] sm:$0xf] }
  0x5d   : > { %v859_v3 = vsel %vm833_vm4, %v849_v15, %v858_v40  ;;  %v17498_v53 = vcombine.low %v4962_v1, %v4963_v44  ;;  %v6824_v15 = vsel %vm1372_vm3, %v6821_v14, %v6823_v36  ;;  %v1362_v44 = vld [vmem:[%s17154_s26] sm:$0x8]  ;;  %v17523_v14 = vld [vmem:[%s17154_s26 + $0x48] sm:$0xff]  }
  0x5e   : > { %14418 = vmatmul.mubr.msk.bf16.gmra.mrb[36].mxu1 %vm349_vm1, %v16699_v17  ;;  %v16701_v17 = vld [vmem:[%s17154_s26 + $0xa8] sm:$0xff]   ;;  %v867_v35 = vor.u32 %v866_v38, %v863_v37  ;;  %v881_v37 = vrot.slane %v879_v8, 1  ;;  %v884_v38 = vrot.slane %v882_v59, 2  ;;  %v17514_v8 = vld [vmem:[%s20432_s1 + $0x6] sm:$0x3]  ;;  %v20632_v59 = vrot.slane %v17325_v2, 3 }
  0x5f   : > { %14421 = vmatprep.mubr.msk.bf16.mxu1 %vm349_vm1, %v16700_v34  ;;  %v873_v34 = vshll.u32 %v17446_v0, 16  ;;  %20630 = vst [vmem:[#allocation43_spill] sm:$0xff] %v17498_v53 }
  0x60   : > { %v868_v13 = vsel %vm833_vm4, %v858_v40, %v867_v35  ;;  %v6826_v40 = vsel %vm1372_vm3, %v6823_v36, %v20632_v59  ;;  %v4967_v36 = vld [vmem:[%s17154_s26 + $0xac] sm:$0xf] }
  0x61   : > { %14988 = vmatmul.mubr.msk.bf16.gmra.mrb[8].mxu0 %vm349_vm1, %v6816_v56  ;;  %v4960_v56 = vld [vmem:[%s17154_s26 + $0x90] sm:$0xf]  ;;  %v875_v29 = vrot.slane %v873_v34, 2  ;;  %v4965_v34 = vld [vmem:[%s17154_s26 + $0xa4] sm:$0xf] }
  0x62   : > { %14991 = vmatprep.mubr.msk.bf16.mxu0 %vm349_vm1, %v6818_v5  ;;  %v4961_v5 = vld [vmem:[%s17154_s26 + $0x94] sm:$0xf] }
  0x63   : > { %v17488_v6 = vcombine.low %v4960_v56, %v4961_v5  ;;  %v17502_v56 = vld [vmem:[%s17154_s26 + $0x40] sm:$0xff]  }
  0x65   : > { %20629 = vst [vmem:[#allocation42_spill] sm:$0xff] %v17488_v6 }
  0x66   : > { %14422 = vmatmul.mubr.msk.bf16.gmra.mrb[40].mxu1 %vm349_vm1, %v16701_v17  ;;  %v891_v17 = vshll.u32 %v17470_v47, 16 }
  0x67   : > { %14427 = vmatprep.mubr.msk.bf16.mxu1 %vm349_vm1, %v850_v48  ;;  %v897_v48 = vshrl.u32 %v17480_v58, 16 }
  0x68   : > { %v893_v45 = vrot.slane %v891_v17, 2  ;;  %v906_v17 = vshrl.u32 %v17502_v56, 16 }
  0x69   : > { %14992 = vmatmul.mubr.msk.bf16.gmra.mrb[12].mxu0 %vm349_vm1, %v6820_v51  ;;  %v900_v51 = vshll.u32 %v17480_v58, 16  ;;  %v899_v1 = vrot.slane %v897_v48, 1  ;;  %v13007_v48 = vcombine.low %v1362_v44, %v17403_v41  ;;  %v915_v44 = vshrl.u32 %v17523_v14, 16 }
  0x6a   : > { %14995 = vmatprep.mubr.msk.bf16.mxu0 %vm349_vm1, %v6822_v7  ;;  %v17507_v7 = vcombine.low %v4964_v25, %v4965_v34  ;;  %v876_v25 = vor.u32 %v875_v29, %v872_v60  ;;  %v885_v34 = vor.u32 %v884_v38, %v881_v37  ;;  %v1376_v60 = vrot.slane %v17423_v10, 3  ;;  %v4969_v38 = vld [vmem:[%s17154_s26 + $0xb4] sm:$0xf] }
  0x6b   : > { %v902_v5 = vrot.slane %v900_v51, 2  ;;  %v908_v41 = vrot.slane %v906_v17, 1  ;;  %v17543_v51 = vcombine.low %v4966_v23, %v4967_v36  ;;  %v20636_v17 = vrot.slane %v17349_v32, 3 }
  0x6c   : > { %20631 = vst [vmem:[#allocation44_spill] sm:$0xff] %v17507_v7  ;;  %v877_v29 = vsel %vm833_vm4, %v867_v35, %v876_v25  ;;  %v886_v37 = vsel %vm833_vm4, %v876_v25, %v885_v34  ;;  %v17553_v10 = vsel %vm1372_vm3, %v1374_v22, %v1376_v60  ;;  %v4970_v35 = vld [vmem:[%s17154_s26 + $0xb8] sm:$0xf]  ;;  %v17557_v25 = vsel %vm1372_vm3, %v1376_v60, %v1378_v57 }
  0x6d   : > { %20633 = vst [vmem:[#allocation45_spill] sm:$0xff] %v17543_v51  ;;  %20634 = vst [vmem:[#allocation46_spill] sm:$0xff] %v17553_v10  ;;  %v20637_v23 = vmov %v20632_v59  ;;  %v918_v36 = vshll.u32 %v17523_v14, 16  ;;  %v20639_v59 = vrot.slane %v17466_v24, 3  ;;  %v20640_v60 = vmov %v20636_v17 }
  0x6e   : > { %14428 = vmatmul.mubr.msk.bf16.vlgmr.msra.gmra.mrb[0].mxu1 %vm349_vm1, %v859_v3  ;;  %v909_v3 = vshll.u32 %v17502_v56, 16  ;;  %20635 = vst [vmem:[#allocation47_spill] sm:$0xff] %v17557_v25  ;;  %v6828_v28 = vsel %vm1372_vm3, %v20637_v23, %v20636_v17  ;;  %v894_v2 = vor.u32 %v893_v45, %v890_v46  ;;  %v903_v10 = vor.u32 %v902_v5, %v899_v1  ;;  %v17577_v17 = vld [vmem:[%s17154_s26 + $0x58] sm:$0xff]  }
  0x6f   : > { %14431 = vmatprep.mubr.msk.bf16.mxu1 %vm349_vm1, %v868_v13  ;;  %14472 = vmatpush3.bf16.msra.mxu1 %v17450_v4  ;;  %v4968_v13 = vld [vmem:[%s17154_s26 + $0xb0] sm:$0xf]  ;;  %v1373_v4 = vrot.slane %v13007_v48, 3  ;;  %v6830_v25 = vsel %vm1372_vm3, %v20640_v60, %v20639_v59  ;;  %v1384_v46 = vrot.slane %v17470_v47, 3  ;;  %v920_v5 = vrot.slane %v918_v36, 2  ;;  %v17605_v36 = vld [vmem:[%s17154_s26 + $0x60] sm:$0xff]  }
  0x70   : > { %16634 = vmatprep.subr.msk.bf16.mxu1 %vm416_vm0, %v17514_v8  ;;  %v17566_v48 = vcombine.low %v4968_v13, %v4969_v38  ;;  %v911_v13 = vrot.slane %v909_v3, 2  ;;  %v4973_v60 = vld [vmem:[%s17154_s26 + $0xc4] sm:$0xf]  ;;  %v1386_v47 = vrot.slane %v17480_v58, 3  ;;  %v20646_v38 = vrot.slane %v17488_v6, 3 }
  0x71   : > { %14996 = vmatmul.mubr.msk.bf16.gmra.mrb[16].mxu0 %vm349_vm1, %v6824_v15  ;;  %v17547_v15 = vld [vmem:[%s17154_s26 + $0x50] sm:$0xff]   ;;  %v20647_v58 = vrot.slane %v17466_v24, 3  ;;  %v4975_v6 = vld [vmem:[%s17154_s26 + $0xcc] sm:$0xf] }
  0x72   : > { %14999 = vmatprep.mubr.msk.bf16.mxu0 %vm349_vm1, %v6826_v40  ;;  %v17550_v40 = vsel %vm1372_vm3, %v1373_v4, %v1374_v22  ;;  %20638 = vst [vmem:[#allocation48_spill] sm:$0xff] %v17566_v48  ;;  %v4971_v4 = vld [vmem:[%s17154_s26 + $0xbc] sm:$0xf]  ;;  %v1380_v22 = vrot.slane %v17446_v0, 3  ;;  %v924_v0 = vshrl.u32 %v17547_v15, 16  ;;  %v927_v59 = vshll.u32 %v17547_v15, 16 }
  0x73   : > { %v17593_v3 = vcombine.low %v4970_v35, %v4971_v4  ;;  %v936_v35 = vshll.u32 %v17577_v17, 16  ;;  %v17609_v4 = vld [vmem:[%s17154_s26 + $0x68] sm:$0xff]  }
  0x74   : > { %v17583_v23 = vsel %vm1372_vm3, %v1378_v57, %v1380_v22  ;;  %v895_v57 = vsel %vm833_vm4, %v885_v34, %v894_v2  ;;  %v929_v1 = vrot.slane %v927_v59, 2  ;;  %v17612_v34 = vsel %vm1372_vm3, %v1384_v46, %v1386_v47 }
  0x75   : > { %20641 = vst [vmem:[#allocation49_spill] sm:$0xff] %v17583_v23  ;;  %20643 = vst [vmem:[#allocation51_spill] sm:$0xff] %v17593_v3  ;;  %v20649_v59 = vmov %v20646_v38  ;;  %v4974_v23 = vld [vmem:[%s17154_s26 + $0xc8] sm:$0xf] }
  0x76   : > { %14432 = vmatmul.mubr.msk.bf16.gmra.mrb[4].mxu1 %vm349_vm1, %v877_v29  ;;  %v1382_v29 = vrot.slane %v17461_v55, 3  ;;  %v917_v55 = vrot.slane %v915_v44, 1  ;;  %v926_v44 = vrot.slane %v924_v0, 1  ;;  %20645 = vst [vmem:[#allocation53_spill] sm:$0xff] %v17612_v34  ;;  %v20648_v0 = vrot.slane %v17498_v53, 3  ;;  %v17630_v34 = vld [vmem:[%s17154_s26 + $0x70] sm:$0xff]  }
  0x77   : > { %14435 = vmatprep.mubr.msk.bf16.mxu1 %vm349_vm1, %v886_v37  ;;  %v4972_v37 = vld [vmem:[%s17154_s26 + $0xc0] sm:$0xf] }
  0x78   : > { %v17588_v45 = vsel %vm1372_vm3, %v1380_v22, %v1382_v29  ;;  %v17600_v22 = vsel %vm1372_vm3, %v1382_v29, %v1384_v46  ;;  %v1388_v29 = vrot.slane %v17502_v56, 3  ;;  %v6834_v32 = vsel %vm1372_vm3, %v20649_v59, %v20648_v0 }
  0x79   : > { %15000 = vmatmul.mubr.msk.bf16.gmra.mrb[20].mxu0 %vm349_vm1, %v6828_v28  ;;  %20642 = vst [vmem:[#allocation50_spill] sm:$0xff] %v17588_v45  ;;  %v933_v28 = vshrl.u32 %v17577_v17, 16  ;;  %20644 = vst [vmem:[#allocation52_spill] sm:$0xff] %v17600_v22  ;;  %v17627_v46 = vcombine.low %v4972_v37, %v4973_v60  ;;  %v912_v56 = vor.u32 %v911_v13, %v908_v41  ;;  %v942_v37 = vshrl.u32 %v17605_v36, 16  ;;  %v16727_v13 = vld [vmem:[%s17154_s26 + $0x78] sm:$0xff]  }
  0x7a   : > { %15003 = vmatprep.mubr.msk.bf16.mxu0 %vm349_vm1, %v6830_v25  ;;  %v904_v25 = vsel %vm833_vm4, %v894_v2, %v903_v10  ;;  %v6832_v2 = vsel %vm1372_vm3, %v20647_v58, %v20646_v38  ;;  %v17634_v38 = vsel %vm1372_vm3, %v1386_v47, %v1388_v29  ;;  %v921_v58 = vor.u32 %v920_v5, %v917_v55  ;;  %v17653_v47 = vld [vmem:[%s17154_s26 + $0xd0] ss:$0 sps:$4 sm:$0x77]  }
  0x7b   : > { %20650 = vst [vmem:[#allocation54_spill] sm:$0xff] %v17627_v46  ;;  %v935_v45 = vrot.slane %v933_v28, 1  ;;  %20651 = vst [vmem:[#allocation55_spill] sm:$0xff] %v17634_v38  ;;  %v938_v41 = vrot.slane %v936_v35, 2  ;;  %v951_v55 = vshrl.u32 %v17609_v4, 16  ;;  %v913_v5 = vsel %vm833_vm4, %v903_v10, %v912_v56 }
  0x7c   : > { %v17650_v28 = vcombine.low %v4974_v23, %v4975_v6  ;;  %v20656_v35 = vmov %v20648_v0  ;;  %v922_v0 = vsel %vm833_vm4, %v912_v56, %v921_v58  ;;  %v954_v59 = vshll.u32 %v17609_v4, 16 }
  0x7d   : > { %v960_v6 = vshrl.u32 %v17630_v34, 16  ;;  %v944_v10 = vrot.slane %v942_v37, 1  ;;  %v963_v23 = vshll.u32 %v17630_v34, 16  ;;  %v20659_v56 = vrot.slane %v17507_v7, 3 }
  0x7e   : > { %14436 = vmatmul.mubr.msk.bf16.gmra.mrb[8].mxu1 %vm349_vm1, %v895_v57  ;;  %v1390_v57 = vrot.slane %v17523_v14, 3  ;;  %v945_v14 = vshll.u32 %v17605_v36, 16  ;;  %20653 = vst [vmem:[#allocation57_spill] sm:$0xff] %v17650_v28  ;;  %v930_v22 = vor.u32 %v929_v1, %v926_v44  ;;  %v17687_v1 = vld [vmem:[%s17154_s26 + $0x80] sm:$0xff]   ;;  %v1400_v44 = vrot.slane %v17630_v34, 3 }
  0x7f   : > { %14439 = vmatprep.mubr.msk.bf16.mxu1 %vm349_vm1, %v904_v25  ;;  %v1392_v25 = vrot.slane %v17547_v15, 3  ;;  %v1394_v15 = vrot.slane %v17577_v17, 3  ;;  %v1396_v17 = vrot.slane %v17605_v36, 3  ;;  %v20664_v38 = vrot.slane %v17566_v48, 3 }
  0x80   : > { %v17642_v60 = vsel %vm1372_vm3, %v1388_v29, %v1390_v57  ;;  %v947_v37 = vrot.slane %v945_v14, 2  ;;  %v17693_v14 = vld [vmem:[%s17154_s26 + $0x88] sm:$0xff]   ;;  %v931_v34 = vsel %vm833_vm4, %v921_v58, %v930_v22 }
  0x81   : > { %15004 = vmatmul.mubr.msk.bf16.gmra.mrb[24].mxu0 %vm349_vm1, %v6832_v2  ;;  %20652 = vst [vmem:[#allocation56_spill] sm:$0xff] %v17642_v60  ;;  %v17656_v29 = vsel %vm1372_vm3, %v1390_v57, %v1392_v25  ;;  %v17670_v57 = vsel %vm1372_vm3, %v1392_v25, %v1394_v15  ;;  %v939_v60 = vor.u32 %v938_v41, %v935_v45  ;;  %v965_v45 = vrot.slane %v963_v23, 2  ;;  %v17711_v23 = vld [vmem:[%s17154_s26 + $0xa0] sm:$0xff]  }
  0x82   : > { %15007 = vmatprep.mubr.msk.bf16.mxu0 %vm349_vm1, %v6834_v32  ;;  %20654 = vst [vmem:[#allocation58_spill] sm:$0xff] %v17656_v29  ;;  %v20655_v32 = vrot.slane %v17507_v7, 3  ;;  %20657 = vst [vmem:[#allocation59_spill] sm:$0xff] %v17670_v57  ;;  %v953_v29 = vrot.slane %v951_v55, 1  ;;  %v17682_v36 = vsel %vm1372_vm3, %v1394_v15, %v1396_v17  ;;  %v956_v57 = vrot.slane %v954_v59, 2 }
  0x83   : > { %20660 = vst [vmem:[#allocation60_spill] sm:$0xff] %v17682_v36  ;;  %v7178_v41 = vshrl.u32 %v17373_v61, 16  ;;  %v969_v59 = vshrl.u32 %v16727_v13, 16  ;;  %v20665_v25 = vrot.slane %v17543_v51, 3  ;;  %v1412_v48 = vrot.slane %v17711_v23, 3 }
  0x84   : > { %v6836_v2 = vsel %vm1372_vm3, %v20656_v35, %v20655_v32  ;;  %v20658_v32 = vrot.slane %v17543_v51, 3 }
  0x85   : > { %v6840_v58 = vsel %vm1372_vm3, %v20665_v25, %v20664_v38  ;;  %v971_v25 = vrot.slane %v969_v59, 1 }
  0x86   : > { %14440 = vmatmul.mubr.msk.bf16.gmra.mrb[12].mxu1 %vm349_vm1, %v913_v5  ;;  %v6838_v35 = vsel %vm1372_vm3, %v20659_v56, %v20658_v32  ;;  %v1398_v5 = vrot.slane %v17609_v4, 3  ;;  %v962_v32 = vrot.slane %v960_v6, 1  ;;  %v17700_v4 = vld [vmem:[%s17154_s26 + $0x90] sm:$0xff]   ;;  %v17708_v6 = vld [vmem:[%s17154_s26 + $0x98] sm:$0xff]   ;;  %v972_v56 = vshll.u32 %v16727_v13, 16 }
  0x87   : > { %14443 = vmatprep.mubr.msk.bf16.mxu1 %vm349_vm1, %v922_v0  ;;  %v1402_v0 = vrot.slane %v16727_v13, 3  ;;  %v20667_v13 = vmov %v20664_v38  ;;  %v1410_v38 = vrot.slane %v17708_v6, 3 }
  0x88   : > { %v17696_v55 = vsel %vm1372_vm3, %v1396_v17, %v1398_v5  ;;  %v17703_v15 = vsel %vm1372_vm3, %v1398_v5, %v1400_v44  ;;  %v940_v17 = vsel %vm833_vm4, %v930_v22, %v939_v60  ;;  %v1404_v5 = vrot.slane %v17687_v1, 3 }
  0x89   : > { %15008 = vmatmul.mubr.msk.bf16.gmra.mrb[28].mxu0 %vm349_vm1, %v6836_v2  ;;  %20661 = vst [vmem:[#allocation61_spill] sm:$0xff] %v17696_v55  ;;  %20662 = vst [vmem:[#allocation62_spill] sm:$0xff] %v17703_v15  ;;  %v7181_v2 = vshll.u32 %v17373_v61, 16  ;;  %v1406_v61 = vrot.slane %v17693_v14, 3  ;;  %v1408_v15 = vrot.slane %v17700_v4, 3  ;;  %v20666_v22 = vrot.slane %v17593_v3, 3 }
  0x8a   : > { %15011 = vmatprep.mubr.msk.bf16.mxu0 %vm349_vm1, %v6838_v35  ;;  %v17715_v35 = vsel %vm1372_vm3, %v1400_v44, %v1402_v0  ;;  %v17732_v55 = vld [vmem:[%s17154_s26 + $0xa8] sm:$0xff]   ;;  %v17735_v36 = vsel %vm1372_vm3, %v1402_v0, %v1404_v5  ;;  %v974_v0 = vrot.slane %v972_v56, 2  ;;  %v20669_v56 = vrot.slane %v17593_v3, 3 }
  0x8b   : > { %20663 = vst [vmem:[#allocation63_spill] sm:$0xff] %v17715_v35  ;;  %v6842_v44 = vsel %vm1372_vm3, %v20667_v13, %v20666_v22  ;;  %v948_v35 = vor.u32 %v947_v37, %v944_v10  ;;  %v17740_v51 = vsel %vm1372_vm3, %v1404_v5, %v1406_v61  ;;  %v957_v22 = vor.u32 %v956_v57, %v953_v29 }
  0x8c   : > { %v17747_v10 = vsel %vm1372_vm3, %v1408_v15, %v1410_v38  ;;  %v17751_v37 = vsel %vm1372_vm3, %v1410_v38, %v1412_v48  ;;  %v20475_v59 = vrot.slane %v17732_v55, 3  ;;  %v7186_v29 = vrot.slane %v17185_v21, 4 }
  0x8d   : > { %v958_v5 = vsel %vm833_vm4, %v948_v35, %v957_v22 }
  0x8e   : > { %14444 = vmatmul.mubr.msk.bf16.gmra.mrb[16].mxu1 %vm349_vm1, %v931_v34  ;;  %v17743_v34 = vsel %vm1372_vm3, %v1406_v61, %v1408_v15  ;;  %v7185_v61 = vrot.slane %v17182_v20, 3  ;;  %v17762_v57 = vsel %vm1372_vm3, %v1412_v48, %v20475_v59  ;;  %v966_v15 = vor.u32 %v965_v45, %v962_v32 }
  0x8f   : > { %14447 = vmatprep.mubr.msk.bf16.mxu1 %vm349_vm1, %v940_v17  ;;  %v949_v17 = vsel %vm833_vm4, %v939_v60, %v948_v35  ;;  %v7180_v60 = vrot.slane %v7178_v41, 3  ;;  %v7183_v35 = vrot.slane %v7181_v2, 4  ;;  %v975_v48 = vor.u32 %v974_v0, %v971_v25 }
  0x90   : > { %v978_v32 = vshrl.u32 %v17687_v1, 16  ;;  %v981_v45 = vshll.u32 %v17687_v1, 16  ;;  %v987_v59 = vshrl.u32 %v17693_v14, 16  ;;  %v967_v41 = vsel %vm833_vm4, %v957_v22, %v966_v15 }
  0x91   : > { %15012 = vmatmul.mubr.msk.bf16.gmra.mrb[32].mxu0 %vm349_vm1, %v6840_v58  ;;  %v20668_v58 = vrot.slane %v17627_v46, 3  ;;  %v7187_v2 = vor.u32 %v7186_v29, %v7185_v61  ;;  %v7190_v25 = vrot.slane %v17203_v31, 4  ;;  %v7691_v1 = vsel %vm416_vm0, %v17428_v18, 0  ;;  %v18451_v31 = vld [vmem:[%s17154_s26 + $0x7c] sm:$0xff]  }
  0x92   : > { %15015 = vmatprep.mubr.msk.bf16.mxu0 %vm349_vm1, %v6842_v44  ;;  %v20670_v44 = vrot.slane %v17650_v28, 3  ;;  %v7193_v0 = vrot.slane %v17213_v42, 3  ;;  %v7194_v22 = vrot.slane %v17216_v43, 4  ;;  %v996_v29 = vshrl.u32 %v17700_v4, 16  ;;  %v18439_v43 = vld [vmem:[%s17154_s26 + $0xcc] sm:$0xff]   ;;  %v18448_v42 = vld [vmem:[%s17154_s26 + $0xd4] sm:$0xff]  }
  0x93   : > { %v6844_v13 = vsel %vm1372_vm3, %v20669_v56, %v20668_v58  ;;  %v20671_v38 = vmov %v20668_v58  ;;  %v990_v58 = vshll.u32 %v17693_v14, 16  ;;  %v976_v14 = vsel %vm833_vm4, %v966_v15, %v975_v48 }
  0x94   : > { %v6846_v21 = vsel %vm1372_vm3, %v20671_v38, %v20670_v44  ;;  %v980_v56 = vrot.slane %v978_v32, 1  ;;  %v989_v44 = vrot.slane %v987_v59, 1  ;;  %v1005_v59 = vshrl.u32 %v17708_v6, 16 }
  0x95   : > { %v992_v61 = vrot.slane %v990_v58, 2  ;;  %v1008_v32 = vshll.u32 %v17708_v6, 16  ;;  %v7201_v58 = vrot.slane %v17249_v62, 3 }
  0x96   : > { %14448 = vmatmul.mubr.msk.bf16.gmra.mrb[20].mxu1 %vm349_vm1, %v949_v17  ;;  %v7189_v17 = vrot.slane %v17200_v30, 3  ;;  %v1007_v6 = vrot.slane %v1005_v59, 1  ;;  %v7210_v59 = vrot.slane %v17286_v27, 4  ;;  %v18460_v30 = vld [vmem:[%s17154_s26 + $0x84] sm:$0xff]  }
  0x97   : > { %14451 = vmatprep.mubr.msk.bf16.mxu1 %vm349_vm1, %v958_v5  ;;  %v7184_v5 = vor.u32 %v7183_v35, %v7180_v60  ;;  %v20672_v60 = vrot.slane %v17653_v47, 3  ;;  %v20673_v35 = vrot.slane %v17650_v28, 3  ;;  %v7198_v47 = vrot.slane %v17238_v54, 4 }
  0x99   : > { %15016 = vmatmul.mubr.msk.bf16.gmra.mrb[36].mxu0 %vm349_vm1, %v6844_v13  ;;  %v983_v13 = vrot.slane %v981_v45, 2  ;;  %v6848_v18 = vsel %vm1372_vm3, %v20673_v35, %v20672_v60  ;;  %v7188_v15 = vsel %vm1900_vm5, %v7184_v5, %v7187_v2  ;;  %v993_v45 = vor.u32 %v992_v61, %v989_v44 }
  0x9a   : > { %15019 = vmatprep.mubr.msk.bf16.mxu0 %vm349_vm1, %v6846_v21  ;;  %v999_v21 = vshll.u32 %v17700_v4, 16  ;;  %v7197_v4 = vrot.slane %v17233_v52, 3  ;;  %v7191_v5 = vor.u32 %v7190_v25, %v7189_v17  ;;  %v7195_v60 = vor.u32 %v7194_v22, %v7193_v0  ;;  %v18426_v52 = vld [vmem:[%s17154_s26 + $0x74] sm:$0xff]  }
  0x9b   : > { %v984_v38 = vor.u32 %v983_v13, %v980_v56  ;;  %v1010_v44 = vrot.slane %v1008_v32, 2  ;;  %v1014_v35 = vshrl.u32 %v17711_v23, 16  ;;  %v1026_v0 = vshll.u32 %v17732_v55, 16 }
  0x9c   : > { %v1001_v56 = vrot.slane %v999_v21, 2  ;;  %v7192_v62 = vsel %vm1900_vm5, %v7187_v2, %v7191_v5  ;;  %v7196_v17 = vsel %vm1900_vm5, %v7191_v5, %v7195_v60  ;;  %v16734_v2 = vld [vmem:[%s17154_s26 + $0xb0] ss:$0 sps:$4 sm:$0x33]   ;;  %v7205_v21 = vrot.slane %v17266_v11, 3  ;;  %v18407_v11 = vld [vmem:[%s17154_s26 + $0xbc] sm:$0xff]  }
  0x9d   : > { %v985_v13 = vsel %vm833_vm4, %v975_v48, %v984_v38  ;;  %v994_v61 = vsel %vm833_vm4, %v984_v38, %v993_v45  ;;  %v1023_v48 = vshrl.u32 %v17732_v55, 16  ;;  %v1011_v22 = vor.u32 %v1010_v44, %v1007_v6 }
  0x9e   : > { %14452 = vmatmul.mubr.msk.bf16.gmra.mrb[24].mxu1 %vm349_vm1, %v967_v41  ;;  %v7202_v41 = vrot.slane %v17252_v63, 4  ;;  %v7209_v38 = vrot.slane %v17283_v26, 3 }
  0x9f   : > { %14455 = vmatprep.mubr.msk.bf16.mxu1 %vm349_vm1, %v976_v14  ;;  %v998_v14 = vrot.slane %v996_v29, 1  ;;  %v17821_v29 = vld [vmem:[%s20432_s1 + $0x20] sm:$0x3] }
  0xa0   : > { %v7203_v5 = vor.u32 %v7202_v41, %v7201_v58  ;;  %v1035_v58 = vshll.u32 %v16734_v2, 16 }
  0xa1   : > { %15020 = vmatmul.mubr.msk.bf16.gmra.mrb[40].mxu0 %vm349_vm1, %v6848_v18  ;;  %v1017_v18 = vshll.u32 %v17711_v23, 16  ;;  %v1002_v25 = vor.u32 %v1001_v56, %v998_v14  ;;  %v7199_v23 = vor.u32 %v7198_v47, %v7197_v4  ;;  %v1016_v14 = vrot.slane %v1014_v35, 1 }
  0xa2   : > { %15025 = vmatprep.mubr.msk.bf16.mxu0 %vm349_vm1, %v7188_v15  ;;  %v7206_v15 = vrot.slane %v17269_v12, 4  ;;  %v1028_v4 = vrot.slane %v1026_v0, 2  ;;  %v7211_v35 = vor.u32 %v7210_v59, %v7209_v38 }
  0xa3   : > { %v1003_v32 = vsel %vm833_vm4, %v993_v45, %v1002_v25  ;;  %v1019_v56 = vrot.slane %v1017_v18, 2  ;;  %v7200_v47 = vsel %vm1900_vm5, %v7195_v60, %v7199_v23  ;;  %v1032_v45 = vshrl.u32 %v16734_v2, 16 }
  0xa4   : > { %v7207_v44 = vor.u32 %v7206_v15, %v7205_v21  ;;  %v1037_v60 = vrot.slane %v1035_v58, 2  ;;  %v7218_v21 = vrot.slane %v17311_v50, 4 }
  0xa5   : > { %v1020_v6 = vor.u32 %v1019_v56, %v1016_v14  ;;  %v1034_v18 = vrot.slane %v1032_v45, 1  ;;  %v20676_v45 = vld [vmem:[#allocation39_spill] sm:$0xff] }
  0xa6   : > { %14456 = vmatmul.mubr.msk.bf16.gmra.mrb[28].mxu1 %vm349_vm1, %v985_v13  ;;  %v7204_v13 = vsel %vm1900_vm5, %v7199_v23, %v7203_v5  ;;  %v7208_v0 = vsel %vm1900_vm5, %v7203_v5, %v7207_v44  ;;  %v7212_v23 = vsel %vm1900_vm5, %v7207_v44, %v7211_v35  ;;  %v7222_v5 = vrot.slane %v17336_v16, 4 }
  0xa7   : > { %14459 = vmatprep.mubr.msk.bf16.mxu1 %vm349_vm1, %v994_v61  ;;  %v1021_v61 = vsel %vm833_vm4, %v1011_v22, %v1020_v6  ;;  %v1038_v2 = vor.u32 %v1037_v60, %v1034_v18  ;;  %v7230_v58 = vrot.slane %v20676_v45, 4  ;;  %v20679_v60 = vld [vmem:[#allocation46_spill] sm:$0xff]  ;;  %v18281_v45 = vld [vmem:[%s17154_s26 + $0x34] sm:$0xff]  }
  0xa9   : > { %15026 = vmatmul.mubr.msk.bf16.vlgmr.msra.gmra.mrb[0].mxu0 %vm349_vm1, %v7192_v62  ;;  %v1012_v62 = vsel %vm833_vm4, %v1002_v25, %v1011_v22  ;;  %v7213_v25 = vrot.slane %v17292_v33, 3  ;;  %v7217_v22 = vrot.slane %v17308_v49, 3  ;;  %v18373_v33 = vld [vmem:[%s17154_s26 + $0xac] sm:$0xff]  }
  0xaa   : > { %15070 = vmatpush3.bf16.msra.mxu0 %v7691_v1  ;;  %15029 = vmatprep.mubr.msk.bf16.mxu0 %vm349_vm1, %v7196_v17  ;;  %v1025_v1 = vrot.slane %v1023_v48, 1  ;;  %v7214_v48 = vrot.slane %v17300_v39, 4  ;;  %v18385_v39 = vld [vmem:[%s17154_s26 + $0xb4] sm:$0xff]  }
  0xab   : > { %16648 = vmatprep.subr.msk.bf16.mxu0 %vm416_vm0, %v17821_v29  ;;  %v7219_v59 = vor.u32 %v7218_v21, %v7217_v22 }
  0xac   : > { %v1029_v41 = vor.u32 %v1028_v4, %v1025_v1  ;;  %v7215_v15 = vor.u32 %v7214_v48, %v7213_v25  ;;  %v20674_v1 = vld [vmem:[#allocation36_spill] sm:$0xff] }
  0xad   : > { %v7226_v4 = vrot.slane %v20674_v1, 4  ;;  %v18315_v1 = vld [vmem:[%s17154_s26 + $0x94] sm:$0xff]  }
  0xae   : > { %14460 = vmatmul.mubr.msk.bf16.gmra.mrb[32].mxu1 %vm349_vm1, %v1003_v32  ;;  %v1030_v17 = vsel %vm833_vm4, %v1020_v6, %v1029_v41  ;;  %v1039_v38 = vsel %vm833_vm4, %v1029_v41, %v1038_v2  ;;  %v7221_v32 = vrot.slane %v17333_v9, 3  ;;  %v7216_v14 = vsel %vm1900_vm5, %v7211_v35, %v7215_v15  ;;  %v17877_v35 = vld [vmem:[%s20432_s1 + $0x8] sm:$0x3]  ;;  %v18339_v9 = vld [vmem:[%s17154_s26 + $0x9c] sm:$0xff]  }
  0xaf   : > { %14463 = vmatprep.mubr.msk.bf16.mxu1 %vm349_vm1, %v1012_v62  ;;  %v7220_v56 = vsel %vm1900_vm5, %v7215_v15, %v7219_v59  ;;  %v7225_v62 = vrot.slane %v17340_v19, 3  ;;  %v2174_v41 = vsel %vm416_vm0, %v17514_v8, 0  ;;  %v20680_v8 = vld [vmem:[#allocation47_spill] sm:$0xff]  ;;  %v17898_v15 = vshrl.u32 %v17498_v53, 16 }
  0xb0   : > { %v7223_v6 = vor.u32 %v7222_v5, %v7221_v32  ;;  %v20718_v19 = vshll.u32 %v18281_v45, 16 }
  0xb1   : > { %15030 = vmatmul.mubr.msk.bf16.gmra.mrb[4].mxu0 %vm349_vm1, %v7200_v47  ;;  %v20675_v47 = vld [vmem:[#allocation38_spill] sm:$0xff]  ;;  %v7227_v44 = vor.u32 %v7226_v4, %v7225_v62  ;;  %20684 = vst [vmem:[#allocation66_spill] sm:$0xff] %v17898_v15  ;;  %v7241_v4 = vrot.slane %v17898_v15, 3 }
  0xb2   : > { %15033 = vmatprep.mubr.msk.bf16.mxu0 %vm349_vm1, %v7204_v13  ;;  %v7229_v13 = vrot.slane %v20675_v47, 3  ;;  %v7224_v18 = vsel %vm1900_vm5, %v7219_v59, %v7223_v6  ;;  %v20687_v62 = vld [vmem:[#allocation50_spill] sm:$0xff]  ;;  %v2632_v16 = vrot.slane %v20718_v19, 1  ;;  %v20522_v19 = vshrl.u32 %v18281_v45, 16 }
  0xb4   : > { %v7231_v22 = vor.u32 %v7230_v58, %v7229_v13  ;;  %v17918_v58 = vshll.u32 %v17507_v7, 16 }
  0xb6   : > { %14464 = vmatmul.mubr.msk.bf16.gmra.mrb[36].mxu1 %vm349_vm1, %v1021_v61  ;;  %v17869_v61 = vshrl.u32 %v17466_v24, 16  ;;  %v7232_v5 = vsel %vm1900_vm5, %v7227_v44, %v7231_v22  ;;  %20689 = vst [vmem:[#allocation50_spill] sm:$0xff] %v17918_v58 }
  0xb7   : > { %14467 = vmatprep.mubr.msk.bf16.mxu1 %vm349_vm1, %v1030_v17  ;;  %v7228_v17 = vsel %vm1900_vm5, %v7223_v6, %v7227_v44  ;;  %v17915_v6 = vshrl.u32 %v17507_v7, 16 }
  0xb8   : > { %20677 = vst [vmem:[#allocation64_spill] sm:$0xff] %v17869_v61  ;;  %v7233_v25 = vrot.slane %v17869_v61, 3 }
  0xb9   : > { %15034 = vmatmul.mubr.msk.bf16.gmra.mrb[8].mxu0 %vm349_vm1, %v7208_v0  ;;  %v20681_v0 = vld [vmem:[#allocation42_spill] sm:$0xff] }
  0xba   : > { %15037 = vmatprep.mubr.msk.bf16.mxu0 %vm349_vm1, %v7212_v23  ;;  %v17888_v23 = vshrl.u32 %v20681_v0, 16  ;;  %v17891_v2 = vshll.u32 %v20681_v0, 16  ;;  %v18508_v0 = vld [vmem:[%s17154_s26 + $0x24] sm:$0xf] }
  0xbc   : > { %20682 = vst [vmem:[#allocation46_spill] sm:$0xff] %v17888_v23  ;;  %20683 = vst [vmem:[#allocation47_spill] sm:$0xff] %v17891_v2  ;;  %v7237_v59 = vrot.slane %v17888_v23, 3  ;;  %v7238_v32 = vrot.slane %v17891_v2, 4  ;;  %v18219_v2 = vld [vmem:[%s17154_s26 + $0x64] sm:$0xff]  }
  0xbe   : > { %14468 = vmatmul.mubr.msk.bf16.gmra.mrb[40].mxu1 %vm349_vm1, %v1039_v38  ;;  %v17901_v38 = vshll.u32 %v17498_v53, 16  ;;  %v18505_v53 = vld [vmem:[%s17154_s26 + $0x20] sm:$0xf] }
  0xbf   : > { %14473 = vmatprep.mubr.msk.bf16.mxu1 %vm349_vm1, %v17550_v40  ;;  %v17872_v40 = vshll.u32 %v17466_v24, 16 }
  0xc0   : > { %20685 = vst [vmem:[#allocation67_spill] sm:$0xff] %v17901_v38  ;;  %v7242_v13 = vrot.slane %v17901_v38, 4 }
  0xc1   : > { %15038 = vmatmul.mubr.msk.bf16.gmra.mrb[12].mxu0 %vm349_vm1, %v7216_v14  ;;  %20678 = vst [vmem:[#allocation65_spill] sm:$0xff] %v17872_v40  ;;  %v7234_v48 = vrot.slane %v17872_v40, 4  ;;  %v20686_v14 = vld [vmem:[#allocation49_spill] sm:$0xff] }
  0xc2   : > { %15041 = vmatprep.mubr.msk.bf16.mxu0 %vm349_vm1, %v7220_v56  ;;  %20688 = vst [vmem:[#allocation49_spill] sm:$0xff] %v17915_v6  ;;  %v7243_v44 = vor.u32 %v7242_v13, %v7241_v4 }
  0xc3   : > { %v7235_v21 = vor.u32 %v7234_v48, %v7233_v25  ;;  %v7246_v25 = vrot.slane %v17918_v58, 4  ;;  %v20700_v58 = vld [vmem:[#allocation55_spill] sm:$0xff] }
  0xc5   : > { %v7236_v56 = vsel %vm1900_vm5, %v7231_v22, %v7235_v21  ;;  %v20693_v22 = vld [vmem:[#allocation52_spill] sm:$0xff] }
  0xc6   : > { %14474 = vmatmul.mubr.msk.bf16.vlgmr.msra.gmra.mrb[0].mxu1 %vm349_vm1, %v20679_v60 }
  0xc7   : > { %14477 = vmatprep.mubr.msk.bf16.mxu1 %vm349_vm1, %v20680_v8  ;;  %14518 = vmatpush3.bf16.msra.mxu1 %v2174_v41  ;;  %v7239_v41 = vor.u32 %v7238_v32, %v7237_v59  ;;  %v7245_v8 = vrot.slane %v17915_v6, 3  ;;  %v20706_v6 = vld [vmem:[#allocation58_spill] sm:$0xff] }
  0xc8   : > { %16635 = vmatprep.subr.msk.bf16.mxu1 %vm416_vm0, %v17877_v35 }
  0xc9   : > { %15042 = vmatmul.mubr.msk.bf16.gmra.mrb[16].mxu0 %vm349_vm1, %v7224_v18  ;;  %v20690_v18 = vld [vmem:[#allocation45_spill] sm:$0xff]  ;;  %v7240_v48 = vsel %vm1900_vm5, %v7235_v21, %v7239_v41  ;;  %v7247_v21 = vor.u32 %v7246_v25, %v7245_v8  ;;  %v20701_v8 = vld [vmem:[#allocation56_spill] sm:$0xff] }
  0xca   : > { %15045 = vmatprep.mubr.msk.bf16.mxu0 %vm349_vm1, %v7228_v17  ;;  %v17922_v60 = vshrl.u32 %v20690_v18, 16  ;;  %v17925_v17 = vshll.u32 %v20690_v18, 16 }
  0xcc   : > { %20691 = vst [vmem:[#allocation68_spill] sm:$0xff] %v17922_v60  ;;  %20692 = vst [vmem:[#allocation69_spill] sm:$0xff] %v17925_v17  ;;  %v7249_v59 = vrot.slane %v17922_v60, 3  ;;  %v7250_v32 = vrot.slane %v17925_v17, 4  ;;  %v7248_v60 = vsel %vm1900_vm5, %v7243_v44, %v7247_v21 }
  0xce   : > { %14478 = vmatmul.mubr.msk.bf16.gmra.mrb[4].mxu1 %vm349_vm1, %v20686_v14  ;;  %v20694_v14 = vld [vmem:[#allocation53_spill] sm:$0xff]  ;;  %v7251_v13 = vor.u32 %v7250_v32, %v7249_v59  ;;  %v17962_v59 = vshrl.u32 %v17627_v46, 16  ;;  %v17965_v32 = vshll.u32 %v17627_v46, 16 }
  0xcf   : > { %14481 = vmatprep.mubr.msk.bf16.mxu1 %vm349_vm1, %v20687_v62 }
  0xd0   : > { %20702 = vst [vmem:[#allocation55_spill] sm:$0xff] %v17962_v59  ;;  %20703 = vst [vmem:[#allocation56_spill] sm:$0xff] %v17965_v32 }
  0xd1   : > { %15046 = vmatmul.mubr.msk.bf16.gmra.mrb[20].mxu0 %vm349_vm1, %v7232_v5  ;;  %v7244_v5 = vsel %vm1900_vm5, %v7239_v41, %v7243_v44  ;;  %v17946_v41 = vshrl.u32 %v17593_v3, 16 }
  0xd2   : > { %15049 = vmatprep.mubr.msk.bf16.mxu0 %vm349_vm1, %v7236_v56  ;;  %v20695_v56 = vld [vmem:[#allocation48_spill] sm:$0xff] }
  0xd3   : > { %v17938_v62 = vshrl.u32 %v20695_v56, 16  ;;  %v17941_v4 = vshll.u32 %v20695_v56, 16  ;;  %20698 = vst [vmem:[#allocation70_spill] sm:$0xff] %v17946_v41  ;;  %v7257_v25 = vrot.slane %v17946_v41, 3  ;;  %v17976_v41 = vld [vmem:[%s17154_s26 + $0xd0] sm:$0xf] }
  0xd4   : > { %v18485_v56 = vld [vmem:[%s17154_s26 + $0x8c] sm:$0xff]  }
  0xd5   : > { %20696 = vst [vmem:[#allocation52_spill] sm:$0xff] %v17938_v62  ;;  %20697 = vst [vmem:[#allocation53_spill] sm:$0xff] %v17941_v4  ;;  %v7254_v17 = vrot.slane %v17941_v4, 4  ;;  %v7262_v4 = vrot.slane %v17965_v32, 4 }
  0xd6   : > { %14482 = vmatmul.mubr.msk.bf16.gmra.mrb[8].mxu1 %vm349_vm1, %v20693_v22  ;;  %v17949_v22 = vshll.u32 %v17593_v3, 16  ;;  %v20725_v3 = vshll.u32 %v18451_v31, 16 }
  0xd7   : > { %14485 = vmatprep.mubr.msk.bf16.mxu1 %vm349_vm1, %v20694_v14  ;;  %v7253_v14 = vrot.slane %v17938_v62, 3 }
  0xd8   : > { %20699 = vst [vmem:[#allocation71_spill] sm:$0xff] %v17949_v22 }
  0xd9   : > { %15050 = vmatmul.mubr.msk.bf16.gmra.mrb[24].mxu0 %vm349_vm1, %v7240_v48  ;;  %v7252_v48 = vsel %vm1900_vm5, %v7247_v21, %v7251_v13  ;;  %v17970_v21 = vshrl.u32 %v17650_v28, 16 }
  0xda   : > { %15053 = vmatprep.mubr.msk.bf16.mxu0 %vm349_vm1, %v7244_v5  ;;  %v7258_v5 = vrot.slane %v17949_v22, 4  ;;  %v7261_v22 = vrot.slane %v17962_v59, 3 }
  0xdb   : > { %20704 = vst [vmem:[#allocation72_spill] sm:$0xff] %v17970_v21 }
  0xdc   : > { %v7259_v44 = vor.u32 %v7258_v5, %v7257_v25 }
  0xde   : > { %14486 = vmatmul.mubr.msk.bf16.gmra.mrb[12].mxu1 %vm349_vm1, %v20700_v58  ;;  %v7255_v58 = vor.u32 %v7254_v17, %v7253_v14  ;;  %v20707_v14 = vld [vmem:[#allocation59_spill] sm:$0xff] }
  0xdf   : > { %14489 = vmatprep.mubr.msk.bf16.mxu1 %vm349_vm1, %v20701_v8  ;;  %v17973_v8 = vshll.u32 %v17650_v28, 16 }
  0xe0   : > { %v7256_v62 = vsel %vm1900_vm5, %v7251_v13, %v7255_v58  ;;  %v7260_v17 = vsel %vm1900_vm5, %v7255_v58, %v7259_v44  ;;  %v7263_v13 = vor.u32 %v7262_v4, %v7261_v22  ;;  %v20708_v58 = vld [vmem:[#allocation60_spill] sm:$0xff] }
  0xe1   : > { %15054 = vmatmul.mubr.msk.bf16.gmra.mrb[28].mxu0 %vm349_vm1, %v7248_v60  ;;  %20705 = vst [vmem:[#allocation73_spill] sm:$0xff] %v17973_v8  ;;  %v13406_v60 = vcombine.low %v17976_v41, %v17976_v41  ;;  %v7266_v25 = vrot.slane %v17973_v8, 4 }
  0xe2   : > { %15057 = vmatprep.mubr.msk.bf16.mxu0 %vm349_vm1, %v7252_v48  ;;  %v7265_v48 = vrot.slane %v17970_v21, 3  ;;  %v7264_v59 = vsel %vm1900_vm5, %v7259_v44, %v7263_v13  ;;  %v20710_v44 = vld [vmem:[#allocation62_spill] sm:$0xff] }
  0xe3   : > { %v7273_v5 = vshll.u32 %v13406_v60, 16 }
  0xe4   : > { %v7267_v32 = vor.u32 %v7266_v25, %v7265_v48  ;;  %v20711_v25 = vld [vmem:[#allocation63_spill] sm:$0xff] }
  0xe5   : > { %v7275_v21 = vrot.slane %v7273_v5, 4  ;;  %v8218_v5 = vsel %vm416_vm0, %v17821_v29, 0  ;;  %v16984_v29 = vld [vmem:[%s17154_s26 + $0x3c] sm:$0xf] }
  0xe6   : > { %14490 = vmatmul.mubr.msk.bf16.gmra.mrb[16].mxu1 %vm349_vm1, %v20706_v6  ;;  %v7270_v6 = vshrl.u32 %v13406_v60, 16  ;;  %v7268_v8 = vsel %vm1900_vm5, %v7263_v13, %v7267_v32  ;;  %v16978_v60 = vld [vmem:[%s17154_s26 + $0x24] sm:$0xf]  ;;  %v16983_v13 = vld [vmem:[%s17154_s26 + $0x38] sm:$0xf] }
  0xe7   : > { %14493 = vmatprep.mubr.msk.bf16.mxu1 %vm349_vm1, %v20707_v14 }
  0xe8   : > { %v7272_v14 = vrot.slane %v7270_v6, 3 }
  0xe9   : > { %15058 = vmatmul.mubr.msk.bf16.gmra.mrb[32].mxu0 %vm349_vm1, %v7256_v62  ;;  %v20709_v62 = vld [vmem:[#allocation61_spill] sm:$0xff] }
  0xea   : > { %15061 = vmatprep.mubr.msk.bf16.mxu0 %vm349_vm1, %v7260_v17  ;;  %v7276_v4 = vor.u32 %v7275_v21, %v7272_v14  ;;  %v16979_v17 = vld [vmem:[%s17154_s26 + $0x28] sm:$0xf]  ;;  %v16981_v21 = vld [vmem:[%s17154_s26 + $0x30] sm:$0xf] }
  0xeb   : > { %v13430_v48 = vcombine.low %v16978_v60, %v16979_v17  ;;  %v16748_v14 = vld [vmem:[%s17154_s26 + $0x10] sm:$0xff]  }
  0xec   : > { %v7277_v22 = vsel %vm1900_vm5, %v7267_v32, %v7276_v4  ;;  %v16986_v4 = vld [vmem:[%s17154_s26 + $0x44] sm:$0xf]  ;;  %v16745_v60 = vld [vmem:[%s17154_s26 + $0xb0] ss:$0 sps:$4 sm:$0x77]  }
  0xee   : > { %14494 = vmatmul.mubr.msk.bf16.gmra.mrb[20].mxu1 %vm349_vm1, %v20708_v58  ;;  %v18022_v58 = vld [vmem:[%s20432_s1 + $0x22] sm:$0x3] }
  0xef   : > { %14497 = vmatprep.mubr.msk.bf16.mxu1 %vm349_vm1, %v20709_v62  ;;  %v16985_v62 = vld [vmem:[%s17154_s26 + $0x40] sm:$0xf] }
  0xf1   : > { %15062 = vmatmul.mubr.msk.bf16.gmra.mrb[36].mxu0 %vm349_vm1, %v7264_v59  ;;  %v16980_v59 = vld [vmem:[%s17154_s26 + $0x2c] sm:$0xf] }
  0xf2   : > { %15065 = vmatprep.mubr.msk.bf16.mxu0 %vm349_vm1, %v7268_v8  ;;  %v13431_v32 = vcombine.low %v16980_v59, %v16981_v21  ;;  %v16982_v8 = vld [vmem:[%s17154_s26 + $0x34] sm:$0xf]  ;;  %v1913_v59 = vshll.u32 %v16748_v14, 16  ;;  %v16750_v21 = vld [vmem:[%s17154_s26 + $0x18] sm:$0xff]  }
  0xf3   : > { %v13432_v6 = vcombine.low %v16982_v8, %v16983_v13 }
  0xf4   : > { %v1915_v13 = vrot.slane %v1913_v59, 4 }
  0xf6   : > { %14498 = vmatmul.mubr.msk.bf16.gmra.mrb[24].mxu1 %vm349_vm1, %v20710_v44 }
  0xf7   : > { %14501 = vmatprep.mubr.msk.bf16.mxu1 %vm349_vm1, %v20711_v25  ;;  %v1910_v25 = vshrl.u32 %v16748_v14, 16  ;;  %v16991_v14 = vld [vmem:[%s17154_s26 + $0x58] sm:$0xf] }
  0xf9   : > { %15066 = vmatmul.mubr.msk.bf16.gmra.mrb[40].mxu0 %vm349_vm1, %v7277_v22  ;;  %v16987_v22 = vld [vmem:[%s17154_s26 + $0x48] sm:$0xf]  ;;  %v1912_v8 = vrot.slane %v1910_v25, 3 }
  0xfa   : > { %15071 = vmatprep.mubr.msk.bf16.mxu0 %vm349_vm1, %v13430_v48  ;;  %v13434_v44 = vcombine.low %v16986_v4, %v16987_v22  ;;  %v1922_v22 = vshll.u32 %v16750_v21, 16 }
  0xfc   : > { %v1924_v59 = vrot.slane %v1922_v22, 4 }
  0xfe   : > { %14502 = vmatmul.mubr.msk.bf16.gmra.mrb[28].mxu1 %vm349_vm1, %v17735_v36  ;;  %v16747_v36 = vld [vmem:[%s17154_s26 + $0x8] sm:$0xf8]  }
  0xff   : > { %14505 = vmatprep.mubr.msk.bf16.mxu1 %vm349_vm1, %v17740_v51  ;;  %v13433_v51 = vcombine.low %v16984_v29, %v16985_v62  ;;  %v1902_v17 = vshrl.u32 %v16747_v36, 16  ;;  %v1905_v48 = vshll.u32 %v16747_v36, 16  ;;  %v16989_v29 = vld [vmem:[%s17154_s26 + $0x50] sm:$0xf]  ;;  %v1416_v62 = vrot.slane %v16745_v60, 3 }
 0x100   : > { %v16990_v36 = vld [vmem:[%s17154_s26 + $0x54] sm:$0xf] }
 0x101   : > { %15072 = vmatmul.mubr.msk.bf16.vlgmr.msra.gmra.mrb[0].mxu0 %vm349_vm1, %v13431_v32  ;;  %v1907_v32 = vrot.slane %v1905_v48, 4  ;;  %v13436_v4 = vcombine.low %v16990_v36, %v16991_v14  ;;  %v16995_v36 = vld [vmem:[%s17154_s26 + $0x68] sm:$0xf] }
 0x102   : > { %15116 = vmatpush3.bf16.msra.mxu0 %v8218_v5  ;;  %15075 = vmatprep.mubr.msk.bf16.mxu0 %vm349_vm1, %v13432_v6  ;;  %v16752_v6 = vld [vmem:[%s17154_s26 + $0x20] sm:$0xff]   ;;  %v16988_v5 = vld [vmem:[%s17154_s26 + $0x4c] sm:$0xf] }
 0x103   : > { %16649 = vmatprep.subr.msk.bf16.mxu0 %vm416_vm0, %v18022_v58  ;;  %v1928_v48 = vshrl.u32 %v16752_v6, 16  ;;  %v1931_v60 = vshll.u32 %v16752_v6, 16 }
 0x106   : > { %14506 = vmatmul.mubr.msk.bf16.gmra.mrb[32].mxu1 %vm349_vm1, %v17743_v34  ;;  %v1904_v34 = vrot.slane %v1902_v17, 3  ;;  %v1916_v17 = vor.u32 %v1915_v13, %v1912_v8  ;;  %v16992_v8 = vld [vmem:[%s17154_s26 + $0x5c] sm:$0xf]  ;;  %v16993_v13 = vld [vmem:[%s17154_s26 + $0x60] sm:$0xf] }
 0x107   : > { %14509 = vmatprep.mubr.msk.bf16.mxu1 %vm349_vm1, %v17747_v10  ;;  %v13435_v10 = vcombine.low %v16988_v5, %v16989_v29  ;;  %v16754_v5 = vld [vmem:[%s17154_s26 + $0x28] sm:$0xff]   ;;  %v1930_v29 = vrot.slane %v1928_v48, 3  ;;  %v13437_v6 = vcombine.low %v16992_v8, %v16993_v13 }
 0x108   : > { %v18078_v13 = vld [vmem:[%s20432_s1 + $0xa] sm:$0x3] }
 0x109   : > { %15076 = vmatmul.mubr.msk.bf16.gmra.mrb[4].mxu0 %vm349_vm1, %v13433_v51  ;;  %v1919_v51 = vshrl.u32 %v16750_v21, 16 }
 0x10a   : > { %15079 = vmatprep.mubr.msk.bf16.mxu0 %vm349_vm1, %v13434_v44  ;;  %v1908_v44 = vor.u32 %v1907_v32, %v1904_v34  ;;  %v1933_v34 = vrot.slane %v1931_v60, 4  ;;  %v16756_v32 = vld [vmem:[%s17154_s26 + $0x30] sm:$0xff]  }
 0x10b   : > { %v1946_v22 = vshrl.u32 %v16756_v32, 16 }
 0x10c   : > { %v1917_v21 = vsel %vm1900_vm5, %v1908_v44, %v1916_v17  ;;  %v1949_v44 = vshll.u32 %v16756_v32, 16  ;;  %v16997_v32 = vld [vmem:[%s17154_s26 + $0x70] sm:$0xf] }
 0x10e   : > { %14510 = vmatmul.mubr.msk.bf16.gmra.mrb[36].mxu1 %vm349_vm1, %v17751_v37  ;;  %v20712_v37 = vrot.slane %v17732_v55, 3 }
 0x10f   : > { %14513 = vmatprep.mubr.msk.bf16.mxu1 %vm349_vm1, %v17762_v57  ;;  %v1921_v57 = vrot.slane %v1919_v51, 3  ;;  %v1934_v51 = vor.u32 %v1933_v34, %v1930_v29  ;;  %v16760_v29 = vld [vmem:[%s17154_s26 + $0x40] sm:$0xff]   ;;  %v16996_v34 = vld [vmem:[%s17154_s26 + $0x6c] sm:$0xf] }
 0x110   : > { %v1417_v25 = vsel %vm1372_vm3, %v20712_v37, %v1416_v62  ;;  %v1937_v62 = vshrl.u32 %v16754_v5, 16  ;;  %v13439_v8 = vcombine.low %v16996_v34, %v16997_v32  ;;  %v17002_v34 = vld [vmem:[%s17154_s26 + $0x84] sm:$0xf]  ;;  %v17003_v32 = vld [vmem:[%s17154_s26 + $0x88] sm:$0xf] }
 0x111   : > { %15080 = vmatmul.mubr.msk.bf16.gmra.mrb[8].mxu0 %vm349_vm1, %v13435_v10  ;;  %v16994_v10 = vld [vmem:[%s17154_s26 + $0x64] sm:$0xf]  ;;  %v1925_v55 = vor.u32 %v1924_v59, %v1921_v57  ;;  %v2837_v59 = vsel %vm416_vm0, %v17877_v35, 0 }
 0x112   : > { %15083 = vmatprep.mubr.msk.bf16.mxu0 %vm349_vm1, %v13436_v4  ;;  %v13438_v14 = vcombine.low %v16994_v10, %v16995_v36  ;;  %v1940_v4 = vshll.u32 %v16754_v5, 16  ;;  %v1939_v60 = vrot.slane %v1937_v62, 3  ;;  %v1948_v5 = vrot.slane %v1946_v22, 3 }
 0x113   : > { %v1926_v48 = vsel %vm1900_vm5, %v1916_v17, %v1925_v55  ;;  %v1935_v57 = vsel %vm1900_vm5, %v1925_v55, %v1934_v51  ;;  %v16998_v17 = vld [vmem:[%s17154_s26 + $0x74] sm:$0xf]  ;;  %v1964_v62 = vshrl.u32 %v16760_v29, 16 }
 0x114   : > { %v1942_v37 = vrot.slane %v1940_v4, 4  ;;  %v1967_v4 = vshll.u32 %v16760_v29, 16 }
 0x116   : > { %14514 = vmatmul.mubr.msk.bf16.gmra.mrb[40].mxu1 %vm349_vm1, %v1417_v25  ;;  %v16758_v25 = vld [vmem:[%s17154_s26 + $0x38] sm:$0xff]   ;;  %v1943_v35 = vor.u32 %v1942_v37, %v1939_v60  ;;  %v16762_v60 = vld [vmem:[%s17154_s26 + $0x48] sm:$0xff]  }
 0x117   : > { %14519 = vmatprep.mubr.msk.bf16.mxu1 %vm349_vm1, %v1917_v21  ;;  %v1951_v21 = vrot.slane %v1949_v44, 4  ;;  %v1955_v36 = vshrl.u32 %v16758_v25, 16 }
 0x118   : > { %v1944_v22 = vsel %vm1900_vm5, %v1934_v51, %v1943_v35 }
 0x119   : > { %15084 = vmatmul.mubr.msk.bf16.gmra.mrb[12].mxu0 %vm349_vm1, %v13437_v6  ;;  %v16999_v6 = vld [vmem:[%s17154_s26 + $0x78] sm:$0xf]  ;;  %v1952_v55 = vor.u32 %v1951_v21, %v1948_v5  ;;  %v1957_v44 = vrot.slane %v1955_v36, 3  ;;  %v17000_v5 = vld [vmem:[%s17154_s26 + $0x7c] sm:$0xf] }
 0x11a   : > { %15087 = vmatprep.mubr.msk.bf16.mxu0 %vm349_vm1, %v13438_v14  ;;  %v13440_v10 = vcombine.low %v16998_v17, %v16999_v6  ;;  %v1958_v14 = vshll.u32 %v16758_v25, 16  ;;  %v1966_v25 = vrot.slane %v1964_v62, 3  ;;  %v17001_v21 = vld [vmem:[%s17154_s26 + $0x80] sm:$0xf]  ;;  %v1973_v17 = vshrl.u32 %v16762_v60, 16 }
 0x11b   : > { %v1953_v37 = vsel %vm1900_vm5, %v1943_v35, %v1952_v55  ;;  %v13441_v29 = vcombine.low %v17000_v5, %v17001_v21  ;;  %v1976_v6 = vshll.u32 %v16762_v60, 16  ;;  %v16768_v5 = vld [vmem:[%s17154_s26 + $0x60] sm:$0xff]   ;;  %v17004_v60 = vld [vmem:[%s17154_s26 + $0x8c] sm:$0xf]  ;;  %v17007_v21 = vld [vmem:[%s17154_s26 + $0x98] sm:$0xf] }
 0x11c   : > { %v1975_v62 = vrot.slane %v1973_v17, 3  ;;  %v2003_v17 = vshll.u32 %v16768_v5, 16 }
 0x11e   : > { %14520 = vmatmul.mubr.msk.bf16.vlgmr.msra.gmra.mrb[0].mxu1 %vm349_vm1, %v1926_v48  ;;  %v1960_v48 = vrot.slane %v1958_v14, 4 }
 0x11f   : > { %14523 = vmatprep.mubr.msk.bf16.mxu1 %vm349_vm1, %v1935_v57  ;;  %14564 = vmatpush3.bf16.msra.mxu1 %v2837_v59  ;;  %v1969_v57 = vrot.slane %v1967_v4, 4  ;;  %v16764_v59 = vld [vmem:[%s17154_s26 + $0x50] sm:$0xff]   ;;  %v1978_v4 = vrot.slane %v1976_v6, 4 }
 0x120   : > { %16636 = vmatprep.subr.msk.bf16.mxu1 %vm416_vm0, %v18078_v13  ;;  %v1961_v51 = vor.u32 %v1960_v48, %v1957_v44  ;;  %v1982_v35 = vshrl.u32 %v16764_v59, 16  ;;  %v1985_v36 = vshll.u32 %v16764_v59, 16  ;;  %v17006_v59 = vld [vmem:[%s17154_s26 + $0x94] sm:$0xf] }
 0x121   : > { %15088 = vmatmul.mubr.msk.bf16.gmra.mrb[16].mxu0 %vm349_vm1, %v13439_v8  ;;  %v13442_v8 = vcombine.low %v17002_v34, %v17003_v32 }
 0x122   : > { %15091 = vmatprep.mubr.msk.bf16.mxu0 %vm349_vm1, %v13440_v10  ;;  %v1970_v10 = vor.u32 %v1969_v57, %v1966_v25  ;;  %v1962_v14 = vsel %vm1900_vm5, %v1952_v55, %v1961_v51  ;;  %v1984_v48 = vrot.slane %v1982_v35, 3  ;;  %v17005_v25 = vld [vmem:[%s17154_s26 + $0x90] sm:$0xf]  ;;  %v1979_v55 = vor.u32 %v1978_v4, %v1975_v62 }
 0x123   : > { %v13443_v57 = vcombine.low %v17004_v60, %v17005_v25  ;;  %v16772_v60 = vld [vmem:[%s17154_s26 + $0x70] sm:$0xff]   ;;  %v17011_v25 = vld [vmem:[%s17154_s26 + $0xa8] sm:$0xf] }
 0x124   : > { %v1971_v44 = vsel %vm1900_vm5, %v1961_v51, %v1970_v10  ;;  %v2000_v51 = vshrl.u32 %v16768_v5, 16  ;;  %v1980_v6 = vsel %vm1900_vm5, %v1970_v10, %v1979_v55  ;;  %v17010_v5 = vld [vmem:[%s17154_s26 + $0xa4] sm:$0xf] }
 0x126   : > { %14524 = vmatmul.mubr.msk.bf16.gmra.mrb[4].mxu1 %vm349_vm1, %v1944_v22  ;;  %v16766_v22 = vld [vmem:[%s17154_s26 + $0x58] sm:$0xff]   ;;  %v2002_v4 = vrot.slane %v2000_v51, 3 }
 0x127   : > { %14527 = vmatprep.mubr.msk.bf16.mxu1 %vm349_vm1, %v1953_v37  ;;  %v1987_v37 = vrot.slane %v1985_v36, 4  ;;  %v1991_v34 = vshrl.u32 %v16766_v22, 16  ;;  %v1994_v32 = vshll.u32 %v16766_v22, 16  ;;  %v17008_v22 = vld [vmem:[%s17154_s26 + $0x9c] sm:$0xf] }
 0x129   : > { %15092 = vmatmul.mubr.msk.bf16.gmra.mrb[20].mxu0 %vm349_vm1, %v13441_v29  ;;  %v13444_v29 = vcombine.low %v17006_v59, %v17007_v21  ;;  %v1993_v35 = vrot.slane %v1991_v34, 3  ;;  %v1996_v36 = vrot.slane %v1994_v32, 4  ;;  %v2021_v34 = vshll.u32 %v16772_v60, 16  ;;  %v16774_v32 = vld [vmem:[%s17154_s26 + $0x78] sm:$0xff]  }
 0x12a   : > { %15095 = vmatprep.mubr.msk.bf16.mxu0 %vm349_vm1, %v13442_v8  ;;  %v1988_v8 = vor.u32 %v1987_v37, %v1984_v48  ;;  %v17009_v48 = vld [vmem:[%s17154_s26 + $0xa0] sm:$0xf] }
 0x12b   : > { %v13445_v37 = vcombine.low %v17008_v22, %v17009_v48  ;;  %v1997_v10 = vor.u32 %v1996_v36, %v1993_v35  ;;  %v16777_v22 = vld [vmem:[%s17154_s26 + $0x80] sm:$0xff]   ;;  %v17015_v48 = vld [vmem:[%s17154_s26 + $0xb8] sm:$0xf] }
 0x12c   : > { %v1989_v62 = vsel %vm1900_vm5, %v1979_v55, %v1988_v8  ;;  %v2018_v55 = vshrl.u32 %v16772_v60, 16  ;;  %v17014_v60 = vld [vmem:[%s17154_s26 + $0xb4] sm:$0xf] }
 0x12d   : > { %v1998_v51 = vsel %vm1900_vm5, %v1988_v8, %v1997_v10  ;;  %v2030_v8 = vshll.u32 %v16774_v32, 16 }
 0x12e   : > { %14528 = vmatmul.mubr.msk.bf16.gmra.mrb[8].mxu1 %vm349_vm1, %v1962_v14  ;;  %v16770_v14 = vld [vmem:[%s17154_s26 + $0x68] sm:$0xff]   ;;  %v2020_v36 = vrot.slane %v2018_v55, 3 }
 0x12f   : > { %14531 = vmatprep.mubr.msk.bf16.mxu1 %vm349_vm1, %v1971_v44  ;;  %v2005_v44 = vrot.slane %v2003_v17, 4  ;;  %v2009_v59 = vshrl.u32 %v16770_v14, 16  ;;  %v2012_v21 = vshll.u32 %v16770_v14, 16  ;;  %v17012_v14 = vld [vmem:[%s17154_s26 + $0xac] sm:$0xf]  ;;  %v2032_v55 = vrot.slane %v2030_v8, 4 }
 0x131   : > { %15096 = vmatmul.mubr.msk.bf16.gmra.mrb[24].mxu0 %vm349_vm1, %v13443_v57  ;;  %v13446_v57 = vcombine.low %v17010_v5, %v17011_v25  ;;  %v2011_v17 = vrot.slane %v2009_v59, 3  ;;  %v2027_v5 = vshrl.u32 %v16774_v32, 16  ;;  %v2039_v59 = vshll.u32 %v16777_v22, 16  ;;  %v7946_v32 = vld [vmem:[%s17154_s26 + $0x2c] sm:$0xe] }
 0x132   : > { %15099 = vmatprep.mubr.msk.bf16.mxu0 %vm349_vm1, %v13444_v29  ;;  %v2006_v29 = vor.u32 %v2005_v44, %v2002_v4  ;;  %v17013_v4 = vld [vmem:[%s17154_s26 + $0xb0] sm:$0xf] }
 0x133   : > { %v13447_v44 = vcombine.low %v17012_v14, %v17013_v4  ;;  %v17017_v14 = vld [vmem:[%s17154_s26 + $0xc0] sm:$0xf] }
 0x134   : > { %v2007_v35 = vsel %vm1900_vm5, %v1997_v10, %v2006_v29  ;;  %v2036_v10 = vshrl.u32 %v16777_v22, 16  ;;  %v17016_v22 = vld [vmem:[%s17154_s26 + $0xbc] sm:$0xf] }
 0x135   : > { %v13449_v4 = vcombine.low %v17016_v22, %v17017_v14  ;;  %v17020_v14 = vld [vmem:[%s17154_s26 + $0xcc] sm:$0xf] }
 0x136   : > { %14532 = vmatmul.mubr.msk.bf16.gmra.mrb[12].mxu1 %vm349_vm1, %v1980_v6  ;;  %v2014_v6 = vrot.slane %v2012_v21, 4  ;;  %v2029_v21 = vrot.slane %v2027_v5, 3  ;;  %v18151_v5 = vld [vmem:[%s17154_s26 + $0x34] sm:$0xff]  }
 0x137   : > { %14535 = vmatprep.mubr.msk.bf16.mxu1 %vm349_vm1, %v1989_v62  ;;  %v2023_v62 = vrot.slane %v2021_v34, 4  ;;  %v8491_v20 = vshll.u32 %v18151_v5, 16 }
 0x138   : > { %v2015_v25 = vor.u32 %v2014_v6, %v2011_v17  ;;  %v7947_v6 = vld [vmem:[%s17154_s26 + $0x30] sm:$0xf] }
 0x139   : > { %15100 = vmatmul.mubr.msk.bf16.gmra.mrb[28].mxu0 %vm349_vm1, %v13445_v37  ;;  %v13448_v37 = vcombine.low %v17014_v60, %v17015_v48  ;;  %v17019_v60 = vld [vmem:[%s17154_s26 + $0xc8] sm:$0xf]  ;;  %v8493_v18 = vrot.slane %v8491_v20, 2 }
 0x13a   : > { %15103 = vmatprep.mubr.msk.bf16.mxu0 %vm349_vm1, %v13446_v57  ;;  %v2024_v57 = vor.u32 %v2023_v62, %v2020_v36  ;;  %v2016_v34 = vsel %vm1900_vm5, %v2006_v29, %v2015_v25  ;;  %v2041_v36 = vrot.slane %v2039_v59, 4  ;;  %v16781_v62 = vld [vmem:[%s17154_s26 + $0x90] sm:$0xff]   ;;  %v18148_v29 = vcombine.low %v7946_v32, %v7947_v6 }
 0x13b   : > { %v2054_v59 = vshrl.u32 %v16781_v62, 16  ;;  %v2057_v22 = vshll.u32 %v16781_v62, 16  ;;  %v16785_v62 = vld [vmem:[%s17154_s26 + $0xa0] sm:$0xff]  }
 0x13c   : > { %v2025_v17 = vsel %vm1900_vm5, %v2015_v25, %v2024_v57 }
 0x13e   : > { %14536 = vmatmul.mubr.msk.bf16.gmra.mrb[16].mxu1 %vm349_vm1, %v1998_v51  ;;  %v16779_v51 = vld [vmem:[%s17154_s26 + $0x88] sm:$0xff]  }
 0x13f   : > { %14539 = vmatprep.mubr.msk.bf16.mxu1 %vm349_vm1, %v2007_v35  ;;  %v2038_v35 = vrot.slane %v2036_v10, 3  ;;  %v2045_v8 = vshrl.u32 %v16779_v51, 16  ;;  %v2048_v25 = vshll.u32 %v16779_v51, 16  ;;  %v16783_v51 = vld [vmem:[%s17154_s26 + $0x98] sm:$0xff]  }
 0x141   : > { %15104 = vmatmul.mubr.msk.bf16.gmra.mrb[32].mxu0 %vm349_vm1, %v13447_v44  ;;  %v17018_v44 = vld [vmem:[%s17154_s26 + $0xc4] sm:$0xf]  ;;  %v2042_v10 = vor.u32 %v2041_v36, %v2038_v35  ;;  %v2047_v32 = vrot.slane %v2045_v8, 3  ;;  %v2056_v35 = vrot.slane %v2054_v59, 3  ;;  %v2059_v36 = vrot.slane %v2057_v22, 4 }
 0x142   : > { %15107 = vmatprep.mubr.msk.bf16.mxu0 %vm349_vm1, %v13448_v37  ;;  %v13450_v48 = vcombine.low %v17018_v44, %v17019_v60  ;;  %v2033_v37 = vor.u32 %v2032_v55, %v2029_v21  ;;  %v8106_v55 = vrot.slane %v18148_v29, 1  ;;  %v2063_v8 = vshrl.u32 %v16783_v51, 16 }
 0x143   : > { %v2072_v59 = vshrl.u32 %v16785_v62, 16  ;;  %v2075_v22 = vshll.u32 %v16785_v62, 16  ;;  %v16789_v62 = vld [vmem:[%s17154_s26 + $0xb0] sm:$0xff]  }
 0x144   : > { %v2034_v21 = vsel %vm1900_vm5, %v2024_v57, %v2033_v37  ;;  %v2043_v6 = vsel %vm1900_vm5, %v2033_v37, %v2042_v10  ;;  %v18165_v57 = vld [vmem:[%s17154_s26 + $0x3c] sm:$0xff]   ;;  %v2066_v37 = vshll.u32 %v16783_v51, 16  ;;  %v2093_v38 = vshll.u32 %v16789_v62, 16 }
 0x146   : > { %14540 = vmatmul.mubr.msk.bf16.gmra.mrb[20].mxu1 %vm349_vm1, %v2016_v34  ;;  %v8107_v34 = vrot.slane %v18151_v5, 1 }
 0x147   : > { %14543 = vmatprep.mubr.msk.bf16.mxu1 %vm349_vm1, %v2025_v17  ;;  %v2050_v17 = vrot.slane %v2048_v25, 4  ;;  %v2060_v25 = vor.u32 %v2059_v36, %v2056_v35  ;;  %v2074_v35 = vrot.slane %v2072_v59, 3  ;;  %v2077_v36 = vrot.slane %v2075_v22, 4 }
 0x148   : > { %v8108_v44 = vsel %vm5092_vm6, %v8106_v55, %v8107_v34 }
 0x149   : > { %15108 = vmatmul.mubr.msk.bf16.gmra.mrb[36].mxu0 %vm349_vm1, %v13449_v4  ;;  %v13451_v4 = vcombine.low %v17020_v14, %v17976_v41  ;;  %v2051_v60 = vor.u32 %v2050_v17, %v2047_v32  ;;  %v8109_v41 = vrot.slane %v18165_v57, 1  ;;  %v2065_v32 = vrot.slane %v2063_v8, 3 }
 0x14a   : > { %15111 = vmatprep.mubr.msk.bf16.mxu0 %vm349_vm1, %v13450_v48  ;;  %v18170_v48 = vld [vmem:[%s17154_s26 + $0x44] sm:$0xff]   ;;  %v2068_v17 = vrot.slane %v2066_v37, 4  ;;  %v2078_v22 = vor.u32 %v2077_v36, %v2074_v35  ;;  %v16791_v36 = vld [vmem:[%s17154_s26 + $0xb8] ss:$0 sps:$4 sm:$0xff]  }
 0x14b   : > { %v8111_v55 = vrot.slane %v18170_v48, 1  ;;  %v2061_v51 = vsel %vm1900_vm5, %v2051_v60, %v2060_v25  ;;  %v8110_v14 = vsel %vm5092_vm6, %v8107_v34, %v8109_v41  ;;  %v2090_v34 = vshrl.u32 %v16789_v62, 16 }
 0x14c   : > { %v2069_v8 = vor.u32 %v2068_v17, %v2065_v32  ;;  %v2099_v23 = vshrl.u32 %v16791_v36, 16  ;;  %v2102_v40 = vshll.u32 %v16791_v36, 16 }
 0x14e   : > { %14544 = vmatmul.mubr.msk.bf16.gmra.mrb[24].mxu1 %vm349_vm1, %v2034_v21  ;;  %v2052_v21 = vsel %vm1900_vm5, %v2042_v10, %v2051_v60  ;;  %v18185_v10 = vld [vmem:[%s17154_s26 + $0x4c] sm:$0xff]   ;;  %v18190_v60 = vld [vmem:[%s17154_s26 + $0x54] sm:$0xff]   ;;  %v2070_v17 = vsel %vm1900_vm5, %v2060_v25, %v2069_v8  ;;  %v2079_v62 = vsel %vm1900_vm5, %v2069_v8, %v2078_v22  ;;  %v18214_v25 = vld [vmem:[%s17154_s26 + $0x5c] sm:$0xff]  }
 0x14f   : > { %14547 = vmatprep.mubr.msk.bf16.mxu1 %vm349_vm1, %v2043_v6  ;;  %v16787_v6 = vld [vmem:[%s17154_s26 + $0xa8] sm:$0xff]   ;;  %v8113_v32 = vrot.slane %v18185_v10, 1 }
 0x150   : > { %v2081_v37 = vshrl.u32 %v16787_v6, 16  ;;  %v2084_v59 = vshll.u32 %v16787_v6, 16  ;;  %v8115_v6 = vrot.slane %v18190_v60, 1 }
 0x151   : > { %15112 = vmatmul.mubr.msk.bf16.gmra.mrb[40].mxu0 %vm349_vm1, %v13451_v4  ;;  %v8752_v4 = vsel %vm416_vm0, %v18022_v58, 0  ;;  %v18195_v58 = vld [vmem:[%s20432_s1 + $0x24] sm:$0x3]  ;;  %v8114_v15 = vsel %vm5092_vm6, %v8111_v55, %v8113_v32 }
 0x152   : > { %15117 = vmatprep.mubr.msk.bf16.mxu0 %vm349_vm1, %v8108_v44  ;;  %v8112_v44 = vsel %vm5092_vm6, %v8109_v41, %v8111_v55  ;;  %v18200_v41 = vld [vmem:[%s17154_s26 + $0x10] sm:$0xf]  ;;  %v2086_v35 = vrot.slane %v2084_v59, 4  ;;  %v8117_v55 = vrot.slane %v18214_v25, 1 }
 0x156   : > { %14548 = vmatmul.mubr.msk.bf16.gmra.mrb[28].mxu1 %vm349_vm1, %v2052_v21  ;;  %v2429_v21 = vld [vmem:[%s17154_s26 + $0xc] sm:$0xf] }
 0x157   : > { %14551 = vmatprep.mubr.msk.bf16.mxu1 %vm349_vm1, %v2061_v51  ;;  %v2083_v51 = vrot.slane %v2081_v37, 3  ;;  %v8116_v37 = vsel %vm5092_vm6, %v8113_v32, %v8115_v6  ;;  %v8119_v32 = vrot.slane %v18219_v2, 1 }
 0x159   : > { %15118 = vmatmul.mubr.msk.bf16.vlgmr.msra.gmra.mrb[0].mxu0 %vm349_vm1, %v8110_v14  ;;  %v2092_v14 = vrot.slane %v2090_v34, 3  ;;  %v2087_v59 = vor.u32 %v2086_v35, %v2083_v51  ;;  %v2104_v51 = vrot.slane %v2102_v40, 4  ;;  %v18242_v40 = vld [vmem:[%s17154_s26 + $0x74] sm:$0xff]  }
 0x15a   : > { %15162 = vmatpush3.bf16.msra.mxu0 %v8752_v4  ;;  %15121 = vmatprep.mubr.msk.bf16.mxu0 %vm349_vm1, %v8112_v44  ;;  %v2095_v4 = vrot.slane %v2093_v38, 4  ;;  %v13078_v44 = vcombine.low %v2429_v21, %v18200_v41  ;;  %v18222_v38 = vld [vmem:[%s17154_s26 + $0x14] sm:$0xff]  }
 0x15b   : > { %16650 = vmatprep.subr.msk.bf16.mxu0 %vm416_vm0, %v18195_v58  ;;  %v2088_v21 = vsel %vm1900_vm5, %v2078_v22, %v2087_v59  ;;  %v8120_v22 = vsel %vm5092_vm6, %v8117_v55, %v8119_v32 }
 0x15c   : > { %v2096_v8 = vor.u32 %v2095_v4, %v2092_v14  ;;  %v2593_v34 = vshll.u32 %v13078_v44, 16  ;;  %v2591_v36 = vshrl.u32 %v13078_v44, 16  ;;  %v20511_v14 = vshll.u32 %v18222_v38, 16  ;;  %v18234_v4 = vld [vmem:[%s17154_s26 + $0x6c] sm:$0xff]  }
 0x15e   : > { %14552 = vmatmul.mubr.msk.bf16.gmra.mrb[32].mxu1 %vm349_vm1, %v2070_v17  ;;  %v2101_v17 = vrot.slane %v2099_v23, 3  ;;  %v2097_v35 = vsel %vm1900_vm5, %v2087_v59, %v2096_v8  ;;  %v2600_v44 = vrot.slane %v20511_v14, 1 }
 0x15f   : > { %14555 = vmatprep.mubr.msk.bf16.mxu1 %vm349_vm1, %v2079_v62  ;;  %v2595_v62 = vrot.slane %v2593_v34, 1  ;;  %v18247_v34 = vld [vmem:[%s17154_s26 + $0x24] sm:$0xff]  }
 0x160   : > { %v2105_v23 = vor.u32 %v2104_v51, %v2101_v17  ;;  %v8123_v17 = vrot.slane %v18242_v40, 1  ;;  %v20515_v51 = vshrl.u32 %v18222_v38, 16 }
 0x161   : > { %15122 = vmatmul.mubr.msk.bf16.gmra.mrb[4].mxu0 %vm349_vm1, %v8114_v15  ;;  %v8118_v15 = vsel %vm5092_vm6, %v8115_v6, %v8117_v55  ;;  %v2596_v59 = vor.u32 %v2595_v62, %v2591_v36  ;;  %v8121_v6 = vrot.slane %v18234_v4, 1  ;;  %v18274_v36 = vld [vmem:[%s17154_s26 + $0x84] sm:$0xff]  }
 0x162   : > { %15125 = vmatprep.mubr.msk.bf16.mxu0 %vm349_vm1, %v8116_v37  ;;  %v18237_v37 = vld [vmem:[%s17154_s26 + $0x1c] sm:$0xff]  }
 0x163   : > { %v20514_v55 = vshll.u32 %v18237_v37, 16  ;;  %v8124_v14 = vsel %vm5092_vm6, %v8121_v6, %v8123_v17 }
 0x166   : > { %14556 = vmatmul.mubr.msk.bf16.gmra.mrb[36].mxu1 %vm349_vm1, %v2088_v21  ;;  %v2106_v21 = vsel %vm1900_vm5, %v2096_v8, %v2105_v23  ;;  %v2608_v8 = vrot.slane %v20514_v55, 1  ;;  %v18267_v23 = vld [vmem:[%s17154_s26 + $0x2c] sm:$0xff]   ;;  %v8127_v55 = vrot.slane %v18274_v36, 1 }
 0x167   : > { %14559 = vmatprep.mubr.msk.bf16.mxu1 %vm349_vm1, %v2097_v35  ;;  %v2601_v35 = vsel %vm2589_vm7, %v2596_v59, %v2600_v44  ;;  %v2604_v59 = vor.u32 %v20515_v51, %v2600_v44  ;;  %v3270_v51 = vsel %vm416_vm0, %v18078_v13, 0  ;;  %v18308_v13 = vld [vmem:[%s17154_s26 + $0x3c] sm:$0xff]  }
 0x169   : > { %15126 = vmatmul.mubr.msk.bf16.gmra.mrb[8].mxu0 %vm349_vm1, %v8118_v15  ;;  %v8122_v15 = vsel %vm5092_vm6, %v8119_v32, %v8121_v6  ;;  %v20713_v32 = vshrl.u32 %v18237_v37, 16  ;;  %v18298_v6 = vld [vmem:[%s20432_s1 + $0xc] sm:$0x3] }
 0x16a   : > { %15129 = vmatprep.mubr.msk.bf16.mxu0 %vm349_vm1, %v8120_v22  ;;  %v18262_v22 = vld [vmem:[%s17154_s26 + $0x7c] sm:$0xff]  }
 0x16b   : > { %v2612_v62 = vor.u32 %v20713_v32, %v2608_v8  ;;  %v8125_v44 = vrot.slane %v18262_v22, 1 }
 0x16e   : > { %14560 = vmatmul.mubr.msk.bf16.gmra.mrb[40].mxu1 %vm349_vm1, %v2106_v21  ;;  %v20714_v21 = vshll.u32 %v18247_v34, 16 }
 0x16f   : > { %14565 = vmatprep.mubr.msk.bf16.mxu1 %vm349_vm1, %v2601_v35  ;;  %v2609_v35 = vsel %vm2589_vm7, %v2604_v59, %v2608_v8  ;;  %v8126_v8 = vsel %vm5092_vm6, %v8123_v17, %v8125_v44  ;;  %v18303_v59 = vld [vmem:[%s17154_s26 + $0x8c] sm:$0xff]   ;;  %v20717_v17 = vshrl.u32 %v18267_v23, 16 }
 0x170   : > { %v2616_v61 = vrot.slane %v20714_v21, 1 }
 0x171   : > { %15130 = vmatmul.mubr.msk.bf16.gmra.mrb[12].mxu0 %vm349_vm1, %v8122_v15  ;;  %v8128_v15 = vsel %vm5092_vm6, %v8125_v44, %v8127_v55 }
 0x172   : > { %15133 = vmatprep.mubr.msk.bf16.mxu0 %vm349_vm1, %v8124_v14  ;;  %v2617_v21 = vsel %vm2589_vm7, %v2612_v62, %v2616_v61  ;;  %v20715_v62 = vshll.u32 %v18267_v23, 16  ;;  %v20716_v14 = vshrl.u32 %v18247_v34, 16 }
 0x174   : > { %v2624_v32 = vrot.slane %v20715_v62, 1  ;;  %v2620_v47 = vor.u32 %v20716_v14, %v2616_v61  ;;  %v18322_v62 = vld [vmem:[%s17154_s26 + $0x44] sm:$0xff]   ;;  %v8129_v61 = vrot.slane %v18303_v59, 1 }
 0x176   : > { %14566 = vmatmul.mubr.msk.bf16.vlgmr.msra.gmra.mrb[0].mxu1 %vm349_vm1, %v2609_v35  ;;  %v2628_v35 = vor.u32 %v20717_v17, %v2624_v32  ;;  %v2625_v44 = vsel %vm2589_vm7, %v2620_v47, %v2624_v32  ;;  %v18344_v32 = vld [vmem:[%s17154_s26 + $0x4c] sm:$0xff]   ;;  %v18351_v17 = vld [vmem:[%s17154_s26 + $0xa4] sm:$0xff]  }
 0x177   : > { %14569 = vmatprep.mubr.msk.bf16.mxu1 %vm349_vm1, %v2617_v21  ;;  %14610 = vmatpush3.bf16.msra.mxu1 %v3270_v51  ;;  %v20521_v51 = vshll.u32 %v18308_v13, 16  ;;  %v8131_v21 = vrot.slane %v18315_v1, 1 }
 0x178   : > { %16637 = vmatprep.subr.msk.bf16.mxu1 %vm416_vm0, %v18298_v6  ;;  %v2633_v14 = vsel %vm2589_vm7, %v2628_v35, %v2632_v16  ;;  %v2636_v35 = vor.u32 %v20522_v19, %v2632_v16  ;;  %v20528_v16 = vshll.u32 %v18344_v32, 16  ;;  %v8135_v19 = vrot.slane %v18351_v17, 1 }
 0x179   : > { %15134 = vmatmul.mubr.msk.bf16.gmra.mrb[16].mxu0 %vm349_vm1, %v8126_v8  ;;  %v20523_v8 = vshll.u32 %v18322_v62, 16  ;;  %v2640_v47 = vrot.slane %v20521_v51, 1  ;;  %v8132_v50 = vsel %vm5092_vm6, %v8129_v61, %v8131_v21  ;;  %v18358_v51 = vld [vmem:[%s17154_s26 + $0x54] sm:$0xff]  }
 0x17a   : > { %15137 = vmatprep.mubr.msk.bf16.mxu0 %vm349_vm1, %v8128_v15  ;;  %v8130_v15 = vsel %vm5092_vm6, %v8127_v55, %v8129_v61  ;;  %v20719_v55 = vshrl.u32 %v18308_v13, 16  ;;  %v8133_v61 = vrot.slane %v18339_v9, 1 }
 0x17b   : > { %v2648_v49 = vrot.slane %v20523_v8, 1 }
 0x17c   : > { %v8136_v27 = vsel %vm5092_vm6, %v8133_v61, %v8135_v19 }
 0x17e   : > { %14570 = vmatmul.mubr.msk.bf16.gmra.mrb[4].mxu1 %vm349_vm1, %v2625_v44  ;;  %v2644_v44 = vor.u32 %v20719_v55, %v2640_v47  ;;  %v20529_v55 = vshrl.u32 %v18322_v62, 16 }
 0x17f   : > { %14573 = vmatprep.mubr.msk.bf16.mxu1 %vm349_vm1, %v2633_v14  ;;  %v2641_v14 = vsel %vm2589_vm7, %v2636_v35, %v2640_v47  ;;  %v2656_v47 = vrot.slane %v20528_v16, 1  ;;  %v18378_v35 = vld [vmem:[%s17154_s26 + $0x5c] sm:$0xff]   ;;  %v18392_v16 = vld [vmem:[%s17154_s26 + $0x64] sm:$0xff]  }
 0x180   : > { %v2649_v8 = vsel %vm2589_vm7, %v2644_v44, %v2648_v49  ;;  %v2652_v44 = vor.u32 %v20529_v55, %v2648_v49  ;;  %v20536_v49 = vshll.u32 %v18378_v35, 16  ;;  %v8139_v55 = vrot.slane %v18385_v39, 1 }
 0x181   : > { %15138 = vmatmul.mubr.msk.bf16.gmra.mrb[20].mxu0 %vm349_vm1, %v8130_v15  ;;  %v20530_v15 = vshll.u32 %v18358_v51, 16  ;;  %v20537_v12 = vshrl.u32 %v18378_v35, 16 }
 0x182   : > { %15141 = vmatprep.mubr.msk.bf16.mxu0 %vm349_vm1, %v8132_v50  ;;  %v8134_v50 = vsel %vm5092_vm6, %v8131_v21, %v8133_v61  ;;  %v20720_v21 = vshrl.u32 %v18344_v32, 16  ;;  %v2657_v61 = vsel %vm2589_vm7, %v2652_v44, %v2656_v47  ;;  %v18412_v44 = vld [vmem:[%s17154_s26 + $0x6c] sm:$0xff]  }
 0x183   : > { %v2664_v26 = vrot.slane %v20530_v15, 1 }
 0x186   : > { %14574 = vmatmul.mubr.msk.bf16.gmra.mrb[8].mxu1 %vm349_vm1, %v2641_v14  ;;  %v2660_v14 = vor.u32 %v20720_v21, %v2656_v47  ;;  %v20538_v21 = vshrl.u32 %v18358_v51, 16  ;;  %v2672_v47 = vrot.slane %v20536_v49, 1 }
 0x187   : > { %14577 = vmatprep.mubr.msk.bf16.mxu1 %vm349_vm1, %v2649_v8  ;;  %v8137_v8 = vrot.slane %v18373_v33, 1 }
 0x188   : > { %v2665_v15 = vsel %vm2589_vm7, %v2660_v14, %v2664_v26  ;;  %v2668_v14 = vor.u32 %v20538_v21, %v2664_v26  ;;  %v20544_v26 = vshrl.u32 %v18392_v16, 16  ;;  %v20543_v21 = vshrl.u32 %v18412_v44, 16 }
 0x189   : > { %15142 = vmatmul.mubr.msk.bf16.gmra.mrb[24].mxu0 %vm349_vm1, %v8134_v50  ;;  %v8140_v63 = vsel %vm5092_vm6, %v8137_v8, %v8139_v55  ;;  %v18419_v50 = vld [vmem:[%s17154_s26 + $0xc4] sm:$0xff]  }
 0x18a   : > { %15145 = vmatprep.mubr.msk.bf16.mxu0 %vm349_vm1, %v8136_v27  ;;  %v8138_v27 = vsel %vm5092_vm6, %v8135_v19, %v8137_v8  ;;  %v2676_v19 = vor.u32 %v20537_v12, %v2672_v47  ;;  %v2673_v49 = vsel %vm2589_vm7, %v2668_v14, %v2672_v47  ;;  %v8143_v12 = vrot.slane %v18419_v50, 1 }
 0x18b   : > { %v20722_v47 = vshll.u32 %v18412_v44, 16 }
 0x18d   : > { %v2688_v14 = vrot.slane %v20722_v47, 1 }
 0x18e   : > { %14578 = vmatmul.mubr.msk.bf16.gmra.mrb[12].mxu1 %vm349_vm1, %v2657_v61  ;;  %v20721_v61 = vshll.u32 %v18392_v16, 16 }
 0x18f   : > { %14581 = vmatprep.mubr.msk.bf16.mxu1 %vm349_vm1, %v2665_v15  ;;  %v8141_v15 = vrot.slane %v18407_v11, 1 }
 0x190   : > { %v2680_v54 = vrot.slane %v20721_v61, 1 }
 0x191   : > { %15146 = vmatmul.mubr.msk.bf16.gmra.mrb[28].mxu0 %vm349_vm1, %v8138_v27  ;;  %v2692_v27 = vor.u32 %v20543_v21, %v2688_v14 }
 0x192   : > { %15149 = vmatprep.mubr.msk.bf16.mxu0 %vm349_vm1, %v8140_v63  ;;  %v2681_v61 = vsel %vm2589_vm7, %v2676_v19, %v2680_v54  ;;  %v8142_v63 = vsel %vm5092_vm6, %v8139_v55, %v8141_v15  ;;  %v2684_v8 = vor.u32 %v20544_v26, %v2680_v54  ;;  %v8144_v19 = vsel %vm5092_vm6, %v8141_v15, %v8143_v12 }
 0x193   : > { %v20723_v55 = vshll.u32 %v18426_v52, 16  ;;  %v8145_v54 = vrot.slane %v18439_v43, 1  ;;  %v8147_v15 = vrot.slane %v18448_v42, 1  ;;  %v8483_v26 = vshll.u32 %v18148_v29, 16 }
 0x194   : > { %v2689_v47 = vsel %vm2589_vm7, %v2684_v8, %v2688_v14 }
 0x195   : > { %v8146_v14 = vsel %vm5092_vm6, %v8143_v12, %v8145_v54  ;;  %v8148_v21 = vsel %vm5092_vm6, %v8145_v54, %v8147_v15  ;;  %v20726_v12 = vshrl.u32 %v18451_v31, 16  ;;  %v20727_v54 = vshll.u32 %v18460_v30, 16 }
 0x196   : > { %14582 = vmatmul.mubr.msk.bf16.gmra.mrb[16].mxu1 %vm349_vm1, %v2673_v49  ;;  %v2696_v49 = vrot.slane %v20723_v55, 1  ;;  %v8480_v55 = vshrl.u32 %v18148_v29, 16  ;;  %v20724_v29 = vshrl.u32 %v18426_v52, 16 }
 0x197   : > { %14585 = vmatprep.mubr.msk.bf16.mxu1 %vm349_vm1, %v2681_v61  ;;  %v16819_v61 = vld [vmem:[%s17154_s26 + $0xdc] ss:$0 sps:$4 sm:$0x11]   ;;  %v2712_v7 = vrot.slane %v20727_v54, 1  ;;  %v8506_v54 = vshrl.u32 %v18170_v48, 16 }
 0x198   : > { %v2697_v28 = vsel %vm2589_vm7, %v2692_v27, %v2696_v49  ;;  %v2700_v46 = vor.u32 %v20724_v29, %v2696_v49  ;;  %v8482_v27 = vrot.slane %v8480_v55, 1  ;;  %v18493_v49 = vld [vmem:[%s17154_s26 + $0x94] sm:$0xff]   ;;  %v20561_v55 = vshrl.u32 %v18460_v30, 16 }
 0x199   : > { %15150 = vmatmul.mubr.msk.bf16.gmra.mrb[32].mxu0 %vm349_vm1, %v8142_v63  ;;  %v8488_v63 = vshrl.u32 %v18151_v5, 16  ;;  %v2704_v5 = vrot.slane %v20725_v3, 1  ;;  %v8497_v3 = vshrl.u32 %v18165_v57, 16 }
 0x19a   : > { %15153 = vmatprep.mubr.msk.bf16.mxu0 %vm349_vm1, %v8144_v19  ;;  %v8485_v19 = vrot.slane %v8483_v26, 2  ;;  %v8149_v26 = vrot.slane %v16819_v61, 1 }
 0x19b   : > { %v8490_v8 = vrot.slane %v8488_v63, 1  ;;  %v2705_v20 = vsel %vm2589_vm7, %v2700_v46, %v2704_v5  ;;  %v20559_v63 = vshll.u32 %v18485_v56, 16  ;;  %v8508_v46 = vrot.slane %v8506_v54, 1 }
 0x19c   : > { %v8486_v29 = vor.u32 %v8485_v19, %v8482_v27  ;;  %v8499_v19 = vrot.slane %v8497_v3, 1  ;;  %v18522_v27 = vld [vmem:[%s17154_s26 + $0x9c] sm:$0xff]   ;;  %v8518_v54 = vshll.u32 %v18185_v10, 16 }
 0x19e   : > { %14586 = vmatmul.mubr.msk.bf16.gmra.mrb[20].mxu1 %vm349_vm1, %v2689_v47  ;;  %v2708_v47 = vor.u32 %v20726_v12, %v2704_v5  ;;  %v8494_v12 = vor.u32 %v8493_v18, %v8490_v8  ;;  %v8150_v8 = vsel %vm5092_vm6, %v8147_v15, %v8149_v26  ;;  %v2720_v5 = vrot.slane %v20559_v63, 1  ;;  %v18531_v26 = vld [vmem:[%s17154_s26 + $0xa4] sm:$0xff]  }
 0x19f   : > { %14589 = vmatprep.mubr.msk.bf16.mxu1 %vm349_vm1, %v2697_v28  ;;  %v8500_v28 = vshll.u32 %v18165_v57, 16  ;;  %v20728_v15 = vshll.u32 %v18493_v49, 16  ;;  %v20564_v63 = vshrl.u32 %v18493_v49, 16 }
 0x1a0   : > { %v2713_v57 = vsel %vm2589_vm7, %v2708_v47, %v2712_v7  ;;  %v8495_v47 = vsel %vm833_vm4, %v8486_v29, %v8494_v12  ;;  %v8515_v29 = vshrl.u32 %v18185_v10, 16  ;;  %v9125_v10 = vsel %vm416_vm0, %v18195_v58, 0 }
 0x1a1   : > { %15154 = vmatmul.mubr.msk.bf16.gmra.mrb[36].mxu0 %vm349_vm1, %v8146_v14  ;;  %v8509_v14 = vshll.u32 %v18170_v48, 16  ;;  %v8502_v18 = vrot.slane %v8500_v28, 2  ;;  %v2716_v48 = vor.u32 %v20561_v55, %v2712_v7  ;;  %v2728_v28 = vrot.slane %v20728_v15, 1 }
 0x1a2   : > { %15157 = vmatprep.mubr.msk.bf16.mxu0 %vm349_vm1, %v8148_v21  ;;  %v20560_v21 = vshrl.u32 %v18485_v56, 16  ;;  %v8524_v15 = vshrl.u32 %v18190_v60, 16 }
 0x1a3   : > { %v8511_v61 = vrot.slane %v8509_v14, 2  ;;  %v8503_v7 = vor.u32 %v8502_v18, %v8499_v19  ;;  %v20562_v14 = vshll.u32 %v18522_v27, 16  ;;  %v20563_v18 = vshrl.u32 %v18522_v27, 16 }
 0x1a4   : > { %v2724_v3 = vor.u32 %v20560_v21, %v2720_v5  ;;  %v8527_v21 = vshll.u32 %v18190_v60, 16 }
 0x1a5   : > { %v2736_v60 = vrot.slane %v20562_v14, 1  ;;  %v8542_v14 = vshrl.u32 %v18219_v2, 16 }
 0x1a6   : > { %14590 = vmatmul.mubr.msk.bf16.gmra.mrb[24].mxu1 %vm349_vm1, %v2705_v20  ;;  %v2721_v20 = vsel %vm2589_vm7, %v2716_v48, %v2720_v5  ;;  %v2729_v19 = vsel %vm2589_vm7, %v2724_v3, %v2728_v28  ;;  %v8504_v48 = vsel %vm833_vm4, %v8494_v12, %v8503_v7  ;;  %v18547_v5 = vld [vmem:[%s17154_s26 + $0xac] sm:$0xff]   ;;  %v2732_v12 = vor.u32 %v20564_v63, %v2728_v28 }
 0x1a7   : > { %14593 = vmatprep.mubr.msk.bf16.mxu1 %vm349_vm1, %v2713_v57  ;;  %v8512_v57 = vor.u32 %v8511_v61, %v8508_v46  ;;  %v8517_v46 = vrot.slane %v8515_v29, 1  ;;  %v8520_v61 = vrot.slane %v8518_v54, 2  ;;  %v8526_v3 = vrot.slane %v8524_v15, 1  ;;  %v18568_v54 = vld [vmem:[%s20432_s1 + $0x26] sm:$0x3] }
 0x1a8   : > { %v8529_v55 = vrot.slane %v8527_v21, 2  ;;  %v2740_v58 = vor.u32 %v20563_v18, %v2736_v60  ;;  %v8536_v28 = vshll.u32 %v18214_v25, 16  ;;  %v20569_v21 = vshrl.u32 %v18531_v26, 16 }
 0x1a9   : > { %15158 = vmatmul.mubr.msk.bf16.gmra.mrb[40].mxu0 %vm349_vm1, %v8150_v8  ;;  %v18559_v8 = vld [vmem:[%s17154_s26 + $0xb4] sm:$0xff]   ;;  %v20567_v15 = vshll.u32 %v18547_v5, 16  ;;  %v8545_v18 = vshll.u32 %v18219_v2, 16  ;;  %v2737_v63 = vsel %vm2589_vm7, %v2732_v12, %v2736_v60  ;;  %v20568_v24 = vshrl.u32 %v18547_v5, 16 }
 0x1aa   : > { %15163 = vmatprep.mubr.msk.bf16.mxu0 %vm349_vm1, %v8495_v47  ;;  %v8513_v47 = vsel %vm833_vm4, %v8503_v7, %v8512_v57  ;;  %v8533_v7 = vshrl.u32 %v18214_v25, 16  ;;  %v8544_v12 = vrot.slane %v8542_v14, 1 }
 0x1ae   : > { %14594 = vmatmul.mubr.msk.bf16.gmra.mrb[28].mxu1 %vm349_vm1, %v2721_v20  ;;  %v20729_v20 = vshll.u32 %v18531_v26, 16 }
 0x1af   : > { %14597 = vmatprep.mubr.msk.bf16.mxu1 %vm349_vm1, %v2729_v19  ;;  %v3092_v19 = vld [vmem:[%s17154_s26 + $0xc] sm:$0xe] }
 0x1b0   : > { %v2744_v29 = vrot.slane %v20729_v20, 1  ;;  %v8521_v20 = vor.u32 %v8520_v61, %v8517_v46  ;;  %v8535_v46 = vrot.slane %v8533_v7, 1  ;;  %v8538_v61 = vrot.slane %v8536_v28, 2 }
 0x1b1   : > { %15164 = vmatmul.mubr.msk.bf16.vlgmr.msra.gmra.mrb[0].mxu0 %vm349_vm1, %v8504_v48  ;;  %v8530_v48 = vor.u32 %v8529_v55, %v8526_v3  ;;  %v2752_v55 = vrot.slane %v20567_v15, 1  ;;  %v8547_v3 = vrot.slane %v8545_v18, 2  ;;  %v8551_v18 = vshrl.u32 %v18234_v4, 16 }
 0x1b2   : > { %15208 = vmatpush3.bf16.msra.mxu0 %v9125_v10  ;;  %15167 = vmatprep.mubr.msk.bf16.mxu0 %vm349_vm1, %v8513_v47  ;;  %v2745_v10 = vsel %vm2589_vm7, %v2740_v58, %v2744_v29  ;;  %v13124_v47 = vcombine.low %v3092_v19, %v18200_v41  ;;  %v2748_v2 = vor.u32 %v20569_v21, %v2744_v29  ;;  %v20730_v58 = vshll.u32 %v18559_v8, 16  ;;  %v16828_v29 = vld [vmem:[%s17154_s26 + $0xbc] ss:$0 sps:$4 sm:$0x11]  }
 0x1b3   : > { %16651 = vmatprep.subr.msk.bf16.mxu0 %vm416_vm0, %v18568_v54  ;;  %v8522_v60 = vsel %vm833_vm4, %v8512_v57, %v8521_v20  ;;  %v8531_v25 = vsel %vm833_vm4, %v8521_v20, %v8530_v48  ;;  %v2756_v41 = vor.u32 %v20568_v24, %v2752_v55  ;;  %v8539_v57 = vor.u32 %v8538_v61, %v8535_v46 }
 0x1b4   : > { %v2760_v7 = vrot.slane %v20730_v58, 1  ;;  %v3103_v28 = vshrl.u32 %v13124_v47, 16  ;;  %v3106_v19 = vshll.u32 %v13124_v47, 16  ;;  %v8548_v14 = vor.u32 %v8547_v3, %v8544_v12 }
 0x1b5   : > { %v8554_v20 = vshll.u32 %v18234_v4, 16  ;;  %v2766_v58 = vshll.u32 %v16828_v29, 16  ;;  %v8560_v24 = vshrl.u32 %v18242_v40, 16  ;;  %v8563_v47 = vshll.u32 %v18242_v40, 16 }
 0x1b6   : > { %14598 = vmatmul.mubr.msk.bf16.gmra.mrb[32].mxu1 %vm349_vm1, %v2737_v63  ;;  %v2753_v63 = vsel %vm2589_vm7, %v2748_v2, %v2752_v55  ;;  %v2761_v15 = vsel %vm2589_vm7, %v2756_v41, %v2760_v7  ;;  %v3108_v46 = vrot.slane %v3106_v19, 2  ;;  %v20731_v61 = vshrl.u32 %v18222_v38, 16 }
 0x1b7   : > { %14601 = vmatprep.mubr.msk.bf16.mxu1 %vm349_vm1, %v2745_v10  ;;  %v2762_v10 = vshrl.u32 %v18559_v8, 16  ;;  %v8540_v12 = vsel %vm833_vm4, %v8530_v48, %v8539_v57  ;;  %v8549_v4 = vsel %vm833_vm4, %v8539_v57, %v8548_v14  ;;  %v8553_v3 = vrot.slane %v8551_v18, 1 }
 0x1b8   : > { %v3110_v2 = vrot.slane %v20731_v61, 1  ;;  %v8556_v41 = vrot.slane %v8554_v20, 2  ;;  %v2768_v29 = vrot.slane %v2766_v58, 1  ;;  %v8565_v19 = vrot.slane %v8563_v47, 2 }
 0x1b9   : > { %15168 = vmatmul.mubr.msk.bf16.gmra.mrb[4].mxu0 %vm349_vm1, %v8522_v60  ;;  %v3105_v60 = vrot.slane %v3103_v28, 1  ;;  %v2764_v40 = vor.u32 %v2762_v10, %v2760_v7  ;;  %v8562_v28 = vrot.slane %v8560_v24, 1  ;;  %v8569_v57 = vshrl.u32 %v18262_v22, 16 }
 0x1ba   : > { %15171 = vmatprep.mubr.msk.bf16.mxu0 %vm349_vm1, %v8531_v25  ;;  %v20732_v25 = vshll.u32 %v18222_v38, 16  ;;  %v20733_v38 = vshrl.u32 %v18237_v37, 16  ;;  %v8557_v48 = vor.u32 %v8556_v41, %v8553_v3  ;;  %v8578_v20 = vshrl.u32 %v18274_v36, 16 }
 0x1bb   : > { %v3109_v61 = vor.u32 %v3108_v46, %v3105_v60  ;;  %v2769_v24 = vsel %vm2589_vm7, %v2764_v40, %v2768_v29  ;;  %v8566_v18 = vor.u32 %v8565_v19, %v8562_v28  ;;  %v8581_v58 = vshll.u32 %v18274_v36, 16 }
 0x1bc   : > { %v3111_v55 = vrot.slane %v20732_v25, 2  ;;  %v3114_v25 = vrot.slane %v20733_v38, 1  ;;  %v20735_v60 = vshrl.u32 %v18247_v34, 16  ;;  %v8580_v36 = vrot.slane %v8578_v20, 1 }
 0x1bd   : > { %v8567_v3 = vsel %vm833_vm4, %v8557_v48, %v8566_v18  ;;  %v8583_v41 = vrot.slane %v8581_v58, 2  ;;  %v8587_v29 = vshrl.u32 %v18303_v59, 16  ;;  %v20737_v19 = vshrl.u32 %v18267_v23, 16 }
 0x1be   : > { %14602 = vmatmul.mubr.msk.bf16.gmra.mrb[36].mxu1 %vm349_vm1, %v2753_v63  ;;  %v3112_v21 = vor.u32 %v3111_v55, %v3110_v2  ;;  %v20734_v63 = vshll.u32 %v18237_v37, 16  ;;  %v3118_v46 = vrot.slane %v20735_v60, 1  ;;  %v20736_v2 = vshll.u32 %v18247_v34, 16 }
 0x1bf   : > { %14605 = vmatprep.mubr.msk.bf16.mxu1 %vm349_vm1, %v2761_v15  ;;  %v8572_v15 = vshll.u32 %v18262_v22, 16  ;;  %v8558_v22 = vsel %vm833_vm4, %v8548_v14, %v8557_v48  ;;  %v8571_v37 = vrot.slane %v8569_v57, 1  ;;  %v8590_v34 = vshll.u32 %v18303_v59, 16 }
 0x1c0   : > { %v3115_v7 = vrot.slane %v20734_v63, 2  ;;  %v3113_v47 = vsel %vm833_vm4, %v3109_v61, %v3112_v21  ;;  %v3119_v55 = vrot.slane %v20736_v2, 2  ;;  %v3122_v61 = vrot.slane %v20737_v19, 1 }
 0x1c1   : > { %15172 = vmatmul.mubr.msk.bf16.gmra.mrb[8].mxu0 %vm349_vm1, %v8540_v12  ;;  %v8574_v12 = vrot.slane %v8572_v15, 2  ;;  %v8584_v38 = vor.u32 %v8583_v41, %v8580_v36  ;;  %v8596_v57 = vshrl.u32 %v18315_v1, 16  ;;  %v8599_v15 = vshll.u32 %v18315_v1, 16 }
 0x1c2   : > { %15175 = vmatprep.mubr.msk.bf16.mxu0 %vm349_vm1, %v8549_v4  ;;  %v3116_v4 = vor.u32 %v3115_v7, %v3114_v25  ;;  %v3120_v40 = vor.u32 %v3119_v55, %v3118_v46  ;;  %v20738_v25 = vshll.u32 %v18267_v23, 16  ;;  %v3797_v59 = vsel %vm416_vm0, %v18298_v6, 0  ;;  %v18659_v23 = vld [vmem:[%s20432_s1 + $0xe] sm:$0x3] }
 0x1c3   : > { %v8575_v14 = vor.u32 %v8574_v12, %v8571_v37  ;;  %v20739_v7 = vshrl.u32 %v18281_v45, 16  ;;  %v8589_v58 = vrot.slane %v8587_v29, 1  ;;  %v8598_v46 = vrot.slane %v8596_v57, 1 }
 0x1c4   : > { %v3117_v28 = vsel %vm833_vm4, %v3112_v21, %v3116_v4  ;;  %v3123_v48 = vrot.slane %v20738_v25, 2  ;;  %v3121_v63 = vsel %vm833_vm4, %v3116_v4, %v3120_v40  ;;  %v20740_v21 = vshll.u32 %v18281_v45, 16 }
 0x1c5   : > { %v8576_v1 = vsel %vm833_vm4, %v8566_v18, %v8575_v14  ;;  %v8585_v60 = vsel %vm833_vm4, %v8575_v14, %v8584_v38  ;;  %v8601_v45 = vrot.slane %v8599_v15, 2  ;;  %v8605_v18 = vshrl.u32 %v18339_v9, 16 }
 0x1c6   : > { %14606 = vmatmul.mubr.msk.bf16.gmra.mrb[40].mxu1 %vm349_vm1, %v2769_v24  ;;  %v3126_v24 = vrot.slane %v20739_v7, 1  ;;  %v3127_v20 = vrot.slane %v20740_v21, 2  ;;  %v3124_v6 = vor.u32 %v3123_v48, %v3122_v61  ;;  %v20741_v37 = vshrl.u32 %v18308_v13, 16 }
 0x1c7   : > { %14611 = vmatprep.mubr.msk.bf16.mxu1 %vm349_vm1, %v3113_v47  ;;  %v8592_v47 = vrot.slane %v8590_v34, 2  ;;  %v20742_v4 = vshll.u32 %v18308_v13, 16  ;;  %v8602_v41 = vor.u32 %v8601_v45, %v8598_v46  ;;  %v8614_v29 = vshrl.u32 %v18351_v17, 16 }
 0x1c8   : > { %v3128_v2 = vor.u32 %v3127_v20, %v3126_v24  ;;  %v3130_v12 = vrot.slane %v20741_v37, 1  ;;  %v3125_v36 = vsel %vm833_vm4, %v3120_v40, %v3124_v6  ;;  %v8617_v34 = vshll.u32 %v18351_v17, 16 }
 0x1c9   : > { %15176 = vmatmul.mubr.msk.bf16.gmra.mrb[12].mxu0 %vm349_vm1, %v8558_v22  ;;  %v8593_v55 = vor.u32 %v8592_v47, %v8589_v58  ;;  %v8608_v22 = vshll.u32 %v18339_v9, 16  ;;  %v20744_v9 = vshll.u32 %v18322_v62, 16  ;;  %v8607_v13 = vrot.slane %v8605_v18, 1 }
 0x1ca   : > { %15179 = vmatprep.mubr.msk.bf16.mxu0 %vm349_vm1, %v8567_v3  ;;  %v3131_v3 = vrot.slane %v20742_v4, 2  ;;  %v3129_v14 = vsel %vm833_vm4, %v3124_v6, %v3128_v2  ;;  %v8616_v17 = vrot.slane %v8614_v29, 1  ;;  %v8619_v15 = vrot.slane %v8617_v34, 2 }
 0x1cb   : > { %v3135_v61 = vrot.slane %v20744_v9, 2  ;;  %v8594_v25 = vsel %vm833_vm4, %v8584_v38, %v8593_v55  ;;  %v8610_v48 = vrot.slane %v8608_v22, 2  ;;  %v8603_v57 = vsel %vm833_vm4, %v8593_v55, %v8602_v41 }
 0x1cc   : > { %v3132_v40 = vor.u32 %v3131_v3, %v3130_v12  ;;  %v20745_v24 = vshrl.u32 %v18344_v32, 16  ;;  %v8620_v20 = vor.u32 %v8619_v15, %v8616_v17  ;;  %v20746_v58 = vshll.u32 %v18344_v32, 16 }
 0x1cd   : > { %v8611_v38 = vor.u32 %v8610_v48, %v8607_v13  ;;  %v20748_v45 = vshll.u32 %v18358_v51, 16  ;;  %v20750_v34 = vshll.u32 %v18378_v35, 16  ;;  %v8650_v9 = vshrl.u32 %v18419_v50, 16 }
 0x1ce   : > { %14612 = vmatmul.mubr.msk.bf16.vlgmr.msra.gmra.mrb[0].mxu1 %vm349_vm1, %v3117_v28  ;;  %v20743_v28 = vshrl.u32 %v18322_v62, 16  ;;  %v8626_v62 = vshll.u32 %v18373_v33, 16  ;;  %v3133_v7 = vsel %vm833_vm4, %v3128_v2, %v3132_v40  ;;  %v3138_v21 = vrot.slane %v20745_v24, 1 }
 0x1cf   : > { %14615 = vmatprep.mubr.msk.bf16.mxu1 %vm349_vm1, %v3121_v63  ;;  %14656 = vmatpush3.bf16.msra.mxu1 %v3797_v59  ;;  %v8623_v59 = vshrl.u32 %v18373_v33, 16  ;;  %v3139_v47 = vrot.slane %v20746_v58, 2  ;;  %v20747_v33 = vshrl.u32 %v18358_v51, 16  ;;  %v3143_v55 = vrot.slane %v20748_v45, 2 }
 0x1d0   : > { %16638 = vmatprep.subr.msk.bf16.mxu1 %vm416_vm0, %v18659_v23  ;;  %v3134_v19 = vrot.slane %v20743_v28, 1  ;;  %v8628_v18 = vrot.slane %v8626_v62, 2  ;;  %v8612_v22 = vsel %vm833_vm4, %v8602_v41, %v8611_v38  ;;  %v8621_v32 = vsel %vm833_vm4, %v8611_v38, %v8620_v20 }
 0x1d1   : > { %15180 = vmatmul.mubr.msk.bf16.gmra.mrb[16].mxu0 %vm349_vm1, %v8576_v1  ;;  %v8632_v1 = vshrl.u32 %v18385_v39, 16  ;;  %v3142_v46 = vrot.slane %v20747_v33, 1  ;;  %v8625_v2 = vrot.slane %v8623_v59, 1  ;;  %v3140_v37 = vor.u32 %v3139_v47, %v3138_v21 }
 0x1d2   : > { %15183 = vmatprep.mubr.msk.bf16.mxu0 %vm349_vm1, %v8585_v60  ;;  %v3136_v63 = vor.u32 %v3135_v61, %v3134_v19  ;;  %v8635_v60 = vshll.u32 %v18385_v39, 16  ;;  %v8641_v51 = vshrl.u32 %v18407_v11, 16  ;;  %v20749_v41 = vshrl.u32 %v18378_v35, 16 }
 0x1d3   : > { %v8634_v39 = vrot.slane %v8632_v1, 1  ;;  %v3144_v4 = vor.u32 %v3143_v55, %v3142_v46  ;;  %v8629_v3 = vor.u32 %v8628_v18, %v8625_v2  ;;  %v8653_v61 = vshll.u32 %v18419_v50, 16 }
 0x1d4   : > { %v3137_v6 = vsel %vm833_vm4, %v3132_v40, %v3136_v63  ;;  %v8637_v12 = vrot.slane %v8635_v60, 2  ;;  %v3146_v29 = vrot.slane %v20749_v41, 1  ;;  %v3141_v28 = vsel %vm833_vm4, %v3136_v63, %v3140_v37 }
 0x1d5   : > { %v20751_v13 = vshrl.u32 %v18392_v16, 16  ;;  %v8643_v35 = vrot.slane %v8641_v51, 1  ;;  %v8652_v50 = vrot.slane %v8650_v9, 1  ;;  %v8655_v59 = vrot.slane %v8653_v61, 2 }
 0x1d6   : > { %14616 = vmatmul.mubr.msk.bf16.gmra.mrb[4].mxu1 %vm349_vm1, %v3125_v36  ;;  %v8644_v36 = vshll.u32 %v18407_v11, 16  ;;  %v8638_v19 = vor.u32 %v8637_v12, %v8634_v39  ;;  %v20752_v11 = vshll.u32 %v18392_v16, 16  ;;  %v8659_v38 = vshrl.u32 %v18439_v43, 16 }
 0x1d7   : > { %14619 = vmatprep.mubr.msk.bf16.mxu1 %vm349_vm1, %v3129_v14  ;;  %v3147_v14 = vrot.slane %v20750_v34, 2  ;;  %v3150_v48 = vrot.slane %v20751_v13, 1  ;;  %v8662_v16 = vshll.u32 %v18439_v43, 16  ;;  %v20753_v21 = vshrl.u32 %v18412_v44, 16 }
 0x1d8   : > { %v3151_v40 = vrot.slane %v20752_v11, 2  ;;  %v8646_v17 = vrot.slane %v8644_v36, 2  ;;  %v8639_v63 = vsel %vm833_vm4, %v8629_v3, %v8638_v19  ;;  %v8656_v58 = vor.u32 %v8655_v59, %v8652_v50  ;;  %v17022_v59 = vld [vmem:[%s17154_s26 + $0x34] sm:$0xff]  }
 0x1d9   : > { %15184 = vmatmul.mubr.msk.bf16.gmra.mrb[20].mxu0 %vm349_vm1, %v8594_v25  ;;  %v3145_v25 = vsel %vm833_vm4, %v3140_v37, %v3144_v4  ;;  %v3148_v15 = vor.u32 %v3147_v14, %v3146_v29  ;;  %v20754_v47 = vshll.u32 %v18412_v44, 16  ;;  %v8668_v60 = vshrl.u32 %v18448_v42, 16  ;;  %v18746_v44 = vld [vmem:[%s17154_s26 + $0xdc] ss:$0 sps:$4 sm:$0x33]  }
 0x1da   : > { %15187 = vmatprep.mubr.msk.bf16.mxu0 %vm349_vm1, %v8603_v57  ;;  %v8630_v57 = vsel %vm833_vm4, %v8620_v20, %v8629_v3  ;;  %v3152_v62 = vor.u32 %v3151_v40, %v3150_v48  ;;  %v3154_v20 = vrot.slane %v20753_v21, 1  ;;  %v20755_v43 = vshrl.u32 %v18426_v52, 16 }
 0x1db   : > { %v3149_v24 = vsel %vm833_vm4, %v3144_v4, %v3148_v15  ;;  %v3155_v1 = vrot.slane %v20754_v47, 2  ;;  %v20756_v45 = vshll.u32 %v18426_v52, 16  ;;  %v8661_v2 = vrot.slane %v8659_v38, 1 }
 0x1dc   : > { %v3153_v33 = vsel %vm833_vm4, %v3148_v15, %v3152_v62  ;;  %v3158_v46 = vrot.slane %v20755_v43, 1  ;;  %v8664_v18 = vrot.slane %v8662_v16, 2  ;;  %v8670_v37 = vrot.slane %v8668_v60, 1  ;;  %v17023_v43 = vld [vmem:[%s17154_s26 + $0x3c] sm:$0xff]  }
 0x1dd   : > { %v3159_v55 = vrot.slane %v20756_v45, 2  ;;  %v8677_v4 = vshrl.u32 %v18746_v44, 16  ;;  %v8680_v3 = vshll.u32 %v18746_v44, 16  ;;  %v20757_v51 = vshrl.u32 %v18451_v31, 16 }
 0x1de   : > { %14620 = vmatmul.mubr.msk.bf16.gmra.mrb[8].mxu1 %vm349_vm1, %v3133_v7  ;;  %v8647_v7 = vor.u32 %v8646_v17, %v8643_v35  ;;  %v8665_v52 = vor.u32 %v8664_v18, %v8661_v2  ;;  %v20758_v41 = vshll.u32 %v18451_v31, 16  ;;  %v20759_v9 = vshrl.u32 %v18460_v30, 16  ;;  %v17021_v35 = vld [vmem:[%s17154_s26 + $0x30] sm:$0xf] }
 0x1df   : > { %14623 = vmatprep.mubr.msk.bf16.mxu1 %vm349_vm1, %v3137_v6  ;;  %v8671_v6 = vshll.u32 %v18448_v42, 16  ;;  %v3156_v42 = vor.u32 %v3155_v1, %v3154_v20  ;;  %v3160_v12 = vor.u32 %v3159_v55, %v3158_v46  ;;  %v3162_v36 = vrot.slane %v20757_v51, 1 }
 0x1e0   : > { %v3163_v29 = vrot.slane %v20758_v41, 2  ;;  %v3166_v61 = vrot.slane %v20759_v9, 1  ;;  %v8666_v48 = vsel %vm833_vm4, %v8656_v58, %v8665_v52  ;;  %v8679_v11 = vrot.slane %v8677_v4, 1  ;;  %v17025_v41 = vld [vmem:[%s17154_s26 + $0x4c] sm:$0xff]  }
 0x1e1   : > { %15188 = vmatmul.mubr.msk.bf16.gmra.mrb[24].mxu0 %vm349_vm1, %v8612_v22  ;;  %v8648_v22 = vsel %vm833_vm4, %v8638_v19, %v8647_v7  ;;  %v8673_v39 = vrot.slane %v8671_v6, 2  ;;  %v3157_v34 = vsel %vm833_vm4, %v3152_v62, %v3156_v42  ;;  %v9007_v19 = vld [vmem:[%s17154_s26 + $0x2c] sm:$0xc]  ;;  %v8682_v31 = vrot.slane %v8680_v3, 2 }
 0x1e2   : > { %15191 = vmatprep.mubr.msk.bf16.mxu0 %vm349_vm1, %v8621_v32  ;;  %v8657_v32 = vsel %vm833_vm4, %v8647_v7, %v8656_v58  ;;  %v3164_v40 = vor.u32 %v3163_v29, %v3162_v36  ;;  %v13545_v17 = vcombine.low %v9007_v19, %v17021_v35  ;;  %v9014_v62 = vrot.slane %v17022_v59, 2 }
 0x1e3   : > { %v8674_v14 = vor.u32 %v8673_v39, %v8670_v37  ;;  %v20761_v38 = vshrl.u32 %v18485_v56, 16  ;;  %v20762_v7 = vshll.u32 %v18485_v56, 16  ;;  %v20763_v20 = vshrl.u32 %v18493_v49, 16 }
 0x1e4   : > { %v9013_v50 = vrot.slane %v13545_v17, 2  ;;  %v20764_v47 = vshll.u32 %v18493_v49, 16  ;;  %v9016_v46 = vrot.slane %v17023_v43, 2  ;;  %v17024_v49 = vld [vmem:[%s17154_s26 + $0x44] sm:$0xff]   ;;  %v20765_v2 = vshrl.u32 %v18522_v27, 16 }
 0x1e5   : > { %v3170_v16 = vrot.slane %v20761_v38, 1  ;;  %v3174_v58 = vrot.slane %v20763_v20, 1  ;;  %v9018_v55 = vrot.slane %v17024_v49, 2  ;;  %v20767_v37 = vshrl.u32 %v18531_v26, 16  ;;  %v3532_v43 = vld [vmem:[%s17154_s26 + $0x30] sm:$0xf] }
 0x1e6   : > { %14624 = vmatmul.mubr.msk.bf16.gmra.mrb[12].mxu1 %vm349_vm1, %v3141_v28  ;;  %v3161_v28 = vsel %vm833_vm4, %v3156_v42, %v3160_v12  ;;  %v3175_v1 = vrot.slane %v20764_v47, 2  ;;  %v9015_v6 = vsel %vm6000_vm8, %v9013_v50, %v9014_v62  ;;  %v3178_v18 = vrot.slane %v20765_v2, 1 }
 0x1e7   : > { %14627 = vmatprep.mubr.msk.bf16.mxu1 %vm349_vm1, %v3145_v25  ;;  %v20760_v25 = vshll.u32 %v18460_v30, 16  ;;  %v8683_v30 = vor.u32 %v8682_v31, %v8679_v11  ;;  %v3182_v39 = vrot.slane %v20767_v37, 1  ;;  %v9017_v4 = vsel %vm6000_vm8, %v9014_v62, %v9016_v46  ;;  %v17028_v62 = vld [vmem:[%s17154_s26 + $0x64] sm:$0xff]  }
 0x1e8   : > { %v9813_v3 = vsel %vm416_vm0, %v18568_v54, 0  ;;  %v9020_v29 = vrot.slane %v17025_v41, 2  ;;  %v20770_v9 = vshll.u32 %v18547_v5, 16  ;;  %v20771_v11 = vshll.u32 %v18559_v8, 16  ;;  %v17027_v8 = vld [vmem:[%s17154_s26 + $0x5c] sm:$0xff]  }
 0x1e9   : > { %15192 = vmatmul.mubr.msk.bf16.gmra.mrb[28].mxu0 %vm349_vm1, %v8630_v57  ;;  %v3167_v13 = vrot.slane %v20760_v25, 2  ;;  %v8675_v57 = vsel %vm833_vm4, %v8665_v52, %v8674_v14  ;;  %v8684_v60 = vsel %vm833_vm4, %v8674_v14, %v8683_v30  ;;  %v16832_v25 = vld [vmem:[%s17154_s26 + $0xbc] ss:$0 sps:$4 sm:$0x33]   ;;  %v3525_v30 = vld [vmem:[%s17154_s26 + $0x14] sm:$0x8] }
 0x1ea   : > { %15195 = vmatprep.mubr.msk.bf16.mxu0 %vm349_vm1, %v8639_v63  ;;  %v3165_v63 = vsel %vm833_vm4, %v3160_v12, %v3164_v40  ;;  %v20768_v12 = vshll.u32 %v18531_v26, 16  ;;  %v18810_v26 = vld [vmem:[%s20432_s1 + $0x28] sm:$0x3]  ;;  %v3191_v31 = vrot.slane %v20771_v11, 2  ;;  %v3195_v35 = vshrl.u32 %v16832_v25, 16 }
 0x1eb   : > { %v3168_v15 = vor.u32 %v3167_v13, %v3166_v61  ;;  %v3187_v61 = vrot.slane %v20770_v9, 2  ;;  %v3198_v17 = vshll.u32 %v16832_v25, 16  ;;  %v9024_v50 = vrot.slane %v17027_v8, 2  ;;  %v18892_v9 = vld [vmem:[%s20432_s1 + $0x10] sm:$0x3] }
 0x1ec   : > { %v3183_v52 = vrot.slane %v20768_v12, 2  ;;  %v9026_v38 = vrot.slane %v17028_v62, 2  ;;  %v3538_v11 = vld [vmem:[%s17154_s26 + $0x48] sm:$0xf] }
 0x1ed   : > { %v3169_v21 = vsel %vm833_vm4, %v3164_v40, %v3168_v15  ;;  %v9021_v40 = vsel %vm6000_vm8, %v9018_v55, %v9020_v29 }
 0x1ee   : > { %14628 = vmatmul.mubr.msk.bf16.gmra.mrb[16].mxu1 %vm349_vm1, %v3149_v24  ;;  %v3171_v24 = vrot.slane %v20762_v7, 2  ;;  %v3184_v36 = vor.u32 %v3183_v52, %v3182_v39  ;;  %v3200_v7 = vrot.slane %v3198_v17, 2  ;;  %v9027_v47 = vsel %vm6000_vm8, %v9024_v50, %v9026_v38  ;;  %v3533_v52 = vld [vmem:[%s17154_s26 + $0x34] sm:$0xf] }
 0x1ef   : > { %14631 = vmatprep.mubr.msk.bf16.mxu1 %vm349_vm1, %v3153_v33  ;;  %v3176_v33 = vor.u32 %v3175_v1, %v3174_v58  ;;  %v17034_v17 = vld [vmem:[%s17154_s26 + $0x94] sm:$0xff]  }
 0x1f0   : > { %v3172_v56 = vor.u32 %v3171_v24, %v3170_v16  ;;  %v3197_v16 = vrot.slane %v3195_v35, 1 }
 0x1f1   : > { %15196 = vmatmul.mubr.msk.bf16.gmra.mrb[32].mxu0 %vm349_vm1, %v8648_v22  ;;  %v20766_v22 = vshll.u32 %v18522_v27, 16  ;;  %v9019_v27 = vsel %vm6000_vm8, %v9016_v46, %v9018_v55  ;;  %v17029_v46 = vld [vmem:[%s17154_s26 + $0x6c] sm:$0xff]   ;;  %v17030_v55 = vld [vmem:[%s17154_s26 + $0x74] sm:$0xff]  }
 0x1f2   : > { %15199 = vmatprep.mubr.msk.bf16.mxu0 %vm349_vm1, %v8657_v32  ;;  %v3173_v45 = vsel %vm833_vm4, %v3168_v15, %v3172_v56  ;;  %v3177_v42 = vsel %vm833_vm4, %v3172_v56, %v3176_v33  ;;  %v3201_v1 = vor.u32 %v3200_v7, %v3197_v16  ;;  %v9030_v2 = vrot.slane %v17030_v55, 2  ;;  %v3542_v16 = vld [vmem:[%s17154_s26 + $0x58] sm:$0xf]  ;;  %v3543_v7 = vld [vmem:[%s17154_s26 + $0x5c] sm:$0xf] }
 0x1f3   : > { %v3179_v32 = vrot.slane %v20766_v22, 2 }
 0x1f5   : > { %v3180_v51 = vor.u32 %v3179_v32, %v3178_v18 }
 0x1f6   : > { %14632 = vmatmul.mubr.msk.bf16.gmra.mrb[20].mxu1 %vm349_vm1, %v3157_v34  ;;  %v17026_v34 = vld [vmem:[%s17154_s26 + $0x54] sm:$0xff]  }
 0x1f7   : > { %14635 = vmatprep.mubr.msk.bf16.mxu1 %vm349_vm1, %v3161_v28  ;;  %v3181_v54 = vsel %vm833_vm4, %v3176_v33, %v3180_v51  ;;  %v9022_v14 = vrot.slane %v17026_v34, 2  ;;  %v20769_v28 = vshrl.u32 %v18547_v5, 16  ;;  %v3185_v13 = vsel %vm833_vm4, %v3180_v51, %v3184_v36  ;;  %v3531_v33 = vld [vmem:[%s17154_s26 + $0x2c] sm:$0xf]  ;;  %v17031_v51 = vld [vmem:[%s17154_s26 + $0x7c] sm:$0xff]  }
 0x1f8   : > { %v18865_v32 = vcombine.low %v3531_v33, %v3532_v43 }
 0x1f9   : > { %15200 = vmatmul.mubr.msk.bf16.gmra.mrb[36].mxu0 %vm349_vm1, %v8666_v48  ;;  %v3186_v19 = vrot.slane %v20769_v28, 1  ;;  %v3190_v48 = vrot.slane %v2762_v10, 1  ;;  %v9023_v5 = vsel %vm6000_vm8, %v9020_v29, %v9022_v14  ;;  %v3526_v10 = vld [vmem:[%s17154_s26 + $0x18] sm:$0xf]  ;;  %v9025_v58 = vsel %vm6000_vm8, %v9022_v14, %v9024_v50  ;;  %v17032_v29 = vld [vmem:[%s17154_s26 + $0x84] sm:$0xff]  }
 0x1fa   : > { %15203 = vmatprep.mubr.msk.bf16.mxu0 %vm349_vm1, %v8675_v57  ;;  %v3690_v12 = vrot.slane %v18865_v32, 3  ;;  %v4331_v28 = vsel %vm416_vm0, %v18659_v23, 0 }
 0x1fb   : > { %v3188_v57 = vor.u32 %v3187_v61, %v3186_v19  ;;  %v3192_v15 = vor.u32 %v3191_v31, %v3190_v48  ;;  %v3537_v48 = vld [vmem:[%s17154_s26 + $0x44] sm:$0xf]  ;;  %v3539_v31 = vld [vmem:[%s17154_s26 + $0x4c] sm:$0xf] }
 0x1fd   : > { %v3189_v59 = vsel %vm833_vm4, %v3184_v36, %v3188_v57  ;;  %v3193_v24 = vsel %vm833_vm4, %v3188_v57, %v3192_v15  ;;  %v3202_v49 = vsel %vm833_vm4, %v3192_v15, %v3201_v1  ;;  %v9032_v36 = vrot.slane %v17031_v51, 2 }
 0x1fe   : > { %14636 = vmatmul.mubr.msk.bf16.gmra.mrb[24].mxu1 %vm349_vm1, %v3165_v63  ;;  %v3527_v63 = vld [vmem:[%s17154_s26 + $0x1c] sm:$0xf]  ;;  %v9038_v15 = vrot.slane %v17034_v17, 2 }
 0x1ff   : > { %14639 = vmatprep.mubr.msk.bf16.mxu1 %vm349_vm1, %v3169_v21  ;;  %v18842_v21 = vcombine.low %v3525_v30, %v3526_v10  ;;  %v18845_v20 = vcombine.low %v3527_v63, %v18505_v53  ;;  %v9033_v61 = vsel %vm6000_vm8, %v9030_v2, %v9032_v36  ;;  %v18911_v30 = vcombine.low %v3537_v48, %v3538_v11 }
 0x201   : > { %15204 = vmatmul.mubr.msk.bf16.gmra.mrb[40].mxu0 %vm349_vm1, %v8684_v60  ;;  %v3530_v60 = vld [vmem:[%s17154_s26 + $0x28] sm:$0xf]  ;;  %v3686_v56 = vrot.slane %v18845_v20, 3 }
 0x202   : > { %15209 = vmatprep.mubr.msk.bf16.mxu0 %vm349_vm1, %v9015_v6  ;;  %v3685_v6 = vrot.slane %v18842_v21, 3  ;;  %v18862_v18 = vcombine.low %v18508_v0, %v3530_v60  ;;  %v17036_v60 = vld [vmem:[%s17154_s26 + $0xa4] sm:$0xff]  }
 0x204   : > { %v3687_v22 = vsel %vm1372_vm3, %v3685_v6, %v3686_v56  ;;  %v3688_v39 = vrot.slane %v18862_v18, 3  ;;  %v9042_v6 = vrot.slane %v17036_v60, 2 }
 0x206   : > { %14640 = vmatmul.mubr.msk.bf16.gmra.mrb[28].mxu1 %vm349_vm1, %v3173_v45  ;;  %v9028_v45 = vrot.slane %v17029_v46, 2  ;;  %v3689_v41 = vsel %vm1372_vm3, %v3686_v56, %v3688_v39  ;;  %v3691_v14 = vsel %vm1372_vm3, %v3688_v39, %v3690_v12  ;;  %v17037_v39 = vld [vmem:[%s17154_s26 + $0xac] sm:$0xff]  }
 0x207   : > { %14643 = vmatprep.mubr.msk.bf16.mxu1 %vm349_vm1, %v3177_v42 }
 0x208   : > { %v9029_v42 = vsel %vm6000_vm8, %v9026_v38, %v9028_v45  ;;  %v9031_v37 = vsel %vm6000_vm8, %v9028_v45, %v9030_v2  ;;  %v3541_v38 = vld [vmem:[%s17154_s26 + $0x54] sm:$0xf]  ;;  %v3545_v2 = vld [vmem:[%s17154_s26 + $0x64] sm:$0xf] }
 0x209   : > { %15210 = vmatmul.mubr.msk.bf16.vlgmr.msra.gmra.mrb[0].mxu0 %vm349_vm1, %v9017_v4  ;;  %v3534_v4 = vld [vmem:[%s17154_s26 + $0x38] sm:$0xf]  ;;  %v18931_v56 = vcombine.low %v3541_v38, %v3542_v16  ;;  %v17041_v16 = vld [vmem:[%s17154_s26 + $0xcc] sm:$0xff]  }
 0x20a   : > { %15254 = vmatpush3.bf16.msra.mxu0 %v9813_v3  ;;  %15213 = vmatprep.mubr.msk.bf16.mxu0 %vm349_vm1, %v9019_v27  ;;  %v3535_v3 = vld [vmem:[%s17154_s26 + $0x3c] sm:$0xf]  ;;  %v3536_v27 = vld [vmem:[%s17154_s26 + $0x40] sm:$0xf]  ;;  %v18882_v34 = vcombine.low %v3533_v52, %v3534_v4  ;;  %v17038_v4 = vld [vmem:[%s17154_s26 + $0xb4] sm:$0xff]  }
 0x20b   : > { %16652 = vmatprep.subr.msk.bf16.mxu0 %vm416_vm0, %v18810_v26  ;;  %v18887_v19 = vcombine.low %v3535_v3, %v3536_v27  ;;  %v9046_v3 = vrot.slane %v17038_v4, 2 }
 0x20d   : > { %v3694_v23 = vrot.slane %v18887_v19, 3 }
 0x20e   : > { %14644 = vmatmul.mubr.msk.bf16.gmra.mrb[32].mxu1 %vm349_vm1, %v3181_v54  ;;  %v9034_v54 = vrot.slane %v17032_v29, 2 }
 0x20f   : > { %14647 = vmatprep.mubr.msk.bf16.mxu1 %vm349_vm1, %v3185_v13  ;;  %v3692_v13 = vrot.slane %v18882_v34, 3 }
 0x210   : > { %v9035_v25 = vsel %vm6000_vm8, %v9032_v36, %v9034_v54 }
 0x211   : > { %15214 = vmatmul.mubr.msk.bf16.gmra.mrb[4].mxu0 %vm349_vm1, %v9021_v40  ;;  %v3540_v40 = vld [vmem:[%s17154_s26 + $0x50] sm:$0xf]  ;;  %v3693_v35 = vsel %vm1372_vm3, %v3690_v12, %v3692_v13  ;;  %v3695_v10 = vsel %vm1372_vm3, %v3692_v13, %v3694_v23  ;;  %v9044_v12 = vrot.slane %v17037_v39, 2  ;;  %v3552_v13 = vld [vmem:[%s17154_s26 + $0x80] sm:$0xf] }
 0x212   : > { %15217 = vmatprep.mubr.msk.bf16.mxu0 %vm349_vm1, %v9023_v5  ;;  %v17033_v5 = vld [vmem:[%s17154_s26 + $0x8c] sm:$0xff]   ;;  %v18914_v63 = vcombine.low %v3539_v31, %v3540_v40  ;;  %v17040_v31 = vld [vmem:[%s17154_s26 + $0xc4] sm:$0xff]  }
 0x213   : > { %v9036_v57 = vrot.slane %v17033_v5, 2  ;;  %v9047_v29 = vsel %vm6000_vm8, %v9044_v12, %v9046_v3  ;;  %v9050_v40 = vrot.slane %v17040_v31, 2 }
 0x214   : > { %v3698_v62 = vrot.slane %v18914_v63, 3 }
 0x215   : > { %v9037_v8 = vsel %vm6000_vm8, %v9034_v54, %v9036_v57  ;;  %v9039_v50 = vsel %vm6000_vm8, %v9036_v57, %v9038_v15 }
 0x216   : > { %14648 = vmatmul.mubr.msk.bf16.gmra.mrb[36].mxu1 %vm349_vm1, %v3189_v59  ;;  %v3696_v59 = vrot.slane %v18911_v30, 3 }
 0x217   : > { %14651 = vmatprep.mubr.msk.bf16.mxu1 %vm349_vm1, %v3193_v24  ;;  %v3544_v24 = vld [vmem:[%s17154_s26 + $0x60] sm:$0xf] }
 0x218   : > { %v3697_v1 = vsel %vm1372_vm3, %v3694_v23, %v3696_v59  ;;  %v3699_v33 = vsel %vm1372_vm3, %v3696_v59, %v3698_v62  ;;  %v18934_v43 = vcombine.low %v3543_v7, %v3544_v24  ;;  %v17039_v23 = vld [vmem:[%s17154_s26 + $0xbc] sm:$0xff]   ;;  %v3553_v59 = vld [vmem:[%s17154_s26 + $0x84] sm:$0xf]  ;;  %v9052_v7 = vrot.slane %v17041_v16, 2  ;;  %v3555_v24 = vld [vmem:[%s17154_s26 + $0x8c] sm:$0xf] }
 0x219   : > { %15218 = vmatmul.mubr.msk.bf16.gmra.mrb[8].mxu0 %vm349_vm1, %v9025_v58  ;;  %v17035_v58 = vld [vmem:[%s17154_s26 + $0x9c] sm:$0xff]   ;;  %v9048_v48 = vrot.slane %v17039_v23, 2 }
 0x21a   : > { %15221 = vmatprep.mubr.msk.bf16.mxu0 %vm349_vm1, %v9027_v47  ;;  %v9040_v47 = vrot.slane %v17035_v58, 2  ;;  %v3702_v55 = vrot.slane %v18934_v43, 3  ;;  %v3556_v58 = vld [vmem:[%s17154_s26 + $0x90] sm:$0xf] }
 0x21b   : > { %v9049_v17 = vsel %vm6000_vm8, %v9046_v3, %v9048_v48 }
 0x21c   : > { %v9041_v46 = vsel %vm6000_vm8, %v9038_v15, %v9040_v47  ;;  %v9043_v45 = vsel %vm6000_vm8, %v9040_v47, %v9042_v6  ;;  %v16849_v15 = vld [vmem:[%s17154_s26 + $0x34] sm:$0xf8]  }
 0x21d   : > { %v9544_v60 = vshll.u32 %v16849_v15, 16 }
 0x21e   : > { %14652 = vmatmul.mubr.msk.bf16.gmra.mrb[40].mxu1 %vm349_vm1, %v3202_v49  ;;  %v3700_v49 = vrot.slane %v18931_v56, 3 }
 0x21f   : > { %14657 = vmatprep.mubr.msk.bf16.mxu1 %vm349_vm1, %v3687_v22  ;;  %v3546_v22 = vld [vmem:[%s17154_s26 + $0x68] sm:$0xf]  ;;  %v9546_v39 = vrot.slane %v9544_v60, 4  ;;  %v3563_v60 = vld [vmem:[%s17154_s26 + $0xac] sm:$0xf] }
 0x220   : > { %v3701_v52 = vsel %vm1372_vm3, %v3698_v62, %v3700_v49  ;;  %v18951_v27 = vcombine.low %v3545_v2, %v3546_v22  ;;  %v3703_v51 = vsel %vm1372_vm3, %v3700_v49, %v3702_v55  ;;  %v3554_v62 = vld [vmem:[%s17154_s26 + $0x88] sm:$0xf]  ;;  %v18996_v2 = vcombine.low %v3555_v24, %v3556_v58  ;;  %v3561_v24 = vld [vmem:[%s17154_s26 + $0xa4] sm:$0xf] }
 0x221   : > { %15222 = vmatmul.mubr.msk.bf16.gmra.mrb[12].mxu0 %vm349_vm1, %v9029_v42  ;;  %v3547_v42 = vld [vmem:[%s17154_s26 + $0x6c] sm:$0xf]  ;;  %v18991_v47 = vcombine.low %v3553_v59, %v3554_v62  ;;  %v9053_v22 = vsel %vm6000_vm8, %v9050_v40, %v9052_v7  ;;  %v16858_v62 = vld [vmem:[%s17154_s26 + $0x5c] sm:$0xff]   ;;  %v3562_v58 = vld [vmem:[%s17154_s26 + $0xa8] sm:$0xf] }
 0x222   : > { %15225 = vmatprep.mubr.msk.bf16.mxu0 %vm349_vm1, %v9031_v37  ;;  %v3548_v37 = vld [vmem:[%s17154_s26 + $0x70] sm:$0xf]  ;;  %v3704_v54 = vrot.slane %v18951_v27, 3 }
 0x223   : > { %v18954_v36 = vcombine.low %v3547_v42, %v3548_v37  ;;  %v3712_v42 = vrot.slane %v18991_v47, 3 }
 0x224   : > { %v3705_v11 = vsel %vm1372_vm3, %v3702_v55, %v3704_v54 }
 0x226   : > { %14658 = vmatmul.mubr.msk.bf16.vlgmr.msra.gmra.mrb[0].mxu1 %vm349_vm1, %v3689_v41  ;;  %v9045_v41 = vsel %vm6000_vm8, %v9042_v6, %v9044_v12 }
 0x227   : > { %14661 = vmatprep.mubr.msk.bf16.mxu1 %vm349_vm1, %v3691_v14  ;;  %14702 = vmatpush3.bf16.msra.mxu1 %v4331_v28  ;;  %v3706_v14 = vrot.slane %v18954_v36, 3  ;;  %v3549_v28 = vld [vmem:[%s17154_s26 + $0x74] sm:$0xf] }
 0x228   : > { %16639 = vmatprep.subr.msk.bf16.mxu1 %vm416_vm0, %v18892_v9 }
 0x229   : > { %15226 = vmatmul.mubr.msk.bf16.gmra.mrb[16].mxu0 %vm349_vm1, %v9033_v61  ;;  %v3550_v61 = vld [vmem:[%s17154_s26 + $0x78] sm:$0xf]  ;;  %v3707_v57 = vsel %vm1372_vm3, %v3704_v54, %v3706_v14  ;;  %v3714_v54 = vrot.slane %v18996_v2, 3 }
 0x22a   : > { %15229 = vmatprep.mubr.msk.bf16.mxu0 %vm349_vm1, %v9035_v25  ;;  %v3551_v25 = vld [vmem:[%s17154_s26 + $0x7c] sm:$0xf]  ;;  %v18971_v5 = vcombine.low %v3549_v28, %v3550_v61  ;;  %v3560_v61 = vld [vmem:[%s17154_s26 + $0xa0] sm:$0xf] }
 0x22b   : > { %v3559_v28 = vld [vmem:[%s17154_s26 + $0x9c] sm:$0xf] }
 0x22e   : > { %14662 = vmatmul.mubr.msk.bf16.gmra.mrb[4].mxu1 %vm349_vm1, %v3693_v35  ;;  %v18974_v35 = vcombine.low %v3551_v25, %v3552_v13 }
 0x22f   : > { %14665 = vmatprep.mubr.msk.bf16.mxu1 %vm349_vm1, %v3695_v10  ;;  %v16850_v10 = vld [vmem:[%s17154_s26 + $0x3c] sm:$0xff]  }
 0x230   : > { %v3710_v38 = vrot.slane %v18974_v35, 3  ;;  %v9549_v6 = vshrl.u32 %v16850_v10, 16  ;;  %v9552_v49 = vshll.u32 %v16850_v10, 16 }
 0x231   : > { %15230 = vmatmul.mubr.msk.bf16.gmra.mrb[20].mxu0 %vm349_vm1, %v9037_v8  ;;  %v9051_v8 = vsel %vm6000_vm8, %v9048_v48, %v9050_v40 }
 0x232   : > { %15233 = vmatprep.mubr.msk.bf16.mxu0 %vm349_vm1, %v9039_v50  ;;  %v3708_v50 = vrot.slane %v18971_v5, 3  ;;  %v9551_v12 = vrot.slane %v9549_v6, 3  ;;  %v9554_v3 = vrot.slane %v9552_v49, 4  ;;  %v3713_v25 = vsel %vm1372_vm3, %v3710_v38, %v3712_v42  ;;  %v3564_v6 = vld [vmem:[%s17154_s26 + $0xb0] sm:$0xf] }
 0x233   : > { %v19033_v49 = vcombine.low %v3561_v24, %v3562_v58 }
 0x234   : > { %v3711_v55 = vsel %vm1372_vm3, %v3708_v50, %v3710_v38  ;;  %v9555_v31 = vor.u32 %v9554_v3, %v9551_v12 }
 0x236   : > { %14666 = vmatmul.mubr.msk.bf16.gmra.mrb[8].mxu1 %vm349_vm1, %v3697_v1  ;;  %v9541_v1 = vshrl.u32 %v16849_v15, 16  ;;  %v16856_v15 = vld [vmem:[%s17154_s26 + $0x54] sm:$0xff]  }
 0x237   : > { %14669 = vmatprep.mubr.msk.bf16.mxu1 %vm349_vm1, %v3699_v33  ;;  %v3709_v33 = vsel %vm1372_vm3, %v3706_v14, %v3708_v50  ;;  %v9056_v14 = vrot.slane %v18746_v44, 2  ;;  %v19017_v44 = vcombine.low %v3559_v28, %v3560_v61 }
 0x238   : > { %v9543_v37 = vrot.slane %v9541_v1, 3 }
 0x239   : > { %15234 = vmatmul.mubr.msk.bf16.gmra.mrb[24].mxu0 %vm349_vm1, %v9041_v46  ;;  %v17042_v46 = vld [vmem:[%s17154_s26 + $0xd4] sm:$0xff]   ;;  %v3718_v1 = vrot.slane %v19017_v44, 3 }
 0x23a   : > { %15237 = vmatprep.mubr.msk.bf16.mxu0 %vm349_vm1, %v9043_v45  ;;  %v9054_v45 = vrot.slane %v17042_v46, 2  ;;  %v9579_v46 = vshll.u32 %v16856_v15, 16 }
 0x23c   : > { %v9055_v4 = vsel %vm6000_vm8, %v9052_v7, %v9054_v45  ;;  %v9057_v10 = vsel %vm6000_vm8, %v9054_v45, %v9056_v14  ;;  %v16862_v14 = vld [vmem:[%s17154_s26 + $0x6c] sm:$0xff]  }
 0x23e   : > { %14670 = vmatmul.mubr.msk.bf16.gmra.mrb[12].mxu1 %vm349_vm1, %v3701_v52  ;;  %v16852_v52 = vld [vmem:[%s17154_s26 + $0x44] sm:$0xff]  }
 0x23f   : > { %14673 = vmatprep.mubr.msk.bf16.mxu1 %vm349_vm1, %v3703_v51  ;;  %v3557_v51 = vld [vmem:[%s17154_s26 + $0x94] sm:$0xf]  ;;  %v9558_v13 = vshrl.u32 %v16852_v52, 16  ;;  %v9561_v23 = vshll.u32 %v16852_v52, 16 }
 0x241   : > { %15238 = vmatmul.mubr.msk.bf16.gmra.mrb[28].mxu0 %vm349_vm1, %v9045_v41  ;;  %v3558_v41 = vld [vmem:[%s17154_s26 + $0x98] sm:$0xf]  ;;  %v9563_v50 = vrot.slane %v9561_v23, 4 }
 0x242   : > { %15241 = vmatprep.mubr.msk.bf16.mxu0 %vm349_vm1, %v9047_v29  ;;  %v16854_v29 = vld [vmem:[%s17154_s26 + $0x4c] sm:$0xff]   ;;  %v19014_v48 = vcombine.low %v3557_v51, %v3558_v41  ;;  %v10475_v51 = vsel %vm416_vm0, %v18810_v26, 0  ;;  %v3720_v41 = vrot.slane %v19033_v49, 3  ;;  %v3566_v23 = vld [vmem:[%s17154_s26 + $0xb8] sm:$0xf] }
 0x243   : > { %v9567_v40 = vshrl.u32 %v16854_v29, 16  ;;  %v19056_v26 = vld [vmem:[%s20432_s1 + $0x2a] sm:$0x3] }
 0x244   : > { %v3716_v59 = vrot.slane %v19014_v48, 3 }
 0x245   : > { %v9569_v16 = vrot.slane %v9567_v40, 3 }
 0x246   : > { %14674 = vmatmul.mubr.msk.bf16.gmra.mrb[16].mxu1 %vm349_vm1, %v3705_v11  ;;  %v9547_v11 = vor.u32 %v9546_v39, %v9543_v37  ;;  %v9588_v37 = vshll.u32 %v16858_v62, 16  ;;  %v19036_v39 = vcombine.low %v3563_v60, %v3564_v6  ;;  %v3719_v12 = vsel %vm1372_vm3, %v3716_v59, %v3718_v1 }
 0x247   : > { %14677 = vmatprep.mubr.msk.bf16.mxu1 %vm349_vm1, %v3707_v57  ;;  %v9570_v57 = vshll.u32 %v16854_v29, 16 }
 0x248   : > { %v9556_v38 = vsel %vm1900_vm5, %v9547_v11, %v9555_v31  ;;  %v9590_v61 = vrot.slane %v9588_v37, 4  ;;  %v3567_v11 = vld [vmem:[%s17154_s26 + $0xbc] sm:$0xf]  ;;  %v4070_v37 = vshll.u32 %v18845_v20, 16 }
 0x249   : > { %15242 = vmatmul.mubr.msk.bf16.gmra.mrb[32].mxu0 %vm349_vm1, %v9049_v17  ;;  %v3715_v17 = vsel %vm1372_vm3, %v3712_v42, %v3714_v54  ;;  %v9572_v7 = vrot.slane %v9570_v57, 4 }
 0x24a   : > { %15245 = vmatprep.mubr.msk.bf16.mxu0 %vm349_vm1, %v9051_v8  ;;  %v9560_v8 = vrot.slane %v9558_v13, 3  ;;  %v3565_v13 = vld [vmem:[%s17154_s26 + $0xb4] sm:$0xf] }
 0x24b   : > { %v9573_v42 = vor.u32 %v9572_v7, %v9569_v16  ;;  %v16864_v7 = vld [vmem:[%s17154_s26 + $0x74] sm:$0xff]  }
 0x24c   : > { %v9564_v45 = vor.u32 %v9563_v50, %v9560_v8  ;;  %v3721_v8 = vsel %vm1372_vm3, %v3718_v1, %v3720_v41 }
 0x24e   : > { %14678 = vmatmul.mubr.msk.bf16.gmra.mrb[20].mxu1 %vm349_vm1, %v3709_v33  ;;  %v9576_v33 = vshrl.u32 %v16856_v15, 16  ;;  %v9565_v3 = vsel %vm1900_vm5, %v9555_v31, %v9564_v45  ;;  %v9574_v28 = vsel %vm1900_vm5, %v9564_v45, %v9573_v42  ;;  %v3568_v31 = vld [vmem:[%s17154_s26 + $0xc0] sm:$0xf]  ;;  %v9603_v15 = vshrl.u32 %v16862_v14, 16 }
 0x24f   : > { %14681 = vmatprep.mubr.msk.bf16.mxu1 %vm349_vm1, %v3711_v55  ;;  %v9585_v55 = vshrl.u32 %v16858_v62, 16  ;;  %v19063_v62 = vcombine.low %v3567_v11, %v3568_v31  ;;  %v16866_v45 = vld [vmem:[%s17154_s26 + $0x7c] sm:$0xff]   ;;  %v16867_v11 = vld [vmem:[%s17154_s26 + $0x84] sm:$0xff]  }
 0x250   : > { %v9578_v52 = vrot.slane %v9576_v33, 3  ;;  %v9605_v60 = vrot.slane %v9603_v15, 3 }
 0x251   : > { %15246 = vmatmul.mubr.msk.bf16.gmra.mrb[36].mxu0 %vm349_vm1, %v9053_v22  ;;  %v3717_v22 = vsel %vm1372_vm3, %v3714_v54, %v3716_v59  ;;  %v9587_v29 = vrot.slane %v9585_v55, 3  ;;  %v16860_v54 = vld [vmem:[%s17154_s26 + $0x64] sm:$0xff]   ;;  %v19061_v59 = vcombine.low %v3565_v13, %v3566_v23  ;;  %v4059_v55 = vshrl.u32 %v18842_v21, 16 }
 0x252   : > { %15249 = vmatprep.mubr.msk.bf16.mxu0 %vm349_vm1, %v9055_v4  ;;  %v9581_v4 = vrot.slane %v9579_v46, 4  ;;  %v9594_v57 = vshrl.u32 %v16860_v54, 16  ;;  %v3726_v46 = vrot.slane %v19063_v62, 3 }
 0x253   : > { %v9591_v50 = vor.u32 %v9590_v61, %v9587_v29  ;;  %v3724_v33 = vrot.slane %v19061_v59, 3  ;;  %v4072_v61 = vrot.slane %v4070_v37, 4 }
 0x254   : > { %v9582_v40 = vor.u32 %v9581_v4, %v9578_v52  ;;  %v9596_v24 = vrot.slane %v9594_v57, 3  ;;  %v9615_v52 = vshll.u32 %v16864_v7, 16 }
 0x255   : > { %v3727_v29 = vsel %vm1372_vm3, %v3724_v33, %v3726_v46 }
 0x256   : > { %14682 = vmatmul.mubr.msk.bf16.gmra.mrb[24].mxu1 %vm349_vm1, %v3713_v25  ;;  %v3722_v25 = vrot.slane %v19036_v39, 3  ;;  %v9583_v16 = vsel %vm1900_vm5, %v9573_v42, %v9582_v40  ;;  %v9592_v6 = vsel %vm1900_vm5, %v9582_v40, %v9591_v50  ;;  %v4067_v42 = vshrl.u32 %v18845_v20, 16 }
 0x257   : > { %14685 = vmatprep.mubr.msk.bf16.mxu1 %vm349_vm1, %v3715_v17  ;;  %v9597_v17 = vshll.u32 %v16860_v54, 16  ;;  %v9624_v54 = vshll.u32 %v16866_v45, 16  ;;  %v9617_v23 = vrot.slane %v9615_v52, 4 }
 0x258   : > { %v4069_v20 = vrot.slane %v4067_v42, 3 }
 0x259   : > { %15250 = vmatmul.mubr.msk.bf16.gmra.mrb[40].mxu0 %vm349_vm1, %v9057_v10  ;;  %v9606_v10 = vshll.u32 %v16862_v14, 16  ;;  %v9599_v58 = vrot.slane %v9597_v17, 4  ;;  %v4061_v14 = vrot.slane %v4059_v55, 3  ;;  %v16868_v17 = vld [vmem:[%s17154_s26 + $0x8c] sm:$0xff]   ;;  %v9626_v15 = vrot.slane %v9624_v54, 4 }
 0x25a   : > { %15255 = vmatprep.mubr.msk.bf16.mxu0 %vm349_vm1, %v9556_v38  ;;  %v3723_v38 = vsel %vm1372_vm3, %v3720_v41, %v3722_v25  ;;  %v3725_v41 = vsel %vm1372_vm3, %v3722_v25, %v3724_v33 }
 0x25b   : > { %v9608_v1 = vrot.slane %v9606_v10, 4  ;;  %v9600_v4 = vor.u32 %v9599_v58, %v9596_v24  ;;  %v4076_v10 = vshrl.u32 %v18862_v18, 16  ;;  %v9630_v58 = vshrl.u32 %v16867_v11, 16 }
 0x25d   : > { %v9601_v31 = vsel %vm1900_vm5, %v9591_v50, %v9600_v4  ;;  %v4088_v50 = vshll.u32 %v18865_v32, 16 }
 0x25e   : > { %14686 = vmatmul.mubr.msk.bf16.gmra.mrb[28].mxu1 %vm349_vm1, %v3717_v22  ;;  %v4062_v22 = vshll.u32 %v18842_v21, 16  ;;  %v9621_v21 = vshrl.u32 %v16866_v45, 16 }
 0x25f   : > { %14689 = vmatprep.mubr.msk.bf16.mxu1 %vm349_vm1, %v3719_v12  ;;  %v9612_v12 = vshrl.u32 %v16864_v7, 16  ;;  %v4085_v7 = vshrl.u32 %v18865_v32, 16  ;;  %v4090_v32 = vrot.slane %v4088_v50, 4  ;;  %v19119_v50 = vld [vmem:[%s20432_s1 + $0x12] sm:$0x3] }
 0x260   : > { %v9623_v25 = vrot.slane %v9621_v21, 3 }
 0x261   : > { %15256 = vmatmul.mubr.msk.bf16.vlgmr.msra.gmra.mrb[0].mxu0 %vm349_vm1, %v9565_v3  ;;  %v9609_v3 = vor.u32 %v9608_v1, %v9605_v60  ;;  %v9614_v13 = vrot.slane %v9612_v12, 3  ;;  %v9633_v60 = vshll.u32 %v16867_v11, 16  ;;  %v9639_v1 = vshrl.u32 %v16868_v17, 16 }
 0x262   : > { %15300 = vmatpush3.bf16.msra.mxu0 %v10475_v51  ;;  %15259 = vmatprep.mubr.msk.bf16.mxu0 %vm349_vm1, %v9574_v28  ;;  %v16865_v51 = vld [vmem:[%s17154_s26 + $0xc4] ss:$0 sps:$4 sm:$0x77]   ;;  %v4064_v28 = vrot.slane %v4062_v22, 4  ;;  %v9627_v45 = vor.u32 %v9626_v15, %v9623_v25  ;;  %v4087_v42 = vrot.slane %v4085_v7, 3  ;;  %v9632_v12 = vrot.slane %v9630_v58, 3 }
 0x263   : > { %16653 = vmatprep.subr.msk.bf16.mxu0 %vm416_vm0, %v19056_v26  ;;  %v9610_v40 = vsel %vm1900_vm5, %v9600_v4, %v9609_v3  ;;  %v3728_v57 = vrot.slane %v16865_v51, 3  ;;  %v9618_v24 = vor.u32 %v9617_v23, %v9614_v13  ;;  %v9635_v52 = vrot.slane %v9633_v60, 4  ;;  %v16869_v4 = vld [vmem:[%s17154_s26 + $0x94] sm:$0xff]   ;;  %v16871_v7 = vld [vmem:[%s17154_s26 + $0xa4] sm:$0xff]   ;;  %v16872_v60 = vld [vmem:[%s17154_s26 + $0xac] sm:$0xff]  }
 0x264   : > { %v9641_v51 = vrot.slane %v9639_v1, 3  ;;  %v9651_v13 = vshll.u32 %v16869_v4, 16 }
 0x265   : > { %v3729_v33 = vsel %vm1372_vm3, %v3726_v46, %v3728_v57  ;;  %v9619_v37 = vsel %vm1900_vm5, %v9609_v3, %v9618_v24  ;;  %v4097_v46 = vshll.u32 %v18882_v34, 16  ;;  %v9628_v21 = vsel %vm1900_vm5, %v9618_v24, %v9627_v45 }
 0x266   : > { %14690 = vmatmul.mubr.msk.bf16.gmra.mrb[32].mxu1 %vm349_vm1, %v3721_v8  ;;  %v4079_v8 = vshll.u32 %v18862_v18, 16  ;;  %v4078_v18 = vrot.slane %v4076_v10, 3  ;;  %v4103_v3 = vshrl.u32 %v18887_v19, 16  ;;  %v9636_v23 = vor.u32 %v9635_v52, %v9632_v12 }
 0x267   : > { %14693 = vmatprep.mubr.msk.bf16.mxu1 %vm349_vm1, %v3723_v38  ;;  %v4065_v38 = vor.u32 %v4064_v28, %v4061_v14  ;;  %v16870_v14 = vld [vmem:[%s17154_s26 + $0x9c] sm:$0xff]   ;;  %v4091_v28 = vor.u32 %v4090_v32, %v4087_v42  ;;  %v9666_v42 = vshrl.u32 %v16871_v7, 16  ;;  %v9669_v32 = vshll.u32 %v16871_v7, 16 }
 0x268   : > { %v4081_v55 = vrot.slane %v4079_v8, 4  ;;  %v9657_v57 = vshrl.u32 %v16870_v14, 16  ;;  %v4105_v15 = vrot.slane %v4103_v3, 3  ;;  %v9637_v24 = vsel %vm1900_vm5, %v9627_v45, %v9636_v23 }
 0x269   : > { %15260 = vmatmul.mubr.msk.bf16.gmra.mrb[4].mxu0 %vm349_vm1, %v9583_v16  ;;  %v4073_v16 = vor.u32 %v4072_v61, %v4069_v20  ;;  %v4106_v20 = vshll.u32 %v18887_v19, 16  ;;  %v9648_v61 = vshrl.u32 %v16869_v4, 16  ;;  %v4677_v19 = vsel %vm416_vm0, %v18892_v9, 0 }
 0x26a   : > { %15263 = vmatprep.mubr.msk.bf16.mxu0 %vm349_vm1, %v9592_v6  ;;  %v9642_v6 = vshll.u32 %v16868_v17, 16  ;;  %v4082_v54 = vor.u32 %v4081_v55, %v4078_v18  ;;  %v9660_v17 = vshll.u32 %v16870_v14, 16  ;;  %v9659_v9 = vrot.slane %v9657_v57, 3  ;;  %v16873_v14 = vld [vmem:[%s17154_s26 + $0xb4] sm:$0xff]  }
 0x26b   : > { %v4074_v22 = vsel %vm1900_vm5, %v4065_v38, %v4073_v16  ;;  %v4108_v10 = vrot.slane %v4106_v20, 4  ;;  %v9650_v8 = vrot.slane %v9648_v61, 3  ;;  %v9653_v38 = vrot.slane %v9651_v13, 4 }
 0x26c   : > { %v4092_v25 = vsel %vm1900_vm5, %v4082_v54, %v4091_v28  ;;  %v9662_v1 = vrot.slane %v9660_v17, 4  ;;  %v4121_v55 = vshrl.u32 %v18914_v63, 16  ;;  %v4124_v45 = vshll.u32 %v18914_v63, 16 }
 0x26d   : > { %v4109_v18 = vor.u32 %v4108_v10, %v4105_v15  ;;  %v9678_v12 = vshll.u32 %v16872_v60, 16  ;;  %v4130_v61 = vshrl.u32 %v18931_v56, 16  ;;  %v9684_v57 = vshrl.u32 %v16873_v14, 16 }
 0x26e   : > { %14694 = vmatmul.mubr.msk.bf16.gmra.mrb[36].mxu1 %vm349_vm1, %v3725_v41  ;;  %v9644_v41 = vrot.slane %v9642_v6, 4  ;;  %v4112_v6 = vshrl.u32 %v18911_v30, 16  ;;  %v9663_v52 = vor.u32 %v9662_v1, %v9659_v9  ;;  %v9687_v17 = vshll.u32 %v16873_v14, 16  ;;  %v16877_v14 = vld [vmem:[%s17154_s26 + $0xd4] sm:$0xff]  }
 0x26f   : > { %14697 = vmatprep.mubr.msk.bf16.mxu1 %vm349_vm1, %v3727_v29  ;;  %v4094_v29 = vshrl.u32 %v18882_v34, 16  ;;  %v9680_v20 = vrot.slane %v9678_v12, 4 }
 0x270   : > { %v9645_v34 = vor.u32 %v9644_v41, %v9641_v51  ;;  %v4114_v4 = vrot.slane %v4112_v6, 3  ;;  %v4123_v41 = vrot.slane %v4121_v55, 3  ;;  %v16875_v6 = vld [vmem:[%s17154_s26 + $0xc4] sm:$0xff]  }
 0x271   : > { %15264 = vmatmul.mubr.msk.bf16.gmra.mrb[8].mxu0 %vm349_vm1, %v9601_v31  ;;  %v4096_v11 = vrot.slane %v4094_v29, 3  ;;  %v4099_v31 = vrot.slane %v4097_v46, 4  ;;  %v4126_v29 = vrot.slane %v4124_v45, 4  ;;  %v4148_v45 = vshrl.u32 %v18951_v27, 16 }
 0x272   : > { %15267 = vmatprep.mubr.msk.bf16.mxu0 %vm349_vm1, %v9610_v40  ;;  %v4083_v40 = vsel %vm1900_vm5, %v4073_v16, %v4082_v54  ;;  %v9646_v16 = vsel %vm1900_vm5, %v9636_v23, %v9645_v34  ;;  %v9671_v54 = vrot.slane %v9669_v32, 4  ;;  %v4157_v32 = vshrl.u32 %v18954_v36, 16 }
 0x273   : > { %v4100_v58 = vor.u32 %v4099_v31, %v4096_v11  ;;  %v16874_v11 = vld [vmem:[%s17154_s26 + $0xbc] sm:$0xff]   ;;  %v4127_v31 = vor.u32 %v4126_v29, %v4123_v41 }
 0x275   : > { %v4110_v63 = vsel %vm1900_vm5, %v4100_v58, %v4109_v18 }
 0x276   : > { %14698 = vmatmul.mubr.msk.bf16.gmra.mrb[40].mxu1 %vm349_vm1, %v3729_v33  ;;  %v4115_v33 = vshll.u32 %v18911_v30, 16  ;;  %v4101_v30 = vsel %vm1900_vm5, %v4091_v28, %v4100_v58  ;;  %v4133_v28 = vshll.u32 %v18931_v56, 16  ;;  %v9689_v58 = vrot.slane %v9687_v17, 4 }
 0x277   : > { %14703 = vmatprep.mubr.msk.bf16.mxu1 %vm349_vm1, %v4074_v22  ;;  %v9654_v22 = vor.u32 %v9653_v38, %v9650_v8  ;;  %v9693_v8 = vshrl.u32 %v16874_v11, 16  ;;  %v9696_v38 = vshll.u32 %v16874_v11, 16  ;;  %v4178_v17 = vshll.u32 %v18974_v35, 16 }
 0x278   : > { %v4117_v51 = vrot.slane %v4115_v33, 4  ;;  %v4135_v15 = vrot.slane %v4133_v28, 4  ;;  %v16876_v33 = vld [vmem:[%s17154_s26 + $0xcc] sm:$0xff]  }
 0x279   : > { %15268 = vmatmul.mubr.msk.bf16.gmra.mrb[12].mxu0 %vm349_vm1, %v9619_v37  ;;  %v9675_v37 = vshrl.u32 %v16872_v60, 16  ;;  %v9655_v46 = vsel %vm1900_vm5, %v9645_v34, %v9654_v22  ;;  %v9664_v13 = vsel %vm1900_vm5, %v9654_v22, %v9663_v52  ;;  %v4139_v34 = vshrl.u32 %v18934_v43, 16 }
 0x27a   : > { %15271 = vmatprep.mubr.msk.bf16.mxu0 %vm349_vm1, %v9628_v21  ;;  %v9668_v21 = vrot.slane %v9666_v42, 3  ;;  %v4118_v23 = vor.u32 %v4117_v51, %v4114_v4  ;;  %v9698_v55 = vrot.slane %v9696_v38, 4  ;;  %v4151_v22 = vshll.u32 %v18951_v27, 16 }
 0x27b   : > { %v9677_v3 = vrot.slane %v9675_v37, 3  ;;  %v4160_v37 = vshll.u32 %v18954_v36, 16  ;;  %v9711_v4 = vshrl.u32 %v16876_v33, 16  ;;  %v9714_v51 = vshll.u32 %v16876_v33, 16 }
 0x27c   : > { %v4119_v10 = vsel %vm1900_vm5, %v4109_v18, %v4118_v23  ;;  %v4128_v7 = vsel %vm1900_vm5, %v4118_v23, %v4127_v31  ;;  %v9695_v18 = vrot.slane %v9693_v8, 3  ;;  %v4150_v27 = vrot.slane %v4148_v45, 3 }
 0x27d   : > { %v9681_v56 = vor.u32 %v9680_v20, %v9677_v3  ;;  %v4153_v29 = vrot.slane %v4151_v22, 4  ;;  %v4162_v36 = vrot.slane %v4160_v37, 4  ;;  %v9716_v28 = vrot.slane %v9714_v51, 4 }
 0x27e   : > { %14704 = vmatmul.mubr.msk.bf16.vlgmr.msra.gmra.mrb[0].mxu1 %vm349_vm1, %v4083_v40  ;;  %v4142_v40 = vshll.u32 %v18934_v43, 16  ;;  %v9699_v41 = vor.u32 %v9698_v55, %v9695_v18  ;;  %v4184_v22 = vshrl.u32 %v18991_v47, 16 }
 0x27f   : > { %14707 = vmatprep.mubr.msk.bf16.mxu1 %vm349_vm1, %v4092_v25  ;;  %14748 = vmatpush3.bf16.msra.mxu1 %v4677_v19  ;;  %v9672_v25 = vor.u32 %v9671_v54, %v9668_v21  ;;  %v4132_v19 = vrot.slane %v4130_v61, 3  ;;  %v4159_v21 = vrot.slane %v4157_v32, 3  ;;  %v9713_v61 = vrot.slane %v9711_v4, 3 }
 0x280   : > { %16640 = vmatprep.subr.msk.bf16.mxu1 %vm416_vm0, %v19119_v50  ;;  %v4144_v43 = vrot.slane %v4142_v40, 4  ;;  %v4154_v11 = vor.u32 %v4153_v29, %v4150_v27  ;;  %v4186_v27 = vrot.slane %v4184_v22, 3  ;;  %v4232_v22 = vshll.u32 %v19036_v39, 16 }
 0x281   : > { %15272 = vmatmul.mubr.msk.bf16.gmra.mrb[16].mxu0 %vm349_vm1, %v9637_v24  ;;  %v4141_v24 = vrot.slane %v4139_v34, 3  ;;  %v9673_v60 = vsel %vm1900_vm5, %v9663_v52, %v9672_v25  ;;  %v9682_v9 = vsel %vm1900_vm5, %v9672_v25, %v9681_v56  ;;  %v4136_v1 = vor.u32 %v4135_v15, %v4132_v19 }
 0x282   : > { %15275 = vmatprep.mubr.msk.bf16.mxu0 %vm349_vm1, %v9646_v16  ;;  %v9686_v16 = vrot.slane %v9684_v57, 3  ;;  %v9705_v52 = vshll.u32 %v16875_v6, 16  ;;  %v4169_v34 = vshll.u32 %v18971_v5, 16  ;;  %v4163_v40 = vor.u32 %v4162_v36, %v4159_v21 }
 0x283   : > { %v4145_v42 = vor.u32 %v4144_v43, %v4141_v24  ;;  %v4175_v57 = vshrl.u32 %v18974_v35, 16  ;;  %v9720_v25 = vshrl.u32 %v16877_v14, 16  ;;  %v9717_v15 = vor.u32 %v9716_v28, %v9713_v61 }
 0x284   : > { %v9690_v12 = vor.u32 %v9689_v58, %v9686_v16  ;;  %v9707_v20 = vrot.slane %v9705_v52, 4  ;;  %v4164_v24 = vsel %vm1900_vm5, %v4154_v11, %v4163_v40  ;;  %v4180_v35 = vrot.slane %v4178_v17, 4  ;;  %v10068_v16 = vld [vmem:[%s17154_s26 + $0x38] sm:$0xf]  ;;  %v19180_v58 = vld [vmem:[%s17154_s26 + $0x3c] sm:$0xf] }
 0x285   : > { %v4177_v43 = vrot.slane %v4175_v57, 3  ;;  %v13615_v32 = vcombine.low %v10068_v16, %v19180_v58  ;;  %v4202_v61 = vshrl.u32 %v19014_v48, 16  ;;  %v4205_v28 = vshll.u32 %v19014_v48, 16 }
 0x286   : > { %14708 = vmatmul.mubr.msk.bf16.gmra.mrb[4].mxu1 %vm349_vm1, %v4101_v30  ;;  %v9702_v30 = vshrl.u32 %v16875_v6, 16  ;;  %v9691_v54 = vsel %vm1900_vm5, %v9681_v56, %v9690_v12  ;;  %v9700_v23 = vsel %vm1900_vm5, %v9690_v12, %v9699_v41  ;;  %v9723_v56 = vshll.u32 %v16877_v14, 16 }
 0x287   : > { %14711 = vmatprep.mubr.msk.bf16.mxu1 %vm349_vm1, %v4110_v63  ;;  %v4137_v63 = vsel %vm1900_vm5, %v4127_v31, %v4136_v1  ;;  %v4166_v31 = vshrl.u32 %v18971_v5, 16  ;;  %v4155_v5 = vsel %vm1900_vm5, %v4145_v42, %v4154_v11  ;;  %v4181_v37 = vor.u32 %v4180_v35, %v4177_v43 }
 0x288   : > { %v9704_v3 = vrot.slane %v9702_v30, 3  ;;  %v4193_v12 = vshrl.u32 %v18996_v2, 16  ;;  %v4196_v30 = vshll.u32 %v18996_v2, 16  ;;  %v4211_v57 = vshrl.u32 %v19017_v44, 16 }
 0x289   : > { %15276 = vmatmul.mubr.msk.bf16.gmra.mrb[20].mxu0 %vm349_vm1, %v9655_v46  ;;  %v4146_v46 = vsel %vm1900_vm5, %v4136_v1, %v4145_v42  ;;  %v4168_v38 = vrot.slane %v4166_v31, 3  ;;  %v16879_v1 = vld [vmem:[%s17154_s26 + $0xe4] ss:$0 sps:$4 sm:$0xff]   ;;  %v4187_v42 = vshll.u32 %v18991_v47, 16  ;;  %v4214_v17 = vshll.u32 %v19017_v44, 16 }
 0x28a   : > { %15279 = vmatprep.mubr.msk.bf16.mxu0 %vm349_vm1, %v9664_v13  ;;  %v16878_v13 = vld [vmem:[%s17154_s26 + $0xdc] sm:$0xff]   ;;  %v9708_v19 = vor.u32 %v9707_v20, %v9704_v3  ;;  %v9738_v4 = vshrl.u32 %v16879_v1, 16  ;;  %v4195_v36 = vrot.slane %v4193_v12, 3  ;;  %v4198_v2 = vrot.slane %v4196_v30, 4 }
 0x28b   : > { %v9732_v8 = vshll.u32 %v16878_v13, 16  ;;  %v4189_v29 = vrot.slane %v4187_v42, 4  ;;  %v19196_v47 = vld [vmem:[%s17154_s26 + $0x40] sm:$0xff]  }
 0x28c   : > { %v9709_v6 = vsel %vm1900_vm5, %v9699_v41, %v9708_v19  ;;  %v9718_v33 = vsel %vm1900_vm5, %v9708_v19, %v9717_v15  ;;  %v9740_v14 = vrot.slane %v9738_v4, 3  ;;  %v10236_v31 = vshll.u32 %v19196_v47, 16 }
 0x28d   : > { %v9734_v55 = vrot.slane %v9732_v8, 4  ;;  %v19217_v8 = vld [vmem:[%s17154_s26 + $0x50] sm:$0xff]  }
 0x28e   : > { %14712 = vmatmul.mubr.msk.bf16.gmra.mrb[8].mxu1 %vm349_vm1, %v4119_v10  ;;  %v9729_v10 = vshrl.u32 %v16878_v13, 16  ;;  %v4190_v13 = vor.u32 %v4189_v29, %v4186_v27  ;;  %v10256_v27 = vshrl.u32 %v19217_v8, 16 }
 0x28f   : > { %14715 = vmatprep.mubr.msk.bf16.mxu1 %vm349_vm1, %v4128_v7  ;;  %v4171_v7 = vrot.slane %v4169_v34, 4  ;;  %v4199_v34 = vor.u32 %v4198_v2, %v4195_v36  ;;  %v4241_v36 = vshll.u32 %v19061_v59, 16  ;;  %v10908_v2 = vsel %vm416_vm0, %v19056_v26, 0  ;;  %v19272_v26 = vld [vmem:[%s20432_s1 + $0x2c] sm:$0x3] }
 0x290   : > { %v9731_v18 = vrot.slane %v9729_v10, 3  ;;  %v4191_v19 = vsel %vm1900_vm5, %v4181_v37, %v4190_v13  ;;  %v10238_v10 = vrot.slane %v10236_v31, 1 }
 0x291   : > { %15280 = vmatmul.mubr.msk.bf16.gmra.mrb[24].mxu0 %vm349_vm1, %v9673_v60  ;;  %v9722_v60 = vrot.slane %v9720_v25, 3  ;;  %v4172_v45 = vor.u32 %v4171_v7, %v4168_v38  ;;  %v4204_v25 = vrot.slane %v4202_v61, 3  ;;  %v4213_v38 = vrot.slane %v4211_v57, 3 }
 0x292   : > { %15283 = vmatprep.mubr.msk.bf16.mxu0 %vm349_vm1, %v9682_v9  ;;  %v9725_v9 = vrot.slane %v9723_v56, 4  ;;  %v9735_v51 = vor.u32 %v9734_v55, %v9731_v18  ;;  %v4207_v56 = vrot.slane %v4205_v28, 4  ;;  %v4216_v7 = vrot.slane %v4214_v17, 4 }
 0x293   : > { %v4173_v41 = vsel %vm1900_vm5, %v4163_v40, %v4172_v45  ;;  %v4182_v21 = vsel %vm1900_vm5, %v4172_v45, %v4181_v37  ;;  %v19207_v40 = vld [vmem:[%s17154_s26 + $0x48] sm:$0xff]   ;;  %v4229_v45 = vshrl.u32 %v19036_v39, 16  ;;  %v19245_v37 = vld [vmem:[%s17154_s26 + $0x60] sm:$0xff]   ;;  %v4247_v61 = vshrl.u32 %v19063_v62, 16 }
 0x294   : > { %v9726_v52 = vor.u32 %v9725_v9, %v9722_v60  ;;  %v10244_v44 = vshll.u32 %v19207_v40, 16  ;;  %v4208_v35 = vor.u32 %v4207_v56, %v4204_v25  ;;  %v10248_v16 = vshrl.u32 %v19207_v40, 16 }
 0x295   : > { %v10252_v9 = vshll.u32 %v19217_v8, 16  ;;  %v4217_v55 = vor.u32 %v4216_v7, %v4213_v38  ;;  %v4250_v28 = vshll.u32 %v19063_v62, 16  ;;  %v4243_v57 = vrot.slane %v4241_v36, 4 }
 0x296   : > { %14716 = vmatmul.mubr.msk.bf16.gmra.mrb[12].mxu1 %vm349_vm1, %v4137_v63  ;;  %v9741_v63 = vshll.u32 %v16879_v1, 16  ;;  %v9736_v3 = vsel %vm1900_vm5, %v9726_v52, %v9735_v51  ;;  %v19229_v1 = vld [vmem:[%s17154_s26 + $0x58] sm:$0xff]   ;;  %v10246_v18 = vrot.slane %v10244_v44, 1  ;;  %v10272_v7 = vshrl.u32 %v19245_v37, 16 }
 0x297   : > { %14719 = vmatprep.mubr.msk.bf16.mxu1 %vm349_vm1, %v4146_v46  ;;  %v10231_v46 = vshll.u32 %v13615_v32, 16  ;;  %v10254_v12 = vrot.slane %v10252_v9, 1  ;;  %v10260_v30 = vshll.u32 %v19229_v1, 16  ;;  %v4218_v4 = vsel %vm1900_vm5, %v4208_v35, %v4217_v55 }
 0x298   : > { %v9743_v20 = vrot.slane %v9741_v63, 4  ;;  %v4234_v63 = vrot.slane %v4232_v22, 4  ;;  %v10264_v29 = vshrl.u32 %v19229_v1, 16  ;;  %v19574_v1 = vld [vmem:[%s20432_s1 + $0x2e] sm:$0x3] }
 0x299   : > { %15284 = vmatmul.mubr.msk.bf16.gmra.mrb[28].mxu0 %vm349_vm1, %v9691_v54  ;;  %v9727_v54 = vsel %vm1900_vm5, %v9717_v15, %v9726_v52  ;;  %v10233_v11 = vrot.slane %v10231_v46, 1  ;;  %v10268_v46 = vshll.u32 %v19245_v37, 16  ;;  %v17078_v37 = vld [vmem:[%s17154_s26 + $0xac] sm:$0xf] }
 0x29a   : > { %15287 = vmatprep.mubr.msk.bf16.mxu0 %vm349_vm1, %v9700_v23  ;;  %v10229_v23 = vshrl.u32 %v13615_v32, 16  ;;  %v9744_v48 = vor.u32 %v9743_v20, %v9740_v14  ;;  %v4209_v32 = vsel %vm1900_vm5, %v4199_v34, %v4208_v35  ;;  %v10262_v14 = vrot.slane %v10260_v30, 1 }
 0x29b   : > { %v10760_v8 = vrot.slane %v10264_v29, 1 }
 0x29c   : > { %v10234_v15 = vor.u32 %v10233_v11, %v10229_v23  ;;  %v9745_v43 = vsel %vm1900_vm5, %v9735_v51, %v9744_v48  ;;  %v4231_v51 = vrot.slane %v4229_v45, 3  ;;  %v19278_v23 = vld [vmem:[%s17154_s26 + $0x68] sm:$0xff]   ;;  %v10266_v62 = vor.u32 %v10264_v29, %v10262_v14  ;;  %v19287_v48 = vld [vmem:[%s17154_s26 + $0x70] sm:$0xff]   ;;  %v19306_v45 = vld [vmem:[%s17154_s26 + $0x78] sm:$0xff]  }
 0x29d   : > { %v10270_v11 = vrot.slane %v10268_v46, 1  ;;  %v10280_v35 = vshrl.u32 %v19278_v23, 16  ;;  %v17075_v29 = vld [vmem:[%s17154_s26 + $0xa0] sm:$0xf] }
 0x29e   : > { %14720 = vmatmul.mubr.msk.bf16.gmra.mrb[16].mxu1 %vm349_vm1, %v4155_v5  ;;  %v4200_v5 = vsel %vm1900_vm5, %v4190_v13, %v4199_v34  ;;  %v10239_v60 = vsel %vm2589_vm7, %v10234_v15, %v10238_v10  ;;  %v4235_v20 = vor.u32 %v4234_v63, %v4231_v51  ;;  %v19267_v13 = vld [vmem:[%s17154_s26 + $0xc4] sm:$0xf]  ;;  %v4252_v15 = vrot.slane %v4250_v28, 4 }
 0x29f   : > { %14723 = vmatprep.mubr.msk.bf16.mxu1 %vm349_vm1, %v4164_v24  ;;  %v10240_v24 = vshrl.u32 %v19196_v47, 16  ;;  %v13195_v25 = vcombine.low %v19267_v13, %v19267_v13  ;;  %v10271_v38 = vsel %vm2589_vm7, %v10266_v62, %v10270_v11  ;;  %v10274_v22 = vor.u32 %v10272_v7, %v10270_v11  ;;  %v17043_v62 = vld [vmem:[%s17154_s26 + $0x18] sm:$0xf]  ;;  %v17044_v11 = vld [vmem:[%s17154_s26 + $0x1c] sm:$0xf] }
 0x2a0   : > { %v10292_v51 = vshll.u32 %v19306_v45, 16  ;;  %v10752_v47 = vrot.slane %v10248_v16, 1 }
 0x2a1   : > { %15288 = vmatmul.mubr.msk.bf16.gmra.mrb[32].mxu0 %vm349_vm1, %v9709_v6  ;;  %v4220_v6 = vshrl.u32 %v19033_v49, 16  ;;  %v10242_v42 = vor.u32 %v10240_v24, %v10238_v10  ;;  %v10276_v10 = vshll.u32 %v19278_v23, 16  ;;  %v17080_v23 = vld [vmem:[%s17154_s26 + $0xb4] sm:$0xf] }
 0x2a2   : > { %15291 = vmatprep.mubr.msk.bf16.mxu0 %vm349_vm1, %v9718_v33  ;;  %v4223_v33 = vshll.u32 %v19033_v49, 16  ;;  %v10250_v49 = vor.u32 %v10248_v16, %v10246_v18 }
 0x2a3   : > { %v4222_v39 = vrot.slane %v4220_v6, 3  ;;  %v4256_v6 = vshrl.u32 %v13195_v25, 16 }
 0x2a4   : > { %v4225_v52 = vrot.slane %v4223_v33, 4  ;;  %v4259_v33 = vshll.u32 %v13195_v25, 16 }
 0x2a6   : > { %14724 = vmatmul.mubr.msk.bf16.gmra.mrb[20].mxu1 %vm349_vm1, %v4173_v41  ;;  %v10247_v41 = vsel %vm2589_vm7, %v10242_v42, %v10246_v18 }
 0x2a7   : > { %14727 = vmatprep.mubr.msk.bf16.mxu1 %vm349_vm1, %v4182_v21  ;;  %v4238_v21 = vshrl.u32 %v19061_v59, 16  ;;  %v10258_v59 = vor.u32 %v10256_v27, %v10254_v12 }
 0x2a9   : > { %15292 = vmatmul.mubr.msk.bf16.gmra.mrb[36].mxu0 %vm349_vm1, %v9727_v54  ;;  %v10255_v54 = vsel %vm2589_vm7, %v10250_v49, %v10254_v12  ;;  %v4240_v34 = vrot.slane %v4238_v21, 3  ;;  %v4258_v12 = vrot.slane %v4256_v6, 3 }
 0x2aa   : > { %15295 = vmatprep.mubr.msk.bf16.mxu0 %vm349_vm1, %v9736_v3  ;;  %v4226_v3 = vor.u32 %v4225_v52, %v4222_v39  ;;  %v4261_v39 = vrot.slane %v4259_v33, 4  ;;  %v19317_v52 = vld [vmem:[%s17154_s26 + $0x80] sm:$0xff]  }
 0x2ac   : > { %v4227_v17 = vsel %vm1900_vm5, %v4217_v55, %v4226_v3  ;;  %v4236_v56 = vsel %vm1900_vm5, %v4226_v3, %v4235_v20  ;;  %v10278_v55 = vrot.slane %v10276_v10, 1  ;;  %v4262_v36 = vor.u32 %v4261_v39, %v4258_v12  ;;  %v19332_v3 = vld [vmem:[%s17154_s26 + $0x88] sm:$0xff]   ;;  %v19379_v39 = vld [vmem:[%s20432_s1 + $0x14] sm:$0x3] }
 0x2ae   : > { %14728 = vmatmul.mubr.msk.bf16.gmra.mrb[24].mxu1 %vm349_vm1, %v4191_v19  ;;  %v4249_v19 = vrot.slane %v4247_v61, 3  ;;  %v10279_v63 = vsel %vm2589_vm7, %v10274_v22, %v10278_v55  ;;  %v17046_v22 = vld [vmem:[%s17154_s26 + $0x2c] sm:$0xf] }
 0x2af   : > { %14731 = vmatprep.mubr.msk.bf16.mxu1 %vm349_vm1, %v4200_v5  ;;  %v10263_v5 = vsel %vm2589_vm7, %v10258_v59, %v10262_v14  ;;  %v10294_v14 = vrot.slane %v10292_v51, 1 }
 0x2b0   : > { %v4253_v18 = vor.u32 %v4252_v15, %v4249_v19  ;;  %v10312_v15 = vshrl.u32 %v19332_v3, 16 }
 0x2b1   : > { %15296 = vmatmul.mubr.msk.bf16.gmra.mrb[40].mxu0 %vm349_vm1, %v9745_v43  ;;  %v4244_v43 = vor.u32 %v4243_v57, %v4240_v34  ;;  %v13219_v34 = vcombine.low %v17043_v62, %v17044_v11  ;;  %v19345_v57 = vld [vmem:[%s17154_s26 + $0x90] sm:$0xff]  }
 0x2b2   : > { %15301 = vmatprep.mubr.msk.bf16.mxu0 %vm349_vm1, %v10239_v60  ;;  %v10284_v60 = vshll.u32 %v19287_v48, 16  ;;  %v4263_v61 = vsel %vm1900_vm5, %v4253_v18, %v4262_v36 }
 0x2b3   : > { %v4245_v42 = vsel %vm1900_vm5, %v4235_v20, %v4244_v43 }
 0x2b4   : > { %v10286_v49 = vrot.slane %v10284_v60, 1 }
 0x2b6   : > { %14732 = vmatmul.mubr.msk.bf16.gmra.mrb[28].mxu1 %vm349_vm1, %v4209_v32  ;;  %v10282_v32 = vor.u32 %v10280_v35, %v10278_v55  ;;  %v17045_v55 = vld [vmem:[%s17154_s26 + $0x28] sm:$0xf] }
 0x2b7   : > { %14735 = vmatprep.mubr.msk.bf16.mxu1 %vm349_vm1, %v4218_v4  ;;  %v4254_v4 = vsel %vm1900_vm5, %v4244_v43, %v4253_v18  ;;  %v19359_v43 = vld [vmem:[%s17154_s26 + $0x98] sm:$0xff]  }
 0x2b8   : > { %v10287_v21 = vsel %vm2589_vm7, %v10282_v32, %v10286_v49  ;;  %v19371_v32 = vld [vmem:[%s17154_s26 + $0xa0] sm:$0xff]   ;;  %v20580_v12 = vshll.u32 %v19359_v43, 16  ;;  %v20584_v36 = vshrl.u32 %v19359_v43, 16 }
 0x2b9   : > { %15302 = vmatmul.mubr.msk.bf16.vlgmr.msra.gmra.mrb[0].mxu0 %vm349_vm1, %v10247_v41  ;;  %v10288_v41 = vshrl.u32 %v19287_v48, 16 }
 0x2ba   : > { %15346 = vmatpush3.bf16.msra.mxu0 %v10908_v2  ;;  %15305 = vmatprep.mubr.msk.bf16.mxu0 %vm349_vm1, %v10255_v54  ;;  %v10296_v2 = vshrl.u32 %v19306_v45, 16  ;;  %v10300_v54 = vshll.u32 %v19317_v52, 16 }
 0x2bb   : > { %16654 = vmatprep.subr.msk.bf16.mxu0 %vm416_vm0, %v19272_v26  ;;  %v10290_v20 = vor.u32 %v10288_v41, %v10286_v49  ;;  %v5205_v49 = vsel %vm416_vm0, %v19119_v50, 0 }
 0x2bc   : > { %v10298_v28 = vor.u32 %v10296_v2, %v10294_v14  ;;  %v10302_v59 = vrot.slane %v10300_v54, 1 }
 0x2bd   : > { %v10295_v25 = vsel %vm2589_vm7, %v10290_v20, %v10294_v14  ;;  %v20577_v14 = vshll.u32 %v19371_v32, 16 }
 0x2be   : > { %14736 = vmatmul.mubr.msk.bf16.gmra.mrb[32].mxu1 %vm349_vm1, %v4227_v17  ;;  %v10308_v17 = vshll.u32 %v19332_v3, 16  ;;  %v10303_v19 = vsel %vm2589_vm7, %v10298_v28, %v10302_v59  ;;  %v17048_v28 = vld [vmem:[%s17154_s26 + $0x34] sm:$0xf] }
 0x2bf   : > { %14739 = vmatprep.mubr.msk.bf16.mxu1 %vm349_vm1, %v4236_v56  ;;  %v10304_v56 = vshrl.u32 %v19317_v52, 16  ;;  %v10334_v11 = vrot.slane %v20577_v14, 1  ;;  %v10784_v52 = vrot.slane %v10312_v15, 1 }
 0x2c1   : > { %15306 = vmatmul.mubr.msk.bf16.gmra.mrb[4].mxu0 %vm349_vm1, %v10263_v5  ;;  %v20586_v5 = vshll.u32 %v19345_v57, 16  ;;  %v10306_v6 = vor.u32 %v10304_v56, %v10302_v59 }
 0x2c2   : > { %15309 = vmatprep.mubr.msk.bf16.mxu0 %vm349_vm1, %v10271_v38  ;;  %v10310_v38 = vrot.slane %v10308_v17, 1 }
 0x2c3   : > { %v10318_v18 = vrot.slane %v20586_v5, 1 }
 0x2c4   : > { %v10314_v33 = vor.u32 %v10312_v15, %v10310_v38 }
 0x2c6   : > { %14740 = vmatmul.mubr.msk.bf16.gmra.mrb[36].mxu1 %vm349_vm1, %v4245_v42  ;;  %v13221_v42 = vcombine.low %v17045_v55, %v17046_v22  ;;  %v10319_v50 = vsel %vm2589_vm7, %v10314_v33, %v10318_v18 }
 0x2c7   : > { %14743 = vmatprep.mubr.msk.bf16.mxu1 %vm349_vm1, %v4254_v4  ;;  %v10311_v4 = vsel %vm2589_vm7, %v10306_v6, %v10310_v38  ;;  %v19411_v38 = vld [vmem:[%s17154_s26 + $0xb0] sm:$0xff]  }
 0x2c9   : > { %15310 = vmatmul.mubr.msk.bf16.gmra.mrb[8].mxu0 %vm349_vm1, %v10279_v63  ;;  %v20772_v63 = vcombine.low %v18505_v53, %v18508_v0  ;;  %v10326_v53 = vrot.slane %v20580_v12, 1  ;;  %v19397_v0 = vld [vmem:[%s17154_s26 + $0xa8] sm:$0xff]   ;;  %v10730_v12 = vld [vmem:[%s17154_s26 + $0x38] sm:$0xe] }
 0x2ca   : > { %15313 = vmatprep.mubr.msk.bf16.mxu0 %vm349_vm1, %v10287_v21  ;;  %v10320_v21 = vshrl.u32 %v19345_v57, 16  ;;  %v20571_v6 = vshll.u32 %v19397_v0, 16  ;;  %v20573_v22 = vshrl.u32 %v19397_v0, 16 }
 0x2cb   : > { %v10330_v62 = vor.u32 %v20584_v36, %v10326_v53  ;;  %v17066_v36 = vld [vmem:[%s17154_s26 + $0x7c] sm:$0xf] }
 0x2cc   : > { %v10322_v20 = vor.u32 %v10320_v21, %v10318_v18  ;;  %v20578_v18 = vshrl.u32 %v19371_v32, 16 }
 0x2cd   : > { %v10335_v55 = vsel %vm2589_vm7, %v10330_v62, %v10334_v11  ;;  %v17054_v62 = vld [vmem:[%s17154_s26 + $0x4c] sm:$0xf] }
 0x2ce   : > { %14744 = vmatmul.mubr.msk.bf16.gmra.mrb[40].mxu1 %vm349_vm1, %v4263_v61  ;;  %v17047_v61 = vld [vmem:[%s17154_s26 + $0x30] sm:$0xf]  ;;  %v10327_v33 = vsel %vm2589_vm7, %v10322_v20, %v10326_v53  ;;  %v17052_v53 = vld [vmem:[%s17154_s26 + $0x44] sm:$0xf] }
 0x2cf   : > { %14749 = vmatprep.mubr.msk.bf16.mxu1 %vm349_vm1, %v13219_v34  ;;  %v13222_v59 = vcombine.low %v17047_v61, %v17048_v28  ;;  %v17049_v34 = vld [vmem:[%s17154_s26 + $0x38] sm:$0xf] }
 0x2d1   : > { %15314 = vmatmul.mubr.msk.bf16.gmra.mrb[12].mxu0 %vm349_vm1, %v10295_v25  ;;  %v17050_v25 = vld [vmem:[%s17154_s26 + $0x3c] sm:$0xf] }
 0x2d2   : > { %15317 = vmatprep.mubr.msk.bf16.mxu0 %vm349_vm1, %v10303_v19  ;;  %v13223_v19 = vcombine.low %v17049_v34, %v17050_v25  ;;  %v19439_v25 = vld [vmem:[%s17154_s26 + $0xc0] sm:$0xff]  }
 0x2d6   : > { %14750 = vmatmul.mubr.msk.bf16.vlgmr.msra.gmra.mrb[0].mxu1 %vm349_vm1, %v20772_v63  ;;  %v10338_v63 = vor.u32 %v20578_v18, %v10334_v11  ;;  %v17062_v18 = vld [vmem:[%s17154_s26 + $0x6c] sm:$0xf] }
 0x2d7   : > { %14753 = vmatprep.mubr.msk.bf16.mxu1 %vm349_vm1, %v13221_v42  ;;  %14794 = vmatpush3.bf16.msra.mxu1 %v5205_v49  ;;  %v20570_v42 = vshll.u32 %v19411_v38, 16  ;;  %v10342_v49 = vrot.slane %v20571_v6, 1  ;;  %v17058_v6 = vld [vmem:[%s17154_s26 + $0x5c] sm:$0xf] }
 0x2d8   : > { %16641 = vmatprep.subr.msk.bf16.mxu1 %vm416_vm0, %v19379_v39 }
 0x2d9   : > { %15318 = vmatmul.mubr.msk.bf16.gmra.mrb[16].mxu0 %vm349_vm1, %v10311_v4  ;;  %v19425_v4 = vld [vmem:[%s17154_s26 + $0xb8] sm:$0xff]   ;;  %v10346_v61 = vor.u32 %v20573_v22, %v10342_v49  ;;  %v10350_v28 = vrot.slane %v20570_v42, 1  ;;  %v10343_v11 = vsel %vm2589_vm7, %v10338_v63, %v10342_v49  ;;  %v19453_v63 = vld [vmem:[%s17154_s26 + $0xc8] sm:$0xff]   ;;  %v19467_v22 = vld [vmem:[%s17154_s26 + $0xd0] sm:$0xff]  }
 0x2da   : > { %15321 = vmatprep.mubr.msk.bf16.mxu0 %vm349_vm1, %v10319_v50  ;;  %v17051_v50 = vld [vmem:[%s17154_s26 + $0x40] sm:$0xf]  ;;  %v17057_v42 = vld [vmem:[%s17154_s26 + $0x58] sm:$0xf] }
 0x2db   : > { %v13224_v20 = vcombine.low %v17051_v50, %v17052_v53  ;;  %v20575_v50 = vshrl.u32 %v19425_v4, 16  ;;  %v20574_v53 = vshll.u32 %v19439_v25, 16 }
 0x2de   : > { %14754 = vmatmul.mubr.msk.bf16.gmra.mrb[4].mxu1 %vm349_vm1, %v13222_v59  ;;  %v17053_v59 = vld [vmem:[%s17154_s26 + $0x48] sm:$0xf] }
 0x2df   : > { %14757 = vmatprep.mubr.msk.bf16.mxu1 %vm349_vm1, %v13223_v19  ;;  %v13225_v34 = vcombine.low %v17053_v59, %v17054_v62  ;;  %v20572_v19 = vshll.u32 %v19425_v4, 16  ;;  %v17056_v59 = vld [vmem:[%s17154_s26 + $0x54] sm:$0xf] }
 0x2e1   : > { %15322 = vmatmul.mubr.msk.bf16.gmra.mrb[20].mxu0 %vm349_vm1, %v10327_v33  ;;  %v20576_v33 = vshrl.u32 %v19411_v38, 16  ;;  %v10358_v49 = vrot.slane %v20572_v19, 1  ;;  %v13227_v19 = vcombine.low %v17057_v42, %v17058_v6  ;;  %v20582_v6 = vshrl.u32 %v19453_v63, 16 }
 0x2e2   : > { %15325 = vmatprep.mubr.msk.bf16.mxu0 %vm349_vm1, %v10335_v55  ;;  %v10351_v55 = vsel %vm2589_vm7, %v10346_v61, %v10350_v28  ;;  %v17055_v61 = vld [vmem:[%s17154_s26 + $0x50] sm:$0xf]  ;;  %v20581_v42 = vshll.u32 %v19467_v22, 16 }
 0x2e3   : > { %v13226_v62 = vcombine.low %v17055_v61, %v17056_v59  ;;  %v20583_v61 = vshrl.u32 %v19439_v25, 16 }
 0x2e4   : > { %v10382_v14 = vrot.slane %v20581_v42, 1 }
 0x2e6   : > { %14758 = vmatmul.mubr.msk.bf16.gmra.mrb[8].mxu1 %vm349_vm1, %v13224_v20  ;;  %v10354_v20 = vor.u32 %v20576_v33, %v10350_v28 }
 0x2e7   : > { %14761 = vmatprep.mubr.msk.bf16.mxu1 %vm349_vm1, %v13225_v34  ;;  %v10362_v34 = vor.u32 %v20575_v50, %v10358_v49  ;;  %v19489_v50 = vld [vmem:[%s17154_s26 + $0xe0] sm:$0xff]  }
 0x2e8   : > { %v10359_v28 = vsel %vm2589_vm7, %v10354_v20, %v10358_v49  ;;  %v20587_v42 = vshll.u32 %v19489_v50, 16 }
 0x2e9   : > { %15326 = vmatmul.mubr.msk.bf16.gmra.mrb[24].mxu0 %vm349_vm1, %v10343_v11  ;;  %v10366_v11 = vrot.slane %v20574_v53, 1  ;;  %v19478_v53 = vld [vmem:[%s17154_s26 + $0xd8] sm:$0xff]  }
 0x2ea   : > { %15329 = vmatprep.mubr.msk.bf16.mxu0 %vm349_vm1, %v10351_v55  ;;  %v20579_v55 = vshll.u32 %v19453_v63, 16 }
 0x2eb   : > { %v10367_v59 = vsel %vm2589_vm7, %v10362_v34, %v10366_v11  ;;  %v10370_v20 = vor.u32 %v20583_v61, %v10366_v11  ;;  %v17060_v34 = vld [vmem:[%s17154_s26 + $0x64] sm:$0xf] }
 0x2ec   : > { %v10374_v49 = vrot.slane %v20579_v55, 1 }
 0x2ee   : > { %14762 = vmatmul.mubr.msk.bf16.gmra.mrb[12].mxu1 %vm349_vm1, %v13226_v62  ;;  %v17059_v62 = vld [vmem:[%s17154_s26 + $0x60] sm:$0xf]  ;;  %v10378_v33 = vor.u32 %v20582_v6, %v10374_v49  ;;  %v10375_v11 = vsel %vm2589_vm7, %v10370_v20, %v10374_v49 }
 0x2ef   : > { %14765 = vmatprep.mubr.msk.bf16.mxu1 %vm349_vm1, %v13227_v19  ;;  %v13228_v19 = vcombine.low %v17059_v62, %v17060_v34  ;;  %v10384_v62 = vshrl.u32 %v19467_v22, 16  ;;  %v20588_v34 = vshrl.u32 %v19478_v53, 16 }
 0x2f0   : > { %v10383_v6 = vsel %vm2589_vm7, %v10378_v33, %v10382_v14 }
 0x2f1   : > { %15330 = vmatmul.mubr.msk.bf16.gmra.mrb[28].mxu0 %vm349_vm1, %v10359_v28  ;;  %v17061_v28 = vld [vmem:[%s17154_s26 + $0x68] sm:$0xf]  ;;  %v10386_v20 = vor.u32 %v10384_v62, %v10382_v14 }
 0x2f2   : > { %15333 = vmatprep.mubr.msk.bf16.mxu0 %vm349_vm1, %v10367_v59  ;;  %v13229_v55 = vcombine.low %v17061_v28, %v17062_v18  ;;  %v20585_v59 = vshll.u32 %v19478_v53, 16  ;;  %v13661_v18 = vcombine.low %v10730_v12, %v19180_v58  ;;  %v17064_v28 = vld [vmem:[%s17154_s26 + $0x74] sm:$0xf]  ;;  %v16915_v58 = vld [vmem:[%s17154_s26 + $0xe8] ss:$0 sps:$4 sm:$0x11]  }
 0x2f3   : > { %v17065_v12 = vld [vmem:[%s17154_s26 + $0x78] sm:$0xf] }
 0x2f4   : > { %v10390_v49 = vrot.slane %v20585_v59, 1  ;;  %v13231_v59 = vcombine.low %v17065_v12, %v17066_v36  ;;  %v10741_v5 = vshrl.u32 %v13661_v18, 16  ;;  %v10748_v36 = vrot.slane %v10240_v24, 1  ;;  %v17069_v12 = vld [vmem:[%s17154_s26 + $0x88] sm:$0xf] }
 0x2f5   : > { %v17070_v24 = vld [vmem:[%s17154_s26 + $0x8c] sm:$0xf] }
 0x2f6   : > { %14766 = vmatmul.mubr.msk.bf16.gmra.mrb[16].mxu1 %vm349_vm1, %v13228_v19  ;;  %v17063_v19 = vld [vmem:[%s17154_s26 + $0x70] sm:$0xf]  ;;  %v10394_v33 = vor.u32 %v20588_v34, %v10390_v49 }
 0x2f7   : > { %14769 = vmatprep.mubr.msk.bf16.mxu1 %vm349_vm1, %v13229_v55  ;;  %v13230_v61 = vcombine.low %v17063_v19, %v17064_v28  ;;  %v10398_v55 = vrot.slane %v20587_v42, 1  ;;  %v10400_v19 = vshrl.u32 %v19489_v50, 16  ;;  %v10404_v28 = vshll.u32 %v16915_v58, 16 }
 0x2f8   : > { %v10743_v42 = vrot.slane %v10741_v5, 1 }
 0x2f9   : > { %15334 = vmatmul.mubr.msk.bf16.gmra.mrb[32].mxu0 %vm349_vm1, %v10375_v11  ;;  %v10744_v11 = vshll.u32 %v13661_v18, 16  ;;  %v10399_v14 = vsel %vm2589_vm7, %v10394_v33, %v10398_v55  ;;  %v10749_v18 = vrot.slane %v10236_v31, 2  ;;  %v17068_v33 = vld [vmem:[%s17154_s26 + $0x84] sm:$0xf] }
 0x2fa   : > { %15337 = vmatprep.mubr.msk.bf16.mxu0 %vm349_vm1, %v10383_v6  ;;  %v10391_v6 = vsel %vm2589_vm7, %v10386_v20, %v10390_v49  ;;  %v10406_v49 = vrot.slane %v10404_v28, 1  ;;  %v17067_v20 = vld [vmem:[%s17154_s26 + $0x80] sm:$0xf]  ;;  %v17072_v28 = vld [vmem:[%s17154_s26 + $0x94] sm:$0xf] }
 0x2fb   : > { %v10746_v34 = vrot.slane %v10744_v11, 2  ;;  %v13232_v58 = vcombine.low %v17067_v20, %v17068_v33  ;;  %v10750_v5 = vor.u32 %v10749_v18, %v10748_v36  ;;  %v13233_v11 = vcombine.low %v17069_v12, %v17070_v24  ;;  %v17074_v18 = vld [vmem:[%s17154_s26 + $0x9c] sm:$0xf] }
 0x2fc   : > { %v10764_v33 = vrot.slane %v10272_v7, 1  ;;  %v17077_v7 = vld [vmem:[%s17154_s26 + $0xa8] sm:$0xf]  ;;  %v10768_v24 = vrot.slane %v10280_v35, 1 }
 0x2fe   : > { %14770 = vmatmul.mubr.msk.bf16.gmra.mrb[20].mxu1 %vm349_vm1, %v13230_v61  ;;  %v10402_v61 = vor.u32 %v10400_v19, %v10398_v55  ;;  %v10753_v55 = vrot.slane %v10244_v44, 2  ;;  %v17073_v44 = vld [vmem:[%s17154_s26 + $0x98] sm:$0xf] }
 0x2ff   : > { %14773 = vmatprep.mubr.msk.bf16.mxu1 %vm349_vm1, %v13231_v59  ;;  %v10747_v59 = vor.u32 %v10746_v34, %v10743_v42  ;;  %v10756_v34 = vrot.slane %v10256_v27, 1  ;;  %v11435_v27 = vsel %vm416_vm0, %v19272_v26, 0  ;;  %v17076_v26 = vld [vmem:[%s17154_s26 + $0xa4] sm:$0xf] }
 0x300   : > { %v10407_v31 = vsel %vm2589_vm7, %v10402_v61, %v10406_v49  ;;  %v10754_v16 = vor.u32 %v10753_v55, %v10752_v47  ;;  %v13235_v61 = vcombine.low %v17073_v44, %v17074_v18  ;;  %v10773_v55 = vrot.slane %v10284_v60, 2 }
 0x301   : > { %15338 = vmatmul.mubr.msk.bf16.gmra.mrb[36].mxu0 %vm349_vm1, %v10391_v6  ;;  %v10751_v42 = vsel %vm833_vm4, %v10747_v59, %v10750_v5  ;;  %v10757_v6 = vrot.slane %v10252_v9, 2  ;;  %v10761_v9 = vrot.slane %v10260_v30, 2  ;;  %v13236_v59 = vcombine.low %v17075_v29, %v17076_v26 }
 0x302   : > { %15341 = vmatprep.mubr.msk.bf16.mxu0 %vm349_vm1, %v10399_v14  ;;  %v17071_v14 = vld [vmem:[%s17154_s26 + $0x90] sm:$0xf]  ;;  %v10755_v49 = vsel %vm833_vm4, %v10750_v5, %v10754_v16  ;;  %v10776_v60 = vrot.slane %v10296_v2, 1  ;;  %v10780_v18 = vrot.slane %v10304_v56, 1  ;;  %v20775_v29 = vshll.u32 %v19345_v57, 16 }
 0x303   : > { %v13234_v36 = vcombine.low %v17071_v14, %v17072_v28  ;;  %v10758_v40 = vor.u32 %v10757_v6, %v10756_v34  ;;  %v10762_v30 = vor.u32 %v10761_v9, %v10760_v8  ;;  %v17079_v34 = vld [vmem:[%s17154_s26 + $0xb0] sm:$0xf]  ;;  %v17082_v14 = vld [vmem:[%s17154_s26 + $0xbc] sm:$0xf]  ;;  %v20773_v8 = vld [vmem:[#allocation3_spill] sm:$0xff] }
 0x304   : > { %v5094_v9 = vrot.slane %v20773_v8, 1  ;;  %v10789_v26 = vrot.slane %v20775_v29, 2  ;;  %v19648_v57 = vld [vmem:[%s20432_s1 + $0x16] sm:$0x3]  ;;  %v20791_v29 = vld [vmem:[#allocation23_spill] sm:$0xff] }
 0x305   : > { %v10759_v20 = vsel %vm833_vm4, %v10754_v16, %v10758_v40  ;;  %v10763_v12 = vsel %vm833_vm4, %v10758_v40, %v10762_v30  ;;  %v17081_v16 = vld [vmem:[%s17154_s26 + $0xb8] sm:$0xf] }
 0x306   : > { %14774 = vmatmul.mubr.msk.bf16.gmra.mrb[24].mxu1 %vm349_vm1, %v13232_v58  ;;  %v10765_v58 = vrot.slane %v10268_v46, 2  ;;  %v13237_v46 = vcombine.low %v17077_v7, %v17078_v37  ;;  %v13239_v28 = vcombine.low %v17081_v16, %v17082_v14  ;;  %v5739_v37 = vsel %vm416_vm0, %v19379_v39, 0  ;;  %v20779_v39 = vld [vmem:[#allocation13_spill] sm:$0xff] }
 0x307   : > { %14777 = vmatprep.mubr.msk.bf16.mxu1 %vm349_vm1, %v13233_v11  ;;  %v10769_v11 = vrot.slane %v10276_v10, 2  ;;  %v13238_v10 = vcombine.low %v17079_v34, %v17080_v23  ;;  %v20782_v23 = vld [vmem:[#allocation16_spill] sm:$0xff] }
 0x308   : > { %v10766_v5 = vor.u32 %v10765_v58, %v10764_v33  ;;  %v20774_v58 = vld [vmem:[#allocation7_spill] sm:$0xff] }
 0x309   : > { %15342 = vmatmul.mubr.msk.bf16.gmra.mrb[40].mxu0 %vm349_vm1, %v10407_v31  ;;  %v10772_v31 = vrot.slane %v10288_v41, 1  ;;  %v10770_v35 = vor.u32 %v10769_v11, %v10768_v24  ;;  %v10777_v41 = vrot.slane %v10292_v51, 2  ;;  %v17084_v51 = vld [vmem:[%s17154_s26 + $0xc0] sm:$0xf]  ;;  %v20778_v24 = vshll.u32 %v19359_v43, 16 }
 0x30a   : > { %15347 = vmatprep.mubr.msk.bf16.mxu0 %vm349_vm1, %v10751_v42  ;;  %v10767_v47 = vsel %vm833_vm4, %v10762_v30, %v10766_v5  ;;  %v4932_v42 = vld [vmem:[%s17154_s26 + $0x20] sm:$0xe]  ;;  %v13240_v2 = vcombine.low %v17084_v51, %v19267_v13  ;;  %v5096_v30 = vrot.slane %v20774_v58, 1  ;;  %v10788_v13 = vrot.slane %v10320_v21, 1 }
 0x30b   : > { %v10774_v6 = vor.u32 %v10773_v55, %v10772_v31  ;;  %v10771_v48 = vsel %vm833_vm4, %v10766_v5, %v10770_v35  ;;  %v10778_v45 = vor.u32 %v10777_v41, %v10776_v60  ;;  %v10793_v11 = vrot.slane %v20778_v24, 2  ;;  %v20788_v51 = vld [vmem:[#allocation22_spill] sm:$0xff] }
 0x30c   : > { %v10790_v15 = vor.u32 %v10789_v26, %v10788_v13  ;;  %v5100_v31 = vrot.slane %v20779_v39, 1  ;;  %v20780_v55 = vshrl.u32 %v19371_v32, 16  ;;  %v5108_v26 = vrot.slane %v20791_v29, 1 }
 0x30d   : > { %v10775_v44 = vsel %vm833_vm4, %v10770_v35, %v10774_v6  ;;  %v10779_v56 = vsel %vm833_vm4, %v10774_v6, %v10778_v45  ;;  %v20781_v35 = vshll.u32 %v19371_v32, 16  ;;  %v20783_v32 = vshrl.u32 %v19397_v0, 16 }
 0x30e   : > { %14778 = vmatmul.mubr.msk.bf16.gmra.mrb[28].mxu1 %vm349_vm1, %v13234_v36  ;;  %v17083_v36 = vld [vmem:[%s17154_s26 + $0x24] sm:$0xf] }
 0x30f   : > { %14781 = vmatprep.mubr.msk.bf16.mxu1 %vm349_vm1, %v13235_v61  ;;  %v19604_v40 = vcombine.low %v4932_v42, %v17083_v36  ;;  %v10781_v61 = vrot.slane %v10300_v54, 2  ;;  %v10785_v54 = vrot.slane %v10308_v17, 2  ;;  %v5097_v17 = vsel %vm5092_vm6, %v5094_v9, %v5096_v30 }
 0x310   : > { %v10796_v42 = vrot.slane %v20780_v55, 1  ;;  %v10797_v34 = vrot.slane %v20781_v35, 2  ;;  %v10800_v36 = vrot.slane %v20783_v32, 1 }
 0x311   : > { %15348 = vmatmul.mubr.msk.bf16.vlgmr.msra.gmra.mrb[0].mxu0 %vm349_vm1, %v10755_v49  ;;  %v5093_v49 = vrot.slane %v19604_v40, 1  ;;  %v10786_v3 = vor.u32 %v10785_v54, %v10784_v52  ;;  %v20789_v54 = vshrl.u32 %v19425_v4, 16 }
 0x312   : > { %15392 = vmatpush3.bf16.msra.mxu0 %v11435_v27  ;;  %15351 = vmatprep.mubr.msk.bf16.mxu0 %vm349_vm1, %v10759_v20  ;;  %v10782_v27 = vor.u32 %v10781_v61, %v10780_v18  ;;  %v10798_v16 = vor.u32 %v10797_v34, %v10796_v42  ;;  %v20786_v61 = vshrl.u32 %v19411_v38, 16  ;;  %v20797_v42 = vld [vmem:[#allocation31_spill] sm:$0xff]  ;;  %v10820_v34 = vrot.slane %v10384_v62, 1 }
 0x313   : > { %16655 = vmatprep.subr.msk.bf16.mxu0 %vm416_vm0, %v19574_v1  ;;  %v5095_v20 = vsel %vm5092_vm6, %v5093_v49, %v5094_v9  ;;  %v20787_v9 = vshll.u32 %v19411_v38, 16  ;;  %v10808_v38 = vrot.slane %v20789_v54, 1  ;;  %v5112_v35 = vrot.slane %v20797_v42, 1 }
 0x314   : > { %v10783_v33 = vsel %vm833_vm4, %v10778_v45, %v10782_v27  ;;  %v10787_v21 = vsel %vm833_vm4, %v10782_v27, %v10786_v3  ;;  %v10804_v49 = vrot.slane %v20786_v61, 1  ;;  %v20800_v62 = vshrl.u32 %v19478_v53, 16  ;;  %v20802_v61 = vld [vmem:[#allocation37_spill] sm:$0xff] }
 0x315   : > { %v10805_v45 = vrot.slane %v20787_v9, 2  ;;  %v10828_v9 = vrot.slane %v10400_v19, 1  ;;  %v19745_v19 = vld [vmem:[%s17154_s26 + $0x44] sm:$0xf] }
 0x316   : > { %14782 = vmatmul.mubr.msk.bf16.gmra.mrb[32].mxu1 %vm349_vm1, %v13236_v59  ;;  %v20776_v59 = vld [vmem:[#allocation10_spill] sm:$0xff] }
 0x317   : > { %14785 = vmatprep.mubr.msk.bf16.mxu1 %vm349_vm1, %v13237_v46  ;;  %v5098_v5 = vrot.slane %v20776_v59, 1  ;;  %v20777_v46 = vshrl.u32 %v19359_v43, 16 }
 0x319   : > { %15352 = vmatmul.mubr.msk.bf16.gmra.mrb[4].mxu0 %vm349_vm1, %v10763_v12  ;;  %v5099_v7 = vsel %vm5092_vm6, %v5096_v30, %v5098_v5  ;;  %v10792_v12 = vrot.slane %v20777_v46, 1  ;;  %v5101_v6 = vsel %vm5092_vm6, %v5098_v5, %v5100_v31  ;;  %v20792_v5 = vshrl.u32 %v19439_v25, 16 }
 0x31a   : > { %15355 = vmatprep.mubr.msk.bf16.mxu0 %vm349_vm1, %v10767_v47  ;;  %v10791_v47 = vsel %vm833_vm4, %v10786_v3, %v10790_v15 }
 0x31b   : > { %v10794_v43 = vor.u32 %v10793_v11, %v10792_v12  ;;  %v10812_v3 = vrot.slane %v20792_v5, 1  ;;  %v20795_v11 = vshrl.u32 %v19453_v63, 16  ;;  %v20805_v5 = vld [vmem:[#allocation42_spill] sm:$0xff] }
 0x31d   : > { %v10799_v41 = vsel %vm833_vm4, %v10794_v43, %v10798_v16 }
 0x31e   : > { %14786 = vmatmul.mubr.msk.bf16.gmra.mrb[36].mxu1 %vm349_vm1, %v13238_v10  ;;  %v5102_v10 = vrot.slane %v20782_v23, 1 }
 0x31f   : > { %14789 = vmatprep.mubr.msk.bf16.mxu1 %vm349_vm1, %v13239_v28  ;;  %v10795_v28 = vsel %vm833_vm4, %v10790_v15, %v10794_v43 }
 0x320   : > { %v5103_v14 = vsel %vm5092_vm6, %v5100_v31, %v5102_v10 }
 0x321   : > { %15356 = vmatmul.mubr.msk.bf16.gmra.mrb[8].mxu0 %vm349_vm1, %v10771_v48  ;;  %v20784_v48 = vshll.u32 %v19397_v0, 16 }
 0x322   : > { %15359 = vmatprep.mubr.msk.bf16.mxu0 %vm349_vm1, %v10775_v44  ;;  %v20785_v44 = vld [vmem:[#allocation19_spill] sm:$0xff] }
 0x323   : > { %v10801_v60 = vrot.slane %v20784_v48, 2  ;;  %v5104_v18 = vrot.slane %v20785_v44, 1  ;;  %v20801_v48 = vshll.u32 %v19478_v53, 16 }
 0x325   : > { %v10802_v0 = vor.u32 %v10801_v60, %v10800_v36  ;;  %v5105_v27 = vsel %vm5092_vm6, %v5102_v10, %v5104_v18  ;;  %v20798_v10 = vshll.u32 %v19467_v22, 16  ;;  %v10824_v22 = vrot.slane %v20800_v62, 1 }
 0x326   : > { %14790 = vmatmul.mubr.msk.bf16.gmra.mrb[40].mxu1 %vm349_vm1, %v13240_v2  ;;  %v5106_v2 = vrot.slane %v20788_v51, 1  ;;  %v10825_v60 = vrot.slane %v20801_v48, 2  ;;  %v11973_v62 = vsel %vm416_vm0, %v19574_v1, 0  ;;  %v20809_v48 = vld [vmem:[#allocation48_spill] sm:$0xff] }
 0x327   : > { %14795 = vmatprep.mubr.msk.bf16.mxu1 %vm349_vm1, %v5095_v20  ;;  %v10806_v20 = vor.u32 %v10805_v45, %v10804_v49  ;;  %v10803_v52 = vsel %vm833_vm4, %v10798_v16, %v10802_v0  ;;  %v10821_v43 = vrot.slane %v20798_v10, 2  ;;  %v5116_v49 = vrot.slane %v20802_v61, 1  ;;  %v20808_v10 = vld [vmem:[#allocation45_spill] sm:$0xff] }
 0x328   : > { %v20803_v45 = vshll.u32 %v19489_v50, 16  ;;  %v10826_v53 = vor.u32 %v10825_v60, %v10824_v22  ;;  %v5128_v60 = vrot.slane %v20809_v48, 1 }
 0x329   : > { %15360 = vmatmul.mubr.msk.bf16.gmra.mrb[12].mxu0 %vm349_vm1, %v10779_v56  ;;  %v5107_v56 = vsel %vm5092_vm6, %v5104_v18, %v5106_v2  ;;  %v10807_v13 = vsel %vm833_vm4, %v10802_v0, %v10806_v20  ;;  %v20804_v0 = vld [vmem:[#allocation41_spill] sm:$0xff] }
 0x32a   : > { %15363 = vmatprep.mubr.msk.bf16.mxu0 %vm349_vm1, %v10783_v33  ;;  %v20790_v33 = vshll.u32 %v19425_v4, 16 }
 0x32c   : > { %v10809_v30 = vrot.slane %v20790_v33, 2  ;;  %v11163_v33 = vld [vmem:[%s17154_s26 + $0x40] sm:$0xc] }
 0x32e   : > { %14796 = vmatmul.mubr.msk.bf16.vlgmr.msra.gmra.mrb[0].mxu1 %vm349_vm1, %v5097_v17  ;;  %v20793_v17 = vshll.u32 %v19439_v25, 16  ;;  %v10810_v4 = vor.u32 %v10809_v30, %v10808_v38  ;;  %v10816_v25 = vrot.slane %v20795_v11, 1 }
 0x32f   : > { %14799 = vmatprep.mubr.msk.bf16.mxu1 %vm349_vm1, %v5099_v7  ;;  %14840 = vmatpush3.bf16.msra.mxu1 %v5739_v37  ;;  %v20794_v7 = vld [vmem:[#allocation28_spill] sm:$0xff] }
 0x330   : > { %16642 = vmatprep.subr.msk.bf16.mxu1 %vm416_vm0, %v19648_v57  ;;  %v10813_v15 = vrot.slane %v20793_v17, 2  ;;  %v5110_v37 = vrot.slane %v20794_v7, 1  ;;  %v10811_v24 = vsel %vm833_vm4, %v10806_v20, %v10810_v4  ;;  %v13686_v17 = vcombine.low %v11163_v33, %v19745_v19  ;;  %v20812_v33 = vld [vmem:[#allocation57_spill] sm:$0xff] }
 0x331   : > { %15364 = vmatmul.mubr.msk.bf16.gmra.mrb[16].mxu0 %vm349_vm1, %v10787_v21  ;;  %v5109_v21 = vsel %vm5092_vm6, %v5106_v2, %v5108_v26  ;;  %v10829_v2 = vrot.slane %v20803_v45, 2 }
 0x332   : > { %15367 = vmatprep.mubr.msk.bf16.mxu0 %vm349_vm1, %v10791_v47  ;;  %v10814_v46 = vor.u32 %v10813_v15, %v10812_v3  ;;  %v5111_v12 = vsel %vm5092_vm6, %v5108_v26, %v5110_v37  ;;  %v20796_v47 = vshll.u32 %v19453_v63, 16  ;;  %v5120_v3 = vrot.slane %v20805_v5, 1  ;;  %v19754_v15 = vld [vmem:[%s17154_s26 + $0x48] sm:$0xff]  }
 0x333   : > { %v10830_v54 = vor.u32 %v10829_v2, %v10828_v9  ;;  %v19797_v9 = vld [vmem:[%s20432_s1 + $0x30] sm:$0x3] }
 0x334   : > { %v10817_v31 = vrot.slane %v20796_v47, 2  ;;  %v10815_v55 = vsel %vm833_vm4, %v10810_v4, %v10814_v46  ;;  %v19765_v47 = vld [vmem:[%s17154_s26 + $0x50] sm:$0xff]  }
 0x335   : > { %v10831_v26 = vsel %vm833_vm4, %v10826_v53, %v10830_v54 }
 0x336   : > { %14800 = vmatmul.mubr.msk.bf16.gmra.mrb[4].mxu1 %vm349_vm1, %v5101_v6  ;;  %v20799_v6 = vld [vmem:[#allocation32_spill] sm:$0xff]  ;;  %v10818_v63 = vor.u32 %v10817_v31, %v10816_v25 }
 0x337   : > { %14803 = vmatprep.mubr.msk.bf16.mxu1 %vm349_vm1, %v5103_v14  ;;  %v5114_v16 = vrot.slane %v20799_v6, 1  ;;  %v5113_v14 = vsel %vm5092_vm6, %v5110_v37, %v5112_v35  ;;  %v20806_v37 = vld [vmem:[#allocation43_spill] sm:$0xff] }
 0x338   : > { %v10819_v36 = vsel %vm833_vm4, %v10814_v46, %v10818_v63  ;;  %v5122_v4 = vrot.slane %v20806_v37, 1 }
 0x339   : > { %15368 = vmatmul.mubr.msk.bf16.gmra.mrb[20].mxu0 %vm349_vm1, %v10795_v28  ;;  %v10822_v28 = vor.u32 %v10821_v43, %v10820_v34  ;;  %v5115_v32 = vsel %vm5092_vm6, %v5112_v35, %v5114_v16  ;;  %v19771_v34 = vld [vmem:[%s17154_s26 + $0x58] sm:$0xff]   ;;  %v5126_v43 = vrot.slane %v20808_v10, 1 }
 0x33a   : > { %15371 = vmatprep.mubr.msk.bf16.mxu0 %vm349_vm1, %v10799_v41  ;;  %v16927_v41 = vld [vmem:[%s17154_s26 + $0xe8] ss:$0 sps:$4 sm:$0x33]   ;;  %v5123_v11 = vsel %vm5092_vm6, %v5120_v3, %v5122_v4 }
 0x33b   : > { %v10823_v18 = vsel %vm833_vm4, %v10818_v63, %v10822_v28  ;;  %v10833_v20 = vshrl.u32 %v16927_v41, 16  ;;  %v10827_v50 = vsel %vm833_vm4, %v10822_v28, %v10826_v53  ;;  %v5129_v45 = vsel %vm5092_vm6, %v5126_v43, %v5128_v60 }
 0x33d   : > { %v10835_v30 = vrot.slane %v10833_v20, 1  ;;  %v19810_v20 = vld [vmem:[%s17154_s26 + $0x70] sm:$0xff]  }
 0x33e   : > { %14804 = vmatmul.mubr.msk.bf16.gmra.mrb[8].mxu1 %vm349_vm1, %v5105_v27  ;;  %v5118_v27 = vrot.slane %v20804_v0, 1 }
 0x33f   : > { %14807 = vmatprep.mubr.msk.bf16.mxu1 %vm349_vm1, %v5107_v56  ;;  %v10836_v56 = vshll.u32 %v16927_v41, 16  ;;  %v19791_v41 = vld [vmem:[%s17154_s26 + $0x68] sm:$0xff]  }
 0x340   : > { %v5119_v38 = vsel %vm5092_vm6, %v5116_v49, %v5118_v27  ;;  %v5121_v46 = vsel %vm5092_vm6, %v5118_v27, %v5120_v3  ;;  %v11332_v2 = vrot.slane %v19791_v41, 2 }
 0x341   : > { %15372 = vmatmul.mubr.msk.bf16.gmra.mrb[24].mxu0 %vm349_vm1, %v10803_v52  ;;  %v5117_v52 = vsel %vm5092_vm6, %v5114_v16, %v5116_v49  ;;  %v11326_v16 = vrot.slane %v19765_v47, 2 }
 0x342   : > { %15375 = vmatprep.mubr.msk.bf16.mxu0 %vm349_vm1, %v10807_v13  ;;  %v10838_v13 = vrot.slane %v10836_v56, 2 }
 0x346   : > { %14808 = vmatmul.mubr.msk.bf16.gmra.mrb[12].mxu1 %vm349_vm1, %v5109_v21  ;;  %v10839_v21 = vor.u32 %v10838_v13, %v10835_v30  ;;  %v5467_v30 = vshrl.u32 %v19604_v40, 16  ;;  %v5470_v13 = vshll.u32 %v19604_v40, 16 }
 0x347   : > { %14811 = vmatprep.mubr.msk.bf16.mxu1 %vm349_vm1, %v5111_v12  ;;  %v11323_v12 = vrot.slane %v13686_v17, 2 }
 0x348   : > { %v10840_v25 = vsel %vm833_vm4, %v10830_v54, %v10839_v21  ;;  %v16938_v21 = vld [vmem:[%s17154_s26 + $0xd0] ss:$0 sps:$4 sm:$0x11]  }
 0x349   : > { %15376 = vmatmul.mubr.msk.bf16.gmra.mrb[28].mxu0 %vm349_vm1, %v10811_v24  ;;  %v11324_v24 = vrot.slane %v19754_v15, 2 }
 0x34a   : > { %15379 = vmatprep.mubr.msk.bf16.mxu0 %vm349_vm1, %v10815_v55  ;;  %v20807_v55 = vld [vmem:[#allocation44_spill] sm:$0xff] }
 0x34b   : > { %v11325_v31 = vsel %vm6000_vm8, %v11323_v12, %v11324_v24  ;;  %v5124_v35 = vrot.slane %v20807_v55, 1  ;;  %v5472_v12 = vrot.slane %v5470_v13, 2  ;;  %v19853_v13 = vld [vmem:[%s17154_s26 + $0x90] sm:$0xff]  }
 0x34d   : > { %v5125_v63 = vsel %vm5092_vm6, %v5122_v4, %v5124_v35  ;;  %v5127_v28 = vsel %vm5092_vm6, %v5124_v35, %v5126_v43  ;;  %v19833_v35 = vld [vmem:[%s17154_s26 + $0x80] sm:$0xff]  }
 0x34e   : > { %14812 = vmatmul.mubr.msk.bf16.gmra.mrb[16].mxu1 %vm349_vm1, %v5113_v14  ;;  %v11328_v14 = vrot.slane %v19771_v34, 2 }
 0x34f   : > { %14815 = vmatprep.mubr.msk.bf16.mxu1 %vm349_vm1, %v5115_v32  ;;  %v11327_v32 = vsel %vm6000_vm8, %v11324_v24, %v11326_v16  ;;  %v20813_v24 = vld [vmem:[#allocation5_spill] sm:$0xff] }
 0x350   : > { %v11329_v22 = vsel %vm6000_vm8, %v11326_v16, %v11328_v14  ;;  %v5136_v16 = vrot.slane %v16938_v21, 1  ;;  %v11342_v21 = vrot.slane %v19853_v13, 2 }
 0x351   : > { %15380 = vmatmul.mubr.msk.bf16.gmra.mrb[32].mxu0 %vm349_vm1, %v10819_v36  ;;  %v19783_v36 = vld [vmem:[%s17154_s26 + $0x60] sm:$0xff]  }
 0x352   : > { %15383 = vmatprep.mubr.msk.bf16.mxu0 %vm349_vm1, %v10823_v18  ;;  %v20810_v18 = vld [vmem:[#allocation51_spill] sm:$0xff]  ;;  %v11330_v1 = vrot.slane %v19783_v36, 2 }
 0x353   : > { %v5130_v49 = vrot.slane %v20810_v18, 1 }
 0x354   : > { %v11331_v53 = vsel %vm6000_vm8, %v11328_v14, %v11330_v1  ;;  %v11333_v56 = vsel %vm6000_vm8, %v11330_v1, %v11332_v2  ;;  %v20816_v1 = vld [vmem:[#allocation9_spill] sm:$0xff] }
 0x355   : > { %v5131_v27 = vsel %vm5092_vm6, %v5128_v60, %v5130_v49  ;;  %v20815_v60 = vld [vmem:[#allocation8_spill] sm:$0xff] }
 0x356   : > { %14816 = vmatmul.mubr.msk.bf16.gmra.mrb[20].mxu1 %vm349_vm1, %v5117_v52  ;;  %v20811_v52 = vld [vmem:[#allocation54_spill] sm:$0xff] }
 0x357   : > { %14819 = vmatprep.mubr.msk.bf16.mxu1 %vm349_vm1, %v5119_v38  ;;  %v5132_v54 = vrot.slane %v20811_v52, 1  ;;  %v19816_v38 = vld [vmem:[%s17154_s26 + $0x78] sm:$0xff]  }
 0x358   : > { %v11336_v17 = vrot.slane %v19816_v38, 2 }
 0x359   : > { %15384 = vmatmul.mubr.msk.bf16.gmra.mrb[36].mxu0 %vm349_vm1, %v10827_v50  ;;  %v5134_v50 = vrot.slane %v20812_v33, 1  ;;  %v5133_v3 = vsel %vm5092_vm6, %v5130_v49, %v5132_v54  ;;  %v5486_v49 = vrot.slane %v20815_v60, 1 }
 0x35a   : > { %15387 = vmatprep.mubr.msk.bf16.mxu0 %vm349_vm1, %v10831_v26  ;;  %v11334_v26 = vrot.slane %v19810_v20, 2 }
 0x35b   : > { %v5135_v4 = vsel %vm5092_vm6, %v5132_v54, %v5134_v50 }
 0x35c   : > { %v11337_v43 = vsel %vm6000_vm8, %v11334_v26, %v11336_v17 }
 0x35e   : > { %14820 = vmatmul.mubr.msk.bf16.gmra.mrb[24].mxu1 %vm349_vm1, %v5121_v46  ;;  %v5469_v46 = vrot.slane %v5467_v30, 1 }
 0x35f   : > { %14823 = vmatprep.mubr.msk.bf16.mxu1 %vm349_vm1, %v5123_v11  ;;  %v5477_v11 = vrot.slane %v20813_v24, 1 }
 0x360   : > { %v5473_v14 = vor.u32 %v5472_v12, %v5469_v46  ;;  %v20819_v12 = vld [vmem:[#allocation14_spill] sm:$0xff] }
 0x361   : > { %15388 = vmatmul.mubr.msk.bf16.gmra.mrb[40].mxu0 %vm349_vm1, %v10840_v25  ;;  %v20814_v25 = vld [vmem:[#allocation6_spill] sm:$0xff]  ;;  %v5504_v24 = vrot.slane %v20819_v12, 1 }
 0x362   : > { %15393 = vmatprep.mubr.msk.bf16.mxu0 %vm349_vm1, %v11325_v31  ;;  %v5480_v40 = vrot.slane %v20814_v25, 2  ;;  %v11335_v31 = vsel %vm6000_vm8, %v11332_v2, %v11334_v26 }
 0x366   : > { %14824 = vmatmul.mubr.msk.bf16.gmra.mrb[28].mxu1 %vm349_vm1, %v5125_v63  ;;  %v19838_v63 = vld [vmem:[%s17154_s26 + $0x88] sm:$0xff]  }
 0x367   : > { %14827 = vmatprep.mubr.msk.bf16.mxu1 %vm349_vm1, %v5127_v28  ;;  %v5481_v28 = vor.u32 %v5480_v40, %v5477_v11  ;;  %v20820_v11 = vld [vmem:[#allocation15_spill] sm:$0xff] }
 0x368   : > { %v5507_v25 = vrot.slane %v20820_v11, 2  ;;  %v19899_v11 = vld [vmem:[%s17154_s26 + $0xb0] sm:$0xff]  }
 0x369   : > { %15394 = vmatmul.mubr.msk.bf16.vlgmr.msra.gmra.mrb[0].mxu0 %vm349_vm1, %v11327_v32  ;;  %v11338_v32 = vrot.slane %v19833_v35, 2  ;;  %v5482_v2 = vsel %vm833_vm4, %v5473_v14, %v5481_v28  ;;  %v20822_v14 = vld [vmem:[#allocation18_spill] sm:$0xff] }
 0x36a   : > { %15438 = vmatpush3.bf16.msra.mxu0 %v11973_v62  ;;  %15397 = vmatprep.mubr.msk.bf16.mxu0 %vm349_vm1, %v11329_v22  ;;  %v5137_v62 = vsel %vm5092_vm6, %v5134_v50, %v5136_v16  ;;  %v11340_v22 = vrot.slane %v19838_v63, 2 }
 0x36b   : > { %16656 = vmatprep.subr.msk.bf16.mxu0 %vm416_vm0, %v19797_v9  ;;  %v11339_v30 = vsel %vm6000_vm8, %v11336_v17, %v11338_v32 }
 0x36c   : > { %v11341_v50 = vsel %vm6000_vm8, %v11338_v32, %v11340_v22  ;;  %v5516_v32 = vrot.slane %v20822_v14, 2  ;;  %v20827_v14 = vld [vmem:[#allocation26_spill] sm:$0xff] }
 0x36e   : > { %14828 = vmatmul.mubr.msk.bf16.gmra.mrb[32].mxu1 %vm349_vm1, %v5129_v45  ;;  %v5489_v45 = vrot.slane %v20816_v1, 2  ;;  %v19880_v1 = vld [vmem:[%s17154_s26 + $0xa8] sm:$0xff]  }
 0x36f   : > { %14831 = vmatprep.mubr.msk.bf16.mxu1 %vm349_vm1, %v5131_v27  ;;  %v20817_v27 = vld [vmem:[#allocation11_spill] sm:$0xff] }
 0x370   : > { %v5490_v26 = vor.u32 %v5489_v45, %v5486_v49  ;;  %v5508_v49 = vor.u32 %v5507_v25, %v5504_v24  ;;  %v17085_v45 = vld [vmem:[%s20432_s1 + $0x18] sm:$0x3] }
 0x371   : > { %15398 = vmatmul.mubr.msk.bf16.gmra.mrb[4].mxu0 %vm349_vm1, %v11331_v53  ;;  %v5495_v53 = vrot.slane %v20817_v27, 1  ;;  %v11348_v27 = vrot.slane %v19880_v1, 2 }
 0x372   : > { %15401 = vmatprep.mubr.msk.bf16.mxu0 %vm349_vm1, %v11333_v56  ;;  %v20818_v56 = vld [vmem:[#allocation12_spill] sm:$0xff]  ;;  %v5491_v17 = vsel %vm833_vm4, %v5481_v28, %v5490_v26  ;;  %v19875_v28 = vld [vmem:[%s17154_s26 + $0xa0] sm:$0xff]  }
 0x373   : > { %v5498_v54 = vrot.slane %v20818_v56, 2 }
 0x376   : > { %14832 = vmatmul.mubr.msk.bf16.gmra.mrb[36].mxu1 %vm349_vm1, %v5133_v3  ;;  %v19858_v3 = vld [vmem:[%s17154_s26 + $0x98] sm:$0xff]  }
 0x377   : > { %14835 = vmatprep.mubr.msk.bf16.mxu1 %vm349_vm1, %v5135_v4  ;;  %v5499_v4 = vor.u32 %v5498_v54, %v5495_v53  ;;  %v11344_v46 = vrot.slane %v19858_v3, 2  ;;  %v20823_v53 = vld [vmem:[#allocation20_spill] sm:$0xff]  ;;  %v20824_v54 = vld [vmem:[#allocation21_spill] sm:$0xff] }
 0x378   : > { %v5522_v56 = vrot.slane %v20823_v53, 1 }
 0x379   : > { %15402 = vmatmul.mubr.msk.bf16.gmra.mrb[8].mxu0 %vm349_vm1, %v11335_v31  ;;  %v5500_v40 = vsel %vm833_vm4, %v5490_v26, %v5499_v4  ;;  %v6113_v31 = vsel %vm416_vm0, %v19648_v57, 0  ;;  %v11345_v60 = vsel %vm6000_vm8, %v11342_v21, %v11344_v46  ;;  %v20825_v26 = vld [vmem:[#allocation24_spill] sm:$0xff] }
 0x37a   : > { %15405 = vmatprep.mubr.msk.bf16.mxu0 %vm349_vm1, %v11337_v43  ;;  %v20821_v43 = vld [vmem:[#allocation17_spill] sm:$0xff] }
 0x37b   : > { %v5513_v16 = vrot.slane %v20821_v43, 1 }
 0x37d   : > { %v5517_v57 = vor.u32 %v5516_v32, %v5513_v16  ;;  %v5540_v32 = vrot.slane %v20827_v14, 1 }
 0x37e   : > { %14836 = vmatmul.mubr.msk.bf16.gmra.mrb[40].mxu1 %vm349_vm1, %v5137_v62  ;;  %v11343_v62 = vsel %vm6000_vm8, %v11340_v22, %v11342_v21  ;;  %v11346_v22 = vrot.slane %v19875_v28, 2  ;;  %v5531_v21 = vrot.slane %v20825_v26, 1 }
 0x37f   : > { %14841 = vmatprep.mubr.msk.bf16.mxu1 %vm349_vm1, %v5482_v2  ;;  %v5509_v2 = vsel %vm833_vm4, %v5499_v4, %v5508_v49 }
 0x380   : > { %v11347_v24 = vsel %vm6000_vm8, %v11344_v46, %v11346_v22  ;;  %v11349_v4 = vsel %vm6000_vm8, %v11346_v22, %v11348_v27  ;;  %v11350_v46 = vrot.slane %v19899_v11, 2 }
 0x381   : > { %15406 = vmatmul.mubr.msk.bf16.gmra.mrb[12].mxu0 %vm349_vm1, %v11339_v30  ;;  %v5525_v30 = vrot.slane %v20824_v54, 2  ;;  %v19919_v54 = vld [vmem:[%s17154_s26 + $0xc0] sm:$0xff]  }
 0x382   : > { %15409 = vmatprep.mubr.msk.bf16.mxu0 %vm349_vm1, %v11341_v50  ;;  %v5518_v50 = vsel %vm833_vm4, %v5508_v49, %v5517_v57 }
 0x383   : > { %v5526_v25 = vor.u32 %v5525_v30, %v5522_v56  ;;  %v11351_v56 = vsel %vm6000_vm8, %v11348_v27, %v11350_v46  ;;  %v11354_v27 = vrot.slane %v19919_v54, 2 }
 0x385   : > { %v5527_v43 = vsel %vm833_vm4, %v5517_v57, %v5526_v25 }
 0x386   : > { %14842 = vmatmul.mubr.msk.bf16.vlgmr.msra.gmra.mrb[0].mxu1 %vm349_vm1, %v5491_v17  ;;  %v20826_v17 = vld [vmem:[#allocation25_spill] sm:$0xff] }
 0x387   : > { %14845 = vmatprep.mubr.msk.bf16.mxu1 %vm349_vm1, %v5500_v40  ;;  %14886 = vmatpush3.bf16.msra.mxu1 %v6113_v31  ;;  %v5534_v12 = vrot.slane %v20826_v17, 2  ;;  %v19904_v40 = vld [vmem:[%s17154_s26 + $0xb8] sm:$0xff]  }
 0x388   : > { %16644 = vmatprep.subr.msk.bf16.mxu1 %vm416_vm0, %v17085_v45  ;;  %v11352_v16 = vrot.slane %v19904_v40, 2  ;;  %v20829_v45 = vld [vmem:[#allocation29_spill] sm:$0xff] }
 0x389   : > { %15410 = vmatmul.mubr.msk.bf16.gmra.mrb[16].mxu0 %vm349_vm1, %v11343_v62  ;;  %v5535_v31 = vor.u32 %v5534_v12, %v5531_v21  ;;  %v20828_v62 = vld [vmem:[#allocation27_spill] sm:$0xff]  ;;  %v5549_v22 = vrot.slane %v20829_v45, 1  ;;  %v20831_v12 = vld [vmem:[#allocation33_spill] sm:$0xff] }
 0x38a   : > { %15413 = vmatprep.mubr.msk.bf16.mxu0 %vm349_vm1, %v11345_v60  ;;  %v5543_v60 = vrot.slane %v20828_v62, 2  ;;  %v11353_v57 = vsel %vm6000_vm8, %v11350_v46, %v11352_v16 }
 0x38b   : > { %v5536_v49 = vsel %vm833_vm4, %v5526_v25, %v5535_v31 }
 0x38c   : > { %v5544_v30 = vor.u32 %v5543_v60, %v5540_v32  ;;  %v20834_v32 = vld [vmem:[#allocation36_spill] sm:$0xff]  ;;  %v11355_v60 = vsel %vm6000_vm8, %v11352_v16, %v11354_v27 }
 0x38d   : > { %v5570_v62 = vrot.slane %v20834_v32, 2  ;;  %v19960_v32 = vld [vmem:[%s17154_s26 + $0xe0] sm:$0xff]  }
 0x38e   : > { %14846 = vmatmul.mubr.msk.bf16.gmra.mrb[4].mxu1 %vm349_vm1, %v5509_v2  ;;  %v20830_v2 = vld [vmem:[#allocation30_spill] sm:$0xff]  ;;  %v5545_v21 = vsel %vm833_vm4, %v5535_v31, %v5544_v30 }
 0x38f   : > { %14849 = vmatprep.mubr.msk.bf16.mxu1 %vm349_vm1, %v5518_v50  ;;  %v5552_v53 = vrot.slane %v20830_v2, 2  ;;  %v19924_v50 = vld [vmem:[%s17154_s26 + $0xc8] sm:$0xff]  }
 0x390   : > { %v11356_v17 = vrot.slane %v19924_v50, 2 }
 0x391   : > { %15414 = vmatmul.mubr.msk.bf16.gmra.mrb[20].mxu0 %vm349_vm1, %v11347_v24  ;;  %v5553_v26 = vor.u32 %v5552_v53, %v5549_v22  ;;  %v5558_v24 = vrot.slane %v20831_v12, 1  ;;  %v19944_v22 = vld [vmem:[%s17154_s26 + $0xd8] sm:$0xff]   ;;  %v20835_v53 = vld [vmem:[#allocation38_spill] sm:$0xff] }
 0x392   : > { %15417 = vmatprep.mubr.msk.bf16.mxu0 %vm349_vm1, %v11349_v4  ;;  %v20832_v4 = vld [vmem:[#allocation34_spill] sm:$0xff]  ;;  %v11357_v31 = vsel %vm6000_vm8, %v11354_v27, %v11356_v17 }
 0x393   : > { %v5561_v25 = vrot.slane %v20832_v4, 2  ;;  %v5554_v46 = vsel %vm833_vm4, %v5544_v30, %v5553_v26  ;;  %v11690_v12 = vld [vmem:[%s17154_s26 + $0x40] sm:$0x8]  ;;  %v20837_v4 = vld [vmem:[#allocation64_spill] sm:$0xff] }
 0x395   : > { %v5562_v45 = vor.u32 %v5561_v25, %v5558_v24  ;;  %v5585_v25 = vrot.slane %v20837_v4, 1  ;;  %v16952_v4 = vld [vmem:[%s17154_s26 + $0xf0] ss:$0 sps:$4 sm:$0x33]  }
 0x396   : > { %14850 = vmatmul.mubr.msk.bf16.gmra.mrb[8].mxu1 %vm349_vm1, %v5527_v43  ;;  %v20833_v43 = vld [vmem:[#allocation35_spill] sm:$0xff] }
 0x397   : > { %14853 = vmatprep.mubr.msk.bf16.mxu1 %vm349_vm1, %v5536_v49  ;;  %v5567_v14 = vrot.slane %v20833_v43, 1  ;;  %v19939_v49 = vld [vmem:[%s17154_s26 + $0xd0] sm:$0xff]   ;;  %v5563_v27 = vsel %vm833_vm4, %v5553_v26, %v5562_v45  ;;  %v13732_v26 = vcombine.low %v11690_v12, %v19745_v19  ;;  %v11709_v12 = vshrl.u32 %v19754_v15, 16 }
 0x398   : > { %v11358_v16 = vrot.slane %v19939_v49, 2 }
 0x399   : > { %15418 = vmatmul.mubr.msk.bf16.gmra.mrb[24].mxu0 %vm349_vm1, %v11351_v56  ;;  %v5571_v2 = vor.u32 %v5570_v62, %v5567_v14  ;;  %v5576_v56 = vrot.slane %v20835_v53, 1  ;;  %v20839_v53 = vld [vmem:[#allocation46_spill] sm:$0xff]  ;;  %v11711_v18 = vrot.slane %v11709_v12, 3  ;;  %v11727_v12 = vshrl.u32 %v19771_v34, 16 }
 0x39a   : > { %15421 = vmatprep.mubr.msk.bf16.mxu0 %vm349_vm1, %v11353_v57  ;;  %v20836_v57 = vld [vmem:[#allocation39_spill] sm:$0xff]  ;;  %v11359_v14 = vsel %vm6000_vm8, %v11356_v17, %v11358_v16 }
 0x39b   : > { %v5579_v30 = vrot.slane %v20836_v57, 2  ;;  %v5572_v24 = vsel %vm833_vm4, %v5562_v45, %v5571_v2  ;;  %v5594_v57 = vrot.slane %v20839_v53, 1  ;;  %v20840_v17 = vld [vmem:[#allocation47_spill] sm:$0xff] }
 0x39c   : > { %v20842_v53 = vld [vmem:[#allocation67_spill] sm:$0xff] }
 0x39d   : > { %v5580_v62 = vor.u32 %v5579_v30, %v5576_v56  ;;  %v11362_v56 = vrot.slane %v19960_v32, 2 }
 0x39e   : > { %14854 = vmatmul.mubr.msk.bf16.gmra.mrb[12].mxu1 %vm349_vm1, %v5545_v21  ;;  %v11360_v21 = vrot.slane %v19944_v22, 2 }
 0x39f   : > { %14857 = vmatprep.mubr.msk.bf16.mxu1 %vm349_vm1, %v5554_v46  ;;  %v20838_v46 = vld [vmem:[#allocation65_spill] sm:$0xff]  ;;  %v5581_v30 = vsel %vm833_vm4, %v5571_v2, %v5580_v62 }
 0x3a0   : > { %v5588_v43 = vrot.slane %v20838_v46, 2  ;;  %v5597_v46 = vrot.slane %v20840_v17, 2  ;;  %v5606_v17 = vrot.slane %v20842_v53, 2  ;;  %v11363_v33 = vsel %vm6000_vm8, %v11360_v21, %v11362_v56 }
 0x3a1   : > { %15422 = vmatmul.mubr.msk.bf16.gmra.mrb[28].mxu0 %vm349_vm1, %v11355_v60  ;;  %v19963_v60 = vld [vmem:[%s17154_s26 + $0xe8] sm:$0xff]  }
 0x3a2   : > { %15425 = vmatprep.mubr.msk.bf16.mxu0 %vm349_vm1, %v11357_v31  ;;  %v11361_v31 = vsel %vm6000_vm8, %v11358_v16, %v11360_v21  ;;  %v5589_v45 = vor.u32 %v5588_v43, %v5585_v25  ;;  %v11364_v19 = vrot.slane %v19963_v60, 2  ;;  %v11704_v16 = vshll.u32 %v13732_v26, 16  ;;  %v20841_v43 = vld [vmem:[#allocation66_spill] sm:$0xff] }
 0x3a3   : > { %v11718_v21 = vshrl.u32 %v19765_v47, 16 }
 0x3a4   : > { %v5590_v25 = vsel %vm833_vm4, %v5580_v62, %v5589_v45  ;;  %v11365_v2 = vsel %vm6000_vm8, %v11362_v56, %v11364_v19  ;;  %v11706_v52 = vrot.slane %v11704_v16, 4  ;;  %v11366_v62 = vrot.slane %v16952_v4, 2  ;;  %v20845_v4 = vld [vmem:[#allocation68_spill] sm:$0xff] }
 0x3a6   : > { %14858 = vmatmul.mubr.msk.bf16.gmra.mrb[16].mxu1 %vm349_vm1, %v5563_v27  ;;  %v11701_v27 = vshrl.u32 %v13732_v26, 16 }
 0x3a7   : > { %14861 = vmatprep.mubr.msk.bf16.mxu1 %vm349_vm1, %v5572_v24  ;;  %v11712_v24 = vshll.u32 %v19754_v15, 16 }
 0x3a8   : > { %v11703_v26 = vrot.slane %v11701_v27, 3 }
 0x3a9   : > { %15426 = vmatmul.mubr.msk.bf16.gmra.mrb[32].mxu0 %vm349_vm1, %v11359_v14  ;;  %v5603_v14 = vrot.slane %v20841_v43, 1  ;;  %v11714_v15 = vrot.slane %v11712_v24, 4  ;;  %v20846_v24 = vld [vmem:[#allocation69_spill] sm:$0xff] }
 0x3aa   : > { %15429 = vmatprep.mubr.msk.bf16.mxu0 %vm349_vm1, %v11361_v31  ;;  %v5598_v31 = vor.u32 %v5597_v46, %v5594_v57  ;;  %v11721_v46 = vshll.u32 %v19765_v47, 16  ;;  %v20843_v57 = vld [vmem:[#allocation49_spill] sm:$0xff]  ;;  %v11707_v27 = vor.u32 %v11706_v52, %v11703_v26  ;;  %v11720_v47 = vrot.slane %v11718_v21, 3 }
 0x3ab   : > { %v5607_v48 = vor.u32 %v5606_v17, %v5603_v14  ;;  %v5612_v56 = vrot.slane %v20843_v57, 1  ;;  %v11715_v16 = vor.u32 %v11714_v15, %v11711_v18  ;;  %v11730_v17 = vshll.u32 %v19771_v34, 16 }
 0x3ac   : > { %v5599_v53 = vsel %vm833_vm4, %v5589_v45, %v5598_v31  ;;  %v5621_v45 = vrot.slane %v20845_v4, 1  ;;  %v5624_v14 = vrot.slane %v20846_v24, 2  ;;  %v11723_v57 = vrot.slane %v11721_v46, 4 }
 0x3ad   : > { %v11716_v52 = vsel %vm1900_vm5, %v11707_v27, %v11715_v16  ;;  %v11729_v18 = vrot.slane %v11727_v12, 3  ;;  %v11732_v26 = vrot.slane %v11730_v17, 4  ;;  %v11739_v15 = vshll.u32 %v19783_v36, 16 }
 0x3ae   : > { %14862 = vmatmul.mubr.msk.bf16.gmra.mrb[20].mxu1 %vm349_vm1, %v5581_v30  ;;  %v20844_v30 = vld [vmem:[#allocation50_spill] sm:$0xff]  ;;  %v5625_v34 = vor.u32 %v5624_v14, %v5621_v45  ;;  %v11745_v27 = vshrl.u32 %v19791_v41, 16  ;;  %v11748_v12 = vshll.u32 %v19791_v41, 16  ;;  %v20850_v14 = vld [vmem:[#allocation71_spill] sm:$0xff] }
 0x3af   : > { %14865 = vmatprep.mubr.msk.bf16.mxu1 %vm349_vm1, %v5590_v25  ;;  %v5615_v25 = vrot.slane %v20844_v30, 2  ;;  %v11733_v46 = vor.u32 %v11732_v26, %v11729_v18 }
 0x3b0   : > { %v11750_v18 = vrot.slane %v11748_v12, 4 }
 0x3b1   : > { %15430 = vmatmul.mubr.msk.bf16.gmra.mrb[36].mxu0 %vm349_vm1, %v11363_v33  ;;  %v5608_v33 = vsel %vm833_vm4, %v5598_v31, %v5607_v48  ;;  %v5616_v43 = vor.u32 %v5615_v25, %v5612_v56  ;;  %v11736_v31 = vshrl.u32 %v19783_v36, 16  ;;  %v20848_v56 = vld [vmem:[#allocation53_spill] sm:$0xff]  ;;  %v5642_v36 = vrot.slane %v20850_v14, 2 }
 0x3b2   : > { %15433 = vmatprep.mubr.msk.bf16.mxu0 %vm349_vm1, %v11365_v2  ;;  %v11367_v2 = vsel %vm6000_vm8, %v11364_v19, %v11366_v62  ;;  %v11724_v19 = vor.u32 %v11723_v57, %v11720_v47  ;;  %v20847_v62 = vld [vmem:[#allocation52_spill] sm:$0xff]  ;;  %v5633_v25 = vrot.slane %v20848_v56, 2 }
 0x3b3   : > { %v5630_v21 = vrot.slane %v20847_v62, 1  ;;  %v5626_v17 = vsel %vm833_vm4, %v5616_v43, %v5625_v34 }
 0x3b4   : > { %v11725_v57 = vsel %vm1900_vm5, %v11715_v16, %v11724_v19  ;;  %v11734_v47 = vsel %vm1900_vm5, %v11724_v19, %v11733_v46  ;;  %v11757_v16 = vshll.u32 %v19810_v20, 16  ;;  %v20852_v19 = vld [vmem:[#allocation56_spill] sm:$0xff] }
 0x3b5   : > { %v5634_v41 = vor.u32 %v5633_v25, %v5630_v21  ;;  %v5651_v14 = vrot.slane %v20852_v19, 2  ;;  %v11763_v21 = vshrl.u32 %v19816_v38, 16  ;;  %v11766_v25 = vshll.u32 %v19816_v38, 16 }
 0x3b6   : > { %14866 = vmatmul.mubr.msk.bf16.gmra.mrb[24].mxu1 %vm349_vm1, %v5599_v53  ;;  %v5617_v53 = vsel %vm833_vm4, %v5607_v48, %v5616_v43  ;;  %v12500_v48 = vsel %vm416_vm0, %v19797_v9, 0  ;;  %v11747_v43 = vrot.slane %v11745_v27, 3  ;;  %v20851_v9 = vld [vmem:[#allocation55_spill] sm:$0xff] }
 0x3b7   : > { %14869 = vmatprep.mubr.msk.bf16.mxu1 %vm349_vm1, %v5608_v33  ;;  %v20849_v33 = vld [vmem:[#allocation70_spill] sm:$0xff]  ;;  %v5635_v27 = vsel %vm833_vm4, %v5625_v34, %v5634_v41  ;;  %v11768_v38 = vrot.slane %v11766_v25, 4  ;;  %v11781_v25 = vshrl.u32 %v19838_v63, 16 }
 0x3b8   : > { %v5639_v45 = vrot.slane %v20849_v33, 1  ;;  %v11751_v12 = vor.u32 %v11750_v18, %v11747_v43 }
 0x3b9   : > { %15434 = vmatmul.mubr.msk.bf16.gmra.mrb[40].mxu0 %vm349_vm1, %v11367_v2  ;;  %v11738_v2 = vrot.slane %v11736_v31, 3 }
 0x3ba   : > { %15439 = vmatprep.mubr.msk.bf16.mxu0 %vm349_vm1, %v11716_v52  ;;  %v11741_v52 = vrot.slane %v11739_v15, 4  ;;  %v5643_v26 = vor.u32 %v5642_v36, %v5639_v45  ;;  %v11754_v15 = vshrl.u32 %v19810_v20, 16  ;;  %v20853_v36 = vld [vmem:[#allocation72_spill] sm:$0xff] }
 0x3bb   : > { %v5657_v20 = vrot.slane %v20853_v36, 1 }
 0x3bc   : > { %v11742_v31 = vor.u32 %v11741_v52, %v11738_v2  ;;  %v5644_v45 = vsel %vm833_vm4, %v5634_v41, %v5643_v26  ;;  %v20854_v2 = vld [vmem:[#allocation73_spill] sm:$0xff] }
 0x3bd   : > { %v5660_v52 = vrot.slane %v20854_v2, 2 }
 0x3be   : > { %14870 = vmatmul.mubr.msk.bf16.gmra.mrb[28].mxu1 %vm349_vm1, %v5617_v53  ;;  %v5648_v53 = vrot.slane %v20851_v9, 1  ;;  %v11765_v9 = vrot.slane %v11763_v21, 3  ;;  %v11752_v34 = vsel %vm1900_vm5, %v11742_v31, %v11751_v12 }
 0x3bf   : > { %14873 = vmatprep.mubr.msk.bf16.mxu1 %vm349_vm1, %v5626_v17  ;;  %v20029_v17 = vld [vmem:[%s17154_s26 + $0xd0] ss:$0 sps:$4 sm:$0x33]   ;;  %v5661_v18 = vor.u32 %v5660_v52, %v5657_v20 }
 0x3c0   : > { %v5652_v19 = vor.u32 %v5651_v14, %v5648_v53  ;;  %v5664_v43 = vshrl.u32 %v20029_v17, 16  ;;  %v5667_v41 = vshll.u32 %v20029_v17, 16  ;;  %v11772_v14 = vshrl.u32 %v19833_v35, 16 }
 0x3c1   : > { %15440 = vmatmul.mubr.msk.bf16.vlgmr.msra.gmra.mrb[0].mxu0 %vm349_vm1, %v11725_v57  ;;  %v11756_v57 = vrot.slane %v11754_v15, 3  ;;  %v11775_v53 = vshll.u32 %v19833_v35, 16  ;;  %v11783_v35 = vrot.slane %v11781_v25, 3 }
 0x3c2   : > { %15484 = vmatpush3.bf16.msra.mxu0 %v12500_v48  ;;  %15443 = vmatprep.mubr.msk.bf16.mxu0 %vm349_vm1, %v11734_v47  ;;  %v11759_v48 = vrot.slane %v11757_v16, 4  ;;  %v11743_v47 = vsel %vm1900_vm5, %v11733_v46, %v11742_v31  ;;  %v5653_v46 = vsel %vm833_vm4, %v5643_v26, %v5652_v19  ;;  %v11769_v16 = vor.u32 %v11768_v38, %v11765_v9 }
 0x3c3   : > { %v5666_v31 = vrot.slane %v5664_v43, 1  ;;  %v5669_v21 = vrot.slane %v5667_v41, 2  ;;  %v11774_v52 = vrot.slane %v11772_v14, 3 }
 0x3c4   : > { %v11760_v15 = vor.u32 %v11759_v48, %v11756_v57  ;;  %v11777_v57 = vrot.slane %v11775_v53, 4 }
 0x3c5   : > { %v5670_v9 = vor.u32 %v5669_v21, %v5666_v31 }
 0x3c6   : > { %14874 = vmatmul.mubr.msk.bf16.gmra.mrb[32].mxu1 %vm349_vm1, %v5635_v27  ;;  %v11784_v27 = vshll.u32 %v19838_v63, 16  ;;  %v11761_v20 = vsel %vm1900_vm5, %v11751_v12, %v11760_v15  ;;  %v11770_v26 = vsel %vm1900_vm5, %v11760_v15, %v11769_v16  ;;  %v11778_v63 = vor.u32 %v11777_v57, %v11774_v52 }
 0x3c7   : > { %14877 = vmatprep.mubr.msk.bf16.mxu1 %vm349_vm1, %v5644_v45  ;;  %v5662_v45 = vsel %vm833_vm4, %v5652_v19, %v5661_v18  ;;  %v11790_v19 = vshrl.u32 %v19853_v13, 16  ;;  %v11793_v12 = vshll.u32 %v19853_v13, 16  ;;  %v5671_v43 = vsel %vm833_vm4, %v5661_v18, %v5670_v9 }
 0x3c8   : > { %v11786_v48 = vrot.slane %v11784_v27, 4  ;;  %v11799_v15 = vshrl.u32 %v19858_v3, 16  ;;  %v6004_v13 = vrot.slane %v20774_v58, 2  ;;  %v6006_v27 = vrot.slane %v20776_v59, 2 }
 0x3c9   : > { %15444 = vmatmul.mubr.msk.bf16.gmra.mrb[4].mxu0 %vm349_vm1, %v11743_v47  ;;  %v20855_v47 = vld [vmem:[#allocation4_spill] sm:$0xff]  ;;  %v11792_v53 = vrot.slane %v11790_v19, 3  ;;  %v11795_v31 = vrot.slane %v11793_v12, 4  ;;  %v11817_v57 = vshrl.u32 %v19880_v1, 16  ;;  %v11820_v58 = vshll.u32 %v19880_v1, 16 }
 0x3ca   : > { %15447 = vmatprep.mubr.msk.bf16.mxu0 %vm349_vm1, %v11752_v34  ;;  %v6001_v38 = vrot.slane %v20855_v47, 2  ;;  %v6002_v34 = vrot.slane %v20773_v8, 2  ;;  %v11787_v41 = vor.u32 %v11786_v48, %v11783_v35  ;;  %v11779_v8 = vsel %vm1900_vm5, %v11769_v16, %v11778_v63  ;;  %v20856_v47 = vld [vmem:[#allocation2_spill] sm:$0xff] }
 0x3cb   : > { %v11801_v18 = vrot.slane %v11799_v15, 3  ;;  %v11808_v16 = vshrl.u32 %v19875_v28, 16  ;;  %v6010_v1 = vrot.slane %v20782_v23, 2  ;;  %v11826_v19 = vshrl.u32 %v19899_v11, 16 }
 0x3cc   : > { %v6003_v14 = vsel %vm6000_vm8, %v6001_v38, %v6002_v34  ;;  %v11788_v21 = vsel %vm1900_vm5, %v11778_v63, %v11787_v41  ;;  %v11819_v38 = vrot.slane %v11817_v57, 3  ;;  %v11829_v12 = vshll.u32 %v19899_v11, 16 }
 0x3cd   : > { %v11810_v9 = vrot.slane %v11808_v16, 3  ;;  %v11838_v15 = vshll.u32 %v19904_v40, 16  ;;  %v6012_v11 = vrot.slane %v20785_v44, 2  ;;  %v11853_v16 = vshrl.u32 %v19924_v50, 16 }
 0x3ce   : > { %14878 = vmatmul.mubr.msk.bf16.gmra.mrb[36].mxu1 %vm349_vm1, %v5653_v46  ;;  %v11802_v46 = vshll.u32 %v19858_v3, 16  ;;  %v11796_v3 = vor.u32 %v11795_v31, %v11792_v53  ;;  %v11856_v44 = vshll.u32 %v19924_v50, 16 }
 0x3cf   : > { %14881 = vmatprep.mubr.msk.bf16.mxu1 %vm349_vm1, %v5662_v45  ;;  %v11811_v45 = vshll.u32 %v19875_v28, 16  ;;  %v6008_v28 = vrot.slane %v20779_v39, 2  ;;  %v11835_v39 = vshrl.u32 %v19904_v40, 16 }
 0x3d0   : > { %v11804_v25 = vrot.slane %v11802_v46, 4  ;;  %v11797_v59 = vsel %vm1900_vm5, %v11787_v41, %v11796_v3 }
 0x3d1   : > { %15448 = vmatmul.mubr.msk.bf16.gmra.mrb[8].mxu0 %vm349_vm1, %v11761_v20  ;;  %v6005_v20 = vsel %vm6000_vm8, %v6002_v34, %v6004_v13  ;;  %v11813_v35 = vrot.slane %v11811_v45, 4  ;;  %v11822_v34 = vrot.slane %v11820_v58, 4  ;;  %v6011_v46 = vsel %vm6000_vm8, %v6008_v28, %v6010_v1 }
 0x3d2   : > { %15451 = vmatprep.mubr.msk.bf16.mxu0 %vm349_vm1, %v11770_v26  ;;  %v11805_v52 = vor.u32 %v11804_v25, %v11801_v18  ;;  %v6007_v26 = vsel %vm6000_vm8, %v6004_v13, %v6006_v27  ;;  %v11837_v31 = vrot.slane %v11835_v39, 3  ;;  %v6014_v13 = vrot.slane %v20788_v51, 2 }
 0x3d3   : > { %v11814_v63 = vor.u32 %v11813_v35, %v11810_v9  ;;  %v11823_v41 = vor.u32 %v11822_v34, %v11819_v38  ;;  %v11844_v18 = vshrl.u32 %v19919_v54, 16  ;;  %v11847_v25 = vshll.u32 %v19919_v54, 16 }
 0x3d4   : > { %v11806_v48 = vsel %vm1900_vm5, %v11796_v3, %v11805_v52  ;;  %v6015_v45 = vsel %vm6000_vm8, %v6012_v11, %v6014_v13  ;;  %v6016_v54 = vrot.slane %v20791_v29, 2  ;;  %v11855_v58 = vrot.slane %v11853_v16, 3 }
 0x3d5   : > { %v11815_v23 = vsel %vm1900_vm5, %v11805_v52, %v11814_v63  ;;  %v11824_v53 = vsel %vm1900_vm5, %v11814_v63, %v11823_v41  ;;  %v11849_v52 = vrot.slane %v11847_v25, 4  ;;  %v11862_v9 = vshrl.u32 %v19939_v49, 16 }
 0x3d6   : > { %14882 = vmatmul.mubr.msk.bf16.gmra.mrb[40].mxu1 %vm349_vm1, %v5671_v43  ;;  %v6009_v43 = vsel %vm6000_vm8, %v6006_v27, %v6008_v28  ;;  %v6013_v27 = vsel %vm6000_vm8, %v6010_v1, %v6012_v11  ;;  %v11865_v35 = vshll.u32 %v19939_v49, 16  ;;  %v11874_v29 = vshll.u32 %v19944_v22, 16  ;;  %v16954_v11 = vld [vmem:[%s17154_s26 + $0xf0] ss:$0 sps:$4 sm:$0xff]  }
 0x3d7   : > { %14887 = vmatprep.mubr.msk.bf16.mxu1 %vm349_vm1, %v6003_v14  ;;  %v11828_v14 = vrot.slane %v11826_v19, 3  ;;  %v11864_v34 = vrot.slane %v11862_v9, 3  ;;  %v6020_v49 = vrot.slane %v20797_v42, 2  ;;  %v11883_v39 = vshll.u32 %v19960_v32, 16 }
 0x3d8   : > { %v11867_v1 = vrot.slane %v11865_v35, 4  ;;  %v11892_v42 = vshll.u32 %v19963_v60, 16  ;;  %v11901_v25 = vshll.u32 %v16954_v11, 16 }
 0x3d9   : > { %15452 = vmatmul.mubr.msk.bf16.gmra.mrb[12].mxu0 %vm349_vm1, %v11779_v8  ;;  %v11831_v8 = vrot.slane %v11829_v12, 4  ;;  %v11876_v12 = vrot.slane %v11874_v29, 4 }
 0x3da   : > { %15455 = vmatprep.mubr.msk.bf16.mxu0 %vm349_vm1, %v11788_v21  ;;  %v11840_v21 = vrot.slane %v11838_v15, 4 }
 0x3db   : > { %v11832_v40 = vor.u32 %v11831_v8, %v11828_v14 }
 0x3dc   : > { %v11841_v3 = vor.u32 %v11840_v21, %v11837_v31 }
 0x3dd   : > { %v11833_v51 = vsel %vm1900_vm5, %v11823_v41, %v11832_v40  ;;  %v11880_v41 = vshrl.u32 %v19960_v32, 16  ;;  %v6024_v32 = vrot.slane %v20802_v61, 2 }
 0x3de   : > { %14888 = vmatmul.mubr.msk.bf16.vlgmr.msra.gmra.mrb[0].mxu1 %vm349_vm1, %v6005_v20  ;;  %v11846_v20 = vrot.slane %v11844_v18, 3  ;;  %v11842_v57 = vsel %vm1900_vm5, %v11832_v40, %v11841_v3  ;;  %v6026_v40 = vrot.slane %v20804_v0, 2  ;;  %v11898_v18 = vshrl.u32 %v16954_v11, 16 }
 0x3df   : > { %14891 = vmatprep.mubr.msk.bf16.mxu1 %vm349_vm1, %v6007_v26  ;;  %15530 = vmatpush3.bf16.msra.mxu1 %v20856_v47  ;;  %v11858_v26 = vrot.slane %v11856_v44, 4  ;;  %v11871_v47 = vshrl.u32 %v19944_v22, 16  ;;  %v11868_v22 = vor.u32 %v11867_v1, %v11864_v34  ;;  %v11882_v8 = vrot.slane %v11880_v41, 3  ;;  %v16959_v1 = vld [vmem:[%s17154_s26 + $0x64] sm:$0xff]  }
 0x3e0   : > { %v11850_v50 = vor.u32 %v11849_v52, %v11846_v20  ;;  %v6027_v16 = vsel %vm6000_vm8, %v6024_v32, %v6026_v40  ;;  %v11900_v44 = vrot.slane %v11898_v18, 3  ;;  %v11903_v0 = vrot.slane %v11901_v25, 4  ;;  %v16955_v20 = vld [vmem:[%s17154_s26 + $0x44] sm:$0xfe]   ;;  %v16956_v52 = vld [vmem:[%s17154_s26 + $0x4c] sm:$0xff]  }
 0x3e1   : > { %15456 = vmatmul.mubr.msk.bf16.gmra.mrb[16].mxu0 %vm349_vm1, %v11797_v59  ;;  %v6018_v59 = vrot.slane %v20794_v7, 2  ;;  %v11859_v28 = vor.u32 %v11858_v26, %v11855_v58  ;;  %v11873_v19 = vrot.slane %v11871_v47, 3  ;;  %v12388_v26 = vrot.slane %v16955_v20, 1  ;;  %v20863_v20 = vld [vmem:[#allocation46_spill] sm:$0xff] }
 0x3e2   : > { %15459 = vmatprep.mubr.msk.bf16.mxu0 %vm349_vm1, %v11806_v48  ;;  %v6017_v48 = vsel %vm6000_vm8, %v6014_v13, %v6016_v54  ;;  %v11851_v7 = vsel %vm1900_vm5, %v11841_v3, %v11850_v50  ;;  %v11894_v13 = vrot.slane %v11892_v42, 4  ;;  %v20859_v42 = vld [vmem:[#allocation54_spill] sm:$0xff] }
 0x3e3   : > { %v6019_v38 = vsel %vm6000_vm8, %v6016_v54, %v6018_v59  ;;  %v11860_v63 = vsel %vm1900_vm5, %v11850_v50, %v11859_v28  ;;  %v6021_v15 = vsel %vm6000_vm8, %v6018_v59, %v6020_v49  ;;  %v11904_v54 = vor.u32 %v11903_v0, %v11900_v44 }
 0x3e4   : > { %v12389_v59 = vrot.slane %v16956_v52, 1  ;;  %v6435_v52 = vrot.slane %v20863_v20, 2 }
 0x3e6   : > { %14892 = vmatmul.mubr.msk.bf16.gmra.mrb[4].mxu1 %vm349_vm1, %v6009_v43  ;;  %v6022_v43 = vrot.slane %v20799_v6, 2  ;;  %v11869_v6 = vsel %vm1900_vm5, %v11859_v28, %v11868_v22  ;;  %v12390_v35 = vsel %vm5092_vm6, %v12388_v26, %v12389_v59  ;;  %v6034_v28 = vrot.slane %v20808_v10, 2  ;;  %v20857_v10 = vld [vmem:[#allocation48_spill] sm:$0xff] }
 0x3e7   : > { %14895 = vmatprep.mubr.msk.bf16.mxu1 %vm349_vm1, %v6011_v46  ;;  %v11877_v46 = vor.u32 %v11876_v12, %v11873_v19  ;;  %v20858_v19 = vld [vmem:[#allocation51_spill] sm:$0xff] }
 0x3e8   : > { %v6023_v14 = vsel %vm6000_vm8, %v6020_v49, %v6022_v43  ;;  %v16960_v49 = vld [vmem:[%s17154_s26 + $0x6c] sm:$0xff]   ;;  %v6038_v12 = vrot.slane %v20858_v19, 2 }
 0x3e9   : > { %15460 = vmatmul.mubr.msk.bf16.gmra.mrb[20].mxu0 %vm349_vm1, %v11815_v23  ;;  %v11889_v23 = vshrl.u32 %v19963_v60, 16  ;;  %v11878_v31 = vsel %vm1900_vm5, %v11868_v22, %v11877_v46  ;;  %v12397_v41 = vrot.slane %v16960_v49, 1  ;;  %v6448_v49 = vrot.slane %v20846_v24, 3 }
 0x3ea   : > { %15463 = vmatprep.mubr.msk.bf16.mxu0 %vm349_vm1, %v11824_v53  ;;  %v11885_v53 = vrot.slane %v11883_v39, 4 }
 0x3eb   : > { %v11891_v21 = vrot.slane %v11889_v23, 3 }
 0x3ec   : > { %v11886_v60 = vor.u32 %v11885_v53, %v11882_v8  ;;  %v20860_v8 = vld [vmem:[#allocation57_spill] sm:$0xff] }
 0x3ed   : > { %v11895_v3 = vor.u32 %v11894_v13, %v11891_v21  ;;  %v6042_v53 = vrot.slane %v20860_v8, 2  ;;  %v20861_v13 = vld [vmem:[#allocation64_spill] sm:$0xff] }
 0x3ee   : > { %14896 = vmatmul.mubr.msk.bf16.gmra.mrb[8].mxu1 %vm349_vm1, %v6013_v27  ;;  %v6025_v27 = vsel %vm6000_vm8, %v6022_v43, %v6024_v32  ;;  %v11887_v61 = vsel %vm1900_vm5, %v11877_v46, %v11886_v60  ;;  %v12395_v43 = vrot.slane %v16959_v1, 1  ;;  %v16961_v46 = vld [vmem:[%s17154_s26 + $0x74] sm:$0xff]  }
 0x3ef   : > { %14899 = vmatprep.mubr.msk.bf16.mxu1 %vm349_vm1, %v6015_v45  ;;  %v11896_v45 = vsel %vm1900_vm5, %v11886_v60, %v11895_v3  ;;  %v11905_v9 = vsel %vm1900_vm5, %v11895_v3, %v11904_v54  ;;  %v12399_v11 = vrot.slane %v16961_v46, 1  ;;  %v20862_v60 = vld [vmem:[#allocation65_spill] sm:$0xff]  ;;  %v6452_v46 = vrot.slane %v20848_v56, 3 }
 0x3f0   : > { %v12398_v23 = vsel %vm5092_vm6, %v12395_v43, %v12397_v41  ;;  %v6432_v18 = vrot.slane %v20862_v60, 3  ;;  %v20871_v60 = vld [vmem:[#allocation56_spill] sm:$0xff] }
 0x3f1   : > { %15464 = vmatmul.mubr.msk.bf16.gmra.mrb[24].mxu0 %vm349_vm1, %v11833_v51  ;;  %v6028_v51 = vrot.slane %v20805_v5, 2  ;;  %v16957_v5 = vld [vmem:[%s17154_s26 + $0x54] sm:$0xff]   ;;  %v12400_v25 = vsel %vm5092_vm6, %v12397_v41, %v12399_v11  ;;  %v16968_v41 = vld [vmem:[%s17154_s26 + $0xac] sm:$0xff]  }
 0x3f2   : > { %15467 = vmatprep.mubr.msk.bf16.mxu0 %vm349_vm1, %v11842_v57  ;;  %v6030_v57 = vrot.slane %v20806_v37, 2  ;;  %v6032_v37 = vrot.slane %v20807_v55, 2  ;;  %v12391_v47 = vrot.slane %v16957_v5, 1  ;;  %v12413_v24 = vrot.slane %v16968_v41, 1 }
 0x3f3   : > { %v6029_v58 = vsel %vm6000_vm8, %v6026_v40, %v6028_v51  ;;  %v6431_v40 = vrot.slane %v20861_v13, 2  ;;  %v20870_v13 = vld [vmem:[#allocation55_spill] sm:$0xff] }
 0x3f4   : > { %v6031_v50 = vsel %vm6000_vm8, %v6028_v51, %v6030_v57  ;;  %v6033_v29 = vsel %vm6000_vm8, %v6030_v57, %v6032_v37  ;;  %v12392_v34 = vsel %vm5092_vm6, %v12389_v59, %v12391_v47  ;;  %v20864_v57 = vld [vmem:[#allocation47_spill] sm:$0xff]  ;;  %v20866_v59 = vld [vmem:[#allocation66_spill] sm:$0xff] }
 0x3f5   : > { %v6433_v44 = vor.u32 %v6432_v18, %v6431_v40  ;;  %v6436_v54 = vrot.slane %v20864_v57, 3  ;;  %v6459_v40 = vrot.slane %v20870_v13, 2  ;;  %v6460_v18 = vrot.slane %v20871_v60, 3 }
 0x3f6   : > { %14900 = vmatmul.mubr.msk.bf16.gmra.mrb[12].mxu1 %vm349_vm1, %v6017_v48  ;;  %v16958_v48 = vld [vmem:[%s17154_s26 + $0x5c] sm:$0xff]  }
 0x3f7   : > { %14903 = vmatprep.mubr.msk.bf16.mxu1 %vm349_vm1, %v6019_v38  ;;  %v12393_v38 = vrot.slane %v16958_v48, 1  ;;  %v6437_v48 = vor.u32 %v6436_v54, %v6435_v52 }
 0x3f9   : > { %15468 = vmatmul.mubr.msk.bf16.gmra.mrb[28].mxu0 %vm349_vm1, %v11851_v7  ;;  %v6035_v7 = vsel %vm6000_vm8, %v6032_v37, %v6034_v28  ;;  %v12394_v55 = vsel %vm5092_vm6, %v12391_v47, %v12393_v38 }
 0x3fa   : > { %15471 = vmatprep.mubr.msk.bf16.mxu0 %vm349_vm1, %v11860_v63  ;;  %v6036_v63 = vrot.slane %v20857_v10, 2 }
 0x3fc   : > { %v6037_v22 = vsel %vm6000_vm8, %v6034_v28, %v6036_v63  ;;  %v6039_v39 = vsel %vm6000_vm8, %v6036_v63, %v6038_v12  ;;  %v16966_v28 = vld [vmem:[%s17154_s26 + $0x9c] sm:$0xff]   ;;  %v6447_v63 = vrot.slane %v20845_v4, 2 }
 0x3fe   : > { %14904 = vmatmul.mubr.msk.bf16.gmra.mrb[16].mxu1 %vm349_vm1, %v6021_v15  ;;  %v12396_v15 = vsel %vm5092_vm6, %v12393_v38, %v12395_v43  ;;  %v6438_v38 = vsel %vm6374_vm2, %v6433_v44, %v6437_v48 }
 0x3ff   : > { %14907 = vmatprep.mubr.msk.bf16.mxu1 %vm349_vm1, %v6023_v14  ;;  %v6040_v14 = vrot.slane %v20859_v42, 2  ;;  %v6455_v42 = vrot.slane %v20849_v33, 2 }
 0x401   : > { %15472 = vmatmul.mubr.msk.bf16.gmra.mrb[32].mxu0 %vm349_vm1, %v11869_v6  ;;  %v16962_v6 = vld [vmem:[%s17154_s26 + $0x7c] sm:$0xff]   ;;  %v6043_v21 = vsel %vm6000_vm8, %v6040_v14, %v6042_v53 }
 0x402   : > { %15475 = vmatprep.mubr.msk.bf16.mxu0 %vm349_vm1, %v11878_v31  ;;  %v6041_v31 = vsel %vm6000_vm8, %v6038_v12, %v6040_v14  ;;  %v12401_v32 = vrot.slane %v16962_v6, 1  ;;  %v16967_v12 = vld [vmem:[%s17154_s26 + $0xa4] sm:$0xff]  }
 0x403   : > { %v20869_v14 = vld [vmem:[#allocation71_spill] sm:$0xff] }
 0x404   : > { %v12402_v3 = vsel %vm5092_vm6, %v12399_v11, %v12401_v32  ;;  %v6456_v6 = vrot.slane %v20869_v14, 3 }
 0x406   : > { %14908 = vmatmul.mubr.msk.bf16.gmra.mrb[20].mxu1 %vm349_vm1, %v6025_v27  ;;  %v16963_v27 = vld [vmem:[%s17154_s26 + $0x84] sm:$0xff]  }
 0x407   : > { %14911 = vmatprep.mubr.msk.bf16.mxu1 %vm349_vm1, %v6027_v16  ;;  %v6044_v16 = vrot.slane %v20029_v17, 2  ;;  %v12403_v0 = vrot.slane %v16963_v27, 1  ;;  %v6439_v17 = vrot.slane %v20866_v59, 2  ;;  %v6463_v27 = vrot.slane %v20853_v36, 2 }
 0x409   : > { %15476 = vmatmul.mubr.msk.bf16.gmra.mrb[36].mxu0 %vm349_vm1, %v11887_v61  ;;  %v16964_v61 = vld [vmem:[%s17154_s26 + $0x8c] sm:$0xff]   ;;  %v12404_v5 = vsel %vm5092_vm6, %v12401_v32, %v12403_v0  ;;  %v6457_v32 = vor.u32 %v6456_v6, %v6455_v42 }
 0x40a   : > { %15479 = vmatprep.mubr.msk.bf16.mxu0 %vm349_vm1, %v11896_v45  ;;  %v6045_v45 = vsel %vm6000_vm8, %v6042_v53, %v6044_v16  ;;  %v12405_v51 = vrot.slane %v16964_v61, 1  ;;  %v16969_v53 = vld [vmem:[%s17154_s26 + $0xb4] sm:$0xff]   ;;  %v16971_v61 = vld [vmem:[%s17154_s26 + $0xc4] sm:$0xff]  }
 0x40b   : > { %v12415_v56 = vrot.slane %v16969_v53, 1  ;;  %v12419_v36 = vrot.slane %v16971_v61, 1 }
 0x40c   : > { %v12406_v37 = vsel %vm5092_vm6, %v12403_v0, %v12405_v51  ;;  %v6461_v0 = vor.u32 %v6460_v18, %v6459_v40  ;;  %v20319_v40 = vld [vmem:[%s179_s27] ss:$0 sm:$0xff] }
 0x40d   : > { %v12416_v16 = vsel %vm5092_vm6, %v12413_v24, %v12415_v56 }
 0x40e   : > { %14912 = vmatmul.mubr.msk.bf16.gmra.mrb[24].mxu1 %vm349_vm1, %v6029_v58  ;;  %v20865_v58 = vld [vmem:[#allocation40_spill] sm:$0xff] }
 0x40f   : > { %14915 = vmatprep.mubr.msk.bf16.mxu1 %vm349_vm1, %v6031_v50  ;;  %v6434_v26 = vsel %vm6374_vm2, %v20865_v58, %v6433_v44  ;;  %v20867_v50 = vld [vmem:[#allocation67_spill] sm:$0xff] }
 0x411   : > { %15480 = vmatmul.mubr.msk.bf16.gmra.mrb[40].mxu0 %vm349_vm1, %v11905_v9  ;;  %v6440_v9 = vrot.slane %v20867_v50, 3  ;;  %v16973_v50 = vld [vmem:[%s17154_s26 + $0xd4] sm:$0xff]  }
 0x412   : > { %15485 = vmatprep.mubr.msk.bf16.mxu0 %vm349_vm1, %v12390_v35  ;;  %v16965_v35 = vld [vmem:[%s17154_s26 + $0x94] sm:$0xff]  }
 0x413   : > { %v6441_v47 = vor.u32 %v6440_v9, %v6439_v17 }
 0x415   : > { %v6442_v10 = vsel %vm6374_vm2, %v6437_v48, %v6441_v47 }
 0x416   : > { %14916 = vmatmul.mubr.msk.bf16.gmra.mrb[28].mxu1 %vm349_vm1, %v6033_v29  ;;  %v12407_v29 = vrot.slane %v16965_v35, 1  ;;  %v16974_v35 = vld [vmem:[%s17154_s26 + $0xdc] sm:$0xff]  }
 0x417   : > { %14919 = vmatprep.mubr.msk.bf16.mxu1 %vm349_vm1, %v6035_v7  ;;  %v12409_v7 = vrot.slane %v16966_v28, 1  ;;  %v12425_v28 = vrot.slane %v16974_v35, 1 }
 0x418   : > { %v12408_v19 = vsel %vm5092_vm6, %v12405_v51, %v12407_v29  ;;  %v17086_v51 = vld [vmem:[%s17154_s26 + $0xd0] ss:$0 sps:$4 sm:$0x77]  }
 0x419   : > { %15486 = vmatmul.mubr.msk.bf16.vlgmr.msra.gmra.mrb[0].mxu0 %vm349_vm1, %v12392_v34  ;;  %v20868_v34 = vld [vmem:[#allocation49_spill] sm:$0xff]  ;;  %v12410_v43 = vsel %vm5092_vm6, %v12407_v29, %v12409_v7  ;;  %v6468_v20 = vshrl.u32 %v17086_v51, 16  ;;  %v6471_v52 = vshll.u32 %v17086_v51, 16  ;;  %v16975_v29 = vld [vmem:[%s17154_s26 + $0xe4] sm:$0xff]  }
 0x41a   : > { %15489 = vmatprep.mubr.msk.bf16.mxu0 %vm349_vm1, %v12394_v55  ;;  %v6443_v1 = vrot.slane %v20868_v34, 2  ;;  %v6444_v55 = vrot.slane %v20844_v30, 3  ;;  %v12411_v30 = vrot.slane %v16967_v12, 1  ;;  %v12427_v34 = vrot.slane %v16975_v29, 1 }
 0x41b   : > { %v6470_v58 = vrot.slane %v6468_v20, 2 }
 0x41c   : > { %v12412_v8 = vsel %vm5092_vm6, %v12409_v7, %v12411_v30  ;;  %v12414_v11 = vsel %vm5092_vm6, %v12411_v30, %v12413_v24  ;;  %v16976_v7 = vld [vmem:[%s17154_s26 + $0xec] sm:$0xff]  }
 0x41e   : > { %14920 = vmatmul.mubr.msk.bf16.gmra.mrb[32].mxu1 %vm349_vm1, %v6037_v22  ;;  %v6445_v22 = vor.u32 %v6444_v55, %v6443_v1  ;;  %v12429_v1 = vrot.slane %v16976_v7, 1  ;;  %v12428_v55 = vsel %vm5092_vm6, %v12425_v28, %v12427_v34 }
 0x41f   : > { %14923 = vmatprep.mubr.msk.bf16.mxu1 %vm349_vm1, %v6039_v39  ;;  %v6449_v39 = vor.u32 %v6448_v49, %v6447_v63 }
 0x420   : > { %v6446_v4 = vsel %vm6374_vm2, %v6441_v47, %v6445_v22  ;;  %v12430_v63 = vsel %vm5092_vm6, %v12427_v34, %v12429_v1 }
 0x421   : > { %15490 = vmatmul.mubr.msk.bf16.gmra.mrb[4].mxu0 %vm349_vm1, %v12396_v15  ;;  %v6451_v15 = vrot.slane %v20847_v62, 2  ;;  %v16970_v62 = vld [vmem:[%s17154_s26 + $0xbc] sm:$0xff]  }
 0x422   : > { %15493 = vmatprep.mubr.msk.bf16.mxu0 %vm349_vm1, %v12398_v23  ;;  %v6450_v23 = vsel %vm6374_vm2, %v6445_v22, %v6449_v39 }
 0x426   : > { %14924 = vmatmul.mubr.msk.bf16.gmra.mrb[36].mxu1 %vm349_vm1, %v6041_v31  ;;  %v6453_v31 = vor.u32 %v6452_v46, %v6451_v15 }
 0x427   : > { %14927 = vmatprep.mubr.msk.bf16.mxu1 %vm349_vm1, %v6043_v21  ;;  %v12417_v21 = vrot.slane %v16970_v62, 1 }
 0x428   : > { %v6454_v33 = vsel %vm6374_vm2, %v6449_v39, %v6453_v31 }
 0x429   : > { %15494 = vmatmul.mubr.msk.bf16.gmra.mrb[8].mxu0 %vm349_vm1, %v12400_v25  ;;  %v6458_v25 = vsel %vm6374_vm2, %v6453_v31, %v6457_v32  ;;  %v12418_v44 = vsel %vm5092_vm6, %v12415_v56, %v12417_v21  ;;  %v12420_v17 = vsel %vm5092_vm6, %v12417_v21, %v12419_v36 }
 0x42a   : > { %15497 = vmatprep.mubr.msk.bf16.mxu0 %vm349_vm1, %v12402_v3  ;;  %v6464_v3 = vrot.slane %v20854_v2, 3  ;;  %v6462_v2 = vsel %vm6374_vm2, %v6457_v32, %v6461_v0 }
 0x42c   : > { %v6465_v57 = vor.u32 %v6464_v3, %v6463_v27 }
 0x42e   : > { %14928 = vmatmul.mubr.msk.bf16.gmra.mrb[40].mxu1 %vm349_vm1, %v6045_v45  ;;  %v16972_v45 = vld [vmem:[%s17154_s26 + $0xcc] sm:$0xff]   ;;  %v6466_v59 = vsel %vm6374_vm2, %v6461_v0, %v6465_v57 }
 0x42f   : > { %14957 = vmatprep.mubr.msk.bf16.mxu1 %vm349_vm1, %v6434_v26  ;;  %v12421_v54 = vrot.slane %v16972_v45, 1  ;;  %v6473_v26 = vrot.slane %v6471_v52, 3 }
 0x431   : > { %15498 = vmatmul.mubr.msk.bf16.gmra.mrb[12].mxu0 %vm349_vm1, %v12404_v5  ;;  %v12422_v9 = vsel %vm5092_vm6, %v12419_v36, %v12421_v54  ;;  %v6474_v5 = vor.u32 %v6473_v26, %v6470_v58 }
 0x432   : > { %15501 = vmatprep.mubr.msk.bf16.mxu0 %vm349_vm1, %v12406_v37  ;;  %v12423_v37 = vrot.slane %v16973_v50, 1 }
 0x433   : > { %v6475_v48 = vsel %vm6374_vm2, %v6465_v57, %v6474_v5 }
 0x434   : > { %v12424_v47 = vsel %vm5092_vm6, %v12421_v54, %v12423_v37 }
 0x436   : > { %14958 = vmatmul.mubr.msk.bf16.vlgmr.msra.gmra.mrb[24].mxu1 %vm349_vm1, %v6438_v38  ;;  %v12426_v38 = vsel %vm5092_vm6, %v12423_v37, %v12425_v28 }
 0x437   : > { %14961 = vmatprep.mubr.msk.bf16.mxu1 %vm349_vm1, %v6442_v10  ;;  %v16977_v10 = vld [vmem:[%s17154_s26 + $0xf4] ss:$0 sps:$4 sm:$0x11]   ;;  %s180_s26 = smul.u32 44, %s17121_s13 }
 0x438   : > { %v12431_v49 = vrot.slane %v16977_v10, 1 }
 0x439   : > { %15502 = vmatmul.mubr.msk.bf16.gmra.mrb[16].mxu0 %vm349_vm1, %v12408_v19  ;;  %p181_p4 = scmp.lt.s32.totalorder %s180_s26, 87 }
 0x43a   : > { %15505 = vmatprep.mubr.msk.bf16.mxu0 %vm349_vm1, %v12410_v43  ;;  %v12432_v19 = vsel %vm5092_vm6, %v12429_v1, %v12431_v49 }
 0x43b   : > { %s20873_s26 = smov (!%p181_p4, %s180_s26), 87 }
 0x43c   : > { %s12914_s28 = sshll.u32 %s20873_s26, 3 }
 0x43d   : > { %s20328_s30 = scalar_lea.vmem %s20434_s3, %s12914_s28 }
 0x43e   : > { %14962 = vmatmul.mubr.msk.bf16.gmra.mrb[28].mxu1 %vm349_vm1, %v6446_v4 }
 0x43f   : > { %14965 = vmatprep.mubr.msk.bf16.mxu1 %vm349_vm1, %v6450_v23 }
 0x441   : > { %15506 = vmatmul.mubr.msk.bf16.gmra.mrb[20].mxu0 %vm349_vm1, %v12412_v8 }
 0x442   : > { %15509 = vmatprep.mubr.msk.bf16.mxu0 %vm349_vm1, %v12414_v11 }
 0x446   : > { %14966 = vmatmul.mubr.msk.bf16.gmra.mrb[32].mxu1 %vm349_vm1, %v6454_v33 }
 0x447   : > { %14969 = vmatprep.mubr.msk.bf16.mxu1 %vm349_vm1, %v6458_v25 }
 0x449   : > { %15510 = vmatmul.mubr.msk.bf16.gmra.mrb[24].mxu0 %vm349_vm1, %v12416_v16 }
 0x44a   : > { %15513 = vmatprep.mubr.msk.bf16.mxu0 %vm349_vm1, %v12418_v44 }
 0x44e   : > { %14970 = vmatmul.mubr.msk.bf16.gmra.mrb[36].mxu1 %vm349_vm1, %v6462_v2 }
 0x44f   : > { %14973 = vmatprep.mubr.msk.bf16.mxu1 %vm349_vm1, %v6466_v59 }
 0x451   : > { %15514 = vmatmul.mubr.msk.bf16.gmra.mrb[28].mxu0 %vm349_vm1, %v12420_v17 }
 0x452   : > { %15517 = vmatprep.mubr.msk.bf16.mxu0 %vm349_vm1, %v12422_v9 }
 0x456   : > { %14974 = vmatmul.mubr.msk.bf16.gmra.mrb[40].mxu1 %vm349_vm1, %v6475_v48 }
 0x459   : > { %15518 = vmatmul.mubr.msk.bf16.gmra.mrb[32].mxu0 %vm349_vm1, %v12424_v47 }
 0x45a   : > { %15521 = vmatprep.mubr.msk.bf16.mxu0 %vm349_vm1, %v12426_v38 }
 0x461   : > { %15522 = vmatmul.mubr.msk.bf16.gmra.mrb[36].mxu0 %vm349_vm1, %v12428_v55 }
 0x462   : > { %15525 = vmatprep.mubr.msk.bf16.mxu0 %vm349_vm1, %v12430_v63 }
 0x469   : > { %15526 = vmatmul.mubr.msk.bf16.gmra.mrb[40].mxu0 %vm349_vm1, %v12432_v19 }
 0x4b1   : > { %v14889_v12 = vpop.f32.mrb[0].mxu1 }
 0x4b2   : > { %v6149_v43 = vpop.f32.mrb[1].mxu1  ;;  %v15531_v60 = vadd.f32 %v14889_v12, %v20319_v40 }
 0x4b3   : > { %v14890_v22 = vpop.f32.mrb[2].mxu1  ;;  %v15533_v18 = vadd.f32 %v20319_v40, %v6149_v43 }
 0x4b4   : > { %v6152_v41 = vpop.f32.mrb[3].mxu1  ;;  %v15535_v27 = vadd.f32 %v14890_v22, %v20319_v40 }
 0x4b5   : > { %v15537_v61 = vadd.f32 %v20319_v40, %v6152_v41 }
 0x4b9   : > { %v14893_v39 = vpop.f32.mrb[4].mxu1 }
 0x4ba   : > { %v6165_v30 = vpop.f32.mrb[5].mxu1  ;;  %v15539_v54 = vadd.f32 %v14893_v39, %v20319_v40 }
 0x4bb   : > { %v14894_v4 = vpop.f32.mrb[6].mxu1  ;;  %v15541_v58 = vadd.f32 %v20319_v40, %v6165_v30 }
 0x4bc   : > { %v6168_v24 = vpop.f32.mrb[7].mxu1  ;;  %v15543_v59 = vadd.f32 %v14894_v4, %v20319_v40 }
 0x4bd   : > { %v15545_v9 = vadd.f32 %v20319_v40, %v6168_v24 }
 0x4c1   : > { %v14897_v15 = vpop.f32.mrb[8].mxu1 }
 0x4c2   : > { %v6181_v46 = vpop.f32.mrb[9].mxu1  ;;  %v15547_v34 = vadd.f32 %v14897_v15, %v20319_v40 }
 0x4c3   : > { %v20286_v23 = vpop.f32.mrb[10].mxu1  ;;  %v15549_v1 = vadd.f32 %v20319_v40, %v6181_v46 }
 0x4c4   : > { %v20288_v42 = vpop.f32.mrb[11].mxu1  ;;  %v15551_v10 = vadd.f32 %v20286_v23, %v20319_v40 }
 0x4c5   : > { %v15553_v19 = vadd.f32 %v20319_v40, %v20288_v42 }
 0x4c9   : > { %v20290_v14 = vpop.f32.mrb[12].mxu1 }
 0x4ca   : > { %v20292_v6 = vpop.f32.mrb[13].mxu1  ;;  %v15555_v46 = vadd.f32 %v20290_v14, %v20319_v40 }
 0x4cb   : > { %v20294_v8 = vpop.f32.mrb[14].mxu1  ;;  %v15557_v23 = vadd.f32 %v20319_v40, %v20292_v6 }
 0x4cc   : > { %v20296_v53 = vpop.f32.mrb[15].mxu1 }
 0x4d1   : > { %v20298_v11 = vpop.f32.mrb[16].mxu1 }
 0x4d2   : > { %v20300_v31 = vpop.f32.mrb[17].mxu1 }
 0x4d3   : > { %v20302_v62 = vpop.f32.mrb[18].mxu1 }
 0x4d4   : > { %v20304_v32 = vpop.f32.mrb[19].mxu1 }
 0x4d9   : > { %v20306_v56 = vpop.f32.mrb[20].mxu1 }
 0x4da   : > { %v20308_v33 = vpop.f32.mrb[21].mxu1 }
 0x4db   : > { %v20310_v21 = vpop.f32.mrb[22].mxu1 }
 0x4dc   : > { %v20312_v13 = vpop.f32.mrb[23].mxu1 }
 0x4ec   : > { %v15487_v25 = vpop.f32.mrb[0].mxu0 }
 0x4ed   : > { %v15532_v3 = vadd.f32 %v15531_v60, %v15487_v25  ;;  %v12536_v16 = vpop.f32.mrb[1].mxu0  ;;  %v15559_v60 = vadd.f32 %v20294_v8, %v20319_v40 }
 0x4ee   : > { %v15534_v44 = vadd.f32 %v15533_v18, %v12536_v16  ;;  %v15488_v0 = vpop.f32.mrb[2].mxu0 }
 0x4ef   : > { %v12757_v45 = vmax.f32 %v15532_v3, 0.0  ;;  %v15536_v51 = vadd.f32 %v15535_v27, %v15488_v0  ;;  %v12539_v20 = vpop.f32.mrb[3].mxu0  ;;  %v15561_v27 = vadd.f32 %v20319_v40, %v20296_v53  ;;  %v15565_v53 = vadd.f32 %v20319_v40, %v20300_v31 }
 0x4f0   : > { %v12755_v52 = vmax.f32 %v15534_v44, 0.0  ;;  %v15538_v57 = vadd.f32 %v15537_v61, %v12539_v20 }
 0x4f1   : > { %12801 = vst [vmem:[%s20328_s30 + $0x10] sm:$0xff] %v12757_v45  ;;  %v12758_v36 = vmax.f32 %v15536_v51, 0.0 }
 0x4f2   : > { %12799 = vst [vmem:[%s20328_s30] sm:$0xff] %v12755_v52  ;;  %v12756_v2 = vmax.f32 %v15538_v57, 0.0  ;;  %v15563_v52 = vadd.f32 %v20298_v11, %v20319_v40 }
 0x4f3   : > { %12802 = vst [vmem:[%s20328_s30 + $0x18] sm:$0xff] %v12758_v36 }
 0x4f4   : > { %12800 = vst [vmem:[%s20328_s30 + $0x8] sm:$0xff] %v12756_v2  ;;  %v15491_v26 = vpop.f32.mrb[4].mxu0 }
 0x4f5   : > { %v15540_v17 = vadd.f32 %v15539_v54, %v15491_v26  ;;  %v12552_v50 = vpop.f32.mrb[5].mxu0  ;;  %v15567_v54 = vadd.f32 %v20302_v62, %v20319_v40 }
 0x4f6   : > { %v15542_v5 = vadd.f32 %v15541_v58, %v12552_v50  ;;  %v15492_v35 = vpop.f32.mrb[6].mxu0 }
 0x4f7   : > { %v12761_v37 = vmax.f32 %v15540_v17, 0.0  ;;  %v15544_v48 = vadd.f32 %v15543_v59, %v15492_v35  ;;  %v12555_v28 = vpop.f32.mrb[7].mxu0  ;;  %v15569_v59 = vadd.f32 %v20319_v40, %v20304_v32  ;;  %v15573_v32 = vadd.f32 %v20319_v40, %v20308_v33 }
 0x4f8   : > { %v12759_v47 = vmax.f32 %v15542_v5, 0.0  ;;  %v15546_v29 = vadd.f32 %v15545_v9, %v12555_v28 }
 0x4f9   : > { %12805 = vst [vmem:[%s20328_s30 + $0x30] sm:$0xff] %v12761_v37  ;;  %v12762_v38 = vmax.f32 %v15544_v48, 0.0 }
 0x4fa   : > { %12803 = vst [vmem:[%s20328_s30 + $0x20] sm:$0xff] %v12759_v47  ;;  %v12760_v7 = vmax.f32 %v15546_v29, 0.0  ;;  %v15571_v47 = vadd.f32 %v20306_v56, %v20319_v40 }
 0x4fb   : > { %12806 = vst [vmem:[%s20328_s30 + $0x38] sm:$0xff] %v12762_v38 }
 0x4fc   : > { %12804 = vst [vmem:[%s20328_s30 + $0x28] sm:$0xff] %v12760_v7  ;;  %v15495_v55 = vpop.f32.mrb[8].mxu0 }
 0x4fd   : > { %v15548_v63 = vadd.f32 %v15547_v34, %v15495_v55  ;;  %v12568_v49 = vpop.f32.mrb[9].mxu0  ;;  %v15575_v34 = vadd.f32 %v20310_v21, %v20319_v40 }
 0x4fe   : > { %v15550_v12 = vadd.f32 %v15549_v1, %v12568_v49  ;;  %v15496_v43 = vpop.f32.mrb[10].mxu0 }
 0x4ff   : > { %v12765_v22 = vmax.f32 %v15548_v63, 0.0  ;;  %v15552_v41 = vadd.f32 %v15551_v10, %v15496_v43  ;;  %v12571_v39 = vpop.f32.mrb[11].mxu0  ;;  %v15577_v10 = vadd.f32 %v20319_v40, %v20312_v13 }
 0x500   : > { %v12763_v30 = vmax.f32 %v15550_v12, 0.0  ;;  %v15554_v4 = vadd.f32 %v15553_v19, %v12571_v39 }
 0x501   : > { %12809 = vst [vmem:[%s20328_s30 + $0x50] sm:$0xff] %v12765_v22  ;;  %v12766_v24 = vmax.f32 %v15552_v41, 0.0 }
 0x502   : > { %12807 = vst [vmem:[%s20328_s30 + $0x40] sm:$0xff] %v12763_v30  ;;  %v12764_v15 = vmax.f32 %v15554_v4, 0.0 }
 0x503   : > { %12810 = vst [vmem:[%s20328_s30 + $0x58] sm:$0xff] %v12766_v24 }
 0x504   : > { %12808 = vst [vmem:[%s20328_s30 + $0x48] sm:$0xff] %v12764_v15  ;;  %v15499_v42 = vpop.f32.mrb[12].mxu0 }
 0x505   : > { %v15556_v18 = vadd.f32 %v15555_v46, %v15499_v42  ;;  %v12584_v25 = vpop.f32.mrb[13].mxu0 }
 0x506   : > { %v15558_v3 = vadd.f32 %v15557_v23, %v12584_v25  ;;  %v15500_v16 = vpop.f32.mrb[14].mxu0 }
 0x507   : > { %v12769_v14 = vmax.f32 %v15556_v18, 0.0  ;;  %v15560_v61 = vadd.f32 %v15559_v60, %v15500_v16  ;;  %v12587_v44 = vpop.f32.mrb[15].mxu0 }
 0x508   : > { %v12767_v0 = vmax.f32 %v15558_v3, 0.0  ;;  %v15562_v6 = vadd.f32 %v15561_v27, %v12587_v44 }
 0x509   : > { %12813 = vst [vmem:[%s20328_s30 + $0x70] sm:$0xff] %v12769_v14  ;;  %v12770_v45 = vmax.f32 %v15560_v61, 0.0  ;;  %v14959_v51 = vpop.f32.mrb[24].mxu1 }
 0x50a   : > { %12811 = vst [vmem:[%s20328_s30 + $0x60] sm:$0xff] %v12767_v0  ;;  %v12768_v20 = vmax.f32 %v15562_v6, 0.0  ;;  %v6675_v8 = vpop.f32.mrb[25].mxu1  ;;  %v15579_v30 = vadd.f32 %v14959_v51, %v20319_v40 }
 0x50b   : > { %12814 = vst [vmem:[%s20328_s30 + $0x78] sm:$0xff] %v12770_v45  ;;  %v14960_v57 = vpop.f32.mrb[26].mxu1  ;;  %v15581_v13 = vadd.f32 %v20319_v40, %v6675_v8 }
 0x50c   : > { %12812 = vst [vmem:[%s20328_s30 + $0x68] sm:$0xff] %v12768_v20  ;;  %v15503_v36 = vpop.f32.mrb[16].mxu0  ;;  %v6678_v2 = vpop.f32.mrb[27].mxu1  ;;  %v15583_v46 = vadd.f32 %v14960_v57, %v20319_v40 }
 0x50d   : > { %v15564_v58 = vadd.f32 %v15563_v52, %v15503_v36  ;;  %v12600_v26 = vpop.f32.mrb[17].mxu0  ;;  %v15585_v60 = vadd.f32 %v20319_v40, %v6678_v2 }
 0x50e   : > { %v15566_v11 = vadd.f32 %v15565_v53, %v12600_v26  ;;  %v15504_v17 = vpop.f32.mrb[18].mxu0 }
 0x50f   : > { %v12773_v50 = vmax.f32 %v15564_v58, 0.0  ;;  %v15568_v9 = vadd.f32 %v15567_v54, %v15504_v17  ;;  %v12603_v5 = vpop.f32.mrb[19].mxu0 }
 0x510   : > { %v12771_v31 = vmax.f32 %v15566_v11, 0.0  ;;  %v15570_v35 = vadd.f32 %v15569_v59, %v12603_v5 }
 0x511   : > { %12817 = vst [vmem:[%s20328_s30 + $0x90] sm:$0xff] %v12773_v50  ;;  %v12774_v37 = vmax.f32 %v15568_v9, 0.0  ;;  %v14963_v48 = vpop.f32.mrb[28].mxu1 }
 0x512   : > { %12815 = vst [vmem:[%s20328_s30 + $0x80] sm:$0xff] %v12771_v31  ;;  %v12772_v28 = vmax.f32 %v15570_v35, 0.0  ;;  %v6691_v62 = vpop.f32.mrb[29].mxu1  ;;  %v15587_v51 = vadd.f32 %v14963_v48, %v20319_v40 }
 0x513   : > { %12818 = vst [vmem:[%s20328_s30 + $0x98] sm:$0xff] %v12774_v37  ;;  %v14964_v29 = vpop.f32.mrb[30].mxu1  ;;  %v15589_v8 = vadd.f32 %v20319_v40, %v6691_v62 }
 0x514   : > { %12816 = vst [vmem:[%s20328_s30 + $0x88] sm:$0xff] %v12772_v28  ;;  %v15507_v38 = vpop.f32.mrb[20].mxu0  ;;  %v6694_v7 = vpop.f32.mrb[31].mxu1  ;;  %v15591_v53 = vadd.f32 %v14964_v29, %v20319_v40 }
 0x515   : > { %v15572_v1 = vadd.f32 %v15571_v47, %v15507_v38  ;;  %v12616_v55 = vpop.f32.mrb[21].mxu0  ;;  %v15593_v54 = vadd.f32 %v20319_v40, %v6694_v7 }
 0x516   : > { %v15574_v56 = vadd.f32 %v15573_v32, %v12616_v55  ;;  %v15508_v63 = vpop.f32.mrb[22].mxu0 }
 0x517   : > { %v12777_v49 = vmax.f32 %v15572_v1, 0.0  ;;  %v15576_v19 = vadd.f32 %v15575_v34, %v15508_v63  ;;  %v12619_v12 = vpop.f32.mrb[23].mxu0 }
 0x518   : > { %v12775_v33 = vmax.f32 %v15574_v56, 0.0  ;;  %v15578_v43 = vadd.f32 %v15577_v10, %v12619_v12 }
 0x519   : > { %12821 = vst [vmem:[%s20328_s30 + $0xb0] sm:$0xff] %v12777_v49  ;;  %v12778_v22 = vmax.f32 %v15576_v19, 0.0  ;;  %v14967_v41 = vpop.f32.mrb[32].mxu1 }
 0x51a   : > { %12819 = vst [vmem:[%s20328_s30 + $0xa0] sm:$0xff] %v12775_v33  ;;  %v12776_v39 = vmax.f32 %v15578_v43, 0.0  ;;  %v6707_v21 = vpop.f32.mrb[33].mxu1  ;;  %v15595_v48 = vadd.f32 %v14967_v41, %v20319_v40 }
 0x51b   : > { %12822 = vst [vmem:[%s20328_s30 + $0xb8] sm:$0xff] %v12778_v22  ;;  %v14968_v4 = vpop.f32.mrb[34].mxu1  ;;  %v15597_v62 = vadd.f32 %v20319_v40, %v6707_v21 }
 0x51c   : > { %12820 = vst [vmem:[%s20328_s30 + $0xa8] sm:$0xff] %v12776_v39  ;;  %v15511_v24 = vpop.f32.mrb[24].mxu0  ;;  %v6710_v15 = vpop.f32.mrb[35].mxu1  ;;  %v15599_v32 = vadd.f32 %v14968_v4, %v20319_v40 }
 0x51d   : > { %v15580_v23 = vadd.f32 %v15579_v30, %v15511_v24  ;;  %v12632_v42 = vpop.f32.mrb[25].mxu0  ;;  %v15601_v34 = vadd.f32 %v20319_v40, %v6710_v15 }
 0x51e   : > { %v15582_v18 = vadd.f32 %v15581_v13, %v12632_v42  ;;  %v15512_v25 = vpop.f32.mrb[26].mxu0 }
 0x51f   : > { %v12781_v27 = vmax.f32 %v15580_v23, 0.0  ;;  %v15584_v3 = vadd.f32 %v15583_v46, %v15512_v25  ;;  %v12635_v16 = vpop.f32.mrb[27].mxu0 }
 0x520   : > { %v12779_v14 = vmax.f32 %v15582_v18, 0.0  ;;  %v15586_v61 = vadd.f32 %v15585_v60, %v12635_v16 }
 0x521   : > { %12825 = vst [vmem:[%s20328_s30 + $0xd0] sm:$0xff] %v12781_v27  ;;  %v12782_v44 = vmax.f32 %v15584_v3, 0.0  ;;  %v14971_v0 = vpop.f32.mrb[36].mxu1 }
 0x522   : > { %12823 = vst [vmem:[%s20328_s30 + $0xc0] sm:$0xff] %v12779_v14  ;;  %v12780_v6 = vmax.f32 %v15586_v61, 0.0  ;;  %v6723_v45 = vpop.f32.mrb[37].mxu1  ;;  %v15603_v43 = vadd.f32 %v14971_v0, %v20319_v40 }
 0x523   : > { %12826 = vst [vmem:[%s20328_s30 + $0xd8] sm:$0xff] %v12782_v44  ;;  %v14972_v20 = vpop.f32.mrb[38].mxu1  ;;  %v15605_v22 = vadd.f32 %v20319_v40, %v6723_v45 }
 0x524   : > { %12824 = vst [vmem:[%s20328_s30 + $0xc8] sm:$0xff] %v12780_v6  ;;  %v15515_v52 = vpop.f32.mrb[28].mxu0  ;;  %v6726_v57 = vpop.f32.mrb[39].mxu1  ;;  %v15607_v39 = vadd.f32 %v14972_v20, %v20319_v40 }
 0x525   : > { %v15588_v36 = vadd.f32 %v15587_v51, %v15515_v52  ;;  %v12648_v2 = vpop.f32.mrb[29].mxu0  ;;  %v15609_v4 = vadd.f32 %v20319_v40, %v6726_v57 }
 0x526   : > { %v15590_v58 = vadd.f32 %v15589_v8, %v12648_v2  ;;  %v15516_v26 = vpop.f32.mrb[30].mxu0 }
 0x527   : > { %v12785_v59 = vmax.f32 %v15588_v36, 0.0  ;;  %v15592_v11 = vadd.f32 %v15591_v53, %v15516_v26  ;;  %v12651_v17 = vpop.f32.mrb[31].mxu0 }
 0x528   : > { %v12783_v50 = vmax.f32 %v15590_v58, 0.0  ;;  %v15594_v9 = vadd.f32 %v15593_v54, %v12651_v17 }
 0x529   : > { %12829 = vst [vmem:[%s20328_s30 + $0xf0] sm:$0xff] %v12785_v59  ;;  %v12786_v5 = vmax.f32 %v15592_v11, 0.0  ;;  %v14975_v31 = vpop.f32.mrb[40].mxu1 }
 0x52a   : > { %12827 = vst [vmem:[%s20328_s30 + $0xe0] sm:$0xff] %v12783_v50  ;;  %v12784_v35 = vmax.f32 %v15594_v9, 0.0  ;;  %v6739_v37 = vpop.f32.mrb[41].mxu1  ;;  %v15611_v27 = vadd.f32 %v14975_v31, %v20319_v40 }
 0x52b   : > { %12830 = vst [vmem:[%s20328_s30 + $0xf8] sm:$0xff] %v12786_v5  ;;  %v14976_v28 = vpop.f32.mrb[42].mxu1  ;;  %v15613_v3 = vadd.f32 %v20319_v40, %v6739_v37 }
 0x52c   : > { %12828 = vst [vmem:[%s20328_s30 + $0xe8] sm:$0xff] %v12784_v35  ;;  %v15519_v47 = vpop.f32.mrb[32].mxu0  ;;  %v6742_v29 = vpop.f32.mrb[43].mxu1  ;;  %v15615_v14 = vadd.f32 %v14976_v28, %v20319_v40 }
 0x52d   : > { %v15596_v38 = vadd.f32 %v15595_v48, %v15519_v47  ;;  %v12664_v7 = vpop.f32.mrb[33].mxu0  ;;  %v15617_v0 = vadd.f32 %v20319_v40, %v6742_v29 }
 0x52e   : > { %v15598_v1 = vadd.f32 %v15597_v62, %v12664_v7  ;;  %v15520_v55 = vpop.f32.mrb[34].mxu0 }
 0x52f   : > { %v12789_v10 = vmax.f32 %v15596_v38, 0.0  ;;  %v15600_v56 = vadd.f32 %v15599_v32, %v15520_v55  ;;  %v12667_v63 = vpop.f32.mrb[35].mxu0 }
 0x530   : > { %v12787_v49 = vmax.f32 %v15598_v1, 0.0  ;;  %v15602_v19 = vadd.f32 %v15601_v34, %v12667_v63 }
 0x531   : > { %12833 = vst [vmem:[%s20328_s30 + $0x110] sm:$0xff] %v12789_v10  ;;  %v12790_v12 = vmax.f32 %v15600_v56, 0.0 }
 0x532   : > { %12831 = vst [vmem:[%s20328_s30 + $0x100] sm:$0xff] %v12787_v49  ;;  %v12788_v33 = vmax.f32 %v15602_v19, 0.0 }
 0x533   : > { %12834 = vst [vmem:[%s20328_s30 + $0x118] sm:$0xff] %v12790_v12 }
 0x534   : > { %12832 = vst [vmem:[%s20328_s30 + $0x108] sm:$0xff] %v12788_v33  ;;  %v15523_v41 = vpop.f32.mrb[36].mxu0 }
 0x535   : > { %v15604_v21 = vadd.f32 %v15603_v43, %v15523_v41  ;;  %v12680_v30 = vpop.f32.mrb[37].mxu0 }
 0x536   : > { %v15606_v13 = vadd.f32 %v15605_v22, %v12680_v30  ;;  %v15524_v24 = vpop.f32.mrb[38].mxu0 }
 0x537   : > { %v12793_v15 = vmax.f32 %v15604_v21, 0.0  ;;  %v15608_v46 = vadd.f32 %v15607_v39, %v15524_v24  ;;  %v12683_v23 = vpop.f32.mrb[39].mxu0 }
 0x538   : > { %v12791_v42 = vmax.f32 %v15606_v13, 0.0  ;;  %v15610_v60 = vadd.f32 %v15609_v4, %v12683_v23 }
 0x539   : > { %12837 = vst [vmem:[%s20328_s30 + $0x130] sm:$0xff] %v12793_v15  ;;  %v12794_v18 = vmax.f32 %v15608_v46, 0.0 }
 0x53a   : > { %12835 = vst [vmem:[%s20328_s30 + $0x120] sm:$0xff] %v12791_v42  ;;  %v12792_v25 = vmax.f32 %v15610_v60, 0.0 }
 0x53b   : > { %12838 = vst [vmem:[%s20328_s30 + $0x138] sm:$0xff] %v12794_v18 }
 0x53c   : > { %12836 = vst [vmem:[%s20328_s30 + $0x128] sm:$0xff] %v12792_v25  ;;  %v15527_v16 = vpop.f32.mrb[40].mxu0 }
 0x53d   : > { %v15612_v61 = vadd.f32 %v15611_v27, %v15527_v16  ;;  %v12696_v44 = vpop.f32.mrb[41].mxu0 }
 0x53e   : > { %v15614_v6 = vadd.f32 %v15613_v3, %v12696_v44  ;;  %v15528_v45 = vpop.f32.mrb[42].mxu0 }
 0x53f   : > { %v12797_v51 = vmax.f32 %v15612_v61, 0.0  ;;  %v15616_v20 = vadd.f32 %v15615_v14, %v15528_v45  ;;  %v12699_v8 = vpop.f32.mrb[43].mxu0 }
 0x540   : > { %v12795_v52 = vmax.f32 %v15614_v6, 0.0  ;;  %v15618_v57 = vadd.f32 %v15617_v0, %v12699_v8 }
 0x541   : > { %12841 = vst [vmem:[%s20328_s30 + $0x150] sm:$0xff] %v12797_v51  ;;  %v12798_v53 = vmax.f32 %v15616_v20, 0.0 }
 0x542   : > { %12839 = vst [vmem:[%s20328_s30 + $0x140] sm:$0xff] %v12795_v52  ;;  %v12796_v36 = vmax.f32 %v15618_v57, 0.0 }
 0x543   : > { %12842 = vst [vmem:[%s20328_s30 + $0x158] sm:$0xff] %v12798_v53 }
 0x544   : > { %12840 = vst [vmem:[%s20328_s30 + $0x148] sm:$0xff] %v12796_v36 }
 0x545 PF: > { %s13_s12 = sadd.s32 1, %s17093_s12  }
 0x546   : > { %p10_p5 = scmp.ge.s32.totalorder %s13_s12, 4  }
 0x548   :  { %12 = sbr.rel (!%p10_p5) target bundleno = 1 (0x1), region = 89 }

</bundles_post_ra>
